<compile_context>
chip_gen: v7x
topology: tpu7x:2x2x1
jax: 0.10.0
libtpu: 0.0.40
codegen_flags: <defaults>
</compile_context>

<pallas_src>
import jax
import jax.numpy as jnp
from jax import lax
from jax.experimental import pallas as pl
from jax.experimental.pallas import tpu as pltpu


def cnn_lstm_kernel(xproj_ref,       # (T, Bp, 4*H1p)  precomputed conv+ih1 projection
                    whh1_ref,        # (H1p, 4*H1p)    LSTM1 recurrent weights
                    w2s_ref,         # (H1p+H2p, 4*H2p) fused [Wih2; Whh2]
                    consts_ref,      # (2, 4*H2p)      row0=b2, row1=[wfc | bfc | 0]
                    out_ref):        # (Bp, 1)
    T, B, _ = xproj_ref.shape
    H1 = whh1_ref.shape[0]
    H2 = w2s_ref.shape[1] // 4

    b2 = consts_ref[0:1, :]                                  # (1, 4*H2)

    def gates(g, H):
        # Gate order (i, f, o, g): ONE sigmoid over the contiguous 3H slab,
        # ONE tanh over the last H.  All slices are 128-lane aligned.
        s = jax.nn.sigmoid(g[:, :3 * H])
        i = s[:, 0 * H:1 * H]
        f = s[:, 1 * H:2 * H]
        o = s[:, 2 * H:3 * H]
        gg = jnp.tanh(g[:, 3 * H:4 * H])
        return i, f, o, gg

    def body(t, carry):
        h1, c1, h2, c2 = carry
        # --- LSTM1: only the recurrent dot remains on the critical path ----
        g1 = xproj_ref[t] + jnp.dot(h1, whh1_ref[...],
                                    preferred_element_type=jnp.float32)
        i1, f1, o1, gg1 = gates(g1, H1)
        c1 = f1 * c1 + i1 * gg1
        h1 = o1 * jnp.tanh(c1)

        # --- LSTM2: single fused dot [h1 | h2] @ [Wih2; Whh2] ---------------
        # h1/h2 are each exactly one 128-lane vreg wide -> concat is pure
        # vreg stacking (no lane shifts).
        hcat = jnp.concatenate([h1, h2], axis=1)             # (B, H1p + H2p)
        g2 = jnp.dot(hcat, w2s_ref[...],
                     preferred_element_type=jnp.float32) + b2
        i2, f2, o2, gg2 = gates(g2, H2)
        c2 = f2 * c2 + i2 * gg2
        h2 = o2 * jnp.tanh(c2)
        return (h1, c1, h2, c2)

    init = (jnp.zeros((B, H1), jnp.float32),
            jnp.zeros((B, H1), jnp.float32),
            jnp.zeros((B, H2), jnp.float32),
            jnp.zeros((B, H2), jnp.float32))
    # Short fixed trip count -> fully unroll for LLO scheduling visibility.
    h1, c1, h2, c2 = lax.fori_loop(0, T, body, init, unroll=True)

    # Fused fc1 -> fc2 -> sigmoid on the last LSTM2 hidden state (dropout is
    # identity).  Single lane reduction, done once after the loop.
    wfc = consts_ref[1:2, 0:H2]                              # (1, H2)
    bfc = consts_ref[1:2, H2:H2 + 1]                         # (1, 1)
    z = jnp.sum(h2 * wfc, axis=1, keepdims=True) + bfc
    out_ref[...] = jax.nn.sigmoid(z)


def init_params(key, conv_filters, lstm_units_1, lstm_units_2, dense_units):
    """Deterministic PyTorch-shaped parameters (uniform, like torch defaults)."""
    ks = jax.random.split(key, 16)

    def u(k, shape, fan):
        s = 1.0 / jnp.sqrt(jnp.float32(fan))
        return jax.random.uniform(k, shape, jnp.float32, -s, s)

    C, H1, H2, D = conv_filters, lstm_units_1, lstm_units_2, dense_units
    p = {
        "conv_w": u(ks[0], (C, 1, 1), 1),          # Conv1d weight (out, in, k)
        "conv_b": u(ks[1], (C,), 1),
        "w_ih1": u(ks[2], (4 * H1, C), H1),        # LSTM1
        "w_hh1": u(ks[3], (4 * H1, H1), H1),
        "b_ih1": u(ks[4], (4 * H1,), H1),
        "b_hh1": u(ks[5], (4 * H1,), H1),
        "w_ih2": u(ks[6], (4 * H2, H1), H2),       # LSTM2
        "w_hh2": u(ks[7], (4 * H2, H2), H2),
        "b_ih2": u(ks[8], (4 * H2,), H2),
        "b_hh2": u(ks[9], (4 * H2,), H2),
        "fc1_w": u(ks[10], (D, H2), H2),           # Linear(H2, D)
        "fc1_b": u(ks[11], (D,), H2),
        "fc2_w": u(ks[12], (1, D), D),             # Linear(D, 1)
        "fc2_b": u(ks[13], (1,), D),
    }
    return p


def _round_up(n, m):
    return ((n + m - 1) // m) * m


def _prep_gates(w, H, Hp):
    """w: (in, 4H) with PyTorch gate column order (i, f, g, o).
    Returns (in, 4Hp) with gate order (i, f, o, g), each gate block
    zero-padded from H to Hp columns."""
    i, f, g, o = jnp.split(w, 4, axis=1)
    pad = lambda b: jnp.pad(b, ((0, 0), (0, Hp - H)))
    return jnp.concatenate([pad(i), pad(f), pad(o), pad(g)], axis=1)


def _pad_rows(w, n, np_):
    if np_ == n:
        return w
    return jnp.pad(w, ((0, np_ - n), (0, 0)))


@jax.jit
def cnn_lstm_forward(x, params):
    """x: (B, 1, T) float32 (PyTorch NCL).  Returns (B, 1) float32."""
    B, Cin, T = x.shape
    assert Cin == 1
    p = params
    C = p["conv_w"].shape[0]
    H1 = p["w_hh1"].shape[1]
    H2 = p["w_hh2"].shape[1]
    D = p["fc1_w"].shape[0]

    # Pad hidden sizes to 128 so every gate slab is a full (8,128) vreg and
    # all gate slices / concats are lane-aligned.  Zero padding keeps padded
    # hidden units exactly 0.  Pad batch to a sublane multiple.
    H1p = _round_up(H1, 128)
    H2p = _round_up(H2, 128)
    Bp = _round_up(B, 8)

    # ---- weight prep (pre-transposed for plain (B,in)@(in,out) dots,
    #      gate blocks reordered to (i, f, o, g)) ---------------------------
    wc = p["conv_w"].reshape(1, C)
    bc = p["conv_b"].reshape(1, C)

    wih1 = _prep_gates(p["w_ih1"].T, H1, H1p)                      # (C, 4H1p)
    whh1 = _pad_rows(_prep_gates(p["w_hh1"].T, H1, H1p), H1, H1p)  # (H1p, 4H1p)
    b1 = _prep_gates((p["b_ih1"] + p["b_hh1"]).reshape(1, 4 * H1), H1, H1p)

    # Fuse Conv1d(k=1) into the LSTM1 input projection.
    weff = wc @ wih1                                               # (1, 4H1p)
    beff = bc @ wih1 + b1                                          # (1, 4H1p)

    wih2 = _pad_rows(_prep_gates(p["w_ih2"].T, H2, H2p), H1, H1p)  # (H1p, 4H2p)
    whh2 = _pad_rows(_prep_gates(p["w_hh2"].T, H2, H2p), H2, H2p)  # (H2p, 4H2p)
    b2 = _prep_gates((p["b_ih2"] + p["b_hh2"]).reshape(1, 4 * H2), H2, H2p)
    w2s = jnp.concatenate([wih2, whh2], axis=0)                    # (H1p+H2p, 4H2p)

    # Fuse fc1 -> fc2 (no nonlinearity in between; dropout = identity).
    wfc = p["fc1_w"].T @ p["fc2_w"].T                              # (H2, 1)
    bfc = p["fc1_b"].reshape(1, D) @ p["fc2_w"].T + p["fc2_b"].reshape(1, 1)

    # Pack the tiny operands into one constants buffer:
    #   row 0 = b2, row 1 = [wfc (H2p) | bfc | zeros]
    row1 = jnp.zeros((1, 4 * H2p), jnp.float32)
    row1 = row1.at[:, :H2].set(wfc[:, 0].reshape(1, H2))
    row1 = row1.at[:, H2p:H2p + 1].set(bfc)
    consts = jnp.concatenate([b2, row1], axis=0)                   # (2, 4H2p)

    # Precompute the full LSTM1 input projection in the (jitted) wrapper:
    #   xproj[t, b, :] = x[t, b] * weff + beff
    x_tm = jnp.transpose(x[:, 0, :], (1, 0)).astype(jnp.float32)   # (T, B)
    if Bp != B:
        x_tm = jnp.pad(x_tm, ((0, 0), (0, Bp - B)))
    xproj = x_tm[:, :, None] * weff + beff                         # (T, Bp, 4H1p)

    vmem = pl.BlockSpec(memory_space=pltpu.MemorySpace.VMEM)
    out = pl.pallas_call(
        cnn_lstm_kernel,
        out_shape=jax.ShapeDtypeStruct((Bp, 1), jnp.float32),
        in_specs=[vmem] * 4,
        out_specs=vmem,
        compiler_params=pltpu.CompilerParams(vmem_limit_bytes=32 * 1024 * 1024),
    )(xproj, whh1, w2s, consts)
    # TODO(synk): for large-batch serving on v7x, add a leading batch grid
    # axis with dimension_semantics=("parallel",) to use both TensorCores.
    return out[:B]


def reference_forward(x, params):
    """Pure-JAX reference with identical semantics (for verification)."""
    p = params
    B, _, T = x.shape
    C = p["conv_w"].shape[0]
    H1 = p["w_hh1"].shape[1]
    H2 = p["w_hh2"].shape[1]

    xs = x[:, 0, :]                                              # (B, T)
    h0 = xs[:, :, None] * p["conv_w"].reshape(C)[None, None, :] + p["conv_b"]
    # (B, T, C)

    def run_lstm(seq, w_ih, w_hh, b_ih, b_hh, H):
        def step(carry, xt):
            h, c = carry
            g = xt @ w_ih.T + h @ w_hh.T + b_ih + b_hh
            i = jax.nn.sigmoid(g[:, :H])
            f = jax.nn.sigmoid(g[:, H:2 * H])
            gg = jnp.tanh(g[:, 2 * H:3 * H])
            o = jax.nn.sigmoid(g[:, 3 * H:])
            c = f * c + i * gg
            h = o * jnp.tanh(c)
            return (h, c), h
        init = (jnp.zeros((B, H)), jnp.zeros((B, H)))
        (_, _), hs = lax.scan(step, init, jnp.swapaxes(seq, 0, 1))
        return jnp.swapaxes(hs, 0, 1)

    h1_seq = run_lstm(h0, p["w_ih1"], p["w_hh1"], p["b_ih1"], p["b_hh1"], H1)
    h2_seq = run_lstm(h1_seq, p["w_ih2"], p["w_hh2"], p["b_ih2"], p["b_hh2"], H2)
    last = h2_seq[:, -1, :]
    z1 = last @ p["fc1_w"].T + p["fc1_b"]
    z2 = z1 @ p["fc2_w"].T + p["fc2_b"]
    return jax.nn.sigmoid(z2)


if __name__ == "__main__":
    # Small shapes consistent with the module's forward.
    batch, seq_len = 2, 16
    conv_filters, lstm_units_1, lstm_units_2, dense_units = 8, 32, 16, 8

    key = jax.random.PRNGKey(0)
    k_x, k_p = jax.random.split(key)
    x = jax.random.normal(k_x, (batch, 1, seq_len), dtype=jnp.float32)
    params = init_params(k_p, conv_filters, lstm_units_1, lstm_units_2, dense_units)

    out = cnn_lstm_forward(x, params)
    out = jax.block_until_ready(out)

    ref = reference_forward(x, params)
    assert out.shape == (batch, 1)
    assert jnp.allclose(out, ref, rtol=1e-4, atol=1e-4), (out, ref)
    print("KERNEL_OK")
</pallas_src>

<mosaic_0001>
module attributes {stable_mosaic.version = 11 : i64} {
  func.func @cnn_lstm_kernel(%arg0: memref<16x8x512xf32, #tpu.memory_space<vmem>>, %arg1: memref<128x512xf32, #tpu.memory_space<vmem>>, %arg2: memref<256x512xf32, #tpu.memory_space<vmem>>, %arg3: memref<2x512xf32, #tpu.memory_space<vmem>>, %arg4: memref<8x1xf32, #tpu.memory_space<vmem>>) attributes {dimension_semantics = [], scalar_prefetch = 0 : i64, scratch_operands = 0 : i64, tpu.core_type = #tpu.core_type<tc>} {
    %c0 = arith.constant 0 : index
    %c0_0 = arith.constant 0 : index
    %0 = vector.load %arg3[%c0, %c0_0] : memref<2x512xf32, #tpu.memory_space<vmem>>, vector<1x512xf32>
    %cst = arith.constant 0.000000e+00 : f32
    %1 = vector.broadcast %cst : f32 to vector<8x128xf32>
    %cst_1 = arith.constant 0.000000e+00 : f32
    %2 = vector.broadcast %cst_1 : f32 to vector<8x128xf32>
    %cst_2 = arith.constant 0.000000e+00 : f32
    %3 = vector.broadcast %cst_2 : f32 to vector<8x128xf32>
    %cst_3 = arith.constant 0.000000e+00 : f32
    %4 = vector.broadcast %cst_3 : f32 to vector<8x128xf32>
    %c0_i32 = arith.constant 0 : i32
    %5 = arith.index_cast %c0_i32 : i32 to index
    %c0_4 = arith.constant 0 : index
    %c0_5 = arith.constant 0 : index
    %6 = vector.load %arg0[%5, %c0_4, %c0_5] : memref<16x8x512xf32, #tpu.memory_space<vmem>>, vector<1x8x512xf32>
    %7 = vector.shape_cast %6 : vector<1x8x512xf32> to vector<8x512xf32>
    %c0_6 = arith.constant 0 : index
    %c0_7 = arith.constant 0 : index
    %8 = vector.load %arg1[%c0_6, %c0_7] : memref<128x512xf32, #tpu.memory_space<vmem>>, vector<128x512xf32>
    %cst_8 = arith.constant dense<0.000000e+00> : vector<8x512xf32>
    %9 = tpu.matmul %1, %8, %cst_8 {dimension_numbers = #tpu.dot_dimension_numbers<[1], [0], [0], [1], [0, 0, 1, 1], [], []>} : vector<8x128xf32>, vector<128x512xf32>, vector<8x512xf32> -> vector<8x512xf32>
    %10 = arith.addf %7, %9 : vector<8x512xf32>
    %11 = vector.extract_strided_slice %10 {offsets = [0, 0], sizes = [8, 384], strides = [1, 1]} : vector<8x512xf32> to vector<8x384xf32>
    %12 = arith.negf %11 : vector<8x384xf32>
    %13 = math.exp %12 : vector<8x384xf32>
    %cst_9 = arith.constant 1.000000e+00 : f32
    %14 = vector.broadcast %cst_9 : f32 to vector<8x384xf32>
    %15 = arith.addf %14, %13 : vector<8x384xf32>
    %16 = arith.divf %14, %15 : vector<8x384xf32>
    %17 = vector.extract_strided_slice %16 {offsets = [0, 0], sizes = [8, 128], strides = [1, 1]} : vector<8x384xf32> to vector<8x128xf32>
    %18 = vector.extract_strided_slice %16 {offsets = [0, 128], sizes = [8, 128], strides = [1, 1]} : vector<8x384xf32> to vector<8x128xf32>
    %19 = vector.extract_strided_slice %16 {offsets = [0, 256], sizes = [8, 128], strides = [1, 1]} : vector<8x384xf32> to vector<8x128xf32>
    %20 = vector.extract_strided_slice %10 {offsets = [0, 384], sizes = [8, 128], strides = [1, 1]} : vector<8x512xf32> to vector<8x128xf32>
    %21 = math.tanh %20 : vector<8x128xf32>
    %22 = arith.mulf %18, %2 : vector<8x128xf32>
    %23 = arith.mulf %17, %21 : vector<8x128xf32>
    %24 = arith.addf %22, %23 : vector<8x128xf32>
    %25 = math.tanh %24 : vector<8x128xf32>
    %26 = arith.mulf %19, %25 : vector<8x128xf32>
    %27 = tpu.concatenate %26, %3 in 1 : vector<8x128xf32>, vector<8x128xf32> -> vector<8x256xf32>
    %c0_10 = arith.constant 0 : index
    %c0_11 = arith.constant 0 : index
    %28 = vector.load %arg2[%c0_10, %c0_11] : memref<256x512xf32, #tpu.memory_space<vmem>>, vector<256x512xf32>
    %cst_12 = arith.constant dense<0.000000e+00> : vector<8x512xf32>
    %29 = tpu.matmul %27, %28, %cst_12 {dimension_numbers = #tpu.dot_dimension_numbers<[1], [0], [0], [1], [0, 0, 1, 1], [], []>} : vector<8x256xf32>, vector<256x512xf32>, vector<8x512xf32> -> vector<8x512xf32>
    %30 = vector.broadcast %0 : vector<1x512xf32> to vector<8x512xf32>
    %31 = arith.addf %29, %30 : vector<8x512xf32>
    %32 = vector.extract_strided_slice %31 {offsets = [0, 0], sizes = [8, 384], strides = [1, 1]} : vector<8x512xf32> to vector<8x384xf32>
    %33 = arith.negf %32 : vector<8x384xf32>
    %34 = math.exp %33 : vector<8x384xf32>
    %cst_13 = arith.constant 1.000000e+00 : f32
    %35 = vector.broadcast %cst_13 : f32 to vector<8x384xf32>
    %36 = arith.addf %35, %34 : vector<8x384xf32>
    %37 = arith.divf %35, %36 : vector<8x384xf32>
    %38 = vector.extract_strided_slice %37 {offsets = [0, 0], sizes = [8, 128], strides = [1, 1]} : vector<8x384xf32> to vector<8x128xf32>
    %39 = vector.extract_strided_slice %37 {offsets = [0, 128], sizes = [8, 128], strides = [1, 1]} : vector<8x384xf32> to vector<8x128xf32>
    %40 = vector.extract_strided_slice %37 {offsets = [0, 256], sizes = [8, 128], strides = [1, 1]} : vector<8x384xf32> to vector<8x128xf32>
    %41 = vector.extract_strided_slice %31 {offsets = [0, 384], sizes = [8, 128], strides = [1, 1]} : vector<8x512xf32> to vector<8x128xf32>
    %42 = math.tanh %41 : vector<8x128xf32>
    %43 = arith.mulf %39, %4 : vector<8x128xf32>
    %44 = arith.mulf %38, %42 : vector<8x128xf32>
    %45 = arith.addf %43, %44 : vector<8x128xf32>
    %46 = math.tanh %45 : vector<8x128xf32>
    %47 = arith.mulf %40, %46 : vector<8x128xf32>
    %c1_i32 = arith.constant 1 : i32
    %48 = arith.index_cast %c1_i32 : i32 to index
    %c0_14 = arith.constant 0 : index
    %c0_15 = arith.constant 0 : index
    %49 = vector.load %arg0[%48, %c0_14, %c0_15] : memref<16x8x512xf32, #tpu.memory_space<vmem>>, vector<1x8x512xf32>
    %50 = vector.shape_cast %49 : vector<1x8x512xf32> to vector<8x512xf32>
    %c0_16 = arith.constant 0 : index
    %c0_17 = arith.constant 0 : index
    %51 = vector.load %arg1[%c0_16, %c0_17] : memref<128x512xf32, #tpu.memory_space<vmem>>, vector<128x512xf32>
    %cst_18 = arith.constant dense<0.000000e+00> : vector<8x512xf32>
    %52 = tpu.matmul %26, %51, %cst_18 {dimension_numbers = #tpu.dot_dimension_numbers<[1], [0], [0], [1], [0, 0, 1, 1], [], []>} : vector<8x128xf32>, vector<128x512xf32>, vector<8x512xf32> -> vector<8x512xf32>
    %53 = arith.addf %50, %52 : vector<8x512xf32>
    %54 = vector.extract_strided_slice %53 {offsets = [0, 0], sizes = [8, 384], strides = [1, 1]} : vector<8x512xf32> to vector<8x384xf32>
    %55 = arith.negf %54 : vector<8x384xf32>
    %56 = math.exp %55 : vector<8x384xf32>
    %cst_19 = arith.constant 1.000000e+00 : f32
    %57 = vector.broadcast %cst_19 : f32 to vector<8x384xf32>
    %58 = arith.addf %57, %56 : vector<8x384xf32>
    %59 = arith.divf %57, %58 : vector<8x384xf32>
    %60 = vector.extract_strided_slice %59 {offsets = [0, 0], sizes = [8, 128], strides = [1, 1]} : vector<8x384xf32> to vector<8x128xf32>
    %61 = vector.extract_strided_slice %59 {offsets = [0, 128], sizes = [8, 128], strides = [1, 1]} : vector<8x384xf32> to vector<8x128xf32>
    %62 = vector.extract_strided_slice %59 {offsets = [0, 256], sizes = [8, 128], strides = [1, 1]} : vector<8x384xf32> to vector<8x128xf32>
    %63 = vector.extract_strided_slice %53 {offsets = [0, 384], sizes = [8, 128], strides = [1, 1]} : vector<8x512xf32> to vector<8x128xf32>
    %64 = math.tanh %63 : vector<8x128xf32>
    %65 = arith.mulf %61, %24 : vector<8x128xf32>
    %66 = arith.mulf %60, %64 : vector<8x128xf32>
    %67 = arith.addf %65, %66 : vector<8x128xf32>
    %68 = math.tanh %67 : vector<8x128xf32>
    %69 = arith.mulf %62, %68 : vector<8x128xf32>
    %70 = tpu.concatenate %69, %47 in 1 : vector<8x128xf32>, vector<8x128xf32> -> vector<8x256xf32>
    %c0_20 = arith.constant 0 : index
    %c0_21 = arith.constant 0 : index
    %71 = vector.load %arg2[%c0_20, %c0_21] : memref<256x512xf32, #tpu.memory_space<vmem>>, vector<256x512xf32>
    %cst_22 = arith.constant dense<0.000000e+00> : vector<8x512xf32>
    %72 = tpu.matmul %70, %71, %cst_22 {dimension_numbers = #tpu.dot_dimension_numbers<[1], [0], [0], [1], [0, 0, 1, 1], [], []>} : vector<8x256xf32>, vector<256x512xf32>, vector<8x512xf32> -> vector<8x512xf32>
    %73 = vector.broadcast %0 : vector<1x512xf32> to vector<8x512xf32>
    %74 = arith.addf %72, %73 : vector<8x512xf32>
    %75 = vector.extract_strided_slice %74 {offsets = [0, 0], sizes = [8, 384], strides = [1, 1]} : vector<8x512xf32> to vector<8x384xf32>
    %76 = arith.negf %75 : vector<8x384xf32>
    %77 = math.exp %76 : vector<8x384xf32>
    %cst_23 = arith.constant 1.000000e+00 : f32
    %78 = vector.broadcast %cst_23 : f32 to vector<8x384xf32>
    %79 = arith.addf %78, %77 : vector<8x384xf32>
    %80 = arith.divf %78, %79 : vector<8x384xf32>
    %81 = vector.extract_strided_slice %80 {offsets = [0, 0], sizes = [8, 128], strides = [1, 1]} : vector<8x384xf32> to vector<8x128xf32>
    %82 = vector.extract_strided_slice %80 {offsets = [0, 128], sizes = [8, 128], strides = [1, 1]} : vector<8x384xf32> to vector<8x128xf32>
    %83 = vector.extract_strided_slice %80 {offsets = [0, 256], sizes = [8, 128], strides = [1, 1]} : vector<8x384xf32> to vector<8x128xf32>
    %84 = vector.extract_strided_slice %74 {offsets = [0, 384], sizes = [8, 128], strides = [1, 1]} : vector<8x512xf32> to vector<8x128xf32>
    %85 = math.tanh %84 : vector<8x128xf32>
    %86 = arith.mulf %82, %45 : vector<8x128xf32>
    %87 = arith.mulf %81, %85 : vector<8x128xf32>
    %88 = arith.addf %86, %87 : vector<8x128xf32>
    %89 = math.tanh %88 : vector<8x128xf32>
    %90 = arith.mulf %83, %89 : vector<8x128xf32>
    %c2_i32 = arith.constant 2 : i32
    %91 = arith.index_cast %c2_i32 : i32 to index
    %c0_24 = arith.constant 0 : index
    %c0_25 = arith.constant 0 : index
    %92 = vector.load %arg0[%91, %c0_24, %c0_25] : memref<16x8x512xf32, #tpu.memory_space<vmem>>, vector<1x8x512xf32>
    %93 = vector.shape_cast %92 : vector<1x8x512xf32> to vector<8x512xf32>
    %c0_26 = arith.constant 0 : index
    %c0_27 = arith.constant 0 : index
    %94 = vector.load %arg1[%c0_26, %c0_27] : memref<128x512xf32, #tpu.memory_space<vmem>>, vector<128x512xf32>
    %cst_28 = arith.constant dense<0.000000e+00> : vector<8x512xf32>
    %95 = tpu.matmul %69, %94, %cst_28 {dimension_numbers = #tpu.dot_dimension_numbers<[1], [0], [0], [1], [0, 0, 1, 1], [], []>} : vector<8x128xf32>, vector<128x512xf32>, vector<8x512xf32> -> vector<8x512xf32>
    %96 = arith.addf %93, %95 : vector<8x512xf32>
    %97 = vector.extract_strided_slice %96 {offsets = [0, 0], sizes = [8, 384], strides = [1, 1]} : vector<8x512xf32> to vector<8x384xf32>
    %98 = arith.negf %97 : vector<8x384xf32>
    %99 = math.exp %98 : vector<8x384xf32>
    %cst_29 = arith.constant 1.000000e+00 : f32
    %100 = vector.broadcast %cst_29 : f32 to vector<8x384xf32>
    %101 = arith.addf %100, %99 : vector<8x384xf32>
    %102 = arith.divf %100, %101 : vector<8x384xf32>
    %103 = vector.extract_strided_slice %102 {offsets = [0, 0], sizes = [8, 128], strides = [1, 1]} : vector<8x384xf32> to vector<8x128xf32>
    %104 = vector.extract_strided_slice %102 {offsets = [0, 128], sizes = [8, 128], strides = [1, 1]} : vector<8x384xf32> to vector<8x128xf32>
    %105 = vector.extract_strided_slice %102 {offsets = [0, 256], sizes = [8, 128], strides = [1, 1]} : vector<8x384xf32> to vector<8x128xf32>
    %106 = vector.extract_strided_slice %96 {offsets = [0, 384], sizes = [8, 128], strides = [1, 1]} : vector<8x512xf32> to vector<8x128xf32>
    %107 = math.tanh %106 : vector<8x128xf32>
    %108 = arith.mulf %104, %67 : vector<8x128xf32>
    %109 = arith.mulf %103, %107 : vector<8x128xf32>
    %110 = arith.addf %108, %109 : vector<8x128xf32>
    %111 = math.tanh %110 : vector<8x128xf32>
    %112 = arith.mulf %105, %111 : vector<8x128xf32>
    %113 = tpu.concatenate %112, %90 in 1 : vector<8x128xf32>, vector<8x128xf32> -> vector<8x256xf32>
    %c0_30 = arith.constant 0 : index
    %c0_31 = arith.constant 0 : index
    %114 = vector.load %arg2[%c0_30, %c0_31] : memref<256x512xf32, #tpu.memory_space<vmem>>, vector<256x512xf32>
    %cst_32 = arith.constant dense<0.000000e+00> : vector<8x512xf32>
    %115 = tpu.matmul %113, %114, %cst_32 {dimension_numbers = #tpu.dot_dimension_numbers<[1], [0], [0], [1], [0, 0, 1, 1], [], []>} : vector<8x256xf32>, vector<256x512xf32>, vector<8x512xf32> -> vector<8x512xf32>
    %116 = vector.broadcast %0 : vector<1x512xf32> to vector<8x512xf32>
    %117 = arith.addf %115, %116 : vector<8x512xf32>
    %118 = vector.extract_strided_slice %117 {offsets = [0, 0], sizes = [8, 384], strides = [1, 1]} : vector<8x512xf32> to vector<8x384xf32>
    %119 = arith.negf %118 : vector<8x384xf32>
    %120 = math.exp %119 : vector<8x384xf32>
    %cst_33 = arith.constant 1.000000e+00 : f32
    %121 = vector.broadcast %cst_33 : f32 to vector<8x384xf32>
    %122 = arith.addf %121, %120 : vector<8x384xf32>
    %123 = arith.divf %121, %122 : vector<8x384xf32>
    %124 = vector.extract_strided_slice %123 {offsets = [0, 0], sizes = [8, 128], strides = [1, 1]} : vector<8x384xf32> to vector<8x128xf32>
    %125 = vector.extract_strided_slice %123 {offsets = [0, 128], sizes = [8, 128], strides = [1, 1]} : vector<8x384xf32> to vector<8x128xf32>
    %126 = vector.extract_strided_slice %123 {offsets = [0, 256], sizes = [8, 128], strides = [1, 1]} : vector<8x384xf32> to vector<8x128xf32>
    %127 = vector.extract_strided_slice %117 {offsets = [0, 384], sizes = [8, 128], strides = [1, 1]} : vector<8x512xf32> to vector<8x128xf32>
    %128 = math.tanh %127 : vector<8x128xf32>
    %129 = arith.mulf %125, %88 : vector<8x128xf32>
    %130 = arith.mulf %124, %128 : vector<8x128xf32>
    %131 = arith.addf %129, %130 : vector<8x128xf32>
    %132 = math.tanh %131 : vector<8x128xf32>
    %133 = arith.mulf %126, %132 : vector<8x128xf32>
    %c3_i32 = arith.constant 3 : i32
    %134 = arith.index_cast %c3_i32 : i32 to index
    %c0_34 = arith.constant 0 : index
    %c0_35 = arith.constant 0 : index
    %135 = vector.load %arg0[%134, %c0_34, %c0_35] : memref<16x8x512xf32, #tpu.memory_space<vmem>>, vector<1x8x512xf32>
    %136 = vector.shape_cast %135 : vector<1x8x512xf32> to vector<8x512xf32>
    %c0_36 = arith.constant 0 : index
    %c0_37 = arith.constant 0 : index
    %137 = vector.load %arg1[%c0_36, %c0_37] : memref<128x512xf32, #tpu.memory_space<vmem>>, vector<128x512xf32>
    %cst_38 = arith.constant dense<0.000000e+00> : vector<8x512xf32>
    %138 = tpu.matmul %112, %137, %cst_38 {dimension_numbers = #tpu.dot_dimension_numbers<[1], [0], [0], [1], [0, 0, 1, 1], [], []>} : vector<8x128xf32>, vector<128x512xf32>, vector<8x512xf32> -> vector<8x512xf32>
    %139 = arith.addf %136, %138 : vector<8x512xf32>
    %140 = vector.extract_strided_slice %139 {offsets = [0, 0], sizes = [8, 384], strides = [1, 1]} : vector<8x512xf32> to vector<8x384xf32>
    %141 = arith.negf %140 : vector<8x384xf32>
    %142 = math.exp %141 : vector<8x384xf32>
    %cst_39 = arith.constant 1.000000e+00 : f32
    %143 = vector.broadcast %cst_39 : f32 to vector<8x384xf32>
    %144 = arith.addf %143, %142 : vector<8x384xf32>
    %145 = arith.divf %143, %144 : vector<8x384xf32>
    %146 = vector.extract_strided_slice %145 {offsets = [0, 0], sizes = [8, 128], strides = [1, 1]} : vector<8x384xf32> to vector<8x128xf32>
    %147 = vector.extract_strided_slice %145 {offsets = [0, 128], sizes = [8, 128], strides = [1, 1]} : vector<8x384xf32> to vector<8x128xf32>
    %148 = vector.extract_strided_slice %145 {offsets = [0, 256], sizes = [8, 128], strides = [1, 1]} : vector<8x384xf32> to vector<8x128xf32>
    %149 = vector.extract_strided_slice %139 {offsets = [0, 384], sizes = [8, 128], strides = [1, 1]} : vector<8x512xf32> to vector<8x128xf32>
    %150 = math.tanh %149 : vector<8x128xf32>
    %151 = arith.mulf %147, %110 : vector<8x128xf32>
    %152 = arith.mulf %146, %150 : vector<8x128xf32>
    %153 = arith.addf %151, %152 : vector<8x128xf32>
    %154 = math.tanh %153 : vector<8x128xf32>
    %155 = arith.mulf %148, %154 : vector<8x128xf32>
    %156 = tpu.concatenate %155, %133 in 1 : vector<8x128xf32>, vector<8x128xf32> -> vector<8x256xf32>
    %c0_40 = arith.constant 0 : index
    %c0_41 = arith.constant 0 : index
    %157 = vector.load %arg2[%c0_40, %c0_41] : memref<256x512xf32, #tpu.memory_space<vmem>>, vector<256x512xf32>
    %cst_42 = arith.constant dense<0.000000e+00> : vector<8x512xf32>
    %158 = tpu.matmul %156, %157, %cst_42 {dimension_numbers = #tpu.dot_dimension_numbers<[1], [0], [0], [1], [0, 0, 1, 1], [], []>} : vector<8x256xf32>, vector<256x512xf32>, vector<8x512xf32> -> vector<8x512xf32>
    %159 = vector.broadcast %0 : vector<1x512xf32> to vector<8x512xf32>
    %160 = arith.addf %158, %159 : vector<8x512xf32>
    %161 = vector.extract_strided_slice %160 {offsets = [0, 0], sizes = [8, 384], strides = [1, 1]} : vector<8x512xf32> to vector<8x384xf32>
    %162 = arith.negf %161 : vector<8x384xf32>
    %163 = math.exp %162 : vector<8x384xf32>
    %cst_43 = arith.constant 1.000000e+00 : f32
    %164 = vector.broadcast %cst_43 : f32 to vector<8x384xf32>
    %165 = arith.addf %164, %163 : vector<8x384xf32>
    %166 = arith.divf %164, %165 : vector<8x384xf32>
    %167 = vector.extract_strided_slice %166 {offsets = [0, 0], sizes = [8, 128], strides = [1, 1]} : vector<8x384xf32> to vector<8x128xf32>
    %168 = vector.extract_strided_slice %166 {offsets = [0, 128], sizes = [8, 128], strides = [1, 1]} : vector<8x384xf32> to vector<8x128xf32>
    %169 = vector.extract_strided_slice %166 {offsets = [0, 256], sizes = [8, 128], strides = [1, 1]} : vector<8x384xf32> to vector<8x128xf32>
    %170 = vector.extract_strided_slice %160 {offsets = [0, 384], sizes = [8, 128], strides = [1, 1]} : vector<8x512xf32> to vector<8x128xf32>
    %171 = math.tanh %170 : vector<8x128xf32>
    %172 = arith.mulf %168, %131 : vector<8x128xf32>
    %173 = arith.mulf %167, %171 : vector<8x128xf32>
    %174 = arith.addf %172, %173 : vector<8x128xf32>
    %175 = math.tanh %174 : vector<8x128xf32>
    %176 = arith.mulf %169, %175 : vector<8x128xf32>
    %c4_i32 = arith.constant 4 : i32
    %177 = arith.index_cast %c4_i32 : i32 to index
    %c0_44 = arith.constant 0 : index
    %c0_45 = arith.constant 0 : index
    %178 = vector.load %arg0[%177, %c0_44, %c0_45] : memref<16x8x512xf32, #tpu.memory_space<vmem>>, vector<1x8x512xf32>
    %179 = vector.shape_cast %178 : vector<1x8x512xf32> to vector<8x512xf32>
    %c0_46 = arith.constant 0 : index
    %c0_47 = arith.constant 0 : index
    %180 = vector.load %arg1[%c0_46, %c0_47] : memref<128x512xf32, #tpu.memory_space<vmem>>, vector<128x512xf32>
    %cst_48 = arith.constant dense<0.000000e+00> : vector<8x512xf32>
    %181 = tpu.matmul %155, %180, %cst_48 {dimension_numbers = #tpu.dot_dimension_numbers<[1], [0], [0], [1], [0, 0, 1, 1], [], []>} : vector<8x128xf32>, vector<128x512xf32>, vector<8x512xf32> -> vector<8x512xf32>
    %182 = arith.addf %179, %181 : vector<8x512xf32>
    %183 = vector.extract_strided_slice %182 {offsets = [0, 0], sizes = [8, 384], strides = [1, 1]} : vector<8x512xf32> to vector<8x384xf32>
    %184 = arith.negf %183 : vector<8x384xf32>
    %185 = math.exp %184 : vector<8x384xf32>
    %cst_49 = arith.constant 1.000000e+00 : f32
    %186 = vector.broadcast %cst_49 : f32 to vector<8x384xf32>
    %187 = arith.addf %186, %185 : vector<8x384xf32>
    %188 = arith.divf %186, %187 : vector<8x384xf32>
    %189 = vector.extract_strided_slice %188 {offsets = [0, 0], sizes = [8, 128], strides = [1, 1]} : vector<8x384xf32> to vector<8x128xf32>
    %190 = vector.extract_strided_slice %188 {offsets = [0, 128], sizes = [8, 128], strides = [1, 1]} : vector<8x384xf32> to vector<8x128xf32>
    %191 = vector.extract_strided_slice %188 {offsets = [0, 256], sizes = [8, 128], strides = [1, 1]} : vector<8x384xf32> to vector<8x128xf32>
    %192 = vector.extract_strided_slice %182 {offsets = [0, 384], sizes = [8, 128], strides = [1, 1]} : vector<8x512xf32> to vector<8x128xf32>
    %193 = math.tanh %192 : vector<8x128xf32>
    %194 = arith.mulf %190, %153 : vector<8x128xf32>
    %195 = arith.mulf %189, %193 : vector<8x128xf32>
    %196 = arith.addf %194, %195 : vector<8x128xf32>
    %197 = math.tanh %196 : vector<8x128xf32>
    %198 = arith.mulf %191, %197 : vector<8x128xf32>
    %199 = tpu.concatenate %198, %176 in 1 : vector<8x128xf32>, vector<8x128xf32> -> vector<8x256xf32>
    %c0_50 = arith.constant 0 : index
    %c0_51 = arith.constant 0 : index
    %200 = vector.load %arg2[%c0_50, %c0_51] : memref<256x512xf32, #tpu.memory_space<vmem>>, vector<256x512xf32>
    %cst_52 = arith.constant dense<0.000000e+00> : vector<8x512xf32>
    %201 = tpu.matmul %199, %200, %cst_52 {dimension_numbers = #tpu.dot_dimension_numbers<[1], [0], [0], [1], [0, 0, 1, 1], [], []>} : vector<8x256xf32>, vector<256x512xf32>, vector<8x512xf32> -> vector<8x512xf32>
    %202 = vector.broadcast %0 : vector<1x512xf32> to vector<8x512xf32>
    %203 = arith.addf %201, %202 : vector<8x512xf32>
    %204 = vector.extract_strided_slice %203 {offsets = [0, 0], sizes = [8, 384], strides = [1, 1]} : vector<8x512xf32> to vector<8x384xf32>
    %205 = arith.negf %204 : vector<8x384xf32>
    %206 = math.exp %205 : vector<8x384xf32>
    %cst_53 = arith.constant 1.000000e+00 : f32
    %207 = vector.broadcast %cst_53 : f32 to vector<8x384xf32>
    %208 = arith.addf %207, %206 : vector<8x384xf32>
    %209 = arith.divf %207, %208 : vector<8x384xf32>
    %210 = vector.extract_strided_slice %209 {offsets = [0, 0], sizes = [8, 128], strides = [1, 1]} : vector<8x384xf32> to vector<8x128xf32>
    %211 = vector.extract_strided_slice %209 {offsets = [0, 128], sizes = [8, 128], strides = [1, 1]} : vector<8x384xf32> to vector<8x128xf32>
    %212 = vector.extract_strided_slice %209 {offsets = [0, 256], sizes = [8, 128], strides = [1, 1]} : vector<8x384xf32> to vector<8x128xf32>
    %213 = vector.extract_strided_slice %203 {offsets = [0, 384], sizes = [8, 128], strides = [1, 1]} : vector<8x512xf32> to vector<8x128xf32>
    %214 = math.tanh %213 : vector<8x128xf32>
    %215 = arith.mulf %211, %174 : vector<8x128xf32>
    %216 = arith.mulf %210, %214 : vector<8x128xf32>
    %217 = arith.addf %215, %216 : vector<8x128xf32>
    %218 = math.tanh %217 : vector<8x128xf32>
    %219 = arith.mulf %212, %218 : vector<8x128xf32>
    %c5_i32 = arith.constant 5 : i32
    %220 = arith.index_cast %c5_i32 : i32 to index
    %c0_54 = arith.constant 0 : index
    %c0_55 = arith.constant 0 : index
    %221 = vector.load %arg0[%220, %c0_54, %c0_55] : memref<16x8x512xf32, #tpu.memory_space<vmem>>, vector<1x8x512xf32>
    %222 = vector.shape_cast %221 : vector<1x8x512xf32> to vector<8x512xf32>
    %c0_56 = arith.constant 0 : index
    %c0_57 = arith.constant 0 : index
    %223 = vector.load %arg1[%c0_56, %c0_57] : memref<128x512xf32, #tpu.memory_space<vmem>>, vector<128x512xf32>
    %cst_58 = arith.constant dense<0.000000e+00> : vector<8x512xf32>
    %224 = tpu.matmul %198, %223, %cst_58 {dimension_numbers = #tpu.dot_dimension_numbers<[1], [0], [0], [1], [0, 0, 1, 1], [], []>} : vector<8x128xf32>, vector<128x512xf32>, vector<8x512xf32> -> vector<8x512xf32>
    %225 = arith.addf %222, %224 : vector<8x512xf32>
    %226 = vector.extract_strided_slice %225 {offsets = [0, 0], sizes = [8, 384], strides = [1, 1]} : vector<8x512xf32> to vector<8x384xf32>
    %227 = arith.negf %226 : vector<8x384xf32>
    %228 = math.exp %227 : vector<8x384xf32>
    %cst_59 = arith.constant 1.000000e+00 : f32
    %229 = vector.broadcast %cst_59 : f32 to vector<8x384xf32>
    %230 = arith.addf %229, %228 : vector<8x384xf32>
    %231 = arith.divf %229, %230 : vector<8x384xf32>
    %232 = vector.extract_strided_slice %231 {offsets = [0, 0], sizes = [8, 128], strides = [1, 1]} : vector<8x384xf32> to vector<8x128xf32>
    %233 = vector.extract_strided_slice %231 {offsets = [0, 128], sizes = [8, 128], strides = [1, 1]} : vector<8x384xf32> to vector<8x128xf32>
    %234 = vector.extract_strided_slice %231 {offsets = [0, 256], sizes = [8, 128], strides = [1, 1]} : vector<8x384xf32> to vector<8x128xf32>
    %235 = vector.extract_strided_slice %225 {offsets = [0, 384], sizes = [8, 128], strides = [1, 1]} : vector<8x512xf32> to vector<8x128xf32>
    %236 = math.tanh %235 : vector<8x128xf32>
    %237 = arith.mulf %233, %196 : vector<8x128xf32>
    %238 = arith.mulf %232, %236 : vector<8x128xf32>
    %239 = arith.addf %237, %238 : vector<8x128xf32>
    %240 = math.tanh %239 : vector<8x128xf32>
    %241 = arith.mulf %234, %240 : vector<8x128xf32>
    %242 = tpu.concatenate %241, %219 in 1 : vector<8x128xf32>, vector<8x128xf32> -> vector<8x256xf32>
    %c0_60 = arith.constant 0 : index
    %c0_61 = arith.constant 0 : index
    %243 = vector.load %arg2[%c0_60, %c0_61] : memref<256x512xf32, #tpu.memory_space<vmem>>, vector<256x512xf32>
    %cst_62 = arith.constant dense<0.000000e+00> : vector<8x512xf32>
    %244 = tpu.matmul %242, %243, %cst_62 {dimension_numbers = #tpu.dot_dimension_numbers<[1], [0], [0], [1], [0, 0, 1, 1], [], []>} : vector<8x256xf32>, vector<256x512xf32>, vector<8x512xf32> -> vector<8x512xf32>
    %245 = vector.broadcast %0 : vector<1x512xf32> to vector<8x512xf32>
    %246 = arith.addf %244, %245 : vector<8x512xf32>
    %247 = vector.extract_strided_slice %246 {offsets = [0, 0], sizes = [8, 384], strides = [1, 1]} : vector<8x512xf32> to vector<8x384xf32>
    %248 = arith.negf %247 : vector<8x384xf32>
    %249 = math.exp %248 : vector<8x384xf32>
    %cst_63 = arith.constant 1.000000e+00 : f32
    %250 = vector.broadcast %cst_63 : f32 to vector<8x384xf32>
    %251 = arith.addf %250, %249 : vector<8x384xf32>
    %252 = arith.divf %250, %251 : vector<8x384xf32>
    %253 = vector.extract_strided_slice %252 {offsets = [0, 0], sizes = [8, 128], strides = [1, 1]} : vector<8x384xf32> to vector<8x128xf32>
    %254 = vector.extract_strided_slice %252 {offsets = [0, 128], sizes = [8, 128], strides = [1, 1]} : vector<8x384xf32> to vector<8x128xf32>
    %255 = vector.extract_strided_slice %252 {offsets = [0, 256], sizes = [8, 128], strides = [1, 1]} : vector<8x384xf32> to vector<8x128xf32>
    %256 = vector.extract_strided_slice %246 {offsets = [0, 384], sizes = [8, 128], strides = [1, 1]} : vector<8x512xf32> to vector<8x128xf32>
    %257 = math.tanh %256 : vector<8x128xf32>
    %258 = arith.mulf %254, %217 : vector<8x128xf32>
    %259 = arith.mulf %253, %257 : vector<8x128xf32>
    %260 = arith.addf %258, %259 : vector<8x128xf32>
    %261 = math.tanh %260 : vector<8x128xf32>
    %262 = arith.mulf %255, %261 : vector<8x128xf32>
    %c6_i32 = arith.constant 6 : i32
    %263 = arith.index_cast %c6_i32 : i32 to index
    %c0_64 = arith.constant 0 : index
    %c0_65 = arith.constant 0 : index
    %264 = vector.load %arg0[%263, %c0_64, %c0_65] : memref<16x8x512xf32, #tpu.memory_space<vmem>>, vector<1x8x512xf32>
    %265 = vector.shape_cast %264 : vector<1x8x512xf32> to vector<8x512xf32>
    %c0_66 = arith.constant 0 : index
    %c0_67 = arith.constant 0 : index
    %266 = vector.load %arg1[%c0_66, %c0_67] : memref<128x512xf32, #tpu.memory_space<vmem>>, vector<128x512xf32>
    %cst_68 = arith.constant dense<0.000000e+00> : vector<8x512xf32>
    %267 = tpu.matmul %241, %266, %cst_68 {dimension_numbers = #tpu.dot_dimension_numbers<[1], [0], [0], [1], [0, 0, 1, 1], [], []>} : vector<8x128xf32>, vector<128x512xf32>, vector<8x512xf32> -> vector<8x512xf32>
    %268 = arith.addf %265, %267 : vector<8x512xf32>
    %269 = vector.extract_strided_slice %268 {offsets = [0, 0], sizes = [8, 384], strides = [1, 1]} : vector<8x512xf32> to vector<8x384xf32>
    %270 = arith.negf %269 : vector<8x384xf32>
    %271 = math.exp %270 : vector<8x384xf32>
    %cst_69 = arith.constant 1.000000e+00 : f32
    %272 = vector.broadcast %cst_69 : f32 to vector<8x384xf32>
    %273 = arith.addf %272, %271 : vector<8x384xf32>
    %274 = arith.divf %272, %273 : vector<8x384xf32>
    %275 = vector.extract_strided_slice %274 {offsets = [0, 0], sizes = [8, 128], strides = [1, 1]} : vector<8x384xf32> to vector<8x128xf32>
    %276 = vector.extract_strided_slice %274 {offsets = [0, 128], sizes = [8, 128], strides = [1, 1]} : vector<8x384xf32> to vector<8x128xf32>
    %277 = vector.extract_strided_slice %274 {offsets = [0, 256], sizes = [8, 128], strides = [1, 1]} : vector<8x384xf32> to vector<8x128xf32>
    %278 = vector.extract_strided_slice %268 {offsets = [0, 384], sizes = [8, 128], strides = [1, 1]} : vector<8x512xf32> to vector<8x128xf32>
    %279 = math.tanh %278 : vector<8x128xf32>
    %280 = arith.mulf %276, %239 : vector<8x128xf32>
    %281 = arith.mulf %275, %279 : vector<8x128xf32>
    %282 = arith.addf %280, %281 : vector<8x128xf32>
    %283 = math.tanh %282 : vector<8x128xf32>
    %284 = arith.mulf %277, %283 : vector<8x128xf32>
    %285 = tpu.concatenate %284, %262 in 1 : vector<8x128xf32>, vector<8x128xf32> -> vector<8x256xf32>
    %c0_70 = arith.constant 0 : index
    %c0_71 = arith.constant 0 : index
    %286 = vector.load %arg2[%c0_70, %c0_71] : memref<256x512xf32, #tpu.memory_space<vmem>>, vector<256x512xf32>
    %cst_72 = arith.constant dense<0.000000e+00> : vector<8x512xf32>
    %287 = tpu.matmul %285, %286, %cst_72 {dimension_numbers = #tpu.dot_dimension_numbers<[1], [0], [0], [1], [0, 0, 1, 1], [], []>} : vector<8x256xf32>, vector<256x512xf32>, vector<8x512xf32> -> vector<8x512xf32>
    %288 = vector.broadcast %0 : vector<1x512xf32> to vector<8x512xf32>
    %289 = arith.addf %287, %288 : vector<8x512xf32>
    %290 = vector.extract_strided_slice %289 {offsets = [0, 0], sizes = [8, 384], strides = [1, 1]} : vector<8x512xf32> to vector<8x384xf32>
    %291 = arith.negf %290 : vector<8x384xf32>
    %292 = math.exp %291 : vector<8x384xf32>
    %cst_73 = arith.constant 1.000000e+00 : f32
    %293 = vector.broadcast %cst_73 : f32 to vector<8x384xf32>
    %294 = arith.addf %293, %292 : vector<8x384xf32>
    %295 = arith.divf %293, %294 : vector<8x384xf32>
    %296 = vector.extract_strided_slice %295 {offsets = [0, 0], sizes = [8, 128], strides = [1, 1]} : vector<8x384xf32> to vector<8x128xf32>
    %297 = vector.extract_strided_slice %295 {offsets = [0, 128], sizes = [8, 128], strides = [1, 1]} : vector<8x384xf32> to vector<8x128xf32>
    %298 = vector.extract_strided_slice %295 {offsets = [0, 256], sizes = [8, 128], strides = [1, 1]} : vector<8x384xf32> to vector<8x128xf32>
    %299 = vector.extract_strided_slice %289 {offsets = [0, 384], sizes = [8, 128], strides = [1, 1]} : vector<8x512xf32> to vector<8x128xf32>
    %300 = math.tanh %299 : vector<8x128xf32>
    %301 = arith.mulf %297, %260 : vector<8x128xf32>
    %302 = arith.mulf %296, %300 : vector<8x128xf32>
    %303 = arith.addf %301, %302 : vector<8x128xf32>
    %304 = math.tanh %303 : vector<8x128xf32>
    %305 = arith.mulf %298, %304 : vector<8x128xf32>
    %c7_i32 = arith.constant 7 : i32
    %306 = arith.index_cast %c7_i32 : i32 to index
    %c0_74 = arith.constant 0 : index
    %c0_75 = arith.constant 0 : index
    %307 = vector.load %arg0[%306, %c0_74, %c0_75] : memref<16x8x512xf32, #tpu.memory_space<vmem>>, vector<1x8x512xf32>
    %308 = vector.shape_cast %307 : vector<1x8x512xf32> to vector<8x512xf32>
    %c0_76 = arith.constant 0 : index
    %c0_77 = arith.constant 0 : index
    %309 = vector.load %arg1[%c0_76, %c0_77] : memref<128x512xf32, #tpu.memory_space<vmem>>, vector<128x512xf32>
    %cst_78 = arith.constant dense<0.000000e+00> : vector<8x512xf32>
    %310 = tpu.matmul %284, %309, %cst_78 {dimension_numbers = #tpu.dot_dimension_numbers<[1], [0], [0], [1], [0, 0, 1, 1], [], []>} : vector<8x128xf32>, vector<128x512xf32>, vector<8x512xf32> -> vector<8x512xf32>
    %311 = arith.addf %308, %310 : vector<8x512xf32>
    %312 = vector.extract_strided_slice %311 {offsets = [0, 0], sizes = [8, 384], strides = [1, 1]} : vector<8x512xf32> to vector<8x384xf32>
    %313 = arith.negf %312 : vector<8x384xf32>
    %314 = math.exp %313 : vector<8x384xf32>
    %cst_79 = arith.constant 1.000000e+00 : f32
    %315 = vector.broadcast %cst_79 : f32 to vector<8x384xf32>
    %316 = arith.addf %315, %314 : vector<8x384xf32>
    %317 = arith.divf %315, %316 : vector<8x384xf32>
    %318 = vector.extract_strided_slice %317 {offsets = [0, 0], sizes = [8, 128], strides = [1, 1]} : vector<8x384xf32> to vector<8x128xf32>
    %319 = vector.extract_strided_slice %317 {offsets = [0, 128], sizes = [8, 128], strides = [1, 1]} : vector<8x384xf32> to vector<8x128xf32>
    %320 = vector.extract_strided_slice %317 {offsets = [0, 256], sizes = [8, 128], strides = [1, 1]} : vector<8x384xf32> to vector<8x128xf32>
    %321 = vector.extract_strided_slice %311 {offsets = [0, 384], sizes = [8, 128], strides = [1, 1]} : vector<8x512xf32> to vector<8x128xf32>
    %322 = math.tanh %321 : vector<8x128xf32>
    %323 = arith.mulf %319, %282 : vector<8x128xf32>
    %324 = arith.mulf %318, %322 : vector<8x128xf32>
    %325 = arith.addf %323, %324 : vector<8x128xf32>
    %326 = math.tanh %325 : vector<8x128xf32>
    %327 = arith.mulf %320, %326 : vector<8x128xf32>
    %328 = tpu.concatenate %327, %305 in 1 : vector<8x128xf32>, vector<8x128xf32> -> vector<8x256xf32>
    %c0_80 = arith.constant 0 : index
    %c0_81 = arith.constant 0 : index
    %329 = vector.load %arg2[%c0_80, %c0_81] : memref<256x512xf32, #tpu.memory_space<vmem>>, vector<256x512xf32>
    %cst_82 = arith.constant dense<0.000000e+00> : vector<8x512xf32>
    %330 = tpu.matmul %328, %329, %cst_82 {dimension_numbers = #tpu.dot_dimension_numbers<[1], [0], [0], [1], [0, 0, 1, 1], [], []>} : vector<8x256xf32>, vector<256x512xf32>, vector<8x512xf32> -> vector<8x512xf32>
    %331 = vector.broadcast %0 : vector<1x512xf32> to vector<8x512xf32>
    %332 = arith.addf %330, %331 : vector<8x512xf32>
    %333 = vector.extract_strided_slice %332 {offsets = [0, 0], sizes = [8, 384], strides = [1, 1]} : vector<8x512xf32> to vector<8x384xf32>
    %334 = arith.negf %333 : vector<8x384xf32>
    %335 = math.exp %334 : vector<8x384xf32>
    %cst_83 = arith.constant 1.000000e+00 : f32
    %336 = vector.broadcast %cst_83 : f32 to vector<8x384xf32>
    %337 = arith.addf %336, %335 : vector<8x384xf32>
    %338 = arith.divf %336, %337 : vector<8x384xf32>
    %339 = vector.extract_strided_slice %338 {offsets = [0, 0], sizes = [8, 128], strides = [1, 1]} : vector<8x384xf32> to vector<8x128xf32>
    %340 = vector.extract_strided_slice %338 {offsets = [0, 128], sizes = [8, 128], strides = [1, 1]} : vector<8x384xf32> to vector<8x128xf32>
    %341 = vector.extract_strided_slice %338 {offsets = [0, 256], sizes = [8, 128], strides = [1, 1]} : vector<8x384xf32> to vector<8x128xf32>
    %342 = vector.extract_strided_slice %332 {offsets = [0, 384], sizes = [8, 128], strides = [1, 1]} : vector<8x512xf32> to vector<8x128xf32>
    %343 = math.tanh %342 : vector<8x128xf32>
    %344 = arith.mulf %340, %303 : vector<8x128xf32>
    %345 = arith.mulf %339, %343 : vector<8x128xf32>
    %346 = arith.addf %344, %345 : vector<8x128xf32>
    %347 = math.tanh %346 : vector<8x128xf32>
    %348 = arith.mulf %341, %347 : vector<8x128xf32>
    %c8_i32 = arith.constant 8 : i32
    %349 = arith.index_cast %c8_i32 : i32 to index
    %c0_84 = arith.constant 0 : index
    %c0_85 = arith.constant 0 : index
    %350 = vector.load %arg0[%349, %c0_84, %c0_85] : memref<16x8x512xf32, #tpu.memory_space<vmem>>, vector<1x8x512xf32>
    %351 = vector.shape_cast %350 : vector<1x8x512xf32> to vector<8x512xf32>
    %c0_86 = arith.constant 0 : index
    %c0_87 = arith.constant 0 : index
    %352 = vector.load %arg1[%c0_86, %c0_87] : memref<128x512xf32, #tpu.memory_space<vmem>>, vector<128x512xf32>
    %cst_88 = arith.constant dense<0.000000e+00> : vector<8x512xf32>
    %353 = tpu.matmul %327, %352, %cst_88 {dimension_numbers = #tpu.dot_dimension_numbers<[1], [0], [0], [1], [0, 0, 1, 1], [], []>} : vector<8x128xf32>, vector<128x512xf32>, vector<8x512xf32> -> vector<8x512xf32>
    %354 = arith.addf %351, %353 : vector<8x512xf32>
    %355 = vector.extract_strided_slice %354 {offsets = [0, 0], sizes = [8, 384], strides = [1, 1]} : vector<8x512xf32> to vector<8x384xf32>
    %356 = arith.negf %355 : vector<8x384xf32>
    %357 = math.exp %356 : vector<8x384xf32>
    %cst_89 = arith.constant 1.000000e+00 : f32
    %358 = vector.broadcast %cst_89 : f32 to vector<8x384xf32>
    %359 = arith.addf %358, %357 : vector<8x384xf32>
    %360 = arith.divf %358, %359 : vector<8x384xf32>
    %361 = vector.extract_strided_slice %360 {offsets = [0, 0], sizes = [8, 128], strides = [1, 1]} : vector<8x384xf32> to vector<8x128xf32>
    %362 = vector.extract_strided_slice %360 {offsets = [0, 128], sizes = [8, 128], strides = [1, 1]} : vector<8x384xf32> to vector<8x128xf32>
    %363 = vector.extract_strided_slice %360 {offsets = [0, 256], sizes = [8, 128], strides = [1, 1]} : vector<8x384xf32> to vector<8x128xf32>
    %364 = vector.extract_strided_slice %354 {offsets = [0, 384], sizes = [8, 128], strides = [1, 1]} : vector<8x512xf32> to vector<8x128xf32>
    %365 = math.tanh %364 : vector<8x128xf32>
    %366 = arith.mulf %362, %325 : vector<8x128xf32>
    %367 = arith.mulf %361, %365 : vector<8x128xf32>
    %368 = arith.addf %366, %367 : vector<8x128xf32>
    %369 = math.tanh %368 : vector<8x128xf32>
    %370 = arith.mulf %363, %369 : vector<8x128xf32>
    %371 = tpu.concatenate %370, %348 in 1 : vector<8x128xf32>, vector<8x128xf32> -> vector<8x256xf32>
    %c0_90 = arith.constant 0 : index
    %c0_91 = arith.constant 0 : index
    %372 = vector.load %arg2[%c0_90, %c0_91] : memref<256x512xf32, #tpu.memory_space<vmem>>, vector<256x512xf32>
    %cst_92 = arith.constant dense<0.000000e+00> : vector<8x512xf32>
    %373 = tpu.matmul %371, %372, %cst_92 {dimension_numbers = #tpu.dot_dimension_numbers<[1], [0], [0], [1], [0, 0, 1, 1], [], []>} : vector<8x256xf32>, vector<256x512xf32>, vector<8x512xf32> -> vector<8x512xf32>
    %374 = vector.broadcast %0 : vector<1x512xf32> to vector<8x512xf32>
    %375 = arith.addf %373, %374 : vector<8x512xf32>
    %376 = vector.extract_strided_slice %375 {offsets = [0, 0], sizes = [8, 384], strides = [1, 1]} : vector<8x512xf32> to vector<8x384xf32>
    %377 = arith.negf %376 : vector<8x384xf32>
    %378 = math.exp %377 : vector<8x384xf32>
    %cst_93 = arith.constant 1.000000e+00 : f32
    %379 = vector.broadcast %cst_93 : f32 to vector<8x384xf32>
    %380 = arith.addf %379, %378 : vector<8x384xf32>
    %381 = arith.divf %379, %380 : vector<8x384xf32>
    %382 = vector.extract_strided_slice %381 {offsets = [0, 0], sizes = [8, 128], strides = [1, 1]} : vector<8x384xf32> to vector<8x128xf32>
    %383 = vector.extract_strided_slice %381 {offsets = [0, 128], sizes = [8, 128], strides = [1, 1]} : vector<8x384xf32> to vector<8x128xf32>
    %384 = vector.extract_strided_slice %381 {offsets = [0, 256], sizes = [8, 128], strides = [1, 1]} : vector<8x384xf32> to vector<8x128xf32>
    %385 = vector.extract_strided_slice %375 {offsets = [0, 384], sizes = [8, 128], strides = [1, 1]} : vector<8x512xf32> to vector<8x128xf32>
    %386 = math.tanh %385 : vector<8x128xf32>
    %387 = arith.mulf %383, %346 : vector<8x128xf32>
    %388 = arith.mulf %382, %386 : vector<8x128xf32>
    %389 = arith.addf %387, %388 : vector<8x128xf32>
    %390 = math.tanh %389 : vector<8x128xf32>
    %391 = arith.mulf %384, %390 : vector<8x128xf32>
    %c9_i32 = arith.constant 9 : i32
    %392 = arith.index_cast %c9_i32 : i32 to index
    %c0_94 = arith.constant 0 : index
    %c0_95 = arith.constant 0 : index
    %393 = vector.load %arg0[%392, %c0_94, %c0_95] : memref<16x8x512xf32, #tpu.memory_space<vmem>>, vector<1x8x512xf32>
    %394 = vector.shape_cast %393 : vector<1x8x512xf32> to vector<8x512xf32>
    %c0_96 = arith.constant 0 : index
    %c0_97 = arith.constant 0 : index
    %395 = vector.load %arg1[%c0_96, %c0_97] : memref<128x512xf32, #tpu.memory_space<vmem>>, vector<128x512xf32>
    %cst_98 = arith.constant dense<0.000000e+00> : vector<8x512xf32>
    %396 = tpu.matmul %370, %395, %cst_98 {dimension_numbers = #tpu.dot_dimension_numbers<[1], [0], [0], [1], [0, 0, 1, 1], [], []>} : vector<8x128xf32>, vector<128x512xf32>, vector<8x512xf32> -> vector<8x512xf32>
    %397 = arith.addf %394, %396 : vector<8x512xf32>
    %398 = vector.extract_strided_slice %397 {offsets = [0, 0], sizes = [8, 384], strides = [1, 1]} : vector<8x512xf32> to vector<8x384xf32>
    %399 = arith.negf %398 : vector<8x384xf32>
    %400 = math.exp %399 : vector<8x384xf32>
    %cst_99 = arith.constant 1.000000e+00 : f32
    %401 = vector.broadcast %cst_99 : f32 to vector<8x384xf32>
    %402 = arith.addf %401, %400 : vector<8x384xf32>
    %403 = arith.divf %401, %402 : vector<8x384xf32>
    %404 = vector.extract_strided_slice %403 {offsets = [0, 0], sizes = [8, 128], strides = [1, 1]} : vector<8x384xf32> to vector<8x128xf32>
    %405 = vector.extract_strided_slice %403 {offsets = [0, 128], sizes = [8, 128], strides = [1, 1]} : vector<8x384xf32> to vector<8x128xf32>
    %406 = vector.extract_strided_slice %403 {offsets = [0, 256], sizes = [8, 128], strides = [1, 1]} : vector<8x384xf32> to vector<8x128xf32>
    %407 = vector.extract_strided_slice %397 {offsets = [0, 384], sizes = [8, 128], strides = [1, 1]} : vector<8x512xf32> to vector<8x128xf32>
    %408 = math.tanh %407 : vector<8x128xf32>
    %409 = arith.mulf %405, %368 : vector<8x128xf32>
    %410 = arith.mulf %404, %408 : vector<8x128xf32>
    %411 = arith.addf %409, %410 : vector<8x128xf32>
    %412 = math.tanh %411 : vector<8x128xf32>
    %413 = arith.mulf %406, %412 : vector<8x128xf32>
    %414 = tpu.concatenate %413, %391 in 1 : vector<8x128xf32>, vector<8x128xf32> -> vector<8x256xf32>
    %c0_100 = arith.constant 0 : index
    %c0_101 = arith.constant 0 : index
    %415 = vector.load %arg2[%c0_100, %c0_101] : memref<256x512xf32, #tpu.memory_space<vmem>>, vector<256x512xf32>
    %cst_102 = arith.constant dense<0.000000e+00> : vector<8x512xf32>
    %416 = tpu.matmul %414, %415, %cst_102 {dimension_numbers = #tpu.dot_dimension_numbers<[1], [0], [0], [1], [0, 0, 1, 1], [], []>} : vector<8x256xf32>, vector<256x512xf32>, vector<8x512xf32> -> vector<8x512xf32>
    %417 = vector.broadcast %0 : vector<1x512xf32> to vector<8x512xf32>
    %418 = arith.addf %416, %417 : vector<8x512xf32>
    %419 = vector.extract_strided_slice %418 {offsets = [0, 0], sizes = [8, 384], strides = [1, 1]} : vector<8x512xf32> to vector<8x384xf32>
    %420 = arith.negf %419 : vector<8x384xf32>
    %421 = math.exp %420 : vector<8x384xf32>
    %cst_103 = arith.constant 1.000000e+00 : f32
    %422 = vector.broadcast %cst_103 : f32 to vector<8x384xf32>
    %423 = arith.addf %422, %421 : vector<8x384xf32>
    %424 = arith.divf %422, %423 : vector<8x384xf32>
    %425 = vector.extract_strided_slice %424 {offsets = [0, 0], sizes = [8, 128], strides = [1, 1]} : vector<8x384xf32> to vector<8x128xf32>
    %426 = vector.extract_strided_slice %424 {offsets = [0, 128], sizes = [8, 128], strides = [1, 1]} : vector<8x384xf32> to vector<8x128xf32>
    %427 = vector.extract_strided_slice %424 {offsets = [0, 256], sizes = [8, 128], strides = [1, 1]} : vector<8x384xf32> to vector<8x128xf32>
    %428 = vector.extract_strided_slice %418 {offsets = [0, 384], sizes = [8, 128], strides = [1, 1]} : vector<8x512xf32> to vector<8x128xf32>
    %429 = math.tanh %428 : vector<8x128xf32>
    %430 = arith.mulf %426, %389 : vector<8x128xf32>
    %431 = arith.mulf %425, %429 : vector<8x128xf32>
    %432 = arith.addf %430, %431 : vector<8x128xf32>
    %433 = math.tanh %432 : vector<8x128xf32>
    %434 = arith.mulf %427, %433 : vector<8x128xf32>
    %c10_i32 = arith.constant 10 : i32
    %435 = arith.index_cast %c10_i32 : i32 to index
    %c0_104 = arith.constant 0 : index
    %c0_105 = arith.constant 0 : index
    %436 = vector.load %arg0[%435, %c0_104, %c0_105] : memref<16x8x512xf32, #tpu.memory_space<vmem>>, vector<1x8x512xf32>
    %437 = vector.shape_cast %436 : vector<1x8x512xf32> to vector<8x512xf32>
    %c0_106 = arith.constant 0 : index
    %c0_107 = arith.constant 0 : index
    %438 = vector.load %arg1[%c0_106, %c0_107] : memref<128x512xf32, #tpu.memory_space<vmem>>, vector<128x512xf32>
    %cst_108 = arith.constant dense<0.000000e+00> : vector<8x512xf32>
    %439 = tpu.matmul %413, %438, %cst_108 {dimension_numbers = #tpu.dot_dimension_numbers<[1], [0], [0], [1], [0, 0, 1, 1], [], []>} : vector<8x128xf32>, vector<128x512xf32>, vector<8x512xf32> -> vector<8x512xf32>
    %440 = arith.addf %437, %439 : vector<8x512xf32>
    %441 = vector.extract_strided_slice %440 {offsets = [0, 0], sizes = [8, 384], strides = [1, 1]} : vector<8x512xf32> to vector<8x384xf32>
    %442 = arith.negf %441 : vector<8x384xf32>
    %443 = math.exp %442 : vector<8x384xf32>
    %cst_109 = arith.constant 1.000000e+00 : f32
    %444 = vector.broadcast %cst_109 : f32 to vector<8x384xf32>
    %445 = arith.addf %444, %443 : vector<8x384xf32>
    %446 = arith.divf %444, %445 : vector<8x384xf32>
    %447 = vector.extract_strided_slice %446 {offsets = [0, 0], sizes = [8, 128], strides = [1, 1]} : vector<8x384xf32> to vector<8x128xf32>
    %448 = vector.extract_strided_slice %446 {offsets = [0, 128], sizes = [8, 128], strides = [1, 1]} : vector<8x384xf32> to vector<8x128xf32>
    %449 = vector.extract_strided_slice %446 {offsets = [0, 256], sizes = [8, 128], strides = [1, 1]} : vector<8x384xf32> to vector<8x128xf32>
    %450 = vector.extract_strided_slice %440 {offsets = [0, 384], sizes = [8, 128], strides = [1, 1]} : vector<8x512xf32> to vector<8x128xf32>
    %451 = math.tanh %450 : vector<8x128xf32>
    %452 = arith.mulf %448, %411 : vector<8x128xf32>
    %453 = arith.mulf %447, %451 : vector<8x128xf32>
    %454 = arith.addf %452, %453 : vector<8x128xf32>
    %455 = math.tanh %454 : vector<8x128xf32>
    %456 = arith.mulf %449, %455 : vector<8x128xf32>
    %457 = tpu.concatenate %456, %434 in 1 : vector<8x128xf32>, vector<8x128xf32> -> vector<8x256xf32>
    %c0_110 = arith.constant 0 : index
    %c0_111 = arith.constant 0 : index
    %458 = vector.load %arg2[%c0_110, %c0_111] : memref<256x512xf32, #tpu.memory_space<vmem>>, vector<256x512xf32>
    %cst_112 = arith.constant dense<0.000000e+00> : vector<8x512xf32>
    %459 = tpu.matmul %457, %458, %cst_112 {dimension_numbers = #tpu.dot_dimension_numbers<[1], [0], [0], [1], [0, 0, 1, 1], [], []>} : vector<8x256xf32>, vector<256x512xf32>, vector<8x512xf32> -> vector<8x512xf32>
    %460 = vector.broadcast %0 : vector<1x512xf32> to vector<8x512xf32>
    %461 = arith.addf %459, %460 : vector<8x512xf32>
    %462 = vector.extract_strided_slice %461 {offsets = [0, 0], sizes = [8, 384], strides = [1, 1]} : vector<8x512xf32> to vector<8x384xf32>
    %463 = arith.negf %462 : vector<8x384xf32>
    %464 = math.exp %463 : vector<8x384xf32>
    %cst_113 = arith.constant 1.000000e+00 : f32
    %465 = vector.broadcast %cst_113 : f32 to vector<8x384xf32>
    %466 = arith.addf %465, %464 : vector<8x384xf32>
    %467 = arith.divf %465, %466 : vector<8x384xf32>
    %468 = vector.extract_strided_slice %467 {offsets = [0, 0], sizes = [8, 128], strides = [1, 1]} : vector<8x384xf32> to vector<8x128xf32>
    %469 = vector.extract_strided_slice %467 {offsets = [0, 128], sizes = [8, 128], strides = [1, 1]} : vector<8x384xf32> to vector<8x128xf32>
    %470 = vector.extract_strided_slice %467 {offsets = [0, 256], sizes = [8, 128], strides = [1, 1]} : vector<8x384xf32> to vector<8x128xf32>
    %471 = vector.extract_strided_slice %461 {offsets = [0, 384], sizes = [8, 128], strides = [1, 1]} : vector<8x512xf32> to vector<8x128xf32>
    %472 = math.tanh %471 : vector<8x128xf32>
    %473 = arith.mulf %469, %432 : vector<8x128xf32>
    %474 = arith.mulf %468, %472 : vector<8x128xf32>
    %475 = arith.addf %473, %474 : vector<8x128xf32>
    %476 = math.tanh %475 : vector<8x128xf32>
    %477 = arith.mulf %470, %476 : vector<8x128xf32>
    %c11_i32 = arith.constant 11 : i32
    %478 = arith.index_cast %c11_i32 : i32 to index
    %c0_114 = arith.constant 0 : index
    %c0_115 = arith.constant 0 : index
    %479 = vector.load %arg0[%478, %c0_114, %c0_115] : memref<16x8x512xf32, #tpu.memory_space<vmem>>, vector<1x8x512xf32>
    %480 = vector.shape_cast %479 : vector<1x8x512xf32> to vector<8x512xf32>
    %c0_116 = arith.constant 0 : index
    %c0_117 = arith.constant 0 : index
    %481 = vector.load %arg1[%c0_116, %c0_117] : memref<128x512xf32, #tpu.memory_space<vmem>>, vector<128x512xf32>
    %cst_118 = arith.constant dense<0.000000e+00> : vector<8x512xf32>
    %482 = tpu.matmul %456, %481, %cst_118 {dimension_numbers = #tpu.dot_dimension_numbers<[1], [0], [0], [1], [0, 0, 1, 1], [], []>} : vector<8x128xf32>, vector<128x512xf32>, vector<8x512xf32> -> vector<8x512xf32>
    %483 = arith.addf %480, %482 : vector<8x512xf32>
    %484 = vector.extract_strided_slice %483 {offsets = [0, 0], sizes = [8, 384], strides = [1, 1]} : vector<8x512xf32> to vector<8x384xf32>
    %485 = arith.negf %484 : vector<8x384xf32>
    %486 = math.exp %485 : vector<8x384xf32>
    %cst_119 = arith.constant 1.000000e+00 : f32
    %487 = vector.broadcast %cst_119 : f32 to vector<8x384xf32>
    %488 = arith.addf %487, %486 : vector<8x384xf32>
    %489 = arith.divf %487, %488 : vector<8x384xf32>
    %490 = vector.extract_strided_slice %489 {offsets = [0, 0], sizes = [8, 128], strides = [1, 1]} : vector<8x384xf32> to vector<8x128xf32>
    %491 = vector.extract_strided_slice %489 {offsets = [0, 128], sizes = [8, 128], strides = [1, 1]} : vector<8x384xf32> to vector<8x128xf32>
    %492 = vector.extract_strided_slice %489 {offsets = [0, 256], sizes = [8, 128], strides = [1, 1]} : vector<8x384xf32> to vector<8x128xf32>
    %493 = vector.extract_strided_slice %483 {offsets = [0, 384], sizes = [8, 128], strides = [1, 1]} : vector<8x512xf32> to vector<8x128xf32>
    %494 = math.tanh %493 : vector<8x128xf32>
    %495 = arith.mulf %491, %454 : vector<8x128xf32>
    %496 = arith.mulf %490, %494 : vector<8x128xf32>
    %497 = arith.addf %495, %496 : vector<8x128xf32>
    %498 = math.tanh %497 : vector<8x128xf32>
    %499 = arith.mulf %492, %498 : vector<8x128xf32>
    %500 = tpu.concatenate %499, %477 in 1 : vector<8x128xf32>, vector<8x128xf32> -> vector<8x256xf32>
    %c0_120 = arith.constant 0 : index
    %c0_121 = arith.constant 0 : index
    %501 = vector.load %arg2[%c0_120, %c0_121] : memref<256x512xf32, #tpu.memory_space<vmem>>, vector<256x512xf32>
    %cst_122 = arith.constant dense<0.000000e+00> : vector<8x512xf32>
    %502 = tpu.matmul %500, %501, %cst_122 {dimension_numbers = #tpu.dot_dimension_numbers<[1], [0], [0], [1], [0, 0, 1, 1], [], []>} : vector<8x256xf32>, vector<256x512xf32>, vector<8x512xf32> -> vector<8x512xf32>
    %503 = vector.broadcast %0 : vector<1x512xf32> to vector<8x512xf32>
    %504 = arith.addf %502, %503 : vector<8x512xf32>
    %505 = vector.extract_strided_slice %504 {offsets = [0, 0], sizes = [8, 384], strides = [1, 1]} : vector<8x512xf32> to vector<8x384xf32>
    %506 = arith.negf %505 : vector<8x384xf32>
    %507 = math.exp %506 : vector<8x384xf32>
    %cst_123 = arith.constant 1.000000e+00 : f32
    %508 = vector.broadcast %cst_123 : f32 to vector<8x384xf32>
    %509 = arith.addf %508, %507 : vector<8x384xf32>
    %510 = arith.divf %508, %509 : vector<8x384xf32>
    %511 = vector.extract_strided_slice %510 {offsets = [0, 0], sizes = [8, 128], strides = [1, 1]} : vector<8x384xf32> to vector<8x128xf32>
    %512 = vector.extract_strided_slice %510 {offsets = [0, 128], sizes = [8, 128], strides = [1, 1]} : vector<8x384xf32> to vector<8x128xf32>
    %513 = vector.extract_strided_slice %510 {offsets = [0, 256], sizes = [8, 128], strides = [1, 1]} : vector<8x384xf32> to vector<8x128xf32>
    %514 = vector.extract_strided_slice %504 {offsets = [0, 384], sizes = [8, 128], strides = [1, 1]} : vector<8x512xf32> to vector<8x128xf32>
    %515 = math.tanh %514 : vector<8x128xf32>
    %516 = arith.mulf %512, %475 : vector<8x128xf32>
    %517 = arith.mulf %511, %515 : vector<8x128xf32>
    %518 = arith.addf %516, %517 : vector<8x128xf32>
    %519 = math.tanh %518 : vector<8x128xf32>
    %520 = arith.mulf %513, %519 : vector<8x128xf32>
    %c12_i32 = arith.constant 12 : i32
    %521 = arith.index_cast %c12_i32 : i32 to index
    %c0_124 = arith.constant 0 : index
    %c0_125 = arith.constant 0 : index
    %522 = vector.load %arg0[%521, %c0_124, %c0_125] : memref<16x8x512xf32, #tpu.memory_space<vmem>>, vector<1x8x512xf32>
    %523 = vector.shape_cast %522 : vector<1x8x512xf32> to vector<8x512xf32>
    %c0_126 = arith.constant 0 : index
    %c0_127 = arith.constant 0 : index
    %524 = vector.load %arg1[%c0_126, %c0_127] : memref<128x512xf32, #tpu.memory_space<vmem>>, vector<128x512xf32>
    %cst_128 = arith.constant dense<0.000000e+00> : vector<8x512xf32>
    %525 = tpu.matmul %499, %524, %cst_128 {dimension_numbers = #tpu.dot_dimension_numbers<[1], [0], [0], [1], [0, 0, 1, 1], [], []>} : vector<8x128xf32>, vector<128x512xf32>, vector<8x512xf32> -> vector<8x512xf32>
    %526 = arith.addf %523, %525 : vector<8x512xf32>
    %527 = vector.extract_strided_slice %526 {offsets = [0, 0], sizes = [8, 384], strides = [1, 1]} : vector<8x512xf32> to vector<8x384xf32>
    %528 = arith.negf %527 : vector<8x384xf32>
    %529 = math.exp %528 : vector<8x384xf32>
    %cst_129 = arith.constant 1.000000e+00 : f32
    %530 = vector.broadcast %cst_129 : f32 to vector<8x384xf32>
    %531 = arith.addf %530, %529 : vector<8x384xf32>
    %532 = arith.divf %530, %531 : vector<8x384xf32>
    %533 = vector.extract_strided_slice %532 {offsets = [0, 0], sizes = [8, 128], strides = [1, 1]} : vector<8x384xf32> to vector<8x128xf32>
    %534 = vector.extract_strided_slice %532 {offsets = [0, 128], sizes = [8, 128], strides = [1, 1]} : vector<8x384xf32> to vector<8x128xf32>
    %535 = vector.extract_strided_slice %532 {offsets = [0, 256], sizes = [8, 128], strides = [1, 1]} : vector<8x384xf32> to vector<8x128xf32>
    %536 = vector.extract_strided_slice %526 {offsets = [0, 384], sizes = [8, 128], strides = [1, 1]} : vector<8x512xf32> to vector<8x128xf32>
    %537 = math.tanh %536 : vector<8x128xf32>
    %538 = arith.mulf %534, %497 : vector<8x128xf32>
    %539 = arith.mulf %533, %537 : vector<8x128xf32>
    %540 = arith.addf %538, %539 : vector<8x128xf32>
    %541 = math.tanh %540 : vector<8x128xf32>
    %542 = arith.mulf %535, %541 : vector<8x128xf32>
    %543 = tpu.concatenate %542, %520 in 1 : vector<8x128xf32>, vector<8x128xf32> -> vector<8x256xf32>
    %c0_130 = arith.constant 0 : index
    %c0_131 = arith.constant 0 : index
    %544 = vector.load %arg2[%c0_130, %c0_131] : memref<256x512xf32, #tpu.memory_space<vmem>>, vector<256x512xf32>
    %cst_132 = arith.constant dense<0.000000e+00> : vector<8x512xf32>
    %545 = tpu.matmul %543, %544, %cst_132 {dimension_numbers = #tpu.dot_dimension_numbers<[1], [0], [0], [1], [0, 0, 1, 1], [], []>} : vector<8x256xf32>, vector<256x512xf32>, vector<8x512xf32> -> vector<8x512xf32>
    %546 = vector.broadcast %0 : vector<1x512xf32> to vector<8x512xf32>
    %547 = arith.addf %545, %546 : vector<8x512xf32>
    %548 = vector.extract_strided_slice %547 {offsets = [0, 0], sizes = [8, 384], strides = [1, 1]} : vector<8x512xf32> to vector<8x384xf32>
    %549 = arith.negf %548 : vector<8x384xf32>
    %550 = math.exp %549 : vector<8x384xf32>
    %cst_133 = arith.constant 1.000000e+00 : f32
    %551 = vector.broadcast %cst_133 : f32 to vector<8x384xf32>
    %552 = arith.addf %551, %550 : vector<8x384xf32>
    %553 = arith.divf %551, %552 : vector<8x384xf32>
    %554 = vector.extract_strided_slice %553 {offsets = [0, 0], sizes = [8, 128], strides = [1, 1]} : vector<8x384xf32> to vector<8x128xf32>
    %555 = vector.extract_strided_slice %553 {offsets = [0, 128], sizes = [8, 128], strides = [1, 1]} : vector<8x384xf32> to vector<8x128xf32>
    %556 = vector.extract_strided_slice %553 {offsets = [0, 256], sizes = [8, 128], strides = [1, 1]} : vector<8x384xf32> to vector<8x128xf32>
    %557 = vector.extract_strided_slice %547 {offsets = [0, 384], sizes = [8, 128], strides = [1, 1]} : vector<8x512xf32> to vector<8x128xf32>
    %558 = math.tanh %557 : vector<8x128xf32>
    %559 = arith.mulf %555, %518 : vector<8x128xf32>
    %560 = arith.mulf %554, %558 : vector<8x128xf32>
    %561 = arith.addf %559, %560 : vector<8x128xf32>
    %562 = math.tanh %561 : vector<8x128xf32>
    %563 = arith.mulf %556, %562 : vector<8x128xf32>
    %c13_i32 = arith.constant 13 : i32
    %564 = arith.index_cast %c13_i32 : i32 to index
    %c0_134 = arith.constant 0 : index
    %c0_135 = arith.constant 0 : index
    %565 = vector.load %arg0[%564, %c0_134, %c0_135] : memref<16x8x512xf32, #tpu.memory_space<vmem>>, vector<1x8x512xf32>
    %566 = vector.shape_cast %565 : vector<1x8x512xf32> to vector<8x512xf32>
    %c0_136 = arith.constant 0 : index
    %c0_137 = arith.constant 0 : index
    %567 = vector.load %arg1[%c0_136, %c0_137] : memref<128x512xf32, #tpu.memory_space<vmem>>, vector<128x512xf32>
    %cst_138 = arith.constant dense<0.000000e+00> : vector<8x512xf32>
    %568 = tpu.matmul %542, %567, %cst_138 {dimension_numbers = #tpu.dot_dimension_numbers<[1], [0], [0], [1], [0, 0, 1, 1], [], []>} : vector<8x128xf32>, vector<128x512xf32>, vector<8x512xf32> -> vector<8x512xf32>
    %569 = arith.addf %566, %568 : vector<8x512xf32>
    %570 = vector.extract_strided_slice %569 {offsets = [0, 0], sizes = [8, 384], strides = [1, 1]} : vector<8x512xf32> to vector<8x384xf32>
    %571 = arith.negf %570 : vector<8x384xf32>
    %572 = math.exp %571 : vector<8x384xf32>
    %cst_139 = arith.constant 1.000000e+00 : f32
    %573 = vector.broadcast %cst_139 : f32 to vector<8x384xf32>
    %574 = arith.addf %573, %572 : vector<8x384xf32>
    %575 = arith.divf %573, %574 : vector<8x384xf32>
    %576 = vector.extract_strided_slice %575 {offsets = [0, 0], sizes = [8, 128], strides = [1, 1]} : vector<8x384xf32> to vector<8x128xf32>
    %577 = vector.extract_strided_slice %575 {offsets = [0, 128], sizes = [8, 128], strides = [1, 1]} : vector<8x384xf32> to vector<8x128xf32>
    %578 = vector.extract_strided_slice %575 {offsets = [0, 256], sizes = [8, 128], strides = [1, 1]} : vector<8x384xf32> to vector<8x128xf32>
    %579 = vector.extract_strided_slice %569 {offsets = [0, 384], sizes = [8, 128], strides = [1, 1]} : vector<8x512xf32> to vector<8x128xf32>
    %580 = math.tanh %579 : vector<8x128xf32>
    %581 = arith.mulf %577, %540 : vector<8x128xf32>
    %582 = arith.mulf %576, %580 : vector<8x128xf32>
    %583 = arith.addf %581, %582 : vector<8x128xf32>
    %584 = math.tanh %583 : vector<8x128xf32>
    %585 = arith.mulf %578, %584 : vector<8x128xf32>
    %586 = tpu.concatenate %585, %563 in 1 : vector<8x128xf32>, vector<8x128xf32> -> vector<8x256xf32>
    %c0_140 = arith.constant 0 : index
    %c0_141 = arith.constant 0 : index
    %587 = vector.load %arg2[%c0_140, %c0_141] : memref<256x512xf32, #tpu.memory_space<vmem>>, vector<256x512xf32>
    %cst_142 = arith.constant dense<0.000000e+00> : vector<8x512xf32>
    %588 = tpu.matmul %586, %587, %cst_142 {dimension_numbers = #tpu.dot_dimension_numbers<[1], [0], [0], [1], [0, 0, 1, 1], [], []>} : vector<8x256xf32>, vector<256x512xf32>, vector<8x512xf32> -> vector<8x512xf32>
    %589 = vector.broadcast %0 : vector<1x512xf32> to vector<8x512xf32>
    %590 = arith.addf %588, %589 : vector<8x512xf32>
    %591 = vector.extract_strided_slice %590 {offsets = [0, 0], sizes = [8, 384], strides = [1, 1]} : vector<8x512xf32> to vector<8x384xf32>
    %592 = arith.negf %591 : vector<8x384xf32>
    %593 = math.exp %592 : vector<8x384xf32>
    %cst_143 = arith.constant 1.000000e+00 : f32
    %594 = vector.broadcast %cst_143 : f32 to vector<8x384xf32>
    %595 = arith.addf %594, %593 : vector<8x384xf32>
    %596 = arith.divf %594, %595 : vector<8x384xf32>
    %597 = vector.extract_strided_slice %596 {offsets = [0, 0], sizes = [8, 128], strides = [1, 1]} : vector<8x384xf32> to vector<8x128xf32>
    %598 = vector.extract_strided_slice %596 {offsets = [0, 128], sizes = [8, 128], strides = [1, 1]} : vector<8x384xf32> to vector<8x128xf32>
    %599 = vector.extract_strided_slice %596 {offsets = [0, 256], sizes = [8, 128], strides = [1, 1]} : vector<8x384xf32> to vector<8x128xf32>
    %600 = vector.extract_strided_slice %590 {offsets = [0, 384], sizes = [8, 128], strides = [1, 1]} : vector<8x512xf32> to vector<8x128xf32>
    %601 = math.tanh %600 : vector<8x128xf32>
    %602 = arith.mulf %598, %561 : vector<8x128xf32>
    %603 = arith.mulf %597, %601 : vector<8x128xf32>
    %604 = arith.addf %602, %603 : vector<8x128xf32>
    %605 = math.tanh %604 : vector<8x128xf32>
    %606 = arith.mulf %599, %605 : vector<8x128xf32>
    %c14_i32 = arith.constant 14 : i32
    %607 = arith.index_cast %c14_i32 : i32 to index
    %c0_144 = arith.constant 0 : index
    %c0_145 = arith.constant 0 : index
    %608 = vector.load %arg0[%607, %c0_144, %c0_145] : memref<16x8x512xf32, #tpu.memory_space<vmem>>, vector<1x8x512xf32>
    %609 = vector.shape_cast %608 : vector<1x8x512xf32> to vector<8x512xf32>
    %c0_146 = arith.constant 0 : index
    %c0_147 = arith.constant 0 : index
    %610 = vector.load %arg1[%c0_146, %c0_147] : memref<128x512xf32, #tpu.memory_space<vmem>>, vector<128x512xf32>
    %cst_148 = arith.constant dense<0.000000e+00> : vector<8x512xf32>
    %611 = tpu.matmul %585, %610, %cst_148 {dimension_numbers = #tpu.dot_dimension_numbers<[1], [0], [0], [1], [0, 0, 1, 1], [], []>} : vector<8x128xf32>, vector<128x512xf32>, vector<8x512xf32> -> vector<8x512xf32>
    %612 = arith.addf %609, %611 : vector<8x512xf32>
    %613 = vector.extract_strided_slice %612 {offsets = [0, 0], sizes = [8, 384], strides = [1, 1]} : vector<8x512xf32> to vector<8x384xf32>
    %614 = arith.negf %613 : vector<8x384xf32>
    %615 = math.exp %614 : vector<8x384xf32>
    %cst_149 = arith.constant 1.000000e+00 : f32
    %616 = vector.broadcast %cst_149 : f32 to vector<8x384xf32>
    %617 = arith.addf %616, %615 : vector<8x384xf32>
    %618 = arith.divf %616, %617 : vector<8x384xf32>
    %619 = vector.extract_strided_slice %618 {offsets = [0, 0], sizes = [8, 128], strides = [1, 1]} : vector<8x384xf32> to vector<8x128xf32>
    %620 = vector.extract_strided_slice %618 {offsets = [0, 128], sizes = [8, 128], strides = [1, 1]} : vector<8x384xf32> to vector<8x128xf32>
    %621 = vector.extract_strided_slice %618 {offsets = [0, 256], sizes = [8, 128], strides = [1, 1]} : vector<8x384xf32> to vector<8x128xf32>
    %622 = vector.extract_strided_slice %612 {offsets = [0, 384], sizes = [8, 128], strides = [1, 1]} : vector<8x512xf32> to vector<8x128xf32>
    %623 = math.tanh %622 : vector<8x128xf32>
    %624 = arith.mulf %620, %583 : vector<8x128xf32>
    %625 = arith.mulf %619, %623 : vector<8x128xf32>
    %626 = arith.addf %624, %625 : vector<8x128xf32>
    %627 = math.tanh %626 : vector<8x128xf32>
    %628 = arith.mulf %621, %627 : vector<8x128xf32>
    %629 = tpu.concatenate %628, %606 in 1 : vector<8x128xf32>, vector<8x128xf32> -> vector<8x256xf32>
    %c0_150 = arith.constant 0 : index
    %c0_151 = arith.constant 0 : index
    %630 = vector.load %arg2[%c0_150, %c0_151] : memref<256x512xf32, #tpu.memory_space<vmem>>, vector<256x512xf32>
    %cst_152 = arith.constant dense<0.000000e+00> : vector<8x512xf32>
    %631 = tpu.matmul %629, %630, %cst_152 {dimension_numbers = #tpu.dot_dimension_numbers<[1], [0], [0], [1], [0, 0, 1, 1], [], []>} : vector<8x256xf32>, vector<256x512xf32>, vector<8x512xf32> -> vector<8x512xf32>
    %632 = vector.broadcast %0 : vector<1x512xf32> to vector<8x512xf32>
    %633 = arith.addf %631, %632 : vector<8x512xf32>
    %634 = vector.extract_strided_slice %633 {offsets = [0, 0], sizes = [8, 384], strides = [1, 1]} : vector<8x512xf32> to vector<8x384xf32>
    %635 = arith.negf %634 : vector<8x384xf32>
    %636 = math.exp %635 : vector<8x384xf32>
    %cst_153 = arith.constant 1.000000e+00 : f32
    %637 = vector.broadcast %cst_153 : f32 to vector<8x384xf32>
    %638 = arith.addf %637, %636 : vector<8x384xf32>
    %639 = arith.divf %637, %638 : vector<8x384xf32>
    %640 = vector.extract_strided_slice %639 {offsets = [0, 0], sizes = [8, 128], strides = [1, 1]} : vector<8x384xf32> to vector<8x128xf32>
    %641 = vector.extract_strided_slice %639 {offsets = [0, 128], sizes = [8, 128], strides = [1, 1]} : vector<8x384xf32> to vector<8x128xf32>
    %642 = vector.extract_strided_slice %639 {offsets = [0, 256], sizes = [8, 128], strides = [1, 1]} : vector<8x384xf32> to vector<8x128xf32>
    %643 = vector.extract_strided_slice %633 {offsets = [0, 384], sizes = [8, 128], strides = [1, 1]} : vector<8x512xf32> to vector<8x128xf32>
    %644 = math.tanh %643 : vector<8x128xf32>
    %645 = arith.mulf %641, %604 : vector<8x128xf32>
    %646 = arith.mulf %640, %644 : vector<8x128xf32>
    %647 = arith.addf %645, %646 : vector<8x128xf32>
    %648 = math.tanh %647 : vector<8x128xf32>
    %649 = arith.mulf %642, %648 : vector<8x128xf32>
    %c15_i32 = arith.constant 15 : i32
    %650 = arith.index_cast %c15_i32 : i32 to index
    %c0_154 = arith.constant 0 : index
    %c0_155 = arith.constant 0 : index
    %651 = vector.load %arg0[%650, %c0_154, %c0_155] : memref<16x8x512xf32, #tpu.memory_space<vmem>>, vector<1x8x512xf32>
    %652 = vector.shape_cast %651 : vector<1x8x512xf32> to vector<8x512xf32>
    %c0_156 = arith.constant 0 : index
    %c0_157 = arith.constant 0 : index
    %653 = vector.load %arg1[%c0_156, %c0_157] : memref<128x512xf32, #tpu.memory_space<vmem>>, vector<128x512xf32>
    %cst_158 = arith.constant dense<0.000000e+00> : vector<8x512xf32>
    %654 = tpu.matmul %628, %653, %cst_158 {dimension_numbers = #tpu.dot_dimension_numbers<[1], [0], [0], [1], [0, 0, 1, 1], [], []>} : vector<8x128xf32>, vector<128x512xf32>, vector<8x512xf32> -> vector<8x512xf32>
    %655 = arith.addf %652, %654 : vector<8x512xf32>
    %656 = vector.extract_strided_slice %655 {offsets = [0, 0], sizes = [8, 384], strides = [1, 1]} : vector<8x512xf32> to vector<8x384xf32>
    %657 = arith.negf %656 : vector<8x384xf32>
    %658 = math.exp %657 : vector<8x384xf32>
    %cst_159 = arith.constant 1.000000e+00 : f32
    %659 = vector.broadcast %cst_159 : f32 to vector<8x384xf32>
    %660 = arith.addf %659, %658 : vector<8x384xf32>
    %661 = arith.divf %659, %660 : vector<8x384xf32>
    %662 = vector.extract_strided_slice %661 {offsets = [0, 0], sizes = [8, 128], strides = [1, 1]} : vector<8x384xf32> to vector<8x128xf32>
    %663 = vector.extract_strided_slice %661 {offsets = [0, 128], sizes = [8, 128], strides = [1, 1]} : vector<8x384xf32> to vector<8x128xf32>
    %664 = vector.extract_strided_slice %661 {offsets = [0, 256], sizes = [8, 128], strides = [1, 1]} : vector<8x384xf32> to vector<8x128xf32>
    %665 = vector.extract_strided_slice %655 {offsets = [0, 384], sizes = [8, 128], strides = [1, 1]} : vector<8x512xf32> to vector<8x128xf32>
    %666 = math.tanh %665 : vector<8x128xf32>
    %667 = arith.mulf %663, %626 : vector<8x128xf32>
    %668 = arith.mulf %662, %666 : vector<8x128xf32>
    %669 = arith.addf %667, %668 : vector<8x128xf32>
    %670 = math.tanh %669 : vector<8x128xf32>
    %671 = arith.mulf %664, %670 : vector<8x128xf32>
    %672 = tpu.concatenate %671, %649 in 1 : vector<8x128xf32>, vector<8x128xf32> -> vector<8x256xf32>
    %c0_160 = arith.constant 0 : index
    %c0_161 = arith.constant 0 : index
    %673 = vector.load %arg2[%c0_160, %c0_161] : memref<256x512xf32, #tpu.memory_space<vmem>>, vector<256x512xf32>
    %cst_162 = arith.constant dense<0.000000e+00> : vector<8x512xf32>
    %674 = tpu.matmul %672, %673, %cst_162 {dimension_numbers = #tpu.dot_dimension_numbers<[1], [0], [0], [1], [0, 0, 1, 1], [], []>} : vector<8x256xf32>, vector<256x512xf32>, vector<8x512xf32> -> vector<8x512xf32>
    %675 = vector.broadcast %0 : vector<1x512xf32> to vector<8x512xf32>
    %676 = arith.addf %674, %675 : vector<8x512xf32>
    %677 = vector.extract_strided_slice %676 {offsets = [0, 0], sizes = [8, 384], strides = [1, 1]} : vector<8x512xf32> to vector<8x384xf32>
    %678 = arith.negf %677 : vector<8x384xf32>
    %679 = math.exp %678 : vector<8x384xf32>
    %cst_163 = arith.constant 1.000000e+00 : f32
    %680 = vector.broadcast %cst_163 : f32 to vector<8x384xf32>
    %681 = arith.addf %680, %679 : vector<8x384xf32>
    %682 = arith.divf %680, %681 : vector<8x384xf32>
    %683 = vector.extract_strided_slice %682 {offsets = [0, 0], sizes = [8, 128], strides = [1, 1]} : vector<8x384xf32> to vector<8x128xf32>
    %684 = vector.extract_strided_slice %682 {offsets = [0, 128], sizes = [8, 128], strides = [1, 1]} : vector<8x384xf32> to vector<8x128xf32>
    %685 = vector.extract_strided_slice %682 {offsets = [0, 256], sizes = [8, 128], strides = [1, 1]} : vector<8x384xf32> to vector<8x128xf32>
    %686 = vector.extract_strided_slice %676 {offsets = [0, 384], sizes = [8, 128], strides = [1, 1]} : vector<8x512xf32> to vector<8x128xf32>
    %687 = math.tanh %686 : vector<8x128xf32>
    %688 = arith.mulf %684, %647 : vector<8x128xf32>
    %689 = arith.mulf %683, %687 : vector<8x128xf32>
    %690 = arith.addf %688, %689 : vector<8x128xf32>
    %691 = math.tanh %690 : vector<8x128xf32>
    %692 = arith.mulf %685, %691 : vector<8x128xf32>
    %c16_i32 = arith.constant 16 : i32
    %c1 = arith.constant 1 : index
    %c0_164 = arith.constant 0 : index
    %693 = vector.load %arg3[%c1, %c0_164] : memref<2x512xf32, #tpu.memory_space<vmem>>, vector<1x128xf32>
    %c1_165 = arith.constant 1 : index
    %c128 = arith.constant 128 : index
    %694 = vector.load %arg3[%c1_165, %c128] : memref<2x512xf32, #tpu.memory_space<vmem>>, vector<1x1xf32>
    %695 = vector.broadcast %693 : vector<1x128xf32> to vector<8x128xf32>
    %696 = arith.mulf %692, %695 : vector<8x128xf32>
    %cst_166 = arith.constant dense<0.000000e+00> : vector<8xf32>
    %697 = vector.multi_reduction <add>, %696, %cst_166 [1] : vector<8x128xf32> to vector<8xf32>
    %698 = vector.shape_cast %697 : vector<8xf32> to vector<8x1xf32>
    %699 = vector.broadcast %694 : vector<1x1xf32> to vector<8x1xf32>
    %700 = arith.addf %698, %699 : vector<8x1xf32>
    %701 = arith.negf %700 : vector<8x1xf32>
    %702 = math.exp %701 : vector<8x1xf32>
    %cst_167 = arith.constant 1.000000e+00 : f32
    %703 = vector.broadcast %cst_167 : f32 to vector<8x1xf32>
    %704 = arith.addf %703, %702 : vector<8x1xf32>
    %705 = arith.divf %703, %704 : vector<8x1xf32>
    %c0_168 = arith.constant 0 : index
    %c0_169 = arith.constant 0 : index
    %706 = vector.load %arg4[%c0_168, %c0_169] : memref<8x1xf32, #tpu.memory_space<vmem>>, vector<8x1xf32>
    tpu.vector_store %arg4[%c0_168, %c0_169], %705 {strides = array<i32>} : memref<8x1xf32, #tpu.memory_space<vmem>>, vector<8x1xf32>,
    return
  }
}

</mosaic_0001>

<bundles_post_ra>
// kernel: cnn_lstm_forward.1
= control target key start
LH: loop header
LB: loop body
LE: loop exit
PB: predicated region body
PF: predicated region fallthrough
CT: control target
= control target key end

     0   :  { %v12227_v3 = vmov 0.0   ;;  %vm5706_vm0 = vcmask 7168   ;;  %s12222_s1 = inlined_call_operand.vmem [shape: f32[128,512], index: 1, kind: input, shape index: {}]   ;;  %s12223_s2 = inlined_call_operand.vmem [shape: f32[256,512], index: 2, kind: input, shape index: {}]   ;;  %s12224_s0 = inlined_call_operand.vmem [shape: f32[16,8,512], index: 0, kind: input, shape index: {}]   ;;  %s12225_s3 = inlined_call_operand.vmem [shape: f32[2,512], index: 3, kind: input, shape index: {}]   ;;  %s12226_s4 = inlined_call_operand.vmem [shape: f32[8,1], index: 4, kind: output, shape index: {}]  }
   0x1   :  { %v23_v0 = vld [vmem:[%s12222_s1 + $0x8] sm:$0xff]  ;;  %v22_v2 = vld [vmem:[%s12222_s1] sm:$0xff]  ;;  %150 = vmatprep.mubr.f32.mxu0 %v12227_v3  ;;  %221 = vmatprep.mubr.f32.mxu1 %v12227_v3  ;;  %v25_v19 = vld [vmem:[%s12222_s1 + $0x18] sm:$0xff] }
   0x2   :  { %v27_v1 = vld [vmem:[%s12222_s1 + $0x28] sm:$0xff]  ;;  %v26_v5 = vld [vmem:[%s12222_s1 + $0x20] sm:$0xff]  ;;  %v29_v20 = vld [vmem:[%s12222_s1 + $0x38] sm:$0xff] }
   0x3   :  { %v9497_v4 = vpack.c.bf16 %v27_v1, %v23_v0  ;;  %v31_v6 = vld [vmem:[%s12222_s1 + $0x48] sm:$0xff]  ;;  %v9508_v8 = vpack.c.bf16 %v26_v5, %v22_v2  ;;  %v30_v10 = vld [vmem:[%s12222_s1 + $0x40] sm:$0xff]  ;;  %v9549_v22 = vpack.c.bf16 %v29_v20, %v25_v19  ;;  %v24_v23 = vld [vmem:[%s12222_s1 + $0x10] sm:$0xff] }
   0x4   :  { %v35_v7 = vld [vmem:[%s12222_s1 + $0x68] sm:$0xff]  ;;  %v34_v11 = vld [vmem:[%s12222_s1 + $0x60] sm:$0xff]  ;;  %v28_v24 = vld [vmem:[%s12222_s1 + $0x30] sm:$0xff] }
   0x5   :  { %12357 = vst [vmem:[#allocation2_spill] sm:$0xff] %v9497_v4  ;;  %v9510_v9 = vpack.c.bf16 %v35_v7, %v31_v6  ;;  %v39_v12 = vld [vmem:[%s12222_s1 + $0x88] sm:$0xff]  ;;  %5872 = vmatprep.subr.bf16.mxu0 %v9497_v4  ;;  %v9526_v14 = vpack.c.bf16 %v34_v11, %v30_v10  ;;  %v38_v15 = vld [vmem:[%s12222_s1 + $0x80] sm:$0xff]  ;;  %12358 = vst [vmem:[#allocation3_spill] sm:$0xff] %v9549_v22  ;;  %v9557_v25 = vpack.c.bf16 %v28_v24, %v24_v23 }
   0x6   :  { %v43_v13 = vld [vmem:[%s12222_s1 + $0xa8] sm:$0xff]  ;;  %5874 = vmatpush1.bf16.msra.mxu0 %v9508_v8  ;;  %v42_v16 = vld [vmem:[%s12222_s1 + $0xa0] sm:$0xff]  ;;  %5904 = vmatprep.subr.bf16.mxu1 %v9549_v22  ;;  %v33_v27 = vld [vmem:[%s12222_s1 + $0x58] sm:$0xff] }
   0x7   :  { %5876 = vmatprep.subr.bf16.mxu0 %v9510_v9  ;;  %v9535_v17 = vpack.c.bf16 %v43_v13, %v39_v12  ;;  %v47_v18 = vld [vmem:[%s12222_s1 + $0xc8] sm:$0xff]  ;;  %v9560_v26 = vpack.c.bf16 %v42_v16, %v38_v15  ;;  %v37_v28 = vld [vmem:[%s12222_s1 + $0x78] sm:$0xff]  ;;  %v32_v29 = vld [vmem:[%s12222_s1 + $0x50] sm:$0xff]  ;;  %5906 = vmatpush1.bf16.msra.mxu1 %v9557_v25 }
   0x8   :  { %v51_v21 = vld [vmem:[%s12222_s1 + $0xe8] sm:$0xff]  ;;  %v46_v31 = vld [vmem:[%s12222_s1 + $0xc0] sm:$0xff]  ;;  %v9582_v33 = vpack.c.bf16 %v37_v28, %v33_v27  ;;  %v36_v34 = vld [vmem:[%s12222_s1 + $0x70] sm:$0xff] }
   0x9   :  { %v9573_v30 = vpack.c.bf16 %v51_v21, %v47_v18  ;;  %v50_v32 = vld [vmem:[%s12222_s1 + $0xe0] sm:$0xff]  ;;  %v55_v35 = vld [vmem:[%s12222_s1 + $0x108] sm:$0xff]  ;;  %v9593_v37 = vpack.c.bf16 %v36_v34, %v32_v29  ;;  %v41_v38 = vld [vmem:[%s12222_s1 + $0x98] sm:$0xff] }
   0xa   :  { %5878 = vmatpush1.bf16.msra.mxu0 %v9526_v14  ;;  %v59_v36 = vld [vmem:[%s12222_s1 + $0x128] sm:$0xff]  ;;  %5908 = vmatprep.subr.bf16.mxu1 %v9582_v33  ;;  %v45_v39 = vld [vmem:[%s12222_s1 + $0xb8] sm:$0xff]  ;;  %v40_v40 = vld [vmem:[%s12222_s1 + $0x90] sm:$0xff]  ;;  %v9609_v42 = vpack.c.bf16 %v50_v32, %v46_v31 }
   0xb   :  { %5880 = vmatprep.subr.bf16.mxu0 %v9535_v17  ;;  %v44_v41 = vld [vmem:[%s12222_s1 + $0xb0] sm:$0xff]  ;;  %v54_v43 = vld [vmem:[%s12222_s1 + $0x100] sm:$0xff]  ;;  %v9617_v45 = vpack.c.bf16 %v45_v39, %v41_v38  ;;  %v9620_v46 = vpack.c.bf16 %v59_v36, %v55_v35  ;;  %5910 = vmatpush1.bf16.msra.mxu1 %v9593_v37  ;;  %v63_v47 = vld [vmem:[%s12222_s1 + $0x148] sm:$0xff] }
   0xc   :  { %v58_v44 = vld [vmem:[%s12222_s1 + $0x120] sm:$0xff]  ;;  %v9626_v48 = vpack.c.bf16 %v44_v41, %v40_v40  ;;  %v49_v49 = vld [vmem:[%s12222_s1 + $0xd8] sm:$0xff]  ;;  %v67_v51 = vld [vmem:[%s12222_s1 + $0x168] sm:$0xff] }
   0xd   :  { %v53_v50 = vld [vmem:[%s12222_s1 + $0xf8] sm:$0xff]  ;;  %5912 = vmatprep.subr.bf16.mxu1 %v9617_v45  ;;  %v48_v53 = vld [vmem:[%s12222_s1 + $0xd0] sm:$0xff]  ;;  %v9647_v55 = vpack.c.bf16 %v58_v44, %v54_v43  ;;  %v9656_v58 = vpack.c.bf16 %v67_v51, %v63_v47  ;;  %v62_v59 = vld [vmem:[%s12222_s1 + $0x140] sm:$0xff] }
   0xe   :  { %5882 = vmatpush1.bf16.msra.mxu0 %v9560_v26  ;;  %v9638_v52 = vpack.c.bf16 %v53_v50, %v49_v49  ;;  %v52_v54 = vld [vmem:[%s12222_s1 + $0xf0] sm:$0xff]  ;;  %v57_v56 = vld [vmem:[%s12222_s1 + $0x118] sm:$0xff]  ;;  %v66_v60 = vld [vmem:[%s12222_s1 + $0x160] sm:$0xff] }
   0xf   :  { %5884 = vmatprep.subr.bf16.mxu0 %v9573_v30  ;;  %v61_v57 = vld [vmem:[%s12222_s1 + $0x138] sm:$0xff]  ;;  %5914 = vmatpush1.bf16.msra.mxu1 %v9626_v48  ;;  %v71_v61 = vld [vmem:[%s12222_s1 + $0x188] sm:$0xff]  ;;  %v9668_v62 = vpack.c.bf16 %v52_v54, %v48_v53  ;;  %v56_v1 = vld [vmem:[%s12222_s1 + $0x110] sm:$0xff]  ;;  %v9689_v7 = vpack.c.bf16 %v66_v60, %v62_v59 }
  0x10   :  { %v75_v63 = vld [vmem:[%s12222_s1 + $0x1a8] sm:$0xff]  ;;  %5916 = vmatprep.subr.bf16.mxu1 %v9638_v52  ;;  %v9674_v0 = vpack.c.bf16 %v61_v57, %v57_v56  ;;  %v60_v2 = vld [vmem:[%s12222_s1 + $0x130] sm:$0xff]  ;;  %v65_v5 = vld [vmem:[%s12222_s1 + $0x158] sm:$0xff] }
  0x11   :  { %v69_v6 = vld [vmem:[%s12222_s1 + $0x178] sm:$0xff]  ;;  %v9692_v10 = vpack.c.bf16 %v75_v63, %v71_v61  ;;  %v70_v11 = vld [vmem:[%s12222_s1 + $0x180] sm:$0xff]  ;;  %v79_v13 = vld [vmem:[%s12222_s1 + $0x1c8] sm:$0xff]  ;;  %v9704_v15 = vpack.c.bf16 %v60_v2, %v56_v1 }
  0x12   :  { %5886 = vmatpush1.bf16.msra.mxu0 %v9609_v42  ;;  %v74_v12 = vld [vmem:[%s12222_s1 + $0x1a0] sm:$0xff]  ;;  %v83_v16 = vld [vmem:[%s12222_s1 + $0x1e8] sm:$0xff]  ;;  %v9710_v18 = vpack.c.bf16 %v69_v6, %v65_v5  ;;  %v64_v19 = vld [vmem:[%s12222_s1 + $0x150] sm:$0xff] }
  0x13   :  { %5888 = vmatprep.subr.bf16.mxu0 %v9620_v46  ;;  %5918 = vmatpush1.bf16.msra.mxu1 %v9668_v62  ;;  %v68_v20 = vld [vmem:[%s12222_s1 + $0x170] sm:$0xff]  ;;  %v73_v21 = vld [vmem:[%s12222_s1 + $0x198] sm:$0xff]  ;;  %v9725_v24 = vpack.c.bf16 %v74_v12, %v70_v11  ;;  %v9728_v27 = vpack.c.bf16 %v83_v16, %v79_v13  ;;  %v78_v28 = vld [vmem:[%s12222_s1 + $0x1c0] sm:$0xff] }
  0x14   :  { %5920 = vmatprep.subr.bf16.mxu1 %v9674_v0  ;;  %v77_v23 = vld [vmem:[%s12222_s1 + $0x1b8] sm:$0xff]  ;;  %v82_v29 = vld [vmem:[%s12222_s1 + $0x1e0] sm:$0xff]  ;;  %v9737_v31 = vpack.c.bf16 %v68_v20, %v64_v19  ;;  %v72_v32 = vld [vmem:[%s12222_s1 + $0x190] sm:$0xff] }
  0x15   :  { %v9743_v34 = vpack.c.bf16 %v77_v23, %v73_v21  ;;  %v76_v35 = vld [vmem:[%s12222_s1 + $0x1b0] sm:$0xff]  ;;  %v257_v36 = vld [vmem:[%s12223_s2 + $0x8] sm:$0xff]  ;;  %v81_v39 = vld [vmem:[%s12222_s1 + $0x1d8] sm:$0xff]  ;;  %v9761_v41 = vpack.c.bf16 %v82_v29, %v78_v28 }
  0x16   :  { %5890 = vmatpush1.bf16.msra.mxu0 %v9647_v55  ;;  %v261_v38 = vld [vmem:[%s12223_s2 + $0x28] sm:$0xff]  ;;  %v85_v40 = vld [vmem:[%s12222_s1 + $0x1f8] sm:$0xff]  ;;  %v9765_v43 = vpack.c.bf16 %v76_v35, %v72_v32  ;;  %v80_v44 = vld [vmem:[%s12222_s1 + $0x1d0] sm:$0xff] }
  0x17   :  { %5892 = vmatprep.subr.bf16.mxu0 %v9656_v58  ;;  %5922 = vmatpush1.bf16.msra.mxu1 %v9704_v15  ;;  %v9770_v47 = vpack.c.bf16 %v261_v38, %v257_v36  ;;  %v256_v49 = vld [vmem:[%s12223_s2] sm:$0xff]  ;;  %v9779_v51 = vpack.c.bf16 %v85_v40, %v81_v39  ;;  %v84_v53 = vld [vmem:[%s12222_s1 + $0x1f0] sm:$0xff]  ;;  %v265_v54 = vld [vmem:[%s12223_s2 + $0x48] sm:$0xff] }
  0x18   :  { %5924 = vmatprep.subr.bf16.mxu1 %v9710_v18  ;;  %v260_v50 = vld [vmem:[%s12223_s2 + $0x20] sm:$0xff]  ;;  %v269_v56 = vld [vmem:[%s12223_s2 + $0x68] sm:$0xff]  ;;  %v259_v57 = vld [vmem:[%s12223_s2 + $0x18] sm:$0xff]  ;;  %v9800_v61 = vpack.c.bf16 %v84_v53, %v80_v44 }
  0x19   :  { %v263_v59 = vld [vmem:[%s12223_s2 + $0x38] sm:$0xff]  ;;  %v9797_v60 = vpack.c.bf16 %v260_v50, %v256_v49  ;;  %v258_v63 = vld [vmem:[%s12223_s2 + $0x10] sm:$0xff]  ;;  %v9806_v1 = vpack.c.bf16 %v269_v56, %v265_v54  ;;  %v264_v2 = vld [vmem:[%s12223_s2 + $0x40] sm:$0xff] }
  0x1a   :  { %5894 = vmatpush1.bf16.msra.mxu0 %v9689_v7  ;;  %v268_v5 = vld [vmem:[%s12223_s2 + $0x60] sm:$0xff]  ;;  %v9815_v6 = vpack.c.bf16 %v263_v59, %v259_v57  ;;  %v262_v11 = vld [vmem:[%s12223_s2 + $0x30] sm:$0xff]  ;;  %v273_v12 = vld [vmem:[%s12223_s2 + $0x88] sm:$0xff] }
  0x1b   :  { %5896 = vmatprep.subr.bf16.mxu0 %v9692_v10  ;;  %5926 = vmatpush1.bf16.msra.mxu1 %v9737_v31  ;;  %v277_v13 = vld [vmem:[%s12223_s2 + $0xa8] sm:$0xff]  ;;  %v267_v16 = vld [vmem:[%s12223_s2 + $0x58] sm:$0xff]  ;;  %v9834_v20 = vpack.c.bf16 %v268_v5, %v264_v2  ;;  %v9838_v21 = vpack.c.bf16 %v262_v11, %v258_v63  ;;  %v266_v23 = vld [vmem:[%s12223_s2 + $0x50] sm:$0xff] }
  0x1c   :  { %5928 = vmatprep.subr.bf16.mxu1 %v9743_v34  ;;  %v271_v19 = vld [vmem:[%s12223_s2 + $0x78] sm:$0xff]  ;;  %v9844_v28 = vpack.c.bf16 %v277_v13, %v273_v12  ;;  %v272_v29 = vld [vmem:[%s12223_s2 + $0x80] sm:$0xff]  ;;  %v270_v36 = vld [vmem:[%s12223_s2 + $0x70] sm:$0xff] }
  0x1d   :  { %v276_v32 = vld [vmem:[%s12223_s2 + $0xa0] sm:$0xff]  ;;  %v9853_v35 = vpack.c.bf16 %v271_v19, %v267_v16  ;;  %v281_v38 = vld [vmem:[%s12223_s2 + $0xc8] sm:$0xff]  ;;  %v275_v40 = vld [vmem:[%s12223_s2 + $0x98] sm:$0xff]  ;;  %v9875_v50 = vpack.c.bf16 %v270_v36, %v266_v23 }
  0x1e   :  { %5898 = vmatpush1.bf16.msra.mxu0 %v9725_v24  ;;  %v285_v39 = vld [vmem:[%s12223_s2 + $0xe8] sm:$0xff]  ;;  %v279_v44 = vld [vmem:[%s12223_s2 + $0xb8] sm:$0xff]  ;;  %v9872_v49 = vpack.c.bf16 %v276_v32, %v272_v29  ;;  %v274_v53 = vld [vmem:[%s12223_s2 + $0x90] sm:$0xff] }
  0x1f   :  { %5900 = vmatprep.subr.bf16.mxu0 %v9728_v27  ;;  %5930 = vmatpush1.bf16.msra.mxu1 %v9765_v43  ;;  %v9881_v54 = vpack.c.bf16 %v285_v39, %v281_v38  ;;  %v280_v56 = vld [vmem:[%s12223_s2 + $0xc0] sm:$0xff]  ;;  %v9890_v59 = vpack.c.bf16 %v279_v44, %v275_v40  ;;  %v278_v63 = vld [vmem:[%s12223_s2 + $0xb0] sm:$0xff]  ;;  %v289_v2 = vld [vmem:[%s12223_s2 + $0x108] sm:$0xff] }
  0x20   :  { %5932 = vmatprep.subr.bf16.mxu1 %v9779_v51  ;;  %v284_v57 = vld [vmem:[%s12223_s2 + $0xe0] sm:$0xff]  ;;  %v293_v5 = vld [vmem:[%s12223_s2 + $0x128] sm:$0xff]  ;;  %v283_v11 = vld [vmem:[%s12223_s2 + $0xd8] sm:$0xff]  ;;  %v9912_v16 = vpack.c.bf16 %v278_v63, %v274_v53 }
  0x21   :  { %12359 = vst [vmem:[#allocation4_spill] sm:$0xff] %v9881_v54  ;;  %v287_v12 = vld [vmem:[%s12223_s2 + $0xf8] sm:$0xff]  ;;  %v9909_v13 = vpack.c.bf16 %v284_v57, %v280_v56  ;;  %v9915_v19 = vpack.c.bf16 %v293_v5, %v289_v2  ;;  %v288_v23 = vld [vmem:[%s12223_s2 + $0x100] sm:$0xff]  ;;  %v282_v36 = vld [vmem:[%s12223_s2 + $0xd0] sm:$0xff] }
  0x22   :  { %5902 = vmatpush1.bf16.msra.mxu0 %v9761_v41  ;;  %v292_v29 = vld [vmem:[%s12223_s2 + $0x120] sm:$0xff]  ;;  %v9924_v32 = vpack.c.bf16 %v287_v12, %v283_v11  ;;  %v286_v38 = vld [vmem:[%s12223_s2 + $0xf0] sm:$0xff]  ;;  %v291_v39 = vld [vmem:[%s12223_s2 + $0x118] sm:$0xff] }
  0x23   :  { %5936 = vmatprep.subr.bf16.mxu0 %v9770_v47  ;;  %5934 = vmatpush1.bf16.msra.mxu1 %v9800_v61  ;;  %12360 = vst [vmem:[#allocation5_spill] sm:$0xff] %v9909_v13  ;;  %12361 = vst [vmem:[#allocation6_spill] sm:$0xff] %v9915_v19  ;;  %v295_v40 = vld [vmem:[%s12223_s2 + $0x138] sm:$0xff]  ;;  %v9939_v44 = vpack.c.bf16 %v292_v29, %v288_v23  ;;  %v9942_v53 = vpack.c.bf16 %v286_v38, %v282_v36  ;;  %v290_v57 = vld [vmem:[%s12223_s2 + $0x110] sm:$0xff] }
  0x24   :  { %6000 = vmatprep.subr.bf16.mxu1 %v9815_v6  ;;  %12362 = vst [vmem:[#allocation7_spill] sm:$0xff] %v9924_v32  ;;  %v9946_v56 = vpack.c.bf16 %v295_v40, %v291_v39  ;;  %v294_v63 = vld [vmem:[%s12223_s2 + $0x130] sm:$0xff]  ;;  %v297_v5 = vld [vmem:[%s12223_s2 + $0x148] sm:$0xff]  ;;  %v299_v12 = vld [vmem:[%s12223_s2 + $0x158] sm:$0xff] }
  0x25   :  { %151 = vmatmul.mubr.f32.vlgmr.msra.gmra.mrb[0].mxu0 %v12227_v3  ;;  %12363 = vst [vmem:[#allocation8_spill] sm:$0xff] %v9939_v44  ;;  %12364 = vst [vmem:[#allocation9_spill] sm:$0xff] %v9942_v53  ;;  %v9956_v2 = vpack.c.bf16 %v294_v63, %v290_v57  ;;  %v301_v11 = vld [vmem:[%s12223_s2 + $0x168] sm:$0xff]  ;;  %v303_v29 = vld [vmem:[%s12223_s2 + $0x178] sm:$0xff] }
  0x26   :  { %5938 = vmatpush1.bf16.msra.mxu0 %v9797_v60  ;;  %469 = vmatprep.mubr.f32.mxu0 %v12227_v3  ;;  %12365 = vst [vmem:[#allocation10_spill] sm:$0xff] %v9946_v56  ;;  %v9969_v23 = vpack.c.bf16 %v301_v11, %v297_v5  ;;  %v296_v36 = vld [vmem:[%s12223_s2 + $0x140] sm:$0xff]  ;;  %v9980_v39 = vpack.c.bf16 %v303_v29, %v299_v12  ;;  %v298_v57 = vld [vmem:[%s12223_s2 + $0x150] sm:$0xff]  ;;  %v305_v11 = vld [vmem:[%s12223_s2 + $0x188] sm:$0xff] }
  0x27   :  { %5940 = vmatprep.subr.bf16.mxu0 %v9806_v1  ;;  %222 = vmatmul.mubr.f32.vlgmr.msra.gmra.mrb[0].mxu1 %v12227_v3  ;;  %12366 = vst [vmem:[#allocation11_spill] sm:$0xff] %v9956_v2  ;;  %v300_v38 = vld [vmem:[%s12223_s2 + $0x160] sm:$0xff]  ;;  %v302_v63 = vld [vmem:[%s12223_s2 + $0x170] sm:$0xff]  ;;  %v309_v12 = vld [vmem:[%s12223_s2 + $0x1a8] sm:$0xff] }
  0x28   :  { %6002 = vmatpush1.bf16.msra.mxu1 %v9838_v21  ;;  %540 = vmatprep.mubr.f32.mxu1 %v12227_v3  ;;  %12367 = vst [vmem:[#allocation12_spill] sm:$0xff] %v9969_v23  ;;  %12368 = vst [vmem:[#allocation13_spill] sm:$0xff] %v9980_v39  ;;  %v9982_v40 = vpack.c.bf16 %v300_v38, %v296_v36  ;;  %v9991_v5 = vpack.c.bf16 %v302_v63, %v298_v57  ;;  %v307_v29 = vld [vmem:[%s12223_s2 + $0x198] sm:$0xff]  ;;  %v304_v57 = vld [vmem:[%s12223_s2 + $0x180] sm:$0xff] }
  0x29   :  { %6004 = vmatprep.subr.bf16.mxu1 %v9853_v35  ;;  %v10005_v36 = vpack.c.bf16 %v309_v12, %v305_v11  ;;  %v311_v38 = vld [vmem:[%s12223_s2 + $0x1b8] sm:$0xff]  ;;  %v308_v63 = vld [vmem:[%s12223_s2 + $0x1a0] sm:$0xff]  ;;  %v306_v11 = vld [vmem:[%s12223_s2 + $0x190] sm:$0xff] }
  0x2a   :  { %5942 = vmatpush1.bf16.msra.mxu0 %v9834_v20  ;;  %12369 = vst [vmem:[#allocation14_spill] sm:$0xff] %v9982_v40  ;;  %12370 = vst [vmem:[#allocation15_spill] sm:$0xff] %v9991_v5  ;;  %v10016_v3 = vpack.c.bf16 %v311_v38, %v307_v29  ;;  %v310_v12 = vld [vmem:[%s12223_s2 + $0x1b0] sm:$0xff]  ;;  %v313_v29 = vld [vmem:[%s12223_s2 + $0x1c8] sm:$0xff] }
  0x2b   :  { %5944 = vmatprep.subr.bf16.mxu0 %v9844_v28  ;;  %12371 = vst [vmem:[#allocation16_spill] sm:$0xff] %v10005_v36  ;;  %v317_v38 = vld [vmem:[%s12223_s2 + $0x1e8] sm:$0xff] }
  0x2c   :  { %6006 = vmatpush1.bf16.msra.mxu1 %v9875_v50  ;;  %12372 = vst [vmem:[#allocation17_spill] sm:$0xff] %v10016_v3 }
  0x2d   :  { %6008 = vmatprep.subr.bf16.mxu1 %v9890_v59 }
  0x2e   :  { %5946 = vmatpush1.bf16.msra.mxu0 %v9872_v49 }
  0x2f   :  { %5948 = vmatprep.subr.bf16.mxu0 %v9881_v54 }
  0x30   :  { %6010 = vmatpush1.bf16.msra.mxu1 %v9912_v16 }
  0x31   :  { %6012 = vmatprep.subr.bf16.mxu1 %v9924_v32 }
  0x32   :  { %5950 = vmatpush1.bf16.msra.mxu0 %v9909_v13 }
  0x33   :  { %5952 = vmatprep.subr.bf16.mxu0 %v9915_v19 }
  0x34   :  { %6014 = vmatpush1.bf16.msra.mxu1 %v9942_v53 }
  0x35   :  { %6016 = vmatprep.subr.bf16.mxu1 %v9946_v56 }
  0x36   :  { %5954 = vmatpush1.bf16.msra.mxu0 %v9939_v44 }
  0x37   :  { %5956 = vmatprep.subr.bf16.mxu0 %v9969_v23 }
  0x38   :  { %6018 = vmatpush1.bf16.msra.mxu1 %v9956_v2 }
  0x39   :  { %6020 = vmatprep.subr.bf16.mxu1 %v9980_v39 }
  0x3a   :  { %5958 = vmatpush1.bf16.msra.mxu0 %v9982_v40  ;;  %v10018_v40 = vpack.c.bf16 %v308_v63, %v304_v57  ;;  %v315_v57 = vld [vmem:[%s12223_s2 + $0x1d8] sm:$0xff]  ;;  %v10041_v63 = vpack.c.bf16 %v317_v38, %v313_v29  ;;  %v314_v29 = vld [vmem:[%s12223_s2 + $0x1d0] sm:$0xff] }
  0x3b   :  { %5960 = vmatprep.subr.bf16.mxu0 %v10005_v36  ;;  %v318_v38 = vld [vmem:[%s12223_s2 + $0x1f0] sm:$0xff] }
  0x3c   :  { %6022 = vmatpush1.bf16.msra.mxu1 %v9991_v5  ;;  %12373 = vst [vmem:[#allocation18_spill] sm:$0xff] %v10018_v40  ;;  %v10027_v5 = vpack.c.bf16 %v310_v12, %v306_v11  ;;  %12375 = vst [vmem:[#allocation20_spill] sm:$0xff] %v10041_v63  ;;  %v319_v11 = vld [vmem:[%s12223_s2 + $0x1f8] sm:$0xff]  ;;  %v312_v12 = vld [vmem:[%s12223_s2 + $0x1c0] sm:$0xff] }
  0x3d   :  { %6024 = vmatprep.subr.bf16.mxu1 %v10016_v3  ;;  %v10052_v3 = vpack.c.bf16 %v319_v11, %v315_v57  ;;  %v325_v57 = vld [vmem:[%s12223_s2 + $0x228] sm:$0xff]  ;;  %v323_v11 = vld [vmem:[%s12223_s2 + $0x218] sm:$0xff] }
  0x3e   :  { %12374 = vst [vmem:[#allocation19_spill] sm:$0xff] %v10027_v5  ;;  %5962 = vmatpush1.bf16.msra.mxu0 %v10018_v40  ;;  %v316_v40 = vld [vmem:[%s12223_s2 + $0x1e0] sm:$0xff] }
  0x3f   :  { %12376 = vst [vmem:[#allocation21_spill] sm:$0xff] %v10052_v3  ;;  %v10054_v36 = vpack.c.bf16 %v316_v40, %v312_v12  ;;  %5964 = vmatprep.subr.bf16.mxu0 %v10041_v63  ;;  %v321_v40 = vld [vmem:[%s12223_s2 + $0x208] sm:$0xff] }
  0x40   :  { %6026 = vmatpush1.bf16.msra.mxu1 %v10027_v5  ;;  %v10063_v5 = vpack.c.bf16 %v318_v38, %v314_v29  ;;  %v10077_v12 = vpack.c.bf16 %v325_v57, %v321_v40  ;;  %v327_v29 = vld [vmem:[%s12223_s2 + $0x238] sm:$0xff]  ;;  %v320_v38 = vld [vmem:[%s12223_s2 + $0x200] sm:$0xff]  ;;  %v322_v40 = vld [vmem:[%s12223_s2 + $0x210] sm:$0xff] }
  0x41   :  { %12377 = vst [vmem:[#allocation22_spill] sm:$0xff] %v10054_v36  ;;  %6028 = vmatprep.subr.bf16.mxu1 %v10052_v3  ;;  %v10088_v3 = vpack.c.bf16 %v327_v29, %v323_v11  ;;  %v326_v57 = vld [vmem:[%s12223_s2 + $0x230] sm:$0xff]  ;;  %v333_v11 = vld [vmem:[%s12223_s2 + $0x268] sm:$0xff]  ;;  %v331_v29 = vld [vmem:[%s12223_s2 + $0x258] sm:$0xff] }
  0x42   :  { %12378 = vst [vmem:[#allocation23_spill] sm:$0xff] %v10063_v5  ;;  %5966 = vmatpush1.bf16.msra.mxu0 %v10054_v36  ;;  %12379 = vst [vmem:[#allocation24_spill] sm:$0xff] %v10077_v12  ;;  %v324_v36 = vld [vmem:[%s12223_s2 + $0x220] sm:$0xff] }
  0x43   :  { %12380 = vst [vmem:[#allocation25_spill] sm:$0xff] %v10088_v3  ;;  %v10090_v63 = vpack.c.bf16 %v324_v36, %v320_v38  ;;  %5968 = vmatprep.subr.bf16.mxu0 %v10077_v12  ;;  %v329_v36 = vld [vmem:[%s12223_s2 + $0x248] sm:$0xff]  ;;  %v335_v38 = vld [vmem:[%s12223_s2 + $0x278] sm:$0xff] }
  0x44   :  { %6030 = vmatpush1.bf16.msra.mxu1 %v10063_v5  ;;  %v10099_v5 = vpack.c.bf16 %v326_v57, %v322_v40  ;;  %v10116_v40 = vpack.c.bf16 %v333_v11, %v329_v36  ;;  %v10118_v57 = vpack.c.bf16 %v335_v38, %v331_v29  ;;  %v334_v36 = vld [vmem:[%s12223_s2 + $0x270] sm:$0xff]  ;;  %v337_v29 = vld [vmem:[%s12223_s2 + $0x288] sm:$0xff] }
  0x45   :  { %12381 = vst [vmem:[#allocation26_spill] sm:$0xff] %v10090_v63  ;;  %6032 = vmatprep.subr.bf16.mxu1 %v10088_v3  ;;  %v330_v3 = vld [vmem:[%s12223_s2 + $0x250] sm:$0xff]  ;;  %v341_v38 = vld [vmem:[%s12223_s2 + $0x2a8] sm:$0xff] }
  0x46   :  { %12382 = vst [vmem:[#allocation27_spill] sm:$0xff] %v10099_v5  ;;  %5970 = vmatpush1.bf16.msra.mxu0 %v10090_v63  ;;  %12383 = vst [vmem:[#allocation28_spill] sm:$0xff] %v10116_v40  ;;  %v332_v63 = vld [vmem:[%s12223_s2 + $0x260] sm:$0xff]  ;;  %v10136_v11 = vpack.c.bf16 %v334_v36, %v330_v3  ;;  %v343_v3 = vld [vmem:[%s12223_s2 + $0x2b8] sm:$0xff] }
  0x47   :  { %12384 = vst [vmem:[#allocation29_spill] sm:$0xff] %v10118_v57  ;;  %5972 = vmatprep.subr.bf16.mxu0 %v10116_v40  ;;  %v336_v36 = vld [vmem:[%s12223_s2 + $0x280] sm:$0xff] }
  0x48   :  { %6034 = vmatpush1.bf16.msra.mxu1 %v10099_v5  ;;  %v328_v5 = vld [vmem:[%s12223_s2 + $0x240] sm:$0xff]  ;;  %12386 = vst [vmem:[#allocation31_spill] sm:$0xff] %v10136_v11 }
  0x49   :  { %v10129_v12 = vpack.c.bf16 %v332_v63, %v328_v5  ;;  %6036 = vmatprep.subr.bf16.mxu1 %v10118_v57  ;;  %v339_v5 = vld [vmem:[%s12223_s2 + $0x298] sm:$0xff]  ;;  %v10148_v63 = vpack.c.bf16 %v341_v38, %v337_v29  ;;  %v340_v57 = vld [vmem:[%s12223_s2 + $0x2a0] sm:$0xff]  ;;  %v338_v29 = vld [vmem:[%s12223_s2 + $0x290] sm:$0xff] }
  0x4a   :  { %v10160_v40 = vpack.c.bf16 %v343_v3, %v339_v5  ;;  %v10162_v39 = vpack.c.bf16 %v340_v57, %v336_v36  ;;  %v342_v38 = vld [vmem:[%s12223_s2 + $0x2b0] sm:$0xff]  ;;  %v345_v5 = vld [vmem:[%s12223_s2 + $0x2c8] sm:$0xff]  ;;  %v347_v3 = vld [vmem:[%s12223_s2 + $0x2d8] sm:$0xff] }
  0x4b   :  { %12385 = vst [vmem:[#allocation30_spill] sm:$0xff] %v10129_v12  ;;  %5974 = vmatpush1.bf16.msra.mxu0 %v10129_v12  ;;  %12387 = vst [vmem:[#allocation32_spill] sm:$0xff] %v10148_v63  ;;  %v10171_v12 = vpack.c.bf16 %v342_v38, %v338_v29  ;;  %v349_v57 = vld [vmem:[%s12223_s2 + $0x2e8] sm:$0xff]  ;;  %v351_v29 = vld [vmem:[%s12223_s2 + $0x2f8] sm:$0xff] }
  0x4c   :  { %6038 = vmatpush1.bf16.msra.mxu1 %v10136_v11  ;;  %12388 = vst [vmem:[#allocation33_spill] sm:$0xff] %v10160_v40  ;;  %12389 = vst [vmem:[#allocation34_spill] sm:$0xff] %v10162_v39  ;;  %5976 = vmatprep.subr.bf16.mxu0 %v10148_v63  ;;  %v10184_v36 = vpack.c.bf16 %v349_v57, %v345_v5  ;;  %v344_v38 = vld [vmem:[%s12223_s2 + $0x2c0] sm:$0xff]  ;;  %v10196_v63 = vpack.c.bf16 %v351_v29, %v347_v3  ;;  %v346_v5 = vld [vmem:[%s12223_s2 + $0x2d0] sm:$0xff] }
  0x4d   :  { %12390 = vst [vmem:[#allocation35_spill] sm:$0xff] %v10171_v12  ;;  %6040 = vmatprep.subr.bf16.mxu1 %v10160_v40  ;;  %v348_v40 = vld [vmem:[%s12223_s2 + $0x2e0] sm:$0xff]  ;;  %v350_v57 = vld [vmem:[%s12223_s2 + $0x2f0] sm:$0xff]  ;;  %v353_v3 = vld [vmem:[%s12223_s2 + $0x308] sm:$0xff] }
  0x4e   :  { %12391 = vst [vmem:[#allocation36_spill] sm:$0xff] %v10184_v36  ;;  %12392 = vst [vmem:[#allocation37_spill] sm:$0xff] %v10196_v63  ;;  %v10198_v11 = vpack.c.bf16 %v348_v40, %v344_v38  ;;  %v357_v40 = vld [vmem:[%s12223_s2 + $0x328] sm:$0xff]  ;;  %v355_v29 = vld [vmem:[%s12223_s2 + $0x318] sm:$0xff] }
  0x4f   :  { %5978 = vmatpush1.bf16.msra.mxu0 %v10162_v39  ;;  %v10207_v39 = vpack.c.bf16 %v350_v57, %v346_v5  ;;  %v10220_v38 = vpack.c.bf16 %v357_v40, %v353_v3  ;;  %v359_v5 = vld [vmem:[%s12223_s2 + $0x338] sm:$0xff]  ;;  %v352_v57 = vld [vmem:[%s12223_s2 + $0x300] sm:$0xff]  ;;  %v354_v3 = vld [vmem:[%s12223_s2 + $0x310] sm:$0xff] }
  0x50   :  { %6042 = vmatpush1.bf16.msra.mxu1 %v10171_v12  ;;  %12393 = vst [vmem:[#allocation38_spill] sm:$0xff] %v10198_v11  ;;  %5980 = vmatprep.subr.bf16.mxu0 %v10184_v36  ;;  %v10232_v36 = vpack.c.bf16 %v359_v5, %v355_v29  ;;  %v358_v40 = vld [vmem:[%s12223_s2 + $0x330] sm:$0xff]  ;;  %v361_v29 = vld [vmem:[%s12223_s2 + $0x348] sm:$0xff]  ;;  %v363_v5 = vld [vmem:[%s12223_s2 + $0x358] sm:$0xff] }
  0x51   :  { %12394 = vst [vmem:[#allocation39_spill] sm:$0xff] %v10207_v39  ;;  %6044 = vmatprep.subr.bf16.mxu1 %v10196_v63  ;;  %12395 = vst [vmem:[#allocation40_spill] sm:$0xff] %v10220_v38  ;;  %v356_v63 = vld [vmem:[%s12223_s2 + $0x320] sm:$0xff] }
  0x52   :  { %12396 = vst [vmem:[#allocation41_spill] sm:$0xff] %v10232_v36  ;;  %v10234_v12 = vpack.c.bf16 %v356_v63, %v352_v57  ;;  %v365_v63 = vld [vmem:[%s12223_s2 + $0x368] sm:$0xff] }
  0x53   :  { %5982 = vmatpush1.bf16.msra.mxu0 %v10198_v11  ;;  %v10243_v11 = vpack.c.bf16 %v358_v40, %v354_v3  ;;  %v10256_v57 = vpack.c.bf16 %v365_v63, %v361_v29  ;;  %v367_v3 = vld [vmem:[%s12223_s2 + $0x378] sm:$0xff]  ;;  %v360_v40 = vld [vmem:[%s12223_s2 + $0x340] sm:$0xff]  ;;  %v362_v29 = vld [vmem:[%s12223_s2 + $0x350] sm:$0xff] }
  0x54   :  { %6046 = vmatpush1.bf16.msra.mxu1 %v10207_v39  ;;  %12397 = vst [vmem:[#allocation42_spill] sm:$0xff] %v10234_v12  ;;  %5984 = vmatprep.subr.bf16.mxu0 %v10220_v38  ;;  %v10268_v38 = vpack.c.bf16 %v367_v3, %v363_v5  ;;  %v366_v63 = vld [vmem:[%s12223_s2 + $0x370] sm:$0xff]  ;;  %v371_v5 = vld [vmem:[%s12223_s2 + $0x398] sm:$0xff] }
  0x55   :  { %12398 = vst [vmem:[#allocation43_spill] sm:$0xff] %v10243_v11  ;;  %6048 = vmatprep.subr.bf16.mxu1 %v10232_v36  ;;  %12399 = vst [vmem:[#allocation44_spill] sm:$0xff] %v10256_v57  ;;  %v364_v36 = vld [vmem:[%s12223_s2 + $0x360] sm:$0xff] }
  0x56   :  { %12400 = vst [vmem:[#allocation45_spill] sm:$0xff] %v10268_v38  ;;  %v10270_v39 = vpack.c.bf16 %v364_v36, %v360_v40  ;;  %v373_v36 = vld [vmem:[%s12223_s2 + $0x3a8] sm:$0xff]  ;;  %v375_v40 = vld [vmem:[%s12223_s2 + $0x3b8] sm:$0xff] }
  0x57   :  { %5986 = vmatpush1.bf16.msra.mxu0 %v10234_v12  ;;  %v10279_v12 = vpack.c.bf16 %v366_v63, %v362_v29  ;;  %v368_v29 = vld [vmem:[%s12223_s2 + $0x380] sm:$0xff] }
  0x58   :  { %6050 = vmatpush1.bf16.msra.mxu1 %v10243_v11  ;;  %12401 = vst [vmem:[#allocation46_spill] sm:$0xff] %v10270_v39  ;;  %5988 = vmatprep.subr.bf16.mxu0 %v10256_v57  ;;  %v369_v11 = vld [vmem:[%s12223_s2 + $0x388] sm:$0xff]  ;;  %v372_v63 = vld [vmem:[%s12223_s2 + $0x3a0] sm:$0xff]  ;;  %v10303_v57 = vpack.c.bf16 %v375_v40, %v371_v5 }
  0x59   :  { %12402 = vst [vmem:[#allocation47_spill] sm:$0xff] %v10279_v12  ;;  %6052 = vmatprep.subr.bf16.mxu1 %v10268_v38  ;;  %v10291_v3 = vpack.c.bf16 %v373_v36, %v369_v11  ;;  %v10305_v23 = vpack.c.bf16 %v372_v63, %v368_v29  ;;  %v370_v11 = vld [vmem:[%s12223_s2 + $0x390] sm:$0xff]  ;;  %v377_v38 = vld [vmem:[%s12223_s2 + $0x3c8] sm:$0xff]  ;;  %v379_v29 = vld [vmem:[%s12223_s2 + $0x3d8] sm:$0xff] }
  0x5a   :  { %12404 = vst [vmem:[#allocation49_spill] sm:$0xff] %v10303_v57  ;;  %v374_v36 = vld [vmem:[%s12223_s2 + $0x3b0] sm:$0xff]  ;;  %v381_v40 = vld [vmem:[%s12223_s2 + $0x3e8] sm:$0xff]  ;;  %v383_v63 = vld [vmem:[%s12223_s2 + $0x3f8] sm:$0xff] }
  0x5b   :  { %12403 = vst [vmem:[#allocation48_spill] sm:$0xff] %v10291_v3  ;;  %5990 = vmatpush1.bf16.msra.mxu0 %v10270_v39  ;;  %12405 = vst [vmem:[#allocation50_spill] sm:$0xff] %v10305_v23  ;;  %v10318_v5 = vpack.c.bf16 %v374_v36, %v370_v11  ;;  %v10330_v39 = vpack.c.bf16 %v381_v40, %v377_v38  ;;  %v376_v11 = vld [vmem:[%s12223_s2 + $0x3c0] sm:$0xff] }
  0x5c   :  { %6054 = vmatpush1.bf16.msra.mxu1 %v10279_v12  ;;  %5992 = vmatprep.subr.bf16.mxu0 %v10291_v3  ;;  %v10332_v12 = vpack.c.bf16 %v383_v63, %v379_v29  ;;  %v380_v36 = vld [vmem:[%s12223_s2 + $0x3e0] sm:$0xff]  ;;  %v378_v3 = vld [vmem:[%s12223_s2 + $0x3d0] sm:$0xff]  ;;  %v19_v63 = vld [vmem:[%s12224_s0 + $0x8] sm:$0xff] }
  0x5d   :  { %12406 = vst [vmem:[#allocation51_spill] sm:$0xff] %v10318_v5  ;;  %6056 = vmatprep.subr.bf16.mxu1 %v10303_v57  ;;  %12407 = vst [vmem:[#allocation52_spill] sm:$0xff] %v10330_v39  ;;  %v382_v57 = vld [vmem:[%s12223_s2 + $0x3f0] sm:$0xff]  ;;  %v10347_v38 = vpack.c.bf16 %v380_v36, %v376_v11  ;;  %v18_v29 = vld [vmem:[%s12224_s0] sm:$0xff] }
  0x5e   :  { %12408 = vst [vmem:[#allocation53_spill] sm:$0xff] %v10332_v12  ;;  %v10351_v40 = vpack.c.bf16 %v382_v57, %v378_v3 }
  0x5f   :  { %5994 = vmatpush1.bf16.msra.mxu0 %v10305_v23  ;;  %12409 = vst [vmem:[#allocation54_spill] sm:$0xff] %v10347_v38 }
  0x60   :  { %6058 = vmatpush1.bf16.msra.mxu1 %v10318_v5  ;;  %5996 = vmatprep.subr.bf16.mxu0 %v10330_v39  ;;  %12410 = vst [vmem:[#allocation55_spill] sm:$0xff] %v10351_v40  ;;  %v21_v5 = vld [vmem:[%s12224_s0 + $0x18] sm:$0xff] }
  0x61   :  { %6060 = vmatprep.subr.bf16.mxu1 %v10332_v12 }
  0x63   :  { %5998 = vmatpush1.bf16.msra.mxu0 %v10347_v38 }
  0x64   :  { %6062 = vmatpush1.bf16.msra.mxu1 %v10351_v40  ;;  %6064 = vmatprep.subr.bf16.mxu0 %v9497_v4  ;;  %v20_v4 = vld [vmem:[%s12224_s0 + $0x10] sm:$0xff] }
  0x65   :  { %6096 = vmatprep.subr.bf16.mxu1 %v9549_v22 }
  0xf8   :  { %v152_v57 = vpop.f32.mrb[0].mxu0 }
  0xf9   :  { %v228_v3 = vadd.f32 %v152_v57, %v18_v29  ;;  %v154_v11 = vpop.f32.mrb[1].mxu0 }
  0xfa   :  { %v229_v36 = vadd.f32 %v154_v11, %v19_v63  ;;  %v223_v22 = vpop.f32.mrb[0].mxu1 }
  0xfb   :  { %v5712_v12 = vmul.f32 -1.442695, %v228_v3  ;;  %v225_v40 = vpop.f32.mrb[1].mxu1  ;;  %v230_v39 = vadd.f32 %v223_v22, %v20_v4 }
  0xfc   :  { %v5713_v38 = vmul.f32 -1.442695, %v229_v36  ;;  %v231_v2 = vadd.f32 %v225_v40, %v21_v5  ;;  %v12413_v40 = vld [vmem:[#allocation8_spill] sm:$0xff] }
  0xfd   :  { %8944 = vpow2.f32 %v5712_v12  ;;  %v5714_v23 = vmul.f32 -1.442695, %v230_v39 }
  0xfe   :  { %8946 = vpow2.f32 %v5713_v38 }
  0xff   :  { %8948 = vpow2.f32 %v5714_v23 }
 0x100   :  { %8950 = vtanh.f32 %v231_v2  ;;  %v12411_v2 = vmov 0.0  }
 0x107   :  { %v8945_v29 = vpop.eup %8944 }
 0x108   :  { %v8947_v63 = vpop.eup %8946  ;;  %v241_v57 = vadd.f32 1.0, %v8945_v29  ;;  %v12414_v29 = vld [vmem:[#allocation11_spill] sm:$0xff] }
 0x109   :  { %v242_v3 = vadd.f32 1.0, %v8947_v63  ;;  %v8949_v11 = vpop.eup %8948  ;;  %v12415_v63 = vld [vmem:[#allocation12_spill] sm:$0xff] }
 0x10a   :  { %8952 = vrcp.f32 %v241_v57  ;;  %v8951_v12 = vpop.eup %8950  ;;  %v243_v38 = vadd.f32 1.0, %v8949_v11  ;;  %v12416_v57 = vld [vmem:[#allocation13_spill] sm:$0xff]  ;;  %v12418_v11 = vld [vmem:[#allocation15_spill] sm:$0xff] }
 0x10b   :  { %8954 = vrcp.f32 %v242_v3  ;;  %v12417_v3 = vld [vmem:[#allocation14_spill] sm:$0xff] }
 0x10c   :  { %8956 = vrcp.f32 %v243_v38  ;;  %v12421_v38 = vld [vmem:[#allocation18_spill] sm:$0xff] }
 0x114   :  { %v8953_v36 = vpop.eup %8952 }
 0x115   :  { %v8955_v44 = vpop.eup %8954  ;;  %v252_v4 = vmul.f32 %v8953_v36, %v8951_v12  ;;  %v12419_v12 = vld [vmem:[#allocation16_spill] sm:$0xff]  ;;  %v12420_v36 = vld [vmem:[#allocation17_spill] sm:$0xff] }
 0x116   :  { %v251_v22 = vmul.f32 0.0, %v8955_v44  ;;  %v8957_v39 = vpop.eup %8956  ;;  %v12412_v44 = vld [vmem:[#allocation10_spill] sm:$0xff] }
 0x118   :  { %v10370_v56 = vadd.f32 %v252_v4, %v251_v22  ;;  %v12422_v4 = vld [vmem:[#allocation19_spill] sm:$0xff]  ;;  %v12423_v22 = vld [vmem:[#allocation20_spill] sm:$0xff] }
 0x11a   :  { %8958 = vtanh.f32 %v10370_v56 }
 0x124   :  { %v8959_v23 = vpop.eup %8958 }
 0x125   :  { %v255_v5 = vmul.f32 %v8959_v23, %v8957_v39  ;;  %v12424_v39 = vld [vmem:[#allocation21_spill] sm:$0xff]  ;;  %v12425_v23 = vld [vmem:[#allocation22_spill] sm:$0xff] }
 0x127   :  { %470 = vmatmul.mubr.f32.vlgmr.msra.gmra.mrb[2].mxu0 %v255_v5  ;;  %541 = vmatmul.mubr.f32.vlgmr.msra.gmra.mrb[2].mxu1 %v255_v5 }
 0x128   :  { %6066 = vmatpush1.bf16.msra.mxu0 %v9508_v8  ;;  %6098 = vmatpush1.bf16.msra.mxu1 %v9557_v25 }
 0x129   :  { %6068 = vmatprep.subr.bf16.mxu0 %v9510_v9  ;;  %6100 = vmatprep.subr.bf16.mxu1 %v9582_v33 }
 0x12a   :  { %640 = vmatprep.mubr.f32.mxu0 %v12411_v2  ;;  %711 = vmatprep.mubr.f32.mxu1 %v12411_v2 }
 0x12c   :  { %6070 = vmatpush1.bf16.msra.mxu0 %v9526_v14  ;;  %6102 = vmatpush1.bf16.msra.mxu1 %v9593_v37 }
 0x12d   :  { %6072 = vmatprep.subr.bf16.mxu0 %v9535_v17  ;;  %6104 = vmatprep.subr.bf16.mxu1 %v9617_v45 }
 0x130   :  { %6074 = vmatpush1.bf16.msra.mxu0 %v9560_v26  ;;  %6106 = vmatpush1.bf16.msra.mxu1 %v9626_v48 }
 0x131   :  { %6076 = vmatprep.subr.bf16.mxu0 %v9573_v30  ;;  %6108 = vmatprep.subr.bf16.mxu1 %v9638_v52 }
 0x134   :  { %6078 = vmatpush1.bf16.msra.mxu0 %v9609_v42  ;;  %6110 = vmatpush1.bf16.msra.mxu1 %v9668_v62 }
 0x135   :  { %6080 = vmatprep.subr.bf16.mxu0 %v9620_v46  ;;  %6112 = vmatprep.subr.bf16.mxu1 %v9674_v0 }
 0x138   :  { %6082 = vmatpush1.bf16.msra.mxu0 %v9647_v55  ;;  %6114 = vmatpush1.bf16.msra.mxu1 %v9704_v15 }
 0x139   :  { %6084 = vmatprep.subr.bf16.mxu0 %v9656_v58  ;;  %6116 = vmatprep.subr.bf16.mxu1 %v9710_v18 }
 0x13c   :  { %6086 = vmatpush1.bf16.msra.mxu0 %v9689_v7  ;;  %6118 = vmatpush1.bf16.msra.mxu1 %v9737_v31 }
 0x13d   :  { %6088 = vmatprep.subr.bf16.mxu0 %v9692_v10  ;;  %6120 = vmatprep.subr.bf16.mxu1 %v9743_v34 }
 0x140   :  { %6090 = vmatpush1.bf16.msra.mxu0 %v9725_v24  ;;  %6122 = vmatpush1.bf16.msra.mxu1 %v9765_v43 }
 0x141   :  { %6092 = vmatprep.subr.bf16.mxu0 %v9728_v27  ;;  %6124 = vmatprep.subr.bf16.mxu1 %v9779_v51 }
 0x144   :  { %6094 = vmatpush1.bf16.msra.mxu0 %v9761_v41  ;;  %6126 = vmatpush1.bf16.msra.mxu1 %v9800_v61 }
 0x145   :  { %6128 = vmatprep.subr.bf16.mxu0 %v9770_v47  ;;  %6192 = vmatprep.subr.bf16.mxu1 %v9815_v6 }
 0x147   :  { %641 = vmatmul.mubr.f32.vlgmr.msra.gmra.mrb[4].mxu0 %v255_v5  ;;  %712 = vmatmul.mubr.f32.vlgmr.msra.gmra.mrb[4].mxu1 %v255_v5  ;;  %v12426_v5 = vld [vmem:[#allocation23_spill] sm:$0xff] }
 0x148   :  { %6130 = vmatpush1.bf16.msra.mxu0 %v9797_v60  ;;  %6194 = vmatpush1.bf16.msra.mxu1 %v9838_v21 }
 0x149   :  { %6132 = vmatprep.subr.bf16.mxu0 %v9806_v1  ;;  %6196 = vmatprep.subr.bf16.mxu1 %v9853_v35 }
 0x14c   :  { %6134 = vmatpush1.bf16.msra.mxu0 %v9834_v20  ;;  %6198 = vmatpush1.bf16.msra.mxu1 %v9875_v50 }
 0x14d   :  { %6136 = vmatprep.subr.bf16.mxu0 %v9844_v28  ;;  %6200 = vmatprep.subr.bf16.mxu1 %v9890_v59 }
 0x150   :  { %6138 = vmatpush1.bf16.msra.mxu0 %v9872_v49  ;;  %6202 = vmatpush1.bf16.msra.mxu1 %v9912_v16 }
 0x151   :  { %6140 = vmatprep.subr.bf16.mxu0 %v9881_v54  ;;  %6204 = vmatprep.subr.bf16.mxu1 %v9924_v32 }
 0x154   :  { %6142 = vmatpush1.bf16.msra.mxu0 %v9909_v13  ;;  %6206 = vmatpush1.bf16.msra.mxu1 %v9942_v53 }
 0x155   :  { %6144 = vmatprep.subr.bf16.mxu0 %v9915_v19  ;;  %6208 = vmatprep.subr.bf16.mxu1 %v12412_v44 }
 0x158   :  { %6146 = vmatpush1.bf16.msra.mxu0 %v12413_v40  ;;  %6210 = vmatpush1.bf16.msra.mxu1 %v12414_v29 }
 0x159   :  { %6148 = vmatprep.subr.bf16.mxu0 %v12415_v63  ;;  %6212 = vmatprep.subr.bf16.mxu1 %v12416_v57  ;;  %v12427_v57 = vld [vmem:[#allocation24_spill] sm:$0xff] }
 0x15c   :  { %6150 = vmatpush1.bf16.msra.mxu0 %v12417_v3  ;;  %6214 = vmatpush1.bf16.msra.mxu1 %v12418_v11  ;;  %v12428_v3 = vld [vmem:[#allocation25_spill] sm:$0xff]  ;;  %v12429_v11 = vld [vmem:[#allocation26_spill] sm:$0xff] }
 0x15d   :  { %6152 = vmatprep.subr.bf16.mxu0 %v12419_v12  ;;  %6216 = vmatprep.subr.bf16.mxu1 %v12420_v36  ;;  %v12430_v12 = vld [vmem:[#allocation27_spill] sm:$0xff]  ;;  %v12431_v36 = vld [vmem:[#allocation28_spill] sm:$0xff] }
 0x160   :  { %6154 = vmatpush1.bf16.msra.mxu0 %v12421_v38  ;;  %6218 = vmatpush1.bf16.msra.mxu1 %v12422_v4  ;;  %v12432_v38 = vld [vmem:[#allocation29_spill] sm:$0xff]  ;;  %v12433_v4 = vld [vmem:[#allocation30_spill] sm:$0xff] }
 0x161   :  { %6156 = vmatprep.subr.bf16.mxu0 %v12423_v22  ;;  %6220 = vmatprep.subr.bf16.mxu1 %v12424_v39  ;;  %v12434_v22 = vld [vmem:[#allocation31_spill] sm:$0xff]  ;;  %v12435_v39 = vld [vmem:[#allocation32_spill] sm:$0xff] }
 0x164   :  { %6158 = vmatpush1.bf16.msra.mxu0 %v12425_v23  ;;  %6222 = vmatpush1.bf16.msra.mxu1 %v12426_v5  ;;  %v12436_v23 = vld [vmem:[#allocation33_spill] sm:$0xff]  ;;  %v12437_v5 = vld [vmem:[#allocation34_spill] sm:$0xff] }
 0x165   :  { %6160 = vmatprep.subr.bf16.mxu0 %v12427_v57  ;;  %6224 = vmatprep.subr.bf16.mxu1 %v12428_v3  ;;  %v12438_v57 = vld [vmem:[#allocation35_spill] sm:$0xff]  ;;  %v12439_v3 = vld [vmem:[#allocation36_spill] sm:$0xff] }
 0x168   :  { %6162 = vmatpush1.bf16.msra.mxu0 %v12429_v11  ;;  %6226 = vmatpush1.bf16.msra.mxu1 %v12430_v12  ;;  %v12440_v11 = vld [vmem:[#allocation37_spill] sm:$0xff]  ;;  %v12441_v12 = vld [vmem:[#allocation38_spill] sm:$0xff] }
 0x169   :  { %6164 = vmatprep.subr.bf16.mxu0 %v12431_v36  ;;  %6228 = vmatprep.subr.bf16.mxu1 %v12432_v38  ;;  %v12442_v36 = vld [vmem:[#allocation39_spill] sm:$0xff]  ;;  %v12443_v38 = vld [vmem:[#allocation40_spill] sm:$0xff] }
 0x16c   :  { %6166 = vmatpush1.bf16.msra.mxu0 %v12433_v4  ;;  %6230 = vmatpush1.bf16.msra.mxu1 %v12434_v22  ;;  %v12444_v4 = vld [vmem:[#allocation41_spill] sm:$0xff]  ;;  %v12445_v22 = vld [vmem:[#allocation42_spill] sm:$0xff] }
 0x16d   :  { %6168 = vmatprep.subr.bf16.mxu0 %v12435_v39  ;;  %6232 = vmatprep.subr.bf16.mxu1 %v12436_v23  ;;  %v12446_v39 = vld [vmem:[#allocation43_spill] sm:$0xff]  ;;  %v12447_v23 = vld [vmem:[#allocation44_spill] sm:$0xff] }
 0x170   :  { %6170 = vmatpush1.bf16.msra.mxu0 %v12437_v5  ;;  %6234 = vmatpush1.bf16.msra.mxu1 %v12438_v57  ;;  %v12448_v5 = vld [vmem:[#allocation45_spill] sm:$0xff]  ;;  %v12449_v57 = vld [vmem:[#allocation46_spill] sm:$0xff] }
 0x171   :  { %6172 = vmatprep.subr.bf16.mxu0 %v12439_v3  ;;  %6236 = vmatprep.subr.bf16.mxu1 %v12440_v11  ;;  %v12450_v3 = vld [vmem:[#allocation47_spill] sm:$0xff]  ;;  %v12451_v11 = vld [vmem:[#allocation48_spill] sm:$0xff] }
 0x174   :  { %6174 = vmatpush1.bf16.msra.mxu0 %v12441_v12  ;;  %6238 = vmatpush1.bf16.msra.mxu1 %v12442_v36  ;;  %v12452_v12 = vld [vmem:[#allocation49_spill] sm:$0xff]  ;;  %v12453_v36 = vld [vmem:[#allocation50_spill] sm:$0xff] }
 0x175   :  { %6176 = vmatprep.subr.bf16.mxu0 %v12443_v38  ;;  %6240 = vmatprep.subr.bf16.mxu1 %v12444_v4  ;;  %v12454_v38 = vld [vmem:[#allocation51_spill] sm:$0xff]  ;;  %v12455_v4 = vld [vmem:[#allocation52_spill] sm:$0xff] }
 0x178   :  { %6178 = vmatpush1.bf16.msra.mxu0 %v12445_v22  ;;  %6242 = vmatpush1.bf16.msra.mxu1 %v12446_v39  ;;  %v12456_v22 = vld [vmem:[#allocation53_spill] sm:$0xff]  ;;  %v12457_v39 = vld [vmem:[#allocation54_spill] sm:$0xff] }
 0x179   :  { %6180 = vmatprep.subr.bf16.mxu0 %v12447_v23  ;;  %6244 = vmatprep.subr.bf16.mxu1 %v12448_v5  ;;  %v12458_v23 = vld [vmem:[#allocation55_spill] sm:$0xff]  ;;  %v12459_v5 = vld [vmem:[#allocation2_spill] sm:$0xff] }
 0x17c   :  { %6182 = vmatpush1.bf16.msra.mxu0 %v12449_v57  ;;  %6246 = vmatpush1.bf16.msra.mxu1 %v12450_v3  ;;  %v12460_v57 = vld [vmem:[#allocation3_spill] sm:$0xff]  ;;  %v385_v3 = vlaneseq }
 0x17d   :  { %6184 = vmatprep.subr.bf16.mxu0 %v12451_v11  ;;  %6248 = vmatprep.subr.bf16.mxu1 %v12452_v12 }
 0x17e   :  { %v386_v11 = vshrl.u32 %v385_v3, 7 }
 0x180   :  { %6186 = vmatpush1.bf16.msra.mxu0 %v12453_v36  ;;  %6250 = vmatpush1.bf16.msra.mxu1 %v12454_v38  ;;  %v387_v63 = vsub.s32 0, %v386_v11  ;;  %v17_v36 = vld [vmem:[%s12225_s3] ss:$2 sm:$0xf]  ;;  %v391_v38 = vsub.s32 1, %v386_v11  ;;  %v395_v29 = vsub.s32 2, %v386_v11 }
 0x181   :  { %6188 = vmatprep.subr.bf16.mxu0 %v12455_v4  ;;  %6252 = vmatprep.subr.bf16.mxu1 %v12456_v22  ;;  %v399_v19 = vsub.s32 3, %v386_v11 }
 0x182   :  { %v10474_v12 = vrot.slane %v17_v36, %v387_v63  ;;  %v10476_v4 = vrot.slane %v17_v36, %v391_v38  ;;  %v10480_v53 = vrot.slane %v17_v36, %v395_v29 }
 0x183   :  { %v10482_v63 = vrot.slane %v17_v36, %v399_v19  ;;  %v5718_v36 = vld [vmem:[%s12224_s0 + $0x20] sm:$0xff] }
 0x184   :  { %6190 = vmatpush1.bf16.msra.mxu0 %v12457_v39  ;;  %6254 = vmatpush1.bf16.msra.mxu1 %v12458_v23  ;;  %12461 = vst [vmem:[#allocation56_spill] sm:$0xff] %v10474_v12  ;;  %12462 = vst [vmem:[#allocation57_spill] sm:$0xff] %v10480_v53 }
 0x185   :  { %6256 = vmatprep.subr.bf16.mxu0 %v12459_v5  ;;  %6288 = vmatprep.subr.bf16.mxu1 %v12460_v57  ;;  %12463 = vst [vmem:[#allocation58_spill] sm:$0xff] %v10482_v63 }
 0x1fa   :  { %v471_v22 = vpop.f32.mrb[2].mxu0  ;;  %v542_v39 = vpop.f32.mrb[2].mxu1 }
 0x1fb   :  { %v472_v23 = vadd.f32 %v471_v22, %v10474_v12  ;;  %v473_v5 = vpop.f32.mrb[3].mxu0  ;;  %v544_v40 = vpop.f32.mrb[3].mxu1  ;;  %v543_v38 = vadd.f32 %v542_v39, %v10480_v53 }
 0x1fc   :  { %v474_v57 = vadd.f32 %v473_v5, %v10476_v4  ;;  %v545_v13 = vadd.f32 %v544_v40, %v10482_v63 }
 0x1fd   :  { %v5715_v3 = vmul.f32 -1.442695, %v472_v23  ;;  %v5717_v32 = vmul.f32 -1.442695, %v543_v38 }
 0x1fe   :  { %v5716_v44 = vmul.f32 -1.442695, %v474_v57 }
 0x1ff   :  { %8960 = vpow2.f32 %v5715_v3 }
 0x200   :  { %8962 = vpow2.f32 %v5716_v44 }
 0x201   :  { %8964 = vtanh.f32 %v545_v13  ;;  %v5719_v13 = vld [vmem:[%s12224_s0 + $0x28] sm:$0xff] }
 0x202   :  { %8966 = vpow2.f32 %v5717_v32 }
 0x209   :  { %v8961_v22 = vpop.eup %8960 }
 0x20a   :  { %v556_v12 = vadd.f32 1.0, %v8961_v22  ;;  %v8963_v54 = vpop.eup %8962 }
 0x20b   :  { %v557_v23 = vadd.f32 1.0, %v8963_v54  ;;  %v8965_v57 = vpop.eup %8964 }
 0x20c   :  { %8968 = vrcp.f32 %v556_v12  ;;  %v8967_v11 = vpop.eup %8966 }
 0x20d   :  { %8970 = vrcp.f32 %v557_v23  ;;  %v558_v19 = vadd.f32 1.0, %v8967_v11  ;;  %v5720_v11 = vld [vmem:[%s12224_s0 + $0x30] sm:$0xff] }
 0x20f   :  { %8972 = vrcp.f32 %v558_v19 }
 0x216   :  { %v8969_v29 = vpop.eup %8968 }
 0x217   :  { %v567_v5 = vmul.f32 %v8969_v29, %v8965_v57  ;;  %v8971_v44 = vpop.eup %8970 }
 0x218   :  { %v566_v40 = vmul.f32 0.0, %v8971_v44 }
 0x219   :  { %v8973_v44 = vpop.eup %8972 }
 0x21a   :  { %v642_v39 = vpop.f32.mrb[4].mxu0  ;;  %v713_v32 = vpop.f32.mrb[4].mxu1  ;;  %v10492_v12 = vadd.f32 %v567_v5, %v566_v40  ;;  %v5721_v5 = vld [vmem:[%s12224_s0 + $0x38] sm:$0xff] }
 0x21b   :  { %v718_v54 = vadd.f32 %v5718_v36, %v642_v39  ;;  %v644_v3 = vpop.f32.mrb[5].mxu0  ;;  %v715_v38 = vpop.f32.mrb[5].mxu1  ;;  %v720_v29 = vadd.f32 %v5720_v11, %v713_v32 }
 0x21c   :  { %12464 = vst [vmem:[#allocation59_spill] sm:$0xff] %v10492_v12  ;;  %v719_v22 = vadd.f32 %v5719_v13, %v644_v3  ;;  %8974 = vtanh.f32 %v10492_v12  ;;  %v721_v36 = vadd.f32 %v5721_v5, %v715_v38 }
 0x21d   :  { %v5722_v23 = vmul.f32 -1.442695, %v718_v54  ;;  %v5724_v19 = vmul.f32 -1.442695, %v720_v29 }
 0x21e   :  { %v5723_v57 = vmul.f32 -1.442695, %v719_v22 }
 0x21f   :  { %8976 = vpow2.f32 %v5722_v23 }
 0x220   :  { %8978 = vpow2.f32 %v5723_v57 }
 0x221   :  { %8980 = vtanh.f32 %v721_v36 }
 0x222   :  { %8982 = vpow2.f32 %v5724_v19  ;;  %v12469_v19 = vld [vmem:[#allocation6_spill] sm:$0xff] }
 0x226   :  { %v8975_v40 = vpop.eup %8974 }
 0x227   :  { %v570_v13 = vmul.f32 %v8975_v40, %v8973_v44  ;;  %v12468_v40 = vld [vmem:[#allocation9_spill] sm:$0xff] }
 0x229   :  { %v8977_v39 = vpop.eup %8976  ;;  %810 = vmatprep.mubr.f32.mxu0 %v570_v13  ;;  %881 = vmatprep.mubr.f32.mxu1 %v570_v13  ;;  %v12470_v13 = vld [vmem:[#allocation10_spill] sm:$0xff] }
 0x22a   :  { %v731_v54 = vadd.f32 1.0, %v8977_v39  ;;  %v8979_v3 = vpop.eup %8978  ;;  %v12471_v39 = vld [vmem:[#allocation8_spill] sm:$0xff] }
 0x22b   :  { %v732_v22 = vadd.f32 1.0, %v8979_v3  ;;  %v8981_v32 = vpop.eup %8980  ;;  %v12473_v3 = vld [vmem:[#allocation12_spill] sm:$0xff] }
 0x22c   :  { %8984 = vrcp.f32 %v731_v54  ;;  %v8983_v23 = vpop.eup %8982  ;;  %v12472_v54 = vld [vmem:[#allocation11_spill] sm:$0xff] }
 0x22d   :  { %8986 = vrcp.f32 %v732_v22  ;;  %v733_v63 = vadd.f32 1.0, %v8983_v23  ;;  %v12474_v22 = vld [vmem:[#allocation13_spill] sm:$0xff]  ;;  %v12476_v23 = vld [vmem:[#allocation15_spill] sm:$0xff] }
 0x22f   :  { %8988 = vrcp.f32 %v733_v63  ;;  %v12466_v63 = vld [vmem:[#allocation7_spill] sm:$0xff] }
 0x236   :  { %v8985_v57 = vpop.eup %8984 }
 0x237   :  { %v742_v11 = vmul.f32 %v8985_v57, %v8981_v32  ;;  %v8987_v12 = vpop.eup %8986  ;;  %v12475_v32 = vld [vmem:[#allocation14_spill] sm:$0xff]  ;;  %v12477_v57 = vld [vmem:[#allocation16_spill] sm:$0xff] }
 0x238   :  { %v741_v38 = vmul.f32 %v8987_v12, %v10370_v56  ;;  %v12465_v56 = vld [vmem:[#allocation4_spill] sm:$0xff]  ;;  %v12467_v12 = vld [vmem:[#allocation5_spill] sm:$0xff] }
 0x239   :  { %v8989_v5 = vpop.eup %8988 }
 0x23a   :  { %v10502_v29 = vadd.f32 %v742_v11, %v741_v38  ;;  %v12478_v11 = vld [vmem:[#allocation17_spill] sm:$0xff]  ;;  %v12479_v38 = vld [vmem:[#allocation18_spill] sm:$0xff] }
 0x23c   :  { %8990 = vtanh.f32 %v10502_v29 }
 0x246   :  { %v8991_v44 = vpop.eup %8990 }
 0x247   :  { %v745_v36 = vmul.f32 %v8991_v44, %v8989_v5  ;;  %v12480_v5 = vld [vmem:[#allocation19_spill] sm:$0xff]  ;;  %v12481_v44 = vld [vmem:[#allocation20_spill] sm:$0xff] }
 0x249   :  { %811 = vmatmul.mubr.f32.vlgmr.msra.gmra.mrb[6].mxu0 %v745_v36  ;;  %882 = vmatmul.mubr.f32.vlgmr.msra.gmra.mrb[6].mxu1 %v745_v36 }
 0x24a   :  { %6258 = vmatpush1.bf16.msra.mxu0 %v9508_v8  ;;  %6290 = vmatpush1.bf16.msra.mxu1 %v9557_v25 }
 0x24b   :  { %6260 = vmatprep.subr.bf16.mxu0 %v9510_v9  ;;  %6292 = vmatprep.subr.bf16.mxu1 %v9582_v33 }
 0x24c   :  { %981 = vmatprep.mubr.f32.mxu0 %v12411_v2  ;;  %1052 = vmatprep.mubr.f32.mxu1 %v12411_v2 }
 0x24e   :  { %6262 = vmatpush1.bf16.msra.mxu0 %v9526_v14  ;;  %6294 = vmatpush1.bf16.msra.mxu1 %v9593_v37 }
 0x24f   :  { %6264 = vmatprep.subr.bf16.mxu0 %v9535_v17  ;;  %6296 = vmatprep.subr.bf16.mxu1 %v9617_v45 }
 0x252   :  { %6266 = vmatpush1.bf16.msra.mxu0 %v9560_v26  ;;  %6298 = vmatpush1.bf16.msra.mxu1 %v9626_v48 }
 0x253   :  { %6268 = vmatprep.subr.bf16.mxu0 %v9573_v30  ;;  %6300 = vmatprep.subr.bf16.mxu1 %v9638_v52 }
 0x256   :  { %6270 = vmatpush1.bf16.msra.mxu0 %v9609_v42  ;;  %6302 = vmatpush1.bf16.msra.mxu1 %v9668_v62 }
 0x257   :  { %6272 = vmatprep.subr.bf16.mxu0 %v9620_v46  ;;  %6304 = vmatprep.subr.bf16.mxu1 %v9674_v0 }
 0x25a   :  { %6274 = vmatpush1.bf16.msra.mxu0 %v9647_v55  ;;  %6306 = vmatpush1.bf16.msra.mxu1 %v9704_v15 }
 0x25b   :  { %6276 = vmatprep.subr.bf16.mxu0 %v9656_v58  ;;  %6308 = vmatprep.subr.bf16.mxu1 %v9710_v18 }
 0x25e   :  { %6278 = vmatpush1.bf16.msra.mxu0 %v9689_v7  ;;  %6310 = vmatpush1.bf16.msra.mxu1 %v9737_v31 }
 0x25f   :  { %6280 = vmatprep.subr.bf16.mxu0 %v9692_v10  ;;  %6312 = vmatprep.subr.bf16.mxu1 %v9743_v34 }
 0x262   :  { %6282 = vmatpush1.bf16.msra.mxu0 %v9725_v24  ;;  %6314 = vmatpush1.bf16.msra.mxu1 %v9765_v43 }
 0x263   :  { %6284 = vmatprep.subr.bf16.mxu0 %v9728_v27  ;;  %6316 = vmatprep.subr.bf16.mxu1 %v9779_v51 }
 0x266   :  { %6286 = vmatpush1.bf16.msra.mxu0 %v9761_v41  ;;  %6318 = vmatpush1.bf16.msra.mxu1 %v9800_v61 }
 0x267   :  { %6320 = vmatprep.subr.bf16.mxu0 %v9770_v47  ;;  %6384 = vmatprep.subr.bf16.mxu1 %v9815_v6 }
 0x269   :  { %982 = vmatmul.mubr.f32.vlgmr.msra.gmra.mrb[8].mxu0 %v745_v36  ;;  %1053 = vmatmul.mubr.f32.vlgmr.msra.gmra.mrb[8].mxu1 %v745_v36  ;;  %v12482_v36 = vld [vmem:[#allocation21_spill] sm:$0xff] }
 0x26a   :  { %6322 = vmatpush1.bf16.msra.mxu0 %v9797_v60  ;;  %6386 = vmatpush1.bf16.msra.mxu1 %v9838_v21 }
 0x26b   :  { %6324 = vmatprep.subr.bf16.mxu0 %v9806_v1  ;;  %6388 = vmatprep.subr.bf16.mxu1 %v9853_v35 }
 0x26e   :  { %6326 = vmatpush1.bf16.msra.mxu0 %v9834_v20  ;;  %6390 = vmatpush1.bf16.msra.mxu1 %v9875_v50 }
 0x26f   :  { %6328 = vmatprep.subr.bf16.mxu0 %v9844_v28  ;;  %6392 = vmatprep.subr.bf16.mxu1 %v9890_v59 }
 0x272   :  { %6330 = vmatpush1.bf16.msra.mxu0 %v9872_v49  ;;  %6394 = vmatpush1.bf16.msra.mxu1 %v9912_v16 }
 0x273   :  { %6332 = vmatprep.subr.bf16.mxu0 %v12465_v56  ;;  %6396 = vmatprep.subr.bf16.mxu1 %v12466_v63 }
 0x276   :  { %6334 = vmatpush1.bf16.msra.mxu0 %v12467_v12  ;;  %6398 = vmatpush1.bf16.msra.mxu1 %v12468_v40 }
 0x277   :  { %6336 = vmatprep.subr.bf16.mxu0 %v12469_v19  ;;  %6400 = vmatprep.subr.bf16.mxu1 %v12470_v13 }
 0x27a   :  { %6338 = vmatpush1.bf16.msra.mxu0 %v12471_v39  ;;  %6402 = vmatpush1.bf16.msra.mxu1 %v12472_v54  ;;  %v12483_v54 = vld [vmem:[#allocation22_spill] sm:$0xff]  ;;  %v12519_v39 = vld [vmem:[#allocation56_spill] sm:$0xff] }
 0x27b   :  { %6340 = vmatprep.subr.bf16.mxu0 %v12473_v3  ;;  %6404 = vmatprep.subr.bf16.mxu1 %v12474_v22  ;;  %v12484_v3 = vld [vmem:[#allocation23_spill] sm:$0xff]  ;;  %v12485_v22 = vld [vmem:[#allocation24_spill] sm:$0xff] }
 0x27e   :  { %6342 = vmatpush1.bf16.msra.mxu0 %v12475_v32  ;;  %6406 = vmatpush1.bf16.msra.mxu1 %v12476_v23  ;;  %v12486_v32 = vld [vmem:[#allocation25_spill] sm:$0xff]  ;;  %v12487_v23 = vld [vmem:[#allocation26_spill] sm:$0xff] }
 0x27f   :  { %6344 = vmatprep.subr.bf16.mxu0 %v12477_v57  ;;  %6408 = vmatprep.subr.bf16.mxu1 %v12478_v11  ;;  %v12488_v57 = vld [vmem:[#allocation27_spill] sm:$0xff]  ;;  %v12489_v11 = vld [vmem:[#allocation28_spill] sm:$0xff] }
 0x282   :  { %6346 = vmatpush1.bf16.msra.mxu0 %v12479_v38  ;;  %6410 = vmatpush1.bf16.msra.mxu1 %v12480_v5  ;;  %v12490_v38 = vld [vmem:[#allocation29_spill] sm:$0xff]  ;;  %v12491_v5 = vld [vmem:[#allocation30_spill] sm:$0xff] }
 0x283   :  { %6348 = vmatprep.subr.bf16.mxu0 %v12481_v44  ;;  %6412 = vmatprep.subr.bf16.mxu1 %v12482_v36  ;;  %v12492_v44 = vld [vmem:[#allocation31_spill] sm:$0xff]  ;;  %v12493_v36 = vld [vmem:[#allocation32_spill] sm:$0xff] }
 0x286   :  { %6350 = vmatpush1.bf16.msra.mxu0 %v12483_v54  ;;  %6414 = vmatpush1.bf16.msra.mxu1 %v12484_v3  ;;  %v12494_v54 = vld [vmem:[#allocation33_spill] sm:$0xff]  ;;  %v12495_v3 = vld [vmem:[#allocation34_spill] sm:$0xff] }
 0x287   :  { %6352 = vmatprep.subr.bf16.mxu0 %v12485_v22  ;;  %6416 = vmatprep.subr.bf16.mxu1 %v12486_v32  ;;  %v12496_v22 = vld [vmem:[#allocation35_spill] sm:$0xff]  ;;  %v12497_v32 = vld [vmem:[#allocation36_spill] sm:$0xff] }
 0x28a   :  { %6354 = vmatpush1.bf16.msra.mxu0 %v12487_v23  ;;  %6418 = vmatpush1.bf16.msra.mxu1 %v12488_v57  ;;  %v12498_v23 = vld [vmem:[#allocation37_spill] sm:$0xff]  ;;  %v12499_v57 = vld [vmem:[#allocation38_spill] sm:$0xff] }
 0x28b   :  { %6356 = vmatprep.subr.bf16.mxu0 %v12489_v11  ;;  %6420 = vmatprep.subr.bf16.mxu1 %v12490_v38  ;;  %v12500_v11 = vld [vmem:[#allocation39_spill] sm:$0xff]  ;;  %v12501_v38 = vld [vmem:[#allocation40_spill] sm:$0xff] }
 0x28e   :  { %6358 = vmatpush1.bf16.msra.mxu0 %v12491_v5  ;;  %6422 = vmatpush1.bf16.msra.mxu1 %v12492_v44  ;;  %v12502_v5 = vld [vmem:[#allocation41_spill] sm:$0xff]  ;;  %v12503_v44 = vld [vmem:[#allocation42_spill] sm:$0xff] }
 0x28f   :  { %6360 = vmatprep.subr.bf16.mxu0 %v12493_v36  ;;  %6424 = vmatprep.subr.bf16.mxu1 %v12494_v54  ;;  %v12504_v36 = vld [vmem:[#allocation43_spill] sm:$0xff]  ;;  %v12505_v54 = vld [vmem:[#allocation44_spill] sm:$0xff] }
 0x292   :  { %6362 = vmatpush1.bf16.msra.mxu0 %v12495_v3  ;;  %6426 = vmatpush1.bf16.msra.mxu1 %v12496_v22  ;;  %v12506_v3 = vld [vmem:[#allocation45_spill] sm:$0xff]  ;;  %v12507_v22 = vld [vmem:[#allocation46_spill] sm:$0xff] }
 0x293   :  { %6364 = vmatprep.subr.bf16.mxu0 %v12497_v32  ;;  %6428 = vmatprep.subr.bf16.mxu1 %v12498_v23  ;;  %v12508_v32 = vld [vmem:[#allocation47_spill] sm:$0xff]  ;;  %v12509_v23 = vld [vmem:[#allocation48_spill] sm:$0xff] }
 0x296   :  { %6366 = vmatpush1.bf16.msra.mxu0 %v12499_v57  ;;  %6430 = vmatpush1.bf16.msra.mxu1 %v12500_v11  ;;  %v12510_v57 = vld [vmem:[#allocation49_spill] sm:$0xff]  ;;  %v12511_v11 = vld [vmem:[#allocation50_spill] sm:$0xff] }
 0x297   :  { %6368 = vmatprep.subr.bf16.mxu0 %v12501_v38  ;;  %6432 = vmatprep.subr.bf16.mxu1 %v12502_v5  ;;  %v12512_v38 = vld [vmem:[#allocation51_spill] sm:$0xff]  ;;  %v12513_v5 = vld [vmem:[#allocation52_spill] sm:$0xff] }
 0x29a   :  { %6370 = vmatpush1.bf16.msra.mxu0 %v12503_v44  ;;  %6434 = vmatpush1.bf16.msra.mxu1 %v12504_v36  ;;  %v12514_v44 = vld [vmem:[#allocation53_spill] sm:$0xff]  ;;  %v12515_v36 = vld [vmem:[#allocation54_spill] sm:$0xff] }
 0x29b   :  { %6372 = vmatprep.subr.bf16.mxu0 %v12505_v54  ;;  %6436 = vmatprep.subr.bf16.mxu1 %v12506_v3  ;;  %v12516_v54 = vld [vmem:[#allocation55_spill] sm:$0xff]  ;;  %v12517_v3 = vld [vmem:[#allocation2_spill] sm:$0xff] }
 0x29e   :  { %6374 = vmatpush1.bf16.msra.mxu0 %v12507_v22  ;;  %6438 = vmatpush1.bf16.msra.mxu1 %v12508_v32  ;;  %v12518_v22 = vld [vmem:[#allocation3_spill] sm:$0xff] }
 0x29f   :  { %6376 = vmatprep.subr.bf16.mxu0 %v12509_v23  ;;  %6440 = vmatprep.subr.bf16.mxu1 %v12510_v57 }
 0x2a2   :  { %6378 = vmatpush1.bf16.msra.mxu0 %v12511_v11  ;;  %6442 = vmatpush1.bf16.msra.mxu1 %v12512_v38 }
 0x2a3   :  { %6380 = vmatprep.subr.bf16.mxu0 %v12513_v5  ;;  %6444 = vmatprep.subr.bf16.mxu1 %v12514_v44  ;;  %v12520_v44 = vld [vmem:[#allocation58_spill] sm:$0xff] }
 0x2a6   :  { %6382 = vmatpush1.bf16.msra.mxu0 %v12515_v36  ;;  %6446 = vmatpush1.bf16.msra.mxu1 %v12516_v54 }
 0x2a7   :  { %6448 = vmatprep.subr.bf16.mxu0 %v12517_v3  ;;  %6480 = vmatprep.subr.bf16.mxu1 %v12518_v22 }
 0x31c   :  { %v812_v32 = vpop.f32.mrb[6].mxu0  ;;  %v883_v23 = vpop.f32.mrb[6].mxu1 }
 0x31d   :  { %v813_v57 = vadd.f32 %v812_v32, %v12519_v39  ;;  %v814_v13 = vpop.f32.mrb[7].mxu0  ;;  %v885_v11 = vpop.f32.mrb[7].mxu1  ;;  %v884_v36 = vadd.f32 %v883_v23, %v10480_v53  ;;  %v5728_v23 = vld [vmem:[%s12224_s0 + $0x40] sm:$0xff] }
 0x31e   :  { %v815_v38 = vadd.f32 %v814_v13, %v10476_v4  ;;  %v886_v54 = vadd.f32 %v885_v11, %v12520_v44  ;;  %v12521_v11 = vld [vmem:[#allocation59_spill] sm:$0xff] }
 0x31f   :  { %v5725_v19 = vmul.f32 -1.442695, %v813_v57  ;;  %v5727_v40 = vmul.f32 -1.442695, %v884_v36 }
 0x320   :  { %v5726_v5 = vmul.f32 -1.442695, %v815_v38 }
 0x321   :  { %8992 = vpow2.f32 %v5725_v19 }
 0x322   :  { %8994 = vpow2.f32 %v5726_v5 }
 0x323   :  { %8996 = vtanh.f32 %v886_v54  ;;  %v5729_v54 = vld [vmem:[%s12224_s0 + $0x48] sm:$0xff] }
 0x324   :  { %8998 = vpow2.f32 %v5727_v40 }
 0x32b   :  { %v8993_v3 = vpop.eup %8992 }
 0x32c   :  { %v897_v12 = vadd.f32 1.0, %v8993_v3  ;;  %v8995_v22 = vpop.eup %8994 }
 0x32d   :  { %v898_v32 = vadd.f32 1.0, %v8995_v22  ;;  %v8997_v39 = vpop.eup %8996 }
 0x32e   :  { %9000 = vrcp.f32 %v897_v12  ;;  %v8999_v63 = vpop.eup %8998 }
 0x32f   :  { %9002 = vrcp.f32 %v898_v32  ;;  %v899_v19 = vadd.f32 1.0, %v8999_v63 }
 0x331   :  { %9004 = vrcp.f32 %v899_v19 }
 0x338   :  { %v9001_v13 = vpop.eup %9000 }
 0x339   :  { %v908_v57 = vmul.f32 %v9001_v13, %v8997_v39  ;;  %v9003_v38 = vpop.eup %9002 }
 0x33a   :  { %v907_v5 = vmul.f32 %v9003_v38, %v12521_v11  ;;  %v5730_v38 = vld [vmem:[%s12224_s0 + $0x50] sm:$0xff] }
 0x33c   :  { %v983_v40 = vpop.f32.mrb[8].mxu0  ;;  %v1054_v12 = vpop.f32.mrb[8].mxu1  ;;  %v10614_v3 = vadd.f32 %v908_v57, %v907_v5  ;;  %v5731_v57 = vld [vmem:[%s12224_s0 + $0x58] sm:$0xff] }
 0x33d   :  { %v1059_v22 = vadd.f32 %v5728_v23, %v983_v40  ;;  %v985_v36 = vpop.f32.mrb[9].mxu0  ;;  %v1056_v32 = vpop.f32.mrb[9].mxu1  ;;  %v1061_v11 = vadd.f32 %v5730_v38, %v1054_v12 }
 0x33e   :  { %12522 = vst [vmem:[#allocation4_spill] sm:$0xff] %v10614_v3  ;;  %v1060_v39 = vadd.f32 %v5729_v54, %v985_v36  ;;  %9006 = vtanh.f32 %v10614_v3  ;;  %v9005_v23 = vpop.eup %9004  ;;  %v1062_v5 = vadd.f32 %v5731_v57, %v1056_v32 }
 0x33f   :  { %v5732_v63 = vmul.f32 -1.442695, %v1059_v22  ;;  %v5734_v19 = vmul.f32 -1.442695, %v1061_v11 }
 0x340   :  { %v5733_v13 = vmul.f32 -1.442695, %v1060_v39 }
 0x341   :  { %9008 = vpow2.f32 %v5732_v63 }
 0x342   :  { %9010 = vpow2.f32 %v5733_v13 }
 0x343   :  { %9012 = vtanh.f32 %v1062_v5 }
 0x344   :  { %9014 = vpow2.f32 %v5734_v19  ;;  %v12528_v19 = vld [vmem:[#allocation8_spill] sm:$0xff] }
 0x348   :  { %v9007_v40 = vpop.eup %9006 }
 0x349   :  { %v911_v54 = vmul.f32 %v9007_v40, %v9005_v23  ;;  %v12527_v40 = vld [vmem:[#allocation10_spill] sm:$0xff] }
 0x34b   :  { %v9009_v22 = vpop.eup %9008  ;;  %1151 = vmatprep.mubr.f32.mxu0 %v911_v54  ;;  %1222 = vmatprep.mubr.f32.mxu1 %v911_v54  ;;  %v12529_v54 = vld [vmem:[#allocation11_spill] sm:$0xff] }
 0x34c   :  { %v1072_v36 = vadd.f32 1.0, %v9009_v22  ;;  %v9011_v39 = vpop.eup %9010  ;;  %v12530_v22 = vld [vmem:[#allocation12_spill] sm:$0xff] }
 0x34d   :  { %v1073_v63 = vadd.f32 1.0, %v9011_v39  ;;  %v9013_v12 = vpop.eup %9012  ;;  %v12532_v39 = vld [vmem:[#allocation14_spill] sm:$0xff] }
 0x34e   :  { %9016 = vrcp.f32 %v1072_v36  ;;  %v9015_v13 = vpop.eup %9014  ;;  %v12531_v36 = vld [vmem:[#allocation13_spill] sm:$0xff] }
 0x34f   :  { %9018 = vrcp.f32 %v1073_v63  ;;  %v1074_v53 = vadd.f32 1.0, %v9015_v13  ;;  %v12533_v63 = vld [vmem:[#allocation15_spill] sm:$0xff]  ;;  %v12535_v13 = vld [vmem:[#allocation17_spill] sm:$0xff] }
 0x351   :  { %9020 = vrcp.f32 %v1074_v53  ;;  %v12523_v53 = vld [vmem:[#allocation7_spill] sm:$0xff] }
 0x358   :  { %v9017_v38 = vpop.eup %9016 }
 0x359   :  { %v1083_v3 = vmul.f32 %v9017_v38, %v9013_v12  ;;  %v9019_v44 = vpop.eup %9018  ;;  %v12534_v12 = vld [vmem:[#allocation16_spill] sm:$0xff]  ;;  %v12536_v38 = vld [vmem:[#allocation18_spill] sm:$0xff] }
 0x35a   :  { %v1082_v32 = vmul.f32 %v9019_v44, %v10502_v29  ;;  %v12524_v29 = vld [vmem:[#allocation5_spill] sm:$0xff] }
 0x35b   :  { %v9021_v57 = vpop.eup %9020  ;;  %v12525_v44 = vld [vmem:[#allocation9_spill] sm:$0xff] }
 0x35c   :  { %v10624_v11 = vadd.f32 %v1083_v3, %v1082_v32  ;;  %v12526_v3 = vld [vmem:[#allocation6_spill] sm:$0xff]  ;;  %v12537_v32 = vld [vmem:[#allocation19_spill] sm:$0xff] }
 0x35e   :  { %9022 = vtanh.f32 %v10624_v11 }
 0x368   :  { %v9023_v23 = vpop.eup %9022 }
 0x369   :  { %v1086_v5 = vmul.f32 %v9023_v23, %v9021_v57  ;;  %v12538_v57 = vld [vmem:[#allocation20_spill] sm:$0xff]  ;;  %v12539_v23 = vld [vmem:[#allocation21_spill] sm:$0xff] }
 0x36b   :  { %1152 = vmatmul.mubr.f32.vlgmr.msra.gmra.mrb[10].mxu0 %v1086_v5  ;;  %1223 = vmatmul.mubr.f32.vlgmr.msra.gmra.mrb[10].mxu1 %v1086_v5 }
 0x36c   :  { %6450 = vmatpush1.bf16.msra.mxu0 %v9508_v8  ;;  %6482 = vmatpush1.bf16.msra.mxu1 %v9557_v25 }
 0x36d   :  { %6452 = vmatprep.subr.bf16.mxu0 %v9510_v9  ;;  %6484 = vmatprep.subr.bf16.mxu1 %v9582_v33 }
 0x36e   :  { %1322 = vmatprep.mubr.f32.mxu0 %v12411_v2  ;;  %1393 = vmatprep.mubr.f32.mxu1 %v12411_v2 }
 0x370   :  { %6454 = vmatpush1.bf16.msra.mxu0 %v9526_v14  ;;  %6486 = vmatpush1.bf16.msra.mxu1 %v9593_v37 }
 0x371   :  { %6456 = vmatprep.subr.bf16.mxu0 %v9535_v17  ;;  %6488 = vmatprep.subr.bf16.mxu1 %v9617_v45 }
 0x374   :  { %6458 = vmatpush1.bf16.msra.mxu0 %v9560_v26  ;;  %6490 = vmatpush1.bf16.msra.mxu1 %v9626_v48 }
 0x375   :  { %6460 = vmatprep.subr.bf16.mxu0 %v9573_v30  ;;  %6492 = vmatprep.subr.bf16.mxu1 %v9638_v52 }
 0x378   :  { %6462 = vmatpush1.bf16.msra.mxu0 %v9609_v42  ;;  %6494 = vmatpush1.bf16.msra.mxu1 %v9668_v62 }
 0x379   :  { %6464 = vmatprep.subr.bf16.mxu0 %v9620_v46  ;;  %6496 = vmatprep.subr.bf16.mxu1 %v9674_v0 }
 0x37c   :  { %6466 = vmatpush1.bf16.msra.mxu0 %v9647_v55  ;;  %6498 = vmatpush1.bf16.msra.mxu1 %v9704_v15 }
 0x37d   :  { %6468 = vmatprep.subr.bf16.mxu0 %v9656_v58  ;;  %6500 = vmatprep.subr.bf16.mxu1 %v9710_v18 }
 0x380   :  { %6470 = vmatpush1.bf16.msra.mxu0 %v9689_v7  ;;  %6502 = vmatpush1.bf16.msra.mxu1 %v9737_v31 }
 0x381   :  { %6472 = vmatprep.subr.bf16.mxu0 %v9692_v10  ;;  %6504 = vmatprep.subr.bf16.mxu1 %v9743_v34 }
 0x384   :  { %6474 = vmatpush1.bf16.msra.mxu0 %v9725_v24  ;;  %6506 = vmatpush1.bf16.msra.mxu1 %v9765_v43 }
 0x385   :  { %6476 = vmatprep.subr.bf16.mxu0 %v9728_v27  ;;  %6508 = vmatprep.subr.bf16.mxu1 %v9779_v51 }
 0x388   :  { %6478 = vmatpush1.bf16.msra.mxu0 %v9761_v41  ;;  %6510 = vmatpush1.bf16.msra.mxu1 %v9800_v61 }
 0x389   :  { %6512 = vmatprep.subr.bf16.mxu0 %v9770_v47  ;;  %6576 = vmatprep.subr.bf16.mxu1 %v9815_v6 }
 0x38b   :  { %1323 = vmatmul.mubr.f32.vlgmr.msra.gmra.mrb[12].mxu0 %v1086_v5  ;;  %1394 = vmatmul.mubr.f32.vlgmr.msra.gmra.mrb[12].mxu1 %v1086_v5  ;;  %v12540_v5 = vld [vmem:[#allocation22_spill] sm:$0xff] }
 0x38c   :  { %6514 = vmatpush1.bf16.msra.mxu0 %v9797_v60  ;;  %6578 = vmatpush1.bf16.msra.mxu1 %v9838_v21 }
 0x38d   :  { %6516 = vmatprep.subr.bf16.mxu0 %v9806_v1  ;;  %6580 = vmatprep.subr.bf16.mxu1 %v9853_v35 }
 0x390   :  { %6518 = vmatpush1.bf16.msra.mxu0 %v9834_v20  ;;  %6582 = vmatpush1.bf16.msra.mxu1 %v9875_v50 }
 0x391   :  { %6520 = vmatprep.subr.bf16.mxu0 %v9844_v28  ;;  %6584 = vmatprep.subr.bf16.mxu1 %v9890_v59 }
 0x394   :  { %6522 = vmatpush1.bf16.msra.mxu0 %v9872_v49  ;;  %6586 = vmatpush1.bf16.msra.mxu1 %v9912_v16 }
 0x395   :  { %6524 = vmatprep.subr.bf16.mxu0 %v12465_v56  ;;  %6588 = vmatprep.subr.bf16.mxu1 %v12523_v53 }
 0x398   :  { %6526 = vmatpush1.bf16.msra.mxu0 %v12524_v29  ;;  %6590 = vmatpush1.bf16.msra.mxu1 %v12525_v44 }
 0x399   :  { %6528 = vmatprep.subr.bf16.mxu0 %v12526_v3  ;;  %6592 = vmatprep.subr.bf16.mxu1 %v12527_v40  ;;  %v12578_v3 = vld [vmem:[#allocation58_spill] sm:$0xff] }
 0x39c   :  { %6530 = vmatpush1.bf16.msra.mxu0 %v12528_v19  ;;  %6594 = vmatpush1.bf16.msra.mxu1 %v12529_v54  ;;  %v12576_v54 = vld [vmem:[#allocation56_spill] sm:$0xff] }
 0x39d   :  { %6532 = vmatprep.subr.bf16.mxu0 %v12530_v22  ;;  %6596 = vmatprep.subr.bf16.mxu1 %v12531_v36  ;;  %v12541_v22 = vld [vmem:[#allocation23_spill] sm:$0xff]  ;;  %v12542_v36 = vld [vmem:[#allocation24_spill] sm:$0xff] }
 0x3a0   :  { %6534 = vmatpush1.bf16.msra.mxu0 %v12532_v39  ;;  %6598 = vmatpush1.bf16.msra.mxu1 %v12533_v63  ;;  %v12543_v39 = vld [vmem:[#allocation25_spill] sm:$0xff]  ;;  %v12544_v63 = vld [vmem:[#allocation26_spill] sm:$0xff] }
 0x3a1   :  { %6536 = vmatprep.subr.bf16.mxu0 %v12534_v12  ;;  %6600 = vmatprep.subr.bf16.mxu1 %v12535_v13  ;;  %v12545_v12 = vld [vmem:[#allocation27_spill] sm:$0xff]  ;;  %v12546_v13 = vld [vmem:[#allocation28_spill] sm:$0xff] }
 0x3a4   :  { %6538 = vmatpush1.bf16.msra.mxu0 %v12536_v38  ;;  %6602 = vmatpush1.bf16.msra.mxu1 %v12537_v32  ;;  %v12547_v38 = vld [vmem:[#allocation29_spill] sm:$0xff]  ;;  %v12548_v32 = vld [vmem:[#allocation30_spill] sm:$0xff] }
 0x3a5   :  { %6540 = vmatprep.subr.bf16.mxu0 %v12538_v57  ;;  %6604 = vmatprep.subr.bf16.mxu1 %v12539_v23  ;;  %v12549_v57 = vld [vmem:[#allocation31_spill] sm:$0xff]  ;;  %v12550_v23 = vld [vmem:[#allocation32_spill] sm:$0xff] }
 0x3a8   :  { %6542 = vmatpush1.bf16.msra.mxu0 %v12540_v5  ;;  %6606 = vmatpush1.bf16.msra.mxu1 %v12541_v22  ;;  %v12551_v5 = vld [vmem:[#allocation33_spill] sm:$0xff]  ;;  %v12552_v22 = vld [vmem:[#allocation34_spill] sm:$0xff] }
 0x3a9   :  { %6544 = vmatprep.subr.bf16.mxu0 %v12542_v36  ;;  %6608 = vmatprep.subr.bf16.mxu1 %v12543_v39  ;;  %v12553_v36 = vld [vmem:[#allocation35_spill] sm:$0xff]  ;;  %v12554_v39 = vld [vmem:[#allocation36_spill] sm:$0xff] }
 0x3ac   :  { %6546 = vmatpush1.bf16.msra.mxu0 %v12544_v63  ;;  %6610 = vmatpush1.bf16.msra.mxu1 %v12545_v12  ;;  %v12555_v63 = vld [vmem:[#allocation37_spill] sm:$0xff]  ;;  %v12556_v12 = vld [vmem:[#allocation38_spill] sm:$0xff] }
 0x3ad   :  { %6548 = vmatprep.subr.bf16.mxu0 %v12546_v13  ;;  %6612 = vmatprep.subr.bf16.mxu1 %v12547_v38  ;;  %v12557_v13 = vld [vmem:[#allocation39_spill] sm:$0xff]  ;;  %v12558_v38 = vld [vmem:[#allocation40_spill] sm:$0xff] }
 0x3b0   :  { %6550 = vmatpush1.bf16.msra.mxu0 %v12548_v32  ;;  %6614 = vmatpush1.bf16.msra.mxu1 %v12549_v57  ;;  %v12559_v32 = vld [vmem:[#allocation41_spill] sm:$0xff]  ;;  %v12560_v57 = vld [vmem:[#allocation42_spill] sm:$0xff] }
 0x3b1   :  { %6552 = vmatprep.subr.bf16.mxu0 %v12550_v23  ;;  %6616 = vmatprep.subr.bf16.mxu1 %v12551_v5  ;;  %v12561_v23 = vld [vmem:[#allocation43_spill] sm:$0xff]  ;;  %v12562_v5 = vld [vmem:[#allocation44_spill] sm:$0xff] }
 0x3b4   :  { %6554 = vmatpush1.bf16.msra.mxu0 %v12552_v22  ;;  %6618 = vmatpush1.bf16.msra.mxu1 %v12553_v36  ;;  %v12563_v22 = vld [vmem:[#allocation45_spill] sm:$0xff]  ;;  %v12564_v36 = vld [vmem:[#allocation46_spill] sm:$0xff] }
 0x3b5   :  { %6556 = vmatprep.subr.bf16.mxu0 %v12554_v39  ;;  %6620 = vmatprep.subr.bf16.mxu1 %v12555_v63  ;;  %v12565_v39 = vld [vmem:[#allocation47_spill] sm:$0xff]  ;;  %v12566_v63 = vld [vmem:[#allocation48_spill] sm:$0xff] }
 0x3b8   :  { %6558 = vmatpush1.bf16.msra.mxu0 %v12556_v12  ;;  %6622 = vmatpush1.bf16.msra.mxu1 %v12557_v13  ;;  %v12567_v12 = vld [vmem:[#allocation49_spill] sm:$0xff]  ;;  %v12568_v13 = vld [vmem:[#allocation50_spill] sm:$0xff] }
 0x3b9   :  { %6560 = vmatprep.subr.bf16.mxu0 %v12558_v38  ;;  %6624 = vmatprep.subr.bf16.mxu1 %v12559_v32  ;;  %v12569_v38 = vld [vmem:[#allocation51_spill] sm:$0xff]  ;;  %v12570_v32 = vld [vmem:[#allocation52_spill] sm:$0xff] }
 0x3bc   :  { %6562 = vmatpush1.bf16.msra.mxu0 %v12560_v57  ;;  %6626 = vmatpush1.bf16.msra.mxu1 %v12561_v23  ;;  %v12571_v57 = vld [vmem:[#allocation53_spill] sm:$0xff]  ;;  %v12572_v23 = vld [vmem:[#allocation54_spill] sm:$0xff] }
 0x3bd   :  { %6564 = vmatprep.subr.bf16.mxu0 %v12562_v5  ;;  %6628 = vmatprep.subr.bf16.mxu1 %v12563_v22  ;;  %v12573_v5 = vld [vmem:[#allocation55_spill] sm:$0xff]  ;;  %v12574_v22 = vld [vmem:[#allocation2_spill] sm:$0xff] }
 0x3c0   :  { %6566 = vmatpush1.bf16.msra.mxu0 %v12564_v36  ;;  %6630 = vmatpush1.bf16.msra.mxu1 %v12565_v39  ;;  %v12575_v36 = vld [vmem:[#allocation3_spill] sm:$0xff] }
 0x3c1   :  { %6568 = vmatprep.subr.bf16.mxu0 %v12566_v63  ;;  %6632 = vmatprep.subr.bf16.mxu1 %v12567_v12 }
 0x3c4   :  { %6570 = vmatpush1.bf16.msra.mxu0 %v12568_v13  ;;  %6634 = vmatpush1.bf16.msra.mxu1 %v12569_v38 }
 0x3c5   :  { %6572 = vmatprep.subr.bf16.mxu0 %v12570_v32  ;;  %6636 = vmatprep.subr.bf16.mxu1 %v12571_v57  ;;  %v12577_v57 = vld [vmem:[#allocation57_spill] sm:$0xff] }
 0x3c8   :  { %6574 = vmatpush1.bf16.msra.mxu0 %v12572_v23  ;;  %6638 = vmatpush1.bf16.msra.mxu1 %v12573_v5 }
 0x3c9   :  { %6640 = vmatprep.subr.bf16.mxu0 %v12574_v22  ;;  %6672 = vmatprep.subr.bf16.mxu1 %v12575_v36 }
 0x43e   :  { %v1153_v39 = vpop.f32.mrb[10].mxu0  ;;  %v1224_v63 = vpop.f32.mrb[10].mxu1 }
 0x43f   :  { %v1154_v12 = vadd.f32 %v1153_v39, %v12576_v54  ;;  %v1155_v19 = vpop.f32.mrb[11].mxu0  ;;  %v1226_v13 = vpop.f32.mrb[11].mxu1  ;;  %v1225_v23 = vadd.f32 %v1224_v63, %v12577_v57  ;;  %v5738_v63 = vld [vmem:[%s12224_s0 + $0x60] sm:$0xff] }
 0x440   :  { %v1156_v38 = vadd.f32 %v1155_v19, %v10476_v4  ;;  %v1227_v5 = vadd.f32 %v1226_v13, %v12578_v3  ;;  %v12579_v13 = vld [vmem:[#allocation4_spill] sm:$0xff] }
 0x441   :  { %v5735_v40 = vmul.f32 -1.442695, %v1154_v12  ;;  %v5737_v44 = vmul.f32 -1.442695, %v1225_v23 }
 0x442   :  { %v5736_v32 = vmul.f32 -1.442695, %v1156_v38 }
 0x443   :  { %9024 = vpow2.f32 %v5735_v40 }
 0x444   :  { %9026 = vpow2.f32 %v5736_v32 }
 0x445   :  { %9028 = vtanh.f32 %v1227_v5 }
 0x446   :  { %9030 = vpow2.f32 %v5737_v44 }
 0x44d   :  { %v9025_v22 = vpop.eup %9024 }
 0x44e   :  { %v1238_v29 = vadd.f32 1.0, %v9025_v22  ;;  %v9027_v36 = vpop.eup %9026  ;;  %v5739_v22 = vld [vmem:[%s12224_s0 + $0x68] sm:$0xff] }
 0x44f   :  { %v1239_v39 = vadd.f32 1.0, %v9027_v36  ;;  %v9029_v54 = vpop.eup %9028 }
 0x450   :  { %9032 = vrcp.f32 %v1238_v29  ;;  %v9031_v53 = vpop.eup %9030 }
 0x451   :  { %9034 = vrcp.f32 %v1239_v39  ;;  %v1240_v40 = vadd.f32 1.0, %v9031_v53 }
 0x453   :  { %9036 = vrcp.f32 %v1240_v40 }
 0x45a   :  { %v9033_v19 = vpop.eup %9032 }
 0x45b   :  { %v1249_v12 = vmul.f32 %v9033_v19, %v9029_v54  ;;  %v9035_v38 = vpop.eup %9034 }
 0x45c   :  { %v1248_v32 = vmul.f32 %v9035_v38, %v12579_v13  ;;  %v5740_v38 = vld [vmem:[%s12224_s0 + $0x70] sm:$0xff] }
 0x45e   :  { %v1324_v44 = vpop.f32.mrb[12].mxu0  ;;  %v1395_v29 = vpop.f32.mrb[12].mxu1  ;;  %v10736_v36 = vadd.f32 %v1249_v12, %v1248_v32  ;;  %v5741_v12 = vld [vmem:[%s12224_s0 + $0x78] sm:$0xff] }
 0x45f   :  { %v1400_v23 = vadd.f32 %v5738_v63, %v1324_v44  ;;  %v1326_v5 = vpop.f32.mrb[13].mxu0  ;;  %v1397_v39 = vpop.f32.mrb[13].mxu1  ;;  %v1402_v13 = vadd.f32 %v5740_v38, %v1395_v29 }
 0x460   :  { %12580 = vst [vmem:[#allocation59_spill] sm:$0xff] %v10736_v36  ;;  %v1401_v54 = vadd.f32 %v5739_v22, %v1326_v5  ;;  %9038 = vtanh.f32 %v10736_v36  ;;  %v9037_v63 = vpop.eup %9036  ;;  %v1403_v32 = vadd.f32 %v5741_v12, %v1397_v39 }
 0x461   :  { %v5742_v53 = vmul.f32 -1.442695, %v1400_v23  ;;  %v5744_v40 = vmul.f32 -1.442695, %v1402_v13 }
 0x462   :  { %v5743_v19 = vmul.f32 -1.442695, %v1401_v54 }
 0x463   :  { %9040 = vpow2.f32 %v5742_v53 }
 0x464   :  { %9042 = vpow2.f32 %v5743_v19 }
 0x465   :  { %9044 = vtanh.f32 %v1403_v32 }
 0x466   :  { %9046 = vpow2.f32 %v5744_v40  ;;  %v12586_v40 = vld [vmem:[#allocation8_spill] sm:$0xff] }
 0x46a   :  { %v9039_v44 = vpop.eup %9038 }
 0x46b   :  { %v1252_v22 = vmul.f32 %v9039_v44, %v9037_v63  ;;  %v12585_v44 = vld [vmem:[#allocation10_spill] sm:$0xff] }
 0x46d   :  { %v9041_v23 = vpop.eup %9040  ;;  %1492 = vmatprep.mubr.f32.mxu0 %v1252_v22  ;;  %1563 = vmatprep.mubr.f32.mxu1 %v1252_v22  ;;  %v12587_v22 = vld [vmem:[#allocation11_spill] sm:$0xff] }
 0x46e   :  { %v1413_v5 = vadd.f32 1.0, %v9041_v23  ;;  %v9043_v54 = vpop.eup %9042  ;;  %v12588_v23 = vld [vmem:[#allocation12_spill] sm:$0xff] }
 0x46f   :  { %v1414_v53 = vadd.f32 1.0, %v9043_v54  ;;  %v9045_v29 = vpop.eup %9044  ;;  %v12590_v54 = vld [vmem:[#allocation14_spill] sm:$0xff] }
 0x470   :  { %9048 = vrcp.f32 %v1413_v5  ;;  %v9047_v19 = vpop.eup %9046  ;;  %v12589_v5 = vld [vmem:[#allocation13_spill] sm:$0xff] }
 0x471   :  { %9050 = vrcp.f32 %v1414_v53  ;;  %v1415_v57 = vadd.f32 1.0, %v9047_v19  ;;  %v12591_v53 = vld [vmem:[#allocation15_spill] sm:$0xff]  ;;  %v12593_v19 = vld [vmem:[#allocation17_spill] sm:$0xff] }
 0x473   :  { %9052 = vrcp.f32 %v1415_v57  ;;  %v12583_v57 = vld [vmem:[#allocation9_spill] sm:$0xff] }
 0x47a   :  { %v9049_v38 = vpop.eup %9048 }
 0x47b   :  { %v1424_v36 = vmul.f32 %v9049_v38, %v9045_v29  ;;  %v9051_v3 = vpop.eup %9050  ;;  %v12592_v29 = vld [vmem:[#allocation16_spill] sm:$0xff]  ;;  %v12594_v38 = vld [vmem:[#allocation18_spill] sm:$0xff] }
 0x47c   :  { %v1423_v39 = vmul.f32 %v9051_v3, %v10624_v11  ;;  %v12581_v11 = vld [vmem:[#allocation7_spill] sm:$0xff]  ;;  %v12582_v3 = vld [vmem:[#allocation5_spill] sm:$0xff] }
 0x47d   :  { %v9053_v12 = vpop.eup %9052 }
 0x47e   :  { %v10746_v13 = vadd.f32 %v1424_v36, %v1423_v39  ;;  %v12584_v36 = vld [vmem:[#allocation6_spill] sm:$0xff]  ;;  %v12595_v39 = vld [vmem:[#allocation19_spill] sm:$0xff] }
 0x480   :  { %9054 = vtanh.f32 %v10746_v13 }
 0x48a   :  { %v9055_v63 = vpop.eup %9054 }
 0x48b   :  { %v1427_v32 = vmul.f32 %v9055_v63, %v9053_v12  ;;  %v12596_v12 = vld [vmem:[#allocation20_spill] sm:$0xff]  ;;  %v12597_v63 = vld [vmem:[#allocation21_spill] sm:$0xff] }
 0x48d   :  { %1493 = vmatmul.mubr.f32.vlgmr.msra.gmra.mrb[14].mxu0 %v1427_v32  ;;  %1564 = vmatmul.mubr.f32.vlgmr.msra.gmra.mrb[14].mxu1 %v1427_v32 }
 0x48e   :  { %6642 = vmatpush1.bf16.msra.mxu0 %v9508_v8  ;;  %6674 = vmatpush1.bf16.msra.mxu1 %v9557_v25 }
 0x48f   :  { %6644 = vmatprep.subr.bf16.mxu0 %v9510_v9  ;;  %6676 = vmatprep.subr.bf16.mxu1 %v9582_v33 }
 0x490   :  { %1663 = vmatprep.mubr.f32.mxu0 %v12411_v2  ;;  %1734 = vmatprep.mubr.f32.mxu1 %v12411_v2 }
 0x492   :  { %6646 = vmatpush1.bf16.msra.mxu0 %v9526_v14  ;;  %6678 = vmatpush1.bf16.msra.mxu1 %v9593_v37 }
 0x493   :  { %6648 = vmatprep.subr.bf16.mxu0 %v9535_v17  ;;  %6680 = vmatprep.subr.bf16.mxu1 %v9617_v45 }
 0x496   :  { %6650 = vmatpush1.bf16.msra.mxu0 %v9560_v26  ;;  %6682 = vmatpush1.bf16.msra.mxu1 %v9626_v48 }
 0x497   :  { %6652 = vmatprep.subr.bf16.mxu0 %v9573_v30  ;;  %6684 = vmatprep.subr.bf16.mxu1 %v9638_v52 }
 0x49a   :  { %6654 = vmatpush1.bf16.msra.mxu0 %v9609_v42  ;;  %6686 = vmatpush1.bf16.msra.mxu1 %v9668_v62 }
 0x49b   :  { %6656 = vmatprep.subr.bf16.mxu0 %v9620_v46  ;;  %6688 = vmatprep.subr.bf16.mxu1 %v9674_v0 }
 0x49e   :  { %6658 = vmatpush1.bf16.msra.mxu0 %v9647_v55  ;;  %6690 = vmatpush1.bf16.msra.mxu1 %v9704_v15 }
 0x49f   :  { %6660 = vmatprep.subr.bf16.mxu0 %v9656_v58  ;;  %6692 = vmatprep.subr.bf16.mxu1 %v9710_v18 }
 0x4a2   :  { %6662 = vmatpush1.bf16.msra.mxu0 %v9689_v7  ;;  %6694 = vmatpush1.bf16.msra.mxu1 %v9737_v31 }
 0x4a3   :  { %6664 = vmatprep.subr.bf16.mxu0 %v9692_v10  ;;  %6696 = vmatprep.subr.bf16.mxu1 %v9743_v34 }
 0x4a6   :  { %6666 = vmatpush1.bf16.msra.mxu0 %v9725_v24  ;;  %6698 = vmatpush1.bf16.msra.mxu1 %v9765_v43 }
 0x4a7   :  { %6668 = vmatprep.subr.bf16.mxu0 %v9728_v27  ;;  %6700 = vmatprep.subr.bf16.mxu1 %v9779_v51 }
 0x4aa   :  { %6670 = vmatpush1.bf16.msra.mxu0 %v9761_v41  ;;  %6702 = vmatpush1.bf16.msra.mxu1 %v9800_v61 }
 0x4ab   :  { %6704 = vmatprep.subr.bf16.mxu0 %v9770_v47  ;;  %6768 = vmatprep.subr.bf16.mxu1 %v9815_v6 }
 0x4ad   :  { %1664 = vmatmul.mubr.f32.vlgmr.msra.gmra.mrb[16].mxu0 %v1427_v32  ;;  %1735 = vmatmul.mubr.f32.vlgmr.msra.gmra.mrb[16].mxu1 %v1427_v32  ;;  %v12598_v32 = vld [vmem:[#allocation22_spill] sm:$0xff] }
 0x4ae   :  { %6706 = vmatpush1.bf16.msra.mxu0 %v9797_v60  ;;  %6770 = vmatpush1.bf16.msra.mxu1 %v9838_v21 }
 0x4af   :  { %6708 = vmatprep.subr.bf16.mxu0 %v9806_v1  ;;  %6772 = vmatprep.subr.bf16.mxu1 %v9853_v35 }
 0x4b2   :  { %6710 = vmatpush1.bf16.msra.mxu0 %v9834_v20  ;;  %6774 = vmatpush1.bf16.msra.mxu1 %v9875_v50 }
 0x4b3   :  { %6712 = vmatprep.subr.bf16.mxu0 %v9844_v28  ;;  %6776 = vmatprep.subr.bf16.mxu1 %v9890_v59 }
 0x4b6   :  { %6714 = vmatpush1.bf16.msra.mxu0 %v9872_v49  ;;  %6778 = vmatpush1.bf16.msra.mxu1 %v9912_v16 }
 0x4b7   :  { %6716 = vmatprep.subr.bf16.mxu0 %v12465_v56  ;;  %6780 = vmatprep.subr.bf16.mxu1 %v12581_v11 }
 0x4ba   :  { %6718 = vmatpush1.bf16.msra.mxu0 %v12582_v3  ;;  %6782 = vmatpush1.bf16.msra.mxu1 %v12583_v57 }
 0x4bb   :  { %6720 = vmatprep.subr.bf16.mxu0 %v12584_v36  ;;  %6784 = vmatprep.subr.bf16.mxu1 %v12585_v44  ;;  %v12636_v36 = vld [vmem:[#allocation58_spill] sm:$0xff] }
 0x4be   :  { %6722 = vmatpush1.bf16.msra.mxu0 %v12586_v40  ;;  %6786 = vmatpush1.bf16.msra.mxu1 %v12587_v22  ;;  %v12634_v22 = vld [vmem:[#allocation56_spill] sm:$0xff] }
 0x4bf   :  { %6724 = vmatprep.subr.bf16.mxu0 %v12588_v23  ;;  %6788 = vmatprep.subr.bf16.mxu1 %v12589_v5  ;;  %v12599_v23 = vld [vmem:[#allocation23_spill] sm:$0xff]  ;;  %v12600_v5 = vld [vmem:[#allocation24_spill] sm:$0xff] }
 0x4c2   :  { %6726 = vmatpush1.bf16.msra.mxu0 %v12590_v54  ;;  %6790 = vmatpush1.bf16.msra.mxu1 %v12591_v53  ;;  %v12601_v54 = vld [vmem:[#allocation25_spill] sm:$0xff]  ;;  %v12602_v53 = vld [vmem:[#allocation26_spill] sm:$0xff] }
 0x4c3   :  { %6728 = vmatprep.subr.bf16.mxu0 %v12592_v29  ;;  %6792 = vmatprep.subr.bf16.mxu1 %v12593_v19  ;;  %v12603_v29 = vld [vmem:[#allocation27_spill] sm:$0xff]  ;;  %v12604_v19 = vld [vmem:[#allocation28_spill] sm:$0xff] }
 0x4c6   :  { %6730 = vmatpush1.bf16.msra.mxu0 %v12594_v38  ;;  %6794 = vmatpush1.bf16.msra.mxu1 %v12595_v39  ;;  %v12605_v38 = vld [vmem:[#allocation29_spill] sm:$0xff]  ;;  %v12606_v39 = vld [vmem:[#allocation30_spill] sm:$0xff] }
 0x4c7   :  { %6732 = vmatprep.subr.bf16.mxu0 %v12596_v12  ;;  %6796 = vmatprep.subr.bf16.mxu1 %v12597_v63  ;;  %v12607_v12 = vld [vmem:[#allocation31_spill] sm:$0xff]  ;;  %v12608_v63 = vld [vmem:[#allocation32_spill] sm:$0xff] }
 0x4ca   :  { %6734 = vmatpush1.bf16.msra.mxu0 %v12598_v32  ;;  %6798 = vmatpush1.bf16.msra.mxu1 %v12599_v23  ;;  %v12609_v32 = vld [vmem:[#allocation33_spill] sm:$0xff]  ;;  %v12610_v23 = vld [vmem:[#allocation34_spill] sm:$0xff] }
 0x4cb   :  { %6736 = vmatprep.subr.bf16.mxu0 %v12600_v5  ;;  %6800 = vmatprep.subr.bf16.mxu1 %v12601_v54  ;;  %v12611_v5 = vld [vmem:[#allocation35_spill] sm:$0xff]  ;;  %v12612_v54 = vld [vmem:[#allocation36_spill] sm:$0xff] }
 0x4ce   :  { %6738 = vmatpush1.bf16.msra.mxu0 %v12602_v53  ;;  %6802 = vmatpush1.bf16.msra.mxu1 %v12603_v29  ;;  %v12613_v53 = vld [vmem:[#allocation37_spill] sm:$0xff]  ;;  %v12614_v29 = vld [vmem:[#allocation38_spill] sm:$0xff] }
 0x4cf   :  { %6740 = vmatprep.subr.bf16.mxu0 %v12604_v19  ;;  %6804 = vmatprep.subr.bf16.mxu1 %v12605_v38  ;;  %v12615_v19 = vld [vmem:[#allocation39_spill] sm:$0xff]  ;;  %v12616_v38 = vld [vmem:[#allocation40_spill] sm:$0xff] }
 0x4d2   :  { %6742 = vmatpush1.bf16.msra.mxu0 %v12606_v39  ;;  %6806 = vmatpush1.bf16.msra.mxu1 %v12607_v12  ;;  %v12617_v39 = vld [vmem:[#allocation41_spill] sm:$0xff]  ;;  %v12618_v12 = vld [vmem:[#allocation42_spill] sm:$0xff] }
 0x4d3   :  { %6744 = vmatprep.subr.bf16.mxu0 %v12608_v63  ;;  %6808 = vmatprep.subr.bf16.mxu1 %v12609_v32  ;;  %v12619_v63 = vld [vmem:[#allocation43_spill] sm:$0xff]  ;;  %v12620_v32 = vld [vmem:[#allocation44_spill] sm:$0xff] }
 0x4d6   :  { %6746 = vmatpush1.bf16.msra.mxu0 %v12610_v23  ;;  %6810 = vmatpush1.bf16.msra.mxu1 %v12611_v5  ;;  %v12621_v23 = vld [vmem:[#allocation45_spill] sm:$0xff]  ;;  %v12622_v5 = vld [vmem:[#allocation46_spill] sm:$0xff] }
 0x4d7   :  { %6748 = vmatprep.subr.bf16.mxu0 %v12612_v54  ;;  %6812 = vmatprep.subr.bf16.mxu1 %v12613_v53  ;;  %v12623_v54 = vld [vmem:[#allocation47_spill] sm:$0xff]  ;;  %v12624_v53 = vld [vmem:[#allocation48_spill] sm:$0xff] }
 0x4da   :  { %6750 = vmatpush1.bf16.msra.mxu0 %v12614_v29  ;;  %6814 = vmatpush1.bf16.msra.mxu1 %v12615_v19  ;;  %v12625_v29 = vld [vmem:[#allocation49_spill] sm:$0xff]  ;;  %v12626_v19 = vld [vmem:[#allocation50_spill] sm:$0xff] }
 0x4db   :  { %6752 = vmatprep.subr.bf16.mxu0 %v12616_v38  ;;  %6816 = vmatprep.subr.bf16.mxu1 %v12617_v39  ;;  %v12627_v38 = vld [vmem:[#allocation51_spill] sm:$0xff]  ;;  %v12628_v39 = vld [vmem:[#allocation52_spill] sm:$0xff] }
 0x4de   :  { %6754 = vmatpush1.bf16.msra.mxu0 %v12618_v12  ;;  %6818 = vmatpush1.bf16.msra.mxu1 %v12619_v63  ;;  %v12629_v12 = vld [vmem:[#allocation53_spill] sm:$0xff]  ;;  %v12630_v63 = vld [vmem:[#allocation54_spill] sm:$0xff] }
 0x4df   :  { %6756 = vmatprep.subr.bf16.mxu0 %v12620_v32  ;;  %6820 = vmatprep.subr.bf16.mxu1 %v12621_v23  ;;  %v12631_v32 = vld [vmem:[#allocation55_spill] sm:$0xff]  ;;  %v12632_v23 = vld [vmem:[#allocation2_spill] sm:$0xff] }
 0x4e2   :  { %6758 = vmatpush1.bf16.msra.mxu0 %v12622_v5  ;;  %6822 = vmatpush1.bf16.msra.mxu1 %v12623_v54  ;;  %v12633_v5 = vld [vmem:[#allocation3_spill] sm:$0xff] }
 0x4e3   :  { %6760 = vmatprep.subr.bf16.mxu0 %v12624_v53  ;;  %6824 = vmatprep.subr.bf16.mxu1 %v12625_v29 }
 0x4e6   :  { %6762 = vmatpush1.bf16.msra.mxu0 %v12626_v19  ;;  %6826 = vmatpush1.bf16.msra.mxu1 %v12627_v38 }
 0x4e7   :  { %6764 = vmatprep.subr.bf16.mxu0 %v12628_v39  ;;  %6828 = vmatprep.subr.bf16.mxu1 %v12629_v12  ;;  %v12635_v12 = vld [vmem:[#allocation57_spill] sm:$0xff] }
 0x4ea   :  { %6766 = vmatpush1.bf16.msra.mxu0 %v12630_v63  ;;  %6830 = vmatpush1.bf16.msra.mxu1 %v12631_v32 }
 0x4eb   :  { %6832 = vmatprep.subr.bf16.mxu0 %v12632_v23  ;;  %6864 = vmatprep.subr.bf16.mxu1 %v12633_v5 }
 0x560   :  { %v1494_v54 = vpop.f32.mrb[14].mxu0  ;;  %v1565_v53 = vpop.f32.mrb[14].mxu1 }
 0x561   :  { %v1495_v29 = vadd.f32 %v1494_v54, %v12634_v22  ;;  %v1496_v40 = vpop.f32.mrb[15].mxu0  ;;  %v1567_v19 = vpop.f32.mrb[15].mxu1  ;;  %v1566_v63 = vadd.f32 %v1565_v53, %v12635_v12  ;;  %v5748_v53 = vld [vmem:[%s12224_s0 + $0x80] sm:$0xff] }
 0x562   :  { %v1497_v38 = vadd.f32 %v1496_v40, %v10476_v4  ;;  %v1568_v32 = vadd.f32 %v1567_v19, %v12636_v36  ;;  %v12637_v19 = vld [vmem:[#allocation59_spill] sm:$0xff] }
 0x563   :  { %v5745_v44 = vmul.f32 -1.442695, %v1495_v29  ;;  %v5747_v57 = vmul.f32 -1.442695, %v1566_v63 }
 0x564   :  { %v5746_v39 = vmul.f32 -1.442695, %v1497_v38 }
 0x565   :  { %9056 = vpow2.f32 %v5745_v44 }
 0x566   :  { %9058 = vpow2.f32 %v5746_v39 }
 0x567   :  { %9060 = vtanh.f32 %v1568_v32 }
 0x568   :  { %9062 = vpow2.f32 %v5747_v57 }
 0x56f   :  { %v9057_v23 = vpop.eup %9056 }
 0x570   :  { %v1579_v3 = vadd.f32 1.0, %v9057_v23  ;;  %v9059_v5 = vpop.eup %9058  ;;  %v5749_v23 = vld [vmem:[%s12224_s0 + $0x88] sm:$0xff] }
 0x571   :  { %v1580_v54 = vadd.f32 1.0, %v9059_v5  ;;  %v9061_v22 = vpop.eup %9060 }
 0x572   :  { %9064 = vrcp.f32 %v1579_v3  ;;  %v9063_v11 = vpop.eup %9062 }
 0x573   :  { %9066 = vrcp.f32 %v1580_v54  ;;  %v1581_v44 = vadd.f32 1.0, %v9063_v11 }
 0x575   :  { %9068 = vrcp.f32 %v1581_v44 }
 0x57c   :  { %v9065_v40 = vpop.eup %9064 }
 0x57d   :  { %v1590_v29 = vmul.f32 %v9065_v40, %v9061_v22  ;;  %v9067_v38 = vpop.eup %9066 }
 0x57e   :  { %v1589_v39 = vmul.f32 %v9067_v38, %v12637_v19  ;;  %v5750_v38 = vld [vmem:[%s12224_s0 + $0x90] sm:$0xff] }
 0x580   :  { %v1665_v57 = vpop.f32.mrb[16].mxu0  ;;  %v1736_v3 = vpop.f32.mrb[16].mxu1  ;;  %v10858_v5 = vadd.f32 %v1590_v29, %v1589_v39  ;;  %v5751_v29 = vld [vmem:[%s12224_s0 + $0x98] sm:$0xff] }
 0x581   :  { %v1741_v63 = vadd.f32 %v5748_v53, %v1665_v57  ;;  %v1667_v32 = vpop.f32.mrb[17].mxu0  ;;  %v1738_v54 = vpop.f32.mrb[17].mxu1  ;;  %v1743_v19 = vadd.f32 %v5750_v38, %v1736_v3 }
 0x582   :  { %12638 = vst [vmem:[#allocation4_spill] sm:$0xff] %v10858_v5  ;;  %v1742_v22 = vadd.f32 %v5749_v23, %v1667_v32  ;;  %9070 = vtanh.f32 %v10858_v5  ;;  %v9069_v53 = vpop.eup %9068  ;;  %v1744_v39 = vadd.f32 %v5751_v29, %v1738_v54 }
 0x583   :  { %v5752_v11 = vmul.f32 -1.442695, %v1741_v63  ;;  %v5754_v44 = vmul.f32 -1.442695, %v1743_v19 }
 0x584   :  { %v5753_v40 = vmul.f32 -1.442695, %v1742_v22 }
 0x585   :  { %9072 = vpow2.f32 %v5752_v11 }
 0x586   :  { %9074 = vpow2.f32 %v5753_v40 }
 0x587   :  { %9076 = vtanh.f32 %v1744_v39 }
 0x588   :  { %9078 = vpow2.f32 %v5754_v44  ;;  %v12644_v44 = vld [vmem:[#allocation8_spill] sm:$0xff] }
 0x58c   :  { %v9071_v57 = vpop.eup %9070 }
 0x58d   :  { %v1593_v23 = vmul.f32 %v9071_v57, %v9069_v53  ;;  %v12643_v57 = vld [vmem:[#allocation10_spill] sm:$0xff] }
 0x58f   :  { %v9073_v63 = vpop.eup %9072  ;;  %1833 = vmatprep.mubr.f32.mxu0 %v1593_v23  ;;  %1904 = vmatprep.mubr.f32.mxu1 %v1593_v23  ;;  %v12645_v23 = vld [vmem:[#allocation11_spill] sm:$0xff] }
 0x590   :  { %v1754_v32 = vadd.f32 1.0, %v9073_v63  ;;  %v9075_v22 = vpop.eup %9074  ;;  %v12646_v63 = vld [vmem:[#allocation12_spill] sm:$0xff] }
 0x591   :  { %v1755_v11 = vadd.f32 1.0, %v9075_v22  ;;  %v9077_v3 = vpop.eup %9076  ;;  %v12648_v22 = vld [vmem:[#allocation14_spill] sm:$0xff] }
 0x592   :  { %9080 = vrcp.f32 %v1754_v32  ;;  %v9079_v40 = vpop.eup %9078  ;;  %v12647_v32 = vld [vmem:[#allocation13_spill] sm:$0xff] }
 0x593   :  { %9082 = vrcp.f32 %v1755_v11  ;;  %v1756_v12 = vadd.f32 1.0, %v9079_v40  ;;  %v12649_v11 = vld [vmem:[#allocation15_spill] sm:$0xff]  ;;  %v12651_v40 = vld [vmem:[#allocation17_spill] sm:$0xff] }
 0x595   :  { %9084 = vrcp.f32 %v1756_v12  ;;  %v12641_v12 = vld [vmem:[#allocation9_spill] sm:$0xff] }
 0x59c   :  { %v9081_v38 = vpop.eup %9080 }
 0x59d   :  { %v1765_v5 = vmul.f32 %v9081_v38, %v9077_v3  ;;  %v9083_v36 = vpop.eup %9082  ;;  %v12650_v3 = vld [vmem:[#allocation16_spill] sm:$0xff]  ;;  %v12652_v38 = vld [vmem:[#allocation18_spill] sm:$0xff] }
 0x59e   :  { %v1764_v54 = vmul.f32 %v9083_v36, %v10746_v13  ;;  %v12639_v13 = vld [vmem:[#allocation7_spill] sm:$0xff]  ;;  %v12640_v36 = vld [vmem:[#allocation5_spill] sm:$0xff] }
 0x59f   :  { %v9085_v29 = vpop.eup %9084 }
 0x5a0   :  { %v10868_v19 = vadd.f32 %v1765_v5, %v1764_v54  ;;  %v12642_v5 = vld [vmem:[#allocation6_spill] sm:$0xff]  ;;  %v12653_v54 = vld [vmem:[#allocation19_spill] sm:$0xff] }
 0x5a2   :  { %9086 = vtanh.f32 %v10868_v19 }
 0x5ac   :  { %v9087_v53 = vpop.eup %9086 }
 0x5ad   :  { %v1768_v39 = vmul.f32 %v9087_v53, %v9085_v29  ;;  %v12654_v29 = vld [vmem:[#allocation20_spill] sm:$0xff]  ;;  %v12655_v53 = vld [vmem:[#allocation21_spill] sm:$0xff] }
 0x5af   :  { %1834 = vmatmul.mubr.f32.vlgmr.msra.gmra.mrb[18].mxu0 %v1768_v39  ;;  %1905 = vmatmul.mubr.f32.vlgmr.msra.gmra.mrb[18].mxu1 %v1768_v39 }
 0x5b0   :  { %6834 = vmatpush1.bf16.msra.mxu0 %v9508_v8  ;;  %6866 = vmatpush1.bf16.msra.mxu1 %v9557_v25 }
 0x5b1   :  { %6836 = vmatprep.subr.bf16.mxu0 %v9510_v9  ;;  %6868 = vmatprep.subr.bf16.mxu1 %v9582_v33 }
 0x5b2   :  { %2004 = vmatprep.mubr.f32.mxu0 %v12411_v2  ;;  %2075 = vmatprep.mubr.f32.mxu1 %v12411_v2 }
 0x5b4   :  { %6838 = vmatpush1.bf16.msra.mxu0 %v9526_v14  ;;  %6870 = vmatpush1.bf16.msra.mxu1 %v9593_v37 }
 0x5b5   :  { %6840 = vmatprep.subr.bf16.mxu0 %v9535_v17  ;;  %6872 = vmatprep.subr.bf16.mxu1 %v9617_v45 }
 0x5b8   :  { %6842 = vmatpush1.bf16.msra.mxu0 %v9560_v26  ;;  %6874 = vmatpush1.bf16.msra.mxu1 %v9626_v48 }
 0x5b9   :  { %6844 = vmatprep.subr.bf16.mxu0 %v9573_v30  ;;  %6876 = vmatprep.subr.bf16.mxu1 %v9638_v52 }
 0x5bc   :  { %6846 = vmatpush1.bf16.msra.mxu0 %v9609_v42  ;;  %6878 = vmatpush1.bf16.msra.mxu1 %v9668_v62 }
 0x5bd   :  { %6848 = vmatprep.subr.bf16.mxu0 %v9620_v46  ;;  %6880 = vmatprep.subr.bf16.mxu1 %v9674_v0 }
 0x5c0   :  { %6850 = vmatpush1.bf16.msra.mxu0 %v9647_v55  ;;  %6882 = vmatpush1.bf16.msra.mxu1 %v9704_v15 }
 0x5c1   :  { %6852 = vmatprep.subr.bf16.mxu0 %v9656_v58  ;;  %6884 = vmatprep.subr.bf16.mxu1 %v9710_v18 }
 0x5c4   :  { %6854 = vmatpush1.bf16.msra.mxu0 %v9689_v7  ;;  %6886 = vmatpush1.bf16.msra.mxu1 %v9737_v31 }
 0x5c5   :  { %6856 = vmatprep.subr.bf16.mxu0 %v9692_v10  ;;  %6888 = vmatprep.subr.bf16.mxu1 %v9743_v34 }
 0x5c8   :  { %6858 = vmatpush1.bf16.msra.mxu0 %v9725_v24  ;;  %6890 = vmatpush1.bf16.msra.mxu1 %v9765_v43 }
 0x5c9   :  { %6860 = vmatprep.subr.bf16.mxu0 %v9728_v27  ;;  %6892 = vmatprep.subr.bf16.mxu1 %v9779_v51 }
 0x5cc   :  { %6862 = vmatpush1.bf16.msra.mxu0 %v9761_v41  ;;  %6894 = vmatpush1.bf16.msra.mxu1 %v9800_v61 }
 0x5cd   :  { %6896 = vmatprep.subr.bf16.mxu0 %v9770_v47  ;;  %6960 = vmatprep.subr.bf16.mxu1 %v9815_v6 }
 0x5cf   :  { %2005 = vmatmul.mubr.f32.vlgmr.msra.gmra.mrb[20].mxu0 %v1768_v39  ;;  %2076 = vmatmul.mubr.f32.vlgmr.msra.gmra.mrb[20].mxu1 %v1768_v39  ;;  %v12656_v39 = vld [vmem:[#allocation22_spill] sm:$0xff] }
 0x5d0   :  { %6898 = vmatpush1.bf16.msra.mxu0 %v9797_v60  ;;  %6962 = vmatpush1.bf16.msra.mxu1 %v9838_v21 }
 0x5d1   :  { %6900 = vmatprep.subr.bf16.mxu0 %v9806_v1  ;;  %6964 = vmatprep.subr.bf16.mxu1 %v9853_v35 }
 0x5d4   :  { %6902 = vmatpush1.bf16.msra.mxu0 %v9834_v20  ;;  %6966 = vmatpush1.bf16.msra.mxu1 %v9875_v50 }
 0x5d5   :  { %6904 = vmatprep.subr.bf16.mxu0 %v9844_v28  ;;  %6968 = vmatprep.subr.bf16.mxu1 %v9890_v59 }
 0x5d8   :  { %6906 = vmatpush1.bf16.msra.mxu0 %v9872_v49  ;;  %6970 = vmatpush1.bf16.msra.mxu1 %v9912_v16 }
 0x5d9   :  { %6908 = vmatprep.subr.bf16.mxu0 %v12465_v56  ;;  %6972 = vmatprep.subr.bf16.mxu1 %v12639_v13 }
 0x5dc   :  { %6910 = vmatpush1.bf16.msra.mxu0 %v12640_v36  ;;  %6974 = vmatpush1.bf16.msra.mxu1 %v12641_v12 }
 0x5dd   :  { %6912 = vmatprep.subr.bf16.mxu0 %v12642_v5  ;;  %6976 = vmatprep.subr.bf16.mxu1 %v12643_v57  ;;  %v12694_v5 = vld [vmem:[#allocation58_spill] sm:$0xff] }
 0x5e0   :  { %6914 = vmatpush1.bf16.msra.mxu0 %v12644_v44  ;;  %6978 = vmatpush1.bf16.msra.mxu1 %v12645_v23  ;;  %v12692_v23 = vld [vmem:[#allocation56_spill] sm:$0xff] }
 0x5e1   :  { %6916 = vmatprep.subr.bf16.mxu0 %v12646_v63  ;;  %6980 = vmatprep.subr.bf16.mxu1 %v12647_v32  ;;  %v12657_v63 = vld [vmem:[#allocation23_spill] sm:$0xff]  ;;  %v12658_v32 = vld [vmem:[#allocation24_spill] sm:$0xff] }
 0x5e4   :  { %6918 = vmatpush1.bf16.msra.mxu0 %v12648_v22  ;;  %6982 = vmatpush1.bf16.msra.mxu1 %v12649_v11  ;;  %v12659_v22 = vld [vmem:[#allocation25_spill] sm:$0xff]  ;;  %v12660_v11 = vld [vmem:[#allocation26_spill] sm:$0xff] }
 0x5e5   :  { %6920 = vmatprep.subr.bf16.mxu0 %v12650_v3  ;;  %6984 = vmatprep.subr.bf16.mxu1 %v12651_v40  ;;  %v12661_v3 = vld [vmem:[#allocation27_spill] sm:$0xff]  ;;  %v12662_v40 = vld [vmem:[#allocation28_spill] sm:$0xff] }
 0x5e8   :  { %6922 = vmatpush1.bf16.msra.mxu0 %v12652_v38  ;;  %6986 = vmatpush1.bf16.msra.mxu1 %v12653_v54  ;;  %v12663_v38 = vld [vmem:[#allocation29_spill] sm:$0xff]  ;;  %v12664_v54 = vld [vmem:[#allocation30_spill] sm:$0xff] }
 0x5e9   :  { %6924 = vmatprep.subr.bf16.mxu0 %v12654_v29  ;;  %6988 = vmatprep.subr.bf16.mxu1 %v12655_v53  ;;  %v12665_v29 = vld [vmem:[#allocation31_spill] sm:$0xff]  ;;  %v12666_v53 = vld [vmem:[#allocation32_spill] sm:$0xff] }
 0x5ec   :  { %6926 = vmatpush1.bf16.msra.mxu0 %v12656_v39  ;;  %6990 = vmatpush1.bf16.msra.mxu1 %v12657_v63  ;;  %v12667_v39 = vld [vmem:[#allocation33_spill] sm:$0xff]  ;;  %v12668_v63 = vld [vmem:[#allocation34_spill] sm:$0xff] }
 0x5ed   :  { %6928 = vmatprep.subr.bf16.mxu0 %v12658_v32  ;;  %6992 = vmatprep.subr.bf16.mxu1 %v12659_v22  ;;  %v12669_v32 = vld [vmem:[#allocation35_spill] sm:$0xff]  ;;  %v12670_v22 = vld [vmem:[#allocation36_spill] sm:$0xff] }
 0x5f0   :  { %6930 = vmatpush1.bf16.msra.mxu0 %v12660_v11  ;;  %6994 = vmatpush1.bf16.msra.mxu1 %v12661_v3  ;;  %v12671_v11 = vld [vmem:[#allocation37_spill] sm:$0xff]  ;;  %v12672_v3 = vld [vmem:[#allocation38_spill] sm:$0xff] }
 0x5f1   :  { %6932 = vmatprep.subr.bf16.mxu0 %v12662_v40  ;;  %6996 = vmatprep.subr.bf16.mxu1 %v12663_v38  ;;  %v12673_v40 = vld [vmem:[#allocation39_spill] sm:$0xff]  ;;  %v12674_v38 = vld [vmem:[#allocation40_spill] sm:$0xff] }
 0x5f4   :  { %6934 = vmatpush1.bf16.msra.mxu0 %v12664_v54  ;;  %6998 = vmatpush1.bf16.msra.mxu1 %v12665_v29  ;;  %v12675_v54 = vld [vmem:[#allocation41_spill] sm:$0xff]  ;;  %v12676_v29 = vld [vmem:[#allocation42_spill] sm:$0xff] }
 0x5f5   :  { %6936 = vmatprep.subr.bf16.mxu0 %v12666_v53  ;;  %7000 = vmatprep.subr.bf16.mxu1 %v12667_v39  ;;  %v12677_v53 = vld [vmem:[#allocation43_spill] sm:$0xff]  ;;  %v12678_v39 = vld [vmem:[#allocation44_spill] sm:$0xff] }
 0x5f8   :  { %6938 = vmatpush1.bf16.msra.mxu0 %v12668_v63  ;;  %7002 = vmatpush1.bf16.msra.mxu1 %v12669_v32  ;;  %v12679_v63 = vld [vmem:[#allocation45_spill] sm:$0xff]  ;;  %v12680_v32 = vld [vmem:[#allocation46_spill] sm:$0xff] }
 0x5f9   :  { %6940 = vmatprep.subr.bf16.mxu0 %v12670_v22  ;;  %7004 = vmatprep.subr.bf16.mxu1 %v12671_v11  ;;  %v12681_v22 = vld [vmem:[#allocation47_spill] sm:$0xff]  ;;  %v12682_v11 = vld [vmem:[#allocation48_spill] sm:$0xff] }
 0x5fc   :  { %6942 = vmatpush1.bf16.msra.mxu0 %v12672_v3  ;;  %7006 = vmatpush1.bf16.msra.mxu1 %v12673_v40  ;;  %v12683_v3 = vld [vmem:[#allocation49_spill] sm:$0xff]  ;;  %v12684_v40 = vld [vmem:[#allocation50_spill] sm:$0xff] }
 0x5fd   :  { %6944 = vmatprep.subr.bf16.mxu0 %v12674_v38  ;;  %7008 = vmatprep.subr.bf16.mxu1 %v12675_v54  ;;  %v12685_v38 = vld [vmem:[#allocation51_spill] sm:$0xff]  ;;  %v12686_v54 = vld [vmem:[#allocation52_spill] sm:$0xff] }
 0x600   :  { %6946 = vmatpush1.bf16.msra.mxu0 %v12676_v29  ;;  %7010 = vmatpush1.bf16.msra.mxu1 %v12677_v53  ;;  %v12687_v29 = vld [vmem:[#allocation53_spill] sm:$0xff]  ;;  %v12688_v53 = vld [vmem:[#allocation54_spill] sm:$0xff] }
 0x601   :  { %6948 = vmatprep.subr.bf16.mxu0 %v12678_v39  ;;  %7012 = vmatprep.subr.bf16.mxu1 %v12679_v63  ;;  %v12689_v39 = vld [vmem:[#allocation55_spill] sm:$0xff]  ;;  %v12690_v63 = vld [vmem:[#allocation2_spill] sm:$0xff] }
 0x604   :  { %6950 = vmatpush1.bf16.msra.mxu0 %v12680_v32  ;;  %7014 = vmatpush1.bf16.msra.mxu1 %v12681_v22  ;;  %v12691_v32 = vld [vmem:[#allocation3_spill] sm:$0xff] }
 0x605   :  { %6952 = vmatprep.subr.bf16.mxu0 %v12682_v11  ;;  %7016 = vmatprep.subr.bf16.mxu1 %v12683_v3 }
 0x608   :  { %6954 = vmatpush1.bf16.msra.mxu0 %v12684_v40  ;;  %7018 = vmatpush1.bf16.msra.mxu1 %v12685_v38 }
 0x609   :  { %6956 = vmatprep.subr.bf16.mxu0 %v12686_v54  ;;  %7020 = vmatprep.subr.bf16.mxu1 %v12687_v29  ;;  %v12693_v29 = vld [vmem:[#allocation57_spill] sm:$0xff] }
 0x60c   :  { %6958 = vmatpush1.bf16.msra.mxu0 %v12688_v53  ;;  %7022 = vmatpush1.bf16.msra.mxu1 %v12689_v39 }
 0x60d   :  { %7024 = vmatprep.subr.bf16.mxu0 %v12690_v63  ;;  %7056 = vmatprep.subr.bf16.mxu1 %v12691_v32 }
 0x682   :  { %v1835_v22 = vpop.f32.mrb[18].mxu0  ;;  %v1906_v11 = vpop.f32.mrb[18].mxu1 }
 0x683   :  { %v1836_v3 = vadd.f32 %v1835_v22, %v12692_v23  ;;  %v1837_v44 = vpop.f32.mrb[19].mxu0  ;;  %v1908_v40 = vpop.f32.mrb[19].mxu1  ;;  %v1907_v53 = vadd.f32 %v1906_v11, %v12693_v29  ;;  %v5758_v11 = vld [vmem:[%s12224_s0 + $0xa0] sm:$0xff] }
 0x684   :  { %v1838_v38 = vadd.f32 %v1837_v44, %v10476_v4  ;;  %v1909_v39 = vadd.f32 %v1908_v40, %v12694_v5  ;;  %v12695_v40 = vld [vmem:[#allocation4_spill] sm:$0xff] }
 0x685   :  { %v5755_v57 = vmul.f32 -1.442695, %v1836_v3  ;;  %v5757_v12 = vmul.f32 -1.442695, %v1907_v53 }
 0x686   :  { %v5756_v54 = vmul.f32 -1.442695, %v1838_v38 }
 0x687   :  { %9088 = vpow2.f32 %v5755_v57 }
 0x688   :  { %9090 = vpow2.f32 %v5756_v54 }
 0x689   :  { %9092 = vtanh.f32 %v1909_v39 }
 0x68a   :  { %9094 = vpow2.f32 %v5757_v12 }
 0x691   :  { %v9089_v63 = vpop.eup %9088 }
 0x692   :  { %v1920_v36 = vadd.f32 1.0, %v9089_v63  ;;  %v9091_v32 = vpop.eup %9090  ;;  %v5759_v63 = vld [vmem:[%s12224_s0 + $0xa8] sm:$0xff] }
 0x693   :  { %v1921_v22 = vadd.f32 1.0, %v9091_v32  ;;  %v9093_v23 = vpop.eup %9092 }
 0x694   :  { %9096 = vrcp.f32 %v1920_v36  ;;  %v9095_v13 = vpop.eup %9094 }
 0x695   :  { %9098 = vrcp.f32 %v1921_v22  ;;  %v1922_v57 = vadd.f32 1.0, %v9095_v13 }
 0x697   :  { %9100 = vrcp.f32 %v1922_v57 }
 0x69e   :  { %v9097_v44 = vpop.eup %9096 }
 0x69f   :  { %v1931_v3 = vmul.f32 %v9097_v44, %v9093_v23  ;;  %v9099_v38 = vpop.eup %9098 }
 0x6a0   :  { %v1930_v54 = vmul.f32 %v9099_v38, %v12695_v40  ;;  %v5760_v38 = vld [vmem:[%s12224_s0 + $0xb0] sm:$0xff] }
 0x6a2   :  { %v2006_v12 = vpop.f32.mrb[20].mxu0  ;;  %v2077_v36 = vpop.f32.mrb[20].mxu1  ;;  %v10980_v32 = vadd.f32 %v1931_v3, %v1930_v54  ;;  %v5761_v3 = vld [vmem:[%s12224_s0 + $0xb8] sm:$0xff] }
 0x6a3   :  { %v2082_v53 = vadd.f32 %v5758_v11, %v2006_v12  ;;  %v2008_v39 = vpop.f32.mrb[21].mxu0  ;;  %v2079_v22 = vpop.f32.mrb[21].mxu1  ;;  %v2084_v40 = vadd.f32 %v5760_v38, %v2077_v36 }
 0x6a4   :  { %12696 = vst [vmem:[#allocation59_spill] sm:$0xff] %v10980_v32  ;;  %v2083_v23 = vadd.f32 %v5759_v63, %v2008_v39  ;;  %9102 = vtanh.f32 %v10980_v32  ;;  %v9101_v11 = vpop.eup %9100  ;;  %v2085_v54 = vadd.f32 %v5761_v3, %v2079_v22 }
 0x6a5   :  { %v5762_v13 = vmul.f32 -1.442695, %v2082_v53  ;;  %v5764_v57 = vmul.f32 -1.442695, %v2084_v40 }
 0x6a6   :  { %v5763_v44 = vmul.f32 -1.442695, %v2083_v23 }
 0x6a7   :  { %9104 = vpow2.f32 %v5762_v13 }
 0x6a8   :  { %9106 = vpow2.f32 %v5763_v44 }
 0x6a9   :  { %9108 = vtanh.f32 %v2085_v54 }
 0x6aa   :  { %9110 = vpow2.f32 %v5764_v57  ;;  %v12702_v57 = vld [vmem:[#allocation8_spill] sm:$0xff] }
 0x6ae   :  { %v9103_v12 = vpop.eup %9102 }
 0x6af   :  { %v1934_v63 = vmul.f32 %v9103_v12, %v9101_v11  ;;  %v12701_v12 = vld [vmem:[#allocation10_spill] sm:$0xff] }
 0x6b1   :  { %v9105_v53 = vpop.eup %9104  ;;  %2174 = vmatprep.mubr.f32.mxu0 %v1934_v63  ;;  %2245 = vmatprep.mubr.f32.mxu1 %v1934_v63  ;;  %v12703_v63 = vld [vmem:[#allocation11_spill] sm:$0xff] }
 0x6b2   :  { %v2095_v39 = vadd.f32 1.0, %v9105_v53  ;;  %v9107_v23 = vpop.eup %9106  ;;  %v12704_v53 = vld [vmem:[#allocation12_spill] sm:$0xff] }
 0x6b3   :  { %v2096_v13 = vadd.f32 1.0, %v9107_v23  ;;  %v9109_v36 = vpop.eup %9108  ;;  %v12706_v23 = vld [vmem:[#allocation14_spill] sm:$0xff] }
 0x6b4   :  { %9112 = vrcp.f32 %v2095_v39  ;;  %v9111_v44 = vpop.eup %9110  ;;  %v12705_v39 = vld [vmem:[#allocation13_spill] sm:$0xff] }
 0x6b5   :  { %9114 = vrcp.f32 %v2096_v13  ;;  %v2097_v29 = vadd.f32 1.0, %v9111_v44  ;;  %v12707_v13 = vld [vmem:[#allocation15_spill] sm:$0xff]  ;;  %v12709_v44 = vld [vmem:[#allocation17_spill] sm:$0xff] }
 0x6b7   :  { %9116 = vrcp.f32 %v2097_v29  ;;  %v12699_v29 = vld [vmem:[#allocation9_spill] sm:$0xff] }
 0x6be   :  { %v9113_v38 = vpop.eup %9112 }
 0x6bf   :  { %v2106_v32 = vmul.f32 %v9113_v38, %v9109_v36  ;;  %v9115_v5 = vpop.eup %9114  ;;  %v12708_v36 = vld [vmem:[#allocation16_spill] sm:$0xff]  ;;  %v12710_v38 = vld [vmem:[#allocation18_spill] sm:$0xff] }
 0x6c0   :  { %v2105_v22 = vmul.f32 %v9115_v5, %v10868_v19  ;;  %v12697_v19 = vld [vmem:[#allocation7_spill] sm:$0xff]  ;;  %v12698_v5 = vld [vmem:[#allocation5_spill] sm:$0xff] }
 0x6c1   :  { %v9117_v3 = vpop.eup %9116 }
 0x6c2   :  { %v10990_v40 = vadd.f32 %v2106_v32, %v2105_v22  ;;  %v12700_v32 = vld [vmem:[#allocation6_spill] sm:$0xff]  ;;  %v12711_v22 = vld [vmem:[#allocation19_spill] sm:$0xff] }
 0x6c4   :  { %9118 = vtanh.f32 %v10990_v40 }
 0x6ce   :  { %v9119_v11 = vpop.eup %9118 }
 0x6cf   :  { %v2109_v54 = vmul.f32 %v9119_v11, %v9117_v3  ;;  %v12712_v3 = vld [vmem:[#allocation20_spill] sm:$0xff]  ;;  %v12713_v11 = vld [vmem:[#allocation21_spill] sm:$0xff] }
 0x6d1   :  { %2175 = vmatmul.mubr.f32.vlgmr.msra.gmra.mrb[22].mxu0 %v2109_v54  ;;  %2246 = vmatmul.mubr.f32.vlgmr.msra.gmra.mrb[22].mxu1 %v2109_v54 }
 0x6d2   :  { %7026 = vmatpush1.bf16.msra.mxu0 %v9508_v8  ;;  %7058 = vmatpush1.bf16.msra.mxu1 %v9557_v25 }
 0x6d3   :  { %7028 = vmatprep.subr.bf16.mxu0 %v9510_v9  ;;  %7060 = vmatprep.subr.bf16.mxu1 %v9582_v33 }
 0x6d4   :  { %2345 = vmatprep.mubr.f32.mxu0 %v12411_v2  ;;  %2416 = vmatprep.mubr.f32.mxu1 %v12411_v2 }
 0x6d6   :  { %7030 = vmatpush1.bf16.msra.mxu0 %v9526_v14  ;;  %7062 = vmatpush1.bf16.msra.mxu1 %v9593_v37 }
 0x6d7   :  { %7032 = vmatprep.subr.bf16.mxu0 %v9535_v17  ;;  %7064 = vmatprep.subr.bf16.mxu1 %v9617_v45 }
 0x6da   :  { %7034 = vmatpush1.bf16.msra.mxu0 %v9560_v26  ;;  %7066 = vmatpush1.bf16.msra.mxu1 %v9626_v48 }
 0x6db   :  { %7036 = vmatprep.subr.bf16.mxu0 %v9573_v30  ;;  %7068 = vmatprep.subr.bf16.mxu1 %v9638_v52 }
 0x6de   :  { %7038 = vmatpush1.bf16.msra.mxu0 %v9609_v42  ;;  %7070 = vmatpush1.bf16.msra.mxu1 %v9668_v62 }
 0x6df   :  { %7040 = vmatprep.subr.bf16.mxu0 %v9620_v46  ;;  %7072 = vmatprep.subr.bf16.mxu1 %v9674_v0 }
 0x6e2   :  { %7042 = vmatpush1.bf16.msra.mxu0 %v9647_v55  ;;  %7074 = vmatpush1.bf16.msra.mxu1 %v9704_v15 }
 0x6e3   :  { %7044 = vmatprep.subr.bf16.mxu0 %v9656_v58  ;;  %7076 = vmatprep.subr.bf16.mxu1 %v9710_v18 }
 0x6e6   :  { %7046 = vmatpush1.bf16.msra.mxu0 %v9689_v7  ;;  %7078 = vmatpush1.bf16.msra.mxu1 %v9737_v31 }
 0x6e7   :  { %7048 = vmatprep.subr.bf16.mxu0 %v9692_v10  ;;  %7080 = vmatprep.subr.bf16.mxu1 %v9743_v34 }
 0x6ea   :  { %7050 = vmatpush1.bf16.msra.mxu0 %v9725_v24  ;;  %7082 = vmatpush1.bf16.msra.mxu1 %v9765_v43 }
 0x6eb   :  { %7052 = vmatprep.subr.bf16.mxu0 %v9728_v27  ;;  %7084 = vmatprep.subr.bf16.mxu1 %v9779_v51 }
 0x6ee   :  { %7054 = vmatpush1.bf16.msra.mxu0 %v9761_v41  ;;  %7086 = vmatpush1.bf16.msra.mxu1 %v9800_v61 }
 0x6ef   :  { %7088 = vmatprep.subr.bf16.mxu0 %v9770_v47  ;;  %7152 = vmatprep.subr.bf16.mxu1 %v9815_v6 }
 0x6f1   :  { %2346 = vmatmul.mubr.f32.vlgmr.msra.gmra.mrb[24].mxu0 %v2109_v54  ;;  %2417 = vmatmul.mubr.f32.vlgmr.msra.gmra.mrb[24].mxu1 %v2109_v54  ;;  %v12714_v54 = vld [vmem:[#allocation22_spill] sm:$0xff] }
 0x6f2   :  { %7090 = vmatpush1.bf16.msra.mxu0 %v9797_v60  ;;  %7154 = vmatpush1.bf16.msra.mxu1 %v9838_v21 }
 0x6f3   :  { %7092 = vmatprep.subr.bf16.mxu0 %v9806_v1  ;;  %7156 = vmatprep.subr.bf16.mxu1 %v9853_v35 }
 0x6f6   :  { %7094 = vmatpush1.bf16.msra.mxu0 %v9834_v20  ;;  %7158 = vmatpush1.bf16.msra.mxu1 %v9875_v50 }
 0x6f7   :  { %7096 = vmatprep.subr.bf16.mxu0 %v9844_v28  ;;  %7160 = vmatprep.subr.bf16.mxu1 %v9890_v59 }
 0x6fa   :  { %7098 = vmatpush1.bf16.msra.mxu0 %v9872_v49  ;;  %7162 = vmatpush1.bf16.msra.mxu1 %v9912_v16 }
 0x6fb   :  { %7100 = vmatprep.subr.bf16.mxu0 %v12465_v56  ;;  %7164 = vmatprep.subr.bf16.mxu1 %v12697_v19 }
 0x6fe   :  { %7102 = vmatpush1.bf16.msra.mxu0 %v12698_v5  ;;  %7166 = vmatpush1.bf16.msra.mxu1 %v12699_v29 }
 0x6ff   :  { %7104 = vmatprep.subr.bf16.mxu0 %v12700_v32  ;;  %7168 = vmatprep.subr.bf16.mxu1 %v12701_v12  ;;  %v12752_v32 = vld [vmem:[#allocation58_spill] sm:$0xff] }
 0x702   :  { %7106 = vmatpush1.bf16.msra.mxu0 %v12702_v57  ;;  %7170 = vmatpush1.bf16.msra.mxu1 %v12703_v63  ;;  %v12750_v63 = vld [vmem:[#allocation56_spill] sm:$0xff] }
 0x703   :  { %7108 = vmatprep.subr.bf16.mxu0 %v12704_v53  ;;  %7172 = vmatprep.subr.bf16.mxu1 %v12705_v39  ;;  %v12715_v53 = vld [vmem:[#allocation23_spill] sm:$0xff]  ;;  %v12716_v39 = vld [vmem:[#allocation24_spill] sm:$0xff] }
 0x706   :  { %7110 = vmatpush1.bf16.msra.mxu0 %v12706_v23  ;;  %7174 = vmatpush1.bf16.msra.mxu1 %v12707_v13  ;;  %v12717_v23 = vld [vmem:[#allocation25_spill] sm:$0xff]  ;;  %v12718_v13 = vld [vmem:[#allocation26_spill] sm:$0xff] }
 0x707   :  { %7112 = vmatprep.subr.bf16.mxu0 %v12708_v36  ;;  %7176 = vmatprep.subr.bf16.mxu1 %v12709_v44  ;;  %v12719_v36 = vld [vmem:[#allocation27_spill] sm:$0xff]  ;;  %v12720_v44 = vld [vmem:[#allocation28_spill] sm:$0xff] }
 0x70a   :  { %7114 = vmatpush1.bf16.msra.mxu0 %v12710_v38  ;;  %7178 = vmatpush1.bf16.msra.mxu1 %v12711_v22  ;;  %v12721_v38 = vld [vmem:[#allocation29_spill] sm:$0xff]  ;;  %v12722_v22 = vld [vmem:[#allocation30_spill] sm:$0xff] }
 0x70b   :  { %7116 = vmatprep.subr.bf16.mxu0 %v12712_v3  ;;  %7180 = vmatprep.subr.bf16.mxu1 %v12713_v11  ;;  %v12723_v3 = vld [vmem:[#allocation31_spill] sm:$0xff]  ;;  %v12724_v11 = vld [vmem:[#allocation32_spill] sm:$0xff] }
 0x70e   :  { %7118 = vmatpush1.bf16.msra.mxu0 %v12714_v54  ;;  %7182 = vmatpush1.bf16.msra.mxu1 %v12715_v53  ;;  %v12725_v54 = vld [vmem:[#allocation33_spill] sm:$0xff]  ;;  %v12726_v53 = vld [vmem:[#allocation34_spill] sm:$0xff] }
 0x70f   :  { %7120 = vmatprep.subr.bf16.mxu0 %v12716_v39  ;;  %7184 = vmatprep.subr.bf16.mxu1 %v12717_v23  ;;  %v12727_v39 = vld [vmem:[#allocation35_spill] sm:$0xff]  ;;  %v12728_v23 = vld [vmem:[#allocation36_spill] sm:$0xff] }
 0x712   :  { %7122 = vmatpush1.bf16.msra.mxu0 %v12718_v13  ;;  %7186 = vmatpush1.bf16.msra.mxu1 %v12719_v36  ;;  %v12729_v13 = vld [vmem:[#allocation37_spill] sm:$0xff]  ;;  %v12730_v36 = vld [vmem:[#allocation38_spill] sm:$0xff] }
 0x713   :  { %7124 = vmatprep.subr.bf16.mxu0 %v12720_v44  ;;  %7188 = vmatprep.subr.bf16.mxu1 %v12721_v38  ;;  %v12731_v44 = vld [vmem:[#allocation39_spill] sm:$0xff]  ;;  %v12732_v38 = vld [vmem:[#allocation40_spill] sm:$0xff] }
 0x716   :  { %7126 = vmatpush1.bf16.msra.mxu0 %v12722_v22  ;;  %7190 = vmatpush1.bf16.msra.mxu1 %v12723_v3  ;;  %v12733_v22 = vld [vmem:[#allocation41_spill] sm:$0xff]  ;;  %v12734_v3 = vld [vmem:[#allocation42_spill] sm:$0xff] }
 0x717   :  { %7128 = vmatprep.subr.bf16.mxu0 %v12724_v11  ;;  %7192 = vmatprep.subr.bf16.mxu1 %v12725_v54  ;;  %v12735_v11 = vld [vmem:[#allocation43_spill] sm:$0xff]  ;;  %v12736_v54 = vld [vmem:[#allocation44_spill] sm:$0xff] }
 0x71a   :  { %7130 = vmatpush1.bf16.msra.mxu0 %v12726_v53  ;;  %7194 = vmatpush1.bf16.msra.mxu1 %v12727_v39  ;;  %v12737_v53 = vld [vmem:[#allocation45_spill] sm:$0xff]  ;;  %v12738_v39 = vld [vmem:[#allocation46_spill] sm:$0xff] }
 0x71b   :  { %7132 = vmatprep.subr.bf16.mxu0 %v12728_v23  ;;  %7196 = vmatprep.subr.bf16.mxu1 %v12729_v13  ;;  %v12739_v23 = vld [vmem:[#allocation47_spill] sm:$0xff]  ;;  %v12740_v13 = vld [vmem:[#allocation48_spill] sm:$0xff] }
 0x71e   :  { %7134 = vmatpush1.bf16.msra.mxu0 %v12730_v36  ;;  %7198 = vmatpush1.bf16.msra.mxu1 %v12731_v44  ;;  %v12741_v36 = vld [vmem:[#allocation49_spill] sm:$0xff]  ;;  %v12742_v44 = vld [vmem:[#allocation50_spill] sm:$0xff] }
 0x71f   :  { %7136 = vmatprep.subr.bf16.mxu0 %v12732_v38  ;;  %7200 = vmatprep.subr.bf16.mxu1 %v12733_v22  ;;  %v12743_v38 = vld [vmem:[#allocation51_spill] sm:$0xff]  ;;  %v12744_v22 = vld [vmem:[#allocation52_spill] sm:$0xff] }
 0x722   :  { %7138 = vmatpush1.bf16.msra.mxu0 %v12734_v3  ;;  %7202 = vmatpush1.bf16.msra.mxu1 %v12735_v11  ;;  %v12745_v3 = vld [vmem:[#allocation53_spill] sm:$0xff]  ;;  %v12746_v11 = vld [vmem:[#allocation54_spill] sm:$0xff] }
 0x723   :  { %7140 = vmatprep.subr.bf16.mxu0 %v12736_v54  ;;  %7204 = vmatprep.subr.bf16.mxu1 %v12737_v53  ;;  %v12747_v54 = vld [vmem:[#allocation55_spill] sm:$0xff]  ;;  %v12748_v53 = vld [vmem:[#allocation2_spill] sm:$0xff] }
 0x726   :  { %7142 = vmatpush1.bf16.msra.mxu0 %v12738_v39  ;;  %7206 = vmatpush1.bf16.msra.mxu1 %v12739_v23  ;;  %v12749_v39 = vld [vmem:[#allocation3_spill] sm:$0xff] }
 0x727   :  { %7144 = vmatprep.subr.bf16.mxu0 %v12740_v13  ;;  %7208 = vmatprep.subr.bf16.mxu1 %v12741_v36 }
 0x72a   :  { %7146 = vmatpush1.bf16.msra.mxu0 %v12742_v44  ;;  %7210 = vmatpush1.bf16.msra.mxu1 %v12743_v38 }
 0x72b   :  { %7148 = vmatprep.subr.bf16.mxu0 %v12744_v22  ;;  %7212 = vmatprep.subr.bf16.mxu1 %v12745_v3  ;;  %v12751_v3 = vld [vmem:[#allocation57_spill] sm:$0xff] }
 0x72e   :  { %7150 = vmatpush1.bf16.msra.mxu0 %v12746_v11  ;;  %7214 = vmatpush1.bf16.msra.mxu1 %v12747_v54 }
 0x72f   :  { %7216 = vmatprep.subr.bf16.mxu0 %v12748_v53  ;;  %7248 = vmatprep.subr.bf16.mxu1 %v12749_v39 }
 0x7a4   :  { %v2176_v23 = vpop.f32.mrb[22].mxu0  ;;  %v2247_v13 = vpop.f32.mrb[22].mxu1 }
 0x7a5   :  { %v2177_v36 = vadd.f32 %v2176_v23, %v12750_v63  ;;  %v2178_v57 = vpop.f32.mrb[23].mxu0  ;;  %v2249_v44 = vpop.f32.mrb[23].mxu1  ;;  %v2248_v11 = vadd.f32 %v2247_v13, %v12751_v3  ;;  %v5768_v13 = vld [vmem:[%s12224_s0 + $0xc0] sm:$0xff] }
 0x7a6   :  { %v2179_v38 = vadd.f32 %v2178_v57, %v10476_v4  ;;  %v2250_v54 = vadd.f32 %v2249_v44, %v12752_v32  ;;  %v12753_v44 = vld [vmem:[#allocation59_spill] sm:$0xff] }
 0x7a7   :  { %v5765_v12 = vmul.f32 -1.442695, %v2177_v36  ;;  %v5767_v29 = vmul.f32 -1.442695, %v2248_v11 }
 0x7a8   :  { %v5766_v22 = vmul.f32 -1.442695, %v2179_v38 }
 0x7a9   :  { %9120 = vpow2.f32 %v5765_v12 }
 0x7aa   :  { %9122 = vpow2.f32 %v5766_v22 }
 0x7ab   :  { %9124 = vtanh.f32 %v2250_v54 }
 0x7ac   :  { %9126 = vpow2.f32 %v5767_v29 }
 0x7b3   :  { %v9121_v53 = vpop.eup %9120 }
 0x7b4   :  { %v2261_v5 = vadd.f32 1.0, %v9121_v53  ;;  %v9123_v39 = vpop.eup %9122  ;;  %v5769_v53 = vld [vmem:[%s12224_s0 + $0xc8] sm:$0xff] }
 0x7b5   :  { %v2262_v23 = vadd.f32 1.0, %v9123_v39  ;;  %v9125_v63 = vpop.eup %9124 }
 0x7b6   :  { %9128 = vrcp.f32 %v2261_v5  ;;  %v9127_v19 = vpop.eup %9126 }
 0x7b7   :  { %9130 = vrcp.f32 %v2262_v23  ;;  %v2263_v12 = vadd.f32 1.0, %v9127_v19 }
 0x7b9   :  { %9132 = vrcp.f32 %v2263_v12 }
 0x7c0   :  { %v9129_v57 = vpop.eup %9128 }
 0x7c1   :  { %v2272_v36 = vmul.f32 %v9129_v57, %v9125_v63  ;;  %v9131_v38 = vpop.eup %9130 }
 0x7c2   :  { %v2271_v22 = vmul.f32 %v9131_v38, %v12753_v44  ;;  %v5770_v38 = vld [vmem:[%s12224_s0 + $0xd0] sm:$0xff] }
 0x7c4   :  { %v2347_v29 = vpop.f32.mrb[24].mxu0  ;;  %v2418_v5 = vpop.f32.mrb[24].mxu1  ;;  %v11102_v39 = vadd.f32 %v2272_v36, %v2271_v22  ;;  %v5771_v36 = vld [vmem:[%s12224_s0 + $0xd8] sm:$0xff] }
 0x7c5   :  { %v2423_v11 = vadd.f32 %v5768_v13, %v2347_v29  ;;  %v2349_v54 = vpop.f32.mrb[25].mxu0  ;;  %v2420_v23 = vpop.f32.mrb[25].mxu1  ;;  %v2425_v44 = vadd.f32 %v5770_v38, %v2418_v5 }
 0x7c6   :  { %12754 = vst [vmem:[#allocation4_spill] sm:$0xff] %v11102_v39  ;;  %v2424_v63 = vadd.f32 %v5769_v53, %v2349_v54  ;;  %9134 = vtanh.f32 %v11102_v39  ;;  %v9133_v13 = vpop.eup %9132  ;;  %v2426_v22 = vadd.f32 %v5771_v36, %v2420_v23 }
 0x7c7   :  { %v5772_v19 = vmul.f32 -1.442695, %v2423_v11  ;;  %v5774_v12 = vmul.f32 -1.442695, %v2425_v44 }
 0x7c8   :  { %v5773_v57 = vmul.f32 -1.442695, %v2424_v63 }
 0x7c9   :  { %9136 = vpow2.f32 %v5772_v19 }
 0x7ca   :  { %9138 = vpow2.f32 %v5773_v57 }
 0x7cb   :  { %9140 = vtanh.f32 %v2426_v22 }
 0x7cc   :  { %9142 = vpow2.f32 %v5774_v12  ;;  %v12760_v12 = vld [vmem:[#allocation8_spill] sm:$0xff] }
 0x7d0   :  { %v9135_v29 = vpop.eup %9134 }
 0x7d1   :  { %v2275_v53 = vmul.f32 %v9135_v29, %v9133_v13  ;;  %v12759_v29 = vld [vmem:[#allocation10_spill] sm:$0xff] }
 0x7d3   :  { %v9137_v11 = vpop.eup %9136  ;;  %2515 = vmatprep.mubr.f32.mxu0 %v2275_v53  ;;  %2586 = vmatprep.mubr.f32.mxu1 %v2275_v53  ;;  %v12761_v53 = vld [vmem:[#allocation11_spill] sm:$0xff] }
 0x7d4   :  { %v2436_v54 = vadd.f32 1.0, %v9137_v11  ;;  %v9139_v63 = vpop.eup %9138  ;;  %v12762_v11 = vld [vmem:[#allocation12_spill] sm:$0xff] }
 0x7d5   :  { %v2437_v19 = vadd.f32 1.0, %v9139_v63  ;;  %v9141_v5 = vpop.eup %9140  ;;  %v12764_v63 = vld [vmem:[#allocation14_spill] sm:$0xff] }
 0x7d6   :  { %9144 = vrcp.f32 %v2436_v54  ;;  %v9143_v57 = vpop.eup %9142  ;;  %v12763_v54 = vld [vmem:[#allocation13_spill] sm:$0xff] }
 0x7d7   :  { %9146 = vrcp.f32 %v2437_v19  ;;  %v2438_v3 = vadd.f32 1.0, %v9143_v57  ;;  %v12765_v19 = vld [vmem:[#allocation15_spill] sm:$0xff]  ;;  %v12767_v57 = vld [vmem:[#allocation17_spill] sm:$0xff] }
 0x7d9   :  { %9148 = vrcp.f32 %v2438_v3  ;;  %v12757_v3 = vld [vmem:[#allocation9_spill] sm:$0xff] }
 0x7e0   :  { %v9145_v38 = vpop.eup %9144 }
 0x7e1   :  { %v2447_v39 = vmul.f32 %v9145_v38, %v9141_v5  ;;  %v9147_v32 = vpop.eup %9146  ;;  %v12766_v5 = vld [vmem:[#allocation16_spill] sm:$0xff]  ;;  %v12768_v38 = vld [vmem:[#allocation18_spill] sm:$0xff] }
 0x7e2   :  { %v2446_v23 = vmul.f32 %v9147_v32, %v10990_v40  ;;  %v12755_v40 = vld [vmem:[#allocation7_spill] sm:$0xff]  ;;  %v12756_v32 = vld [vmem:[#allocation5_spill] sm:$0xff] }
 0x7e3   :  { %v9149_v36 = vpop.eup %9148 }
 0x7e4   :  { %v11112_v44 = vadd.f32 %v2447_v39, %v2446_v23  ;;  %v12758_v39 = vld [vmem:[#allocation6_spill] sm:$0xff]  ;;  %v12769_v23 = vld [vmem:[#allocation19_spill] sm:$0xff] }
 0x7e6   :  { %9150 = vtanh.f32 %v11112_v44 }
 0x7f0   :  { %v9151_v13 = vpop.eup %9150 }
 0x7f1   :  { %v2450_v22 = vmul.f32 %v9151_v13, %v9149_v36  ;;  %v12770_v36 = vld [vmem:[#allocation20_spill] sm:$0xff]  ;;  %v12771_v13 = vld [vmem:[#allocation21_spill] sm:$0xff] }
 0x7f3   :  { %2516 = vmatmul.mubr.f32.vlgmr.msra.gmra.mrb[26].mxu0 %v2450_v22  ;;  %2587 = vmatmul.mubr.f32.vlgmr.msra.gmra.mrb[26].mxu1 %v2450_v22 }
 0x7f4   :  { %7218 = vmatpush1.bf16.msra.mxu0 %v9508_v8  ;;  %7250 = vmatpush1.bf16.msra.mxu1 %v9557_v25 }
 0x7f5   :  { %7220 = vmatprep.subr.bf16.mxu0 %v9510_v9  ;;  %7252 = vmatprep.subr.bf16.mxu1 %v9582_v33 }
 0x7f6   :  { %2686 = vmatprep.mubr.f32.mxu0 %v12411_v2  ;;  %2757 = vmatprep.mubr.f32.mxu1 %v12411_v2 }
 0x7f8   :  { %7222 = vmatpush1.bf16.msra.mxu0 %v9526_v14  ;;  %7254 = vmatpush1.bf16.msra.mxu1 %v9593_v37 }
 0x7f9   :  { %7224 = vmatprep.subr.bf16.mxu0 %v9535_v17  ;;  %7256 = vmatprep.subr.bf16.mxu1 %v9617_v45 }
 0x7fc   :  { %7226 = vmatpush1.bf16.msra.mxu0 %v9560_v26  ;;  %7258 = vmatpush1.bf16.msra.mxu1 %v9626_v48 }
 0x7fd   :  { %7228 = vmatprep.subr.bf16.mxu0 %v9573_v30  ;;  %7260 = vmatprep.subr.bf16.mxu1 %v9638_v52 }
 0x800   :  { %7230 = vmatpush1.bf16.msra.mxu0 %v9609_v42  ;;  %7262 = vmatpush1.bf16.msra.mxu1 %v9668_v62 }
 0x801   :  { %7232 = vmatprep.subr.bf16.mxu0 %v9620_v46  ;;  %7264 = vmatprep.subr.bf16.mxu1 %v9674_v0 }
 0x804   :  { %7234 = vmatpush1.bf16.msra.mxu0 %v9647_v55  ;;  %7266 = vmatpush1.bf16.msra.mxu1 %v9704_v15 }
 0x805   :  { %7236 = vmatprep.subr.bf16.mxu0 %v9656_v58  ;;  %7268 = vmatprep.subr.bf16.mxu1 %v9710_v18 }
 0x808   :  { %7238 = vmatpush1.bf16.msra.mxu0 %v9689_v7  ;;  %7270 = vmatpush1.bf16.msra.mxu1 %v9737_v31 }
 0x809   :  { %7240 = vmatprep.subr.bf16.mxu0 %v9692_v10  ;;  %7272 = vmatprep.subr.bf16.mxu1 %v9743_v34 }
 0x80c   :  { %7242 = vmatpush1.bf16.msra.mxu0 %v9725_v24  ;;  %7274 = vmatpush1.bf16.msra.mxu1 %v9765_v43 }
 0x80d   :  { %7244 = vmatprep.subr.bf16.mxu0 %v9728_v27  ;;  %7276 = vmatprep.subr.bf16.mxu1 %v9779_v51 }
 0x810   :  { %7246 = vmatpush1.bf16.msra.mxu0 %v9761_v41  ;;  %7278 = vmatpush1.bf16.msra.mxu1 %v9800_v61 }
 0x811   :  { %7280 = vmatprep.subr.bf16.mxu0 %v9770_v47  ;;  %7344 = vmatprep.subr.bf16.mxu1 %v9815_v6 }
 0x813   :  { %2687 = vmatmul.mubr.f32.vlgmr.msra.gmra.mrb[28].mxu0 %v2450_v22  ;;  %2758 = vmatmul.mubr.f32.vlgmr.msra.gmra.mrb[28].mxu1 %v2450_v22  ;;  %v12772_v22 = vld [vmem:[#allocation22_spill] sm:$0xff] }
 0x814   :  { %7282 = vmatpush1.bf16.msra.mxu0 %v9797_v60  ;;  %7346 = vmatpush1.bf16.msra.mxu1 %v9838_v21 }
 0x815   :  { %7284 = vmatprep.subr.bf16.mxu0 %v9806_v1  ;;  %7348 = vmatprep.subr.bf16.mxu1 %v9853_v35 }
 0x818   :  { %7286 = vmatpush1.bf16.msra.mxu0 %v9834_v20  ;;  %7350 = vmatpush1.bf16.msra.mxu1 %v9875_v50 }
 0x819   :  { %7288 = vmatprep.subr.bf16.mxu0 %v9844_v28  ;;  %7352 = vmatprep.subr.bf16.mxu1 %v9890_v59 }
 0x81c   :  { %7290 = vmatpush1.bf16.msra.mxu0 %v9872_v49  ;;  %7354 = vmatpush1.bf16.msra.mxu1 %v9912_v16 }
 0x81d   :  { %7292 = vmatprep.subr.bf16.mxu0 %v12465_v56  ;;  %7356 = vmatprep.subr.bf16.mxu1 %v12755_v40 }
 0x820   :  { %7294 = vmatpush1.bf16.msra.mxu0 %v12756_v32  ;;  %7358 = vmatpush1.bf16.msra.mxu1 %v12757_v3 }
 0x821   :  { %7296 = vmatprep.subr.bf16.mxu0 %v12758_v39  ;;  %7360 = vmatprep.subr.bf16.mxu1 %v12759_v29  ;;  %v12810_v39 = vld [vmem:[#allocation58_spill] sm:$0xff] }
 0x824   :  { %7298 = vmatpush1.bf16.msra.mxu0 %v12760_v12  ;;  %7362 = vmatpush1.bf16.msra.mxu1 %v12761_v53  ;;  %v12808_v53 = vld [vmem:[#allocation56_spill] sm:$0xff] }
 0x825   :  { %7300 = vmatprep.subr.bf16.mxu0 %v12762_v11  ;;  %7364 = vmatprep.subr.bf16.mxu1 %v12763_v54  ;;  %v12773_v11 = vld [vmem:[#allocation23_spill] sm:$0xff]  ;;  %v12774_v54 = vld [vmem:[#allocation24_spill] sm:$0xff] }
 0x828   :  { %7302 = vmatpush1.bf16.msra.mxu0 %v12764_v63  ;;  %7366 = vmatpush1.bf16.msra.mxu1 %v12765_v19  ;;  %v12775_v63 = vld [vmem:[#allocation25_spill] sm:$0xff]  ;;  %v12776_v19 = vld [vmem:[#allocation26_spill] sm:$0xff] }
 0x829   :  { %7304 = vmatprep.subr.bf16.mxu0 %v12766_v5  ;;  %7368 = vmatprep.subr.bf16.mxu1 %v12767_v57  ;;  %v12777_v5 = vld [vmem:[#allocation27_spill] sm:$0xff]  ;;  %v12778_v57 = vld [vmem:[#allocation28_spill] sm:$0xff] }
 0x82c   :  { %7306 = vmatpush1.bf16.msra.mxu0 %v12768_v38  ;;  %7370 = vmatpush1.bf16.msra.mxu1 %v12769_v23  ;;  %v12779_v38 = vld [vmem:[#allocation29_spill] sm:$0xff]  ;;  %v12780_v23 = vld [vmem:[#allocation30_spill] sm:$0xff] }
 0x82d   :  { %7308 = vmatprep.subr.bf16.mxu0 %v12770_v36  ;;  %7372 = vmatprep.subr.bf16.mxu1 %v12771_v13  ;;  %v12781_v36 = vld [vmem:[#allocation31_spill] sm:$0xff]  ;;  %v12782_v13 = vld [vmem:[#allocation32_spill] sm:$0xff] }
 0x830   :  { %7310 = vmatpush1.bf16.msra.mxu0 %v12772_v22  ;;  %7374 = vmatpush1.bf16.msra.mxu1 %v12773_v11  ;;  %v12783_v22 = vld [vmem:[#allocation33_spill] sm:$0xff]  ;;  %v12784_v11 = vld [vmem:[#allocation34_spill] sm:$0xff] }
 0x831   :  { %7312 = vmatprep.subr.bf16.mxu0 %v12774_v54  ;;  %7376 = vmatprep.subr.bf16.mxu1 %v12775_v63  ;;  %v12785_v54 = vld [vmem:[#allocation35_spill] sm:$0xff]  ;;  %v12786_v63 = vld [vmem:[#allocation36_spill] sm:$0xff] }
 0x834   :  { %7314 = vmatpush1.bf16.msra.mxu0 %v12776_v19  ;;  %7378 = vmatpush1.bf16.msra.mxu1 %v12777_v5  ;;  %v12787_v19 = vld [vmem:[#allocation37_spill] sm:$0xff]  ;;  %v12788_v5 = vld [vmem:[#allocation38_spill] sm:$0xff] }
 0x835   :  { %7316 = vmatprep.subr.bf16.mxu0 %v12778_v57  ;;  %7380 = vmatprep.subr.bf16.mxu1 %v12779_v38  ;;  %v12789_v57 = vld [vmem:[#allocation39_spill] sm:$0xff]  ;;  %v12790_v38 = vld [vmem:[#allocation40_spill] sm:$0xff] }
 0x838   :  { %7318 = vmatpush1.bf16.msra.mxu0 %v12780_v23  ;;  %7382 = vmatpush1.bf16.msra.mxu1 %v12781_v36  ;;  %v12791_v23 = vld [vmem:[#allocation41_spill] sm:$0xff]  ;;  %v12792_v36 = vld [vmem:[#allocation42_spill] sm:$0xff] }
 0x839   :  { %7320 = vmatprep.subr.bf16.mxu0 %v12782_v13  ;;  %7384 = vmatprep.subr.bf16.mxu1 %v12783_v22  ;;  %v12793_v13 = vld [vmem:[#allocation43_spill] sm:$0xff]  ;;  %v12794_v22 = vld [vmem:[#allocation44_spill] sm:$0xff] }
 0x83c   :  { %7322 = vmatpush1.bf16.msra.mxu0 %v12784_v11  ;;  %7386 = vmatpush1.bf16.msra.mxu1 %v12785_v54  ;;  %v12795_v11 = vld [vmem:[#allocation45_spill] sm:$0xff]  ;;  %v12796_v54 = vld [vmem:[#allocation46_spill] sm:$0xff] }
 0x83d   :  { %7324 = vmatprep.subr.bf16.mxu0 %v12786_v63  ;;  %7388 = vmatprep.subr.bf16.mxu1 %v12787_v19  ;;  %v12797_v63 = vld [vmem:[#allocation47_spill] sm:$0xff]  ;;  %v12798_v19 = vld [vmem:[#allocation48_spill] sm:$0xff] }
 0x840   :  { %7326 = vmatpush1.bf16.msra.mxu0 %v12788_v5  ;;  %7390 = vmatpush1.bf16.msra.mxu1 %v12789_v57  ;;  %v12799_v5 = vld [vmem:[#allocation49_spill] sm:$0xff]  ;;  %v12800_v57 = vld [vmem:[#allocation50_spill] sm:$0xff] }
 0x841   :  { %7328 = vmatprep.subr.bf16.mxu0 %v12790_v38  ;;  %7392 = vmatprep.subr.bf16.mxu1 %v12791_v23  ;;  %v12801_v38 = vld [vmem:[#allocation51_spill] sm:$0xff]  ;;  %v12802_v23 = vld [vmem:[#allocation52_spill] sm:$0xff] }
 0x844   :  { %7330 = vmatpush1.bf16.msra.mxu0 %v12792_v36  ;;  %7394 = vmatpush1.bf16.msra.mxu1 %v12793_v13  ;;  %v12803_v36 = vld [vmem:[#allocation53_spill] sm:$0xff]  ;;  %v12804_v13 = vld [vmem:[#allocation54_spill] sm:$0xff] }
 0x845   :  { %7332 = vmatprep.subr.bf16.mxu0 %v12794_v22  ;;  %7396 = vmatprep.subr.bf16.mxu1 %v12795_v11  ;;  %v12805_v22 = vld [vmem:[#allocation55_spill] sm:$0xff]  ;;  %v12806_v11 = vld [vmem:[#allocation2_spill] sm:$0xff] }
 0x848   :  { %7334 = vmatpush1.bf16.msra.mxu0 %v12796_v54  ;;  %7398 = vmatpush1.bf16.msra.mxu1 %v12797_v63  ;;  %v12807_v54 = vld [vmem:[#allocation3_spill] sm:$0xff] }
 0x849   :  { %7336 = vmatprep.subr.bf16.mxu0 %v12798_v19  ;;  %7400 = vmatprep.subr.bf16.mxu1 %v12799_v5 }
 0x84c   :  { %7338 = vmatpush1.bf16.msra.mxu0 %v12800_v57  ;;  %7402 = vmatpush1.bf16.msra.mxu1 %v12801_v38 }
 0x84d   :  { %7340 = vmatprep.subr.bf16.mxu0 %v12802_v23  ;;  %7404 = vmatprep.subr.bf16.mxu1 %v12803_v36  ;;  %v12809_v36 = vld [vmem:[#allocation57_spill] sm:$0xff] }
 0x850   :  { %7342 = vmatpush1.bf16.msra.mxu0 %v12804_v13  ;;  %7406 = vmatpush1.bf16.msra.mxu1 %v12805_v22 }
 0x851   :  { %7408 = vmatprep.subr.bf16.mxu0 %v12806_v11  ;;  %7440 = vmatprep.subr.bf16.mxu1 %v12807_v54 }
 0x8c6   :  { %v2517_v63 = vpop.f32.mrb[26].mxu0  ;;  %v2588_v19 = vpop.f32.mrb[26].mxu1 }
 0x8c7   :  { %v2518_v5 = vadd.f32 %v2517_v63, %v12808_v53  ;;  %v2519_v12 = vpop.f32.mrb[27].mxu0  ;;  %v2590_v57 = vpop.f32.mrb[27].mxu1  ;;  %v2589_v13 = vadd.f32 %v2588_v19, %v12809_v36  ;;  %v5778_v19 = vld [vmem:[%s12224_s0 + $0xe0] sm:$0xff] }
 0x8c8   :  { %v2520_v38 = vadd.f32 %v2519_v12, %v10476_v4  ;;  %v2591_v22 = vadd.f32 %v2590_v57, %v12810_v39  ;;  %v12811_v57 = vld [vmem:[#allocation4_spill] sm:$0xff] }
 0x8c9   :  { %v5775_v29 = vmul.f32 -1.442695, %v2518_v5  ;;  %v5777_v3 = vmul.f32 -1.442695, %v2589_v13 }
 0x8ca   :  { %v5776_v23 = vmul.f32 -1.442695, %v2520_v38 }
 0x8cb   :  { %9152 = vpow2.f32 %v5775_v29 }
 0x8cc   :  { %9154 = vpow2.f32 %v5776_v23 }
 0x8cd   :  { %9156 = vtanh.f32 %v2591_v22 }
 0x8ce   :  { %9158 = vpow2.f32 %v5777_v3 }
 0x8d5   :  { %v9153_v11 = vpop.eup %9152 }
 0x8d6   :  { %v2602_v32 = vadd.f32 1.0, %v9153_v11  ;;  %v9155_v54 = vpop.eup %9154  ;;  %v5779_v11 = vld [vmem:[%s12224_s0 + $0xe8] sm:$0xff] }
 0x8d7   :  { %v2603_v63 = vadd.f32 1.0, %v9155_v54  ;;  %v9157_v53 = vpop.eup %9156 }
 0x8d8   :  { %9160 = vrcp.f32 %v2602_v32  ;;  %v9159_v40 = vpop.eup %9158 }
 0x8d9   :  { %9162 = vrcp.f32 %v2603_v63  ;;  %v2604_v29 = vadd.f32 1.0, %v9159_v40 }
 0x8db   :  { %9164 = vrcp.f32 %v2604_v29 }
 0x8e2   :  { %v9161_v12 = vpop.eup %9160 }
 0x8e3   :  { %v2613_v5 = vmul.f32 %v9161_v12, %v9157_v53  ;;  %v9163_v38 = vpop.eup %9162 }
 0x8e4   :  { %v2612_v23 = vmul.f32 %v9163_v38, %v12811_v57  ;;  %v5780_v38 = vld [vmem:[%s12224_s0 + $0xf0] sm:$0xff] }
 0x8e6   :  { %v2688_v3 = vpop.f32.mrb[28].mxu0  ;;  %v2759_v32 = vpop.f32.mrb[28].mxu1  ;;  %v11224_v54 = vadd.f32 %v2613_v5, %v2612_v23  ;;  %v5781_v5 = vld [vmem:[%s12224_s0 + $0xf8] sm:$0xff] }
 0x8e7   :  { %v2764_v13 = vadd.f32 %v5778_v19, %v2688_v3  ;;  %v2690_v22 = vpop.f32.mrb[29].mxu0  ;;  %v2761_v63 = vpop.f32.mrb[29].mxu1  ;;  %v2766_v57 = vadd.f32 %v5780_v38, %v2759_v32 }
 0x8e8   :  { %12812 = vst [vmem:[#allocation59_spill] sm:$0xff] %v11224_v54  ;;  %v2765_v53 = vadd.f32 %v5779_v11, %v2690_v22  ;;  %9166 = vtanh.f32 %v11224_v54  ;;  %v9165_v19 = vpop.eup %9164  ;;  %v2767_v23 = vadd.f32 %v5781_v5, %v2761_v63 }
 0x8e9   :  { %v5782_v40 = vmul.f32 -1.442695, %v2764_v13  ;;  %v5784_v29 = vmul.f32 -1.442695, %v2766_v57 }
 0x8ea   :  { %v5783_v12 = vmul.f32 -1.442695, %v2765_v53 }
 0x8eb   :  { %9168 = vpow2.f32 %v5782_v40 }
 0x8ec   :  { %9170 = vpow2.f32 %v5783_v12 }
 0x8ed   :  { %9172 = vtanh.f32 %v2767_v23 }
 0x8ee   :  { %9174 = vpow2.f32 %v5784_v29  ;;  %v12818_v29 = vld [vmem:[#allocation8_spill] sm:$0xff] }
 0x8f2   :  { %v9167_v3 = vpop.eup %9166 }
 0x8f3   :  { %v2616_v11 = vmul.f32 %v9167_v3, %v9165_v19  ;;  %v12817_v3 = vld [vmem:[#allocation10_spill] sm:$0xff] }
 0x8f5   :  { %v9169_v13 = vpop.eup %9168  ;;  %2856 = vmatprep.mubr.f32.mxu0 %v2616_v11  ;;  %2927 = vmatprep.mubr.f32.mxu1 %v2616_v11  ;;  %v12819_v11 = vld [vmem:[#allocation11_spill] sm:$0xff] }
 0x8f6   :  { %v2777_v22 = vadd.f32 1.0, %v9169_v13  ;;  %v9171_v53 = vpop.eup %9170  ;;  %v12820_v13 = vld [vmem:[#allocation12_spill] sm:$0xff] }
 0x8f7   :  { %v2778_v40 = vadd.f32 1.0, %v9171_v53  ;;  %v9173_v32 = vpop.eup %9172  ;;  %v12822_v53 = vld [vmem:[#allocation14_spill] sm:$0xff] }
 0x8f8   :  { %9176 = vrcp.f32 %v2777_v22  ;;  %v9175_v12 = vpop.eup %9174  ;;  %v12821_v22 = vld [vmem:[#allocation13_spill] sm:$0xff] }
 0x8f9   :  { %9178 = vrcp.f32 %v2778_v40  ;;  %v2779_v36 = vadd.f32 1.0, %v9175_v12  ;;  %v12823_v40 = vld [vmem:[#allocation15_spill] sm:$0xff]  ;;  %v12825_v12 = vld [vmem:[#allocation17_spill] sm:$0xff] }
 0x8fb   :  { %9180 = vrcp.f32 %v2779_v36  ;;  %v12815_v36 = vld [vmem:[#allocation9_spill] sm:$0xff] }
 0x902   :  { %v9177_v38 = vpop.eup %9176 }
 0x903   :  { %v2788_v54 = vmul.f32 %v9177_v38, %v9173_v32  ;;  %v9179_v39 = vpop.eup %9178  ;;  %v12824_v32 = vld [vmem:[#allocation16_spill] sm:$0xff]  ;;  %v12826_v38 = vld [vmem:[#allocation18_spill] sm:$0xff] }
 0x904   :  { %v2787_v63 = vmul.f32 %v9179_v39, %v11112_v44  ;;  %v12813_v44 = vld [vmem:[#allocation7_spill] sm:$0xff]  ;;  %v12814_v39 = vld [vmem:[#allocation5_spill] sm:$0xff] }
 0x905   :  { %v9181_v5 = vpop.eup %9180 }
 0x906   :  { %v11234_v57 = vadd.f32 %v2788_v54, %v2787_v63  ;;  %v12816_v54 = vld [vmem:[#allocation6_spill] sm:$0xff]  ;;  %v12827_v63 = vld [vmem:[#allocation19_spill] sm:$0xff] }
 0x908   :  { %9182 = vtanh.f32 %v11234_v57 }
 0x912   :  { %v9183_v19 = vpop.eup %9182 }
 0x913   :  { %v2791_v23 = vmul.f32 %v9183_v19, %v9181_v5  ;;  %v12828_v5 = vld [vmem:[#allocation20_spill] sm:$0xff]  ;;  %v12829_v19 = vld [vmem:[#allocation21_spill] sm:$0xff] }
 0x915   :  { %2857 = vmatmul.mubr.f32.vlgmr.msra.gmra.mrb[30].mxu0 %v2791_v23  ;;  %2928 = vmatmul.mubr.f32.vlgmr.msra.gmra.mrb[30].mxu1 %v2791_v23 }
 0x916   :  { %7410 = vmatpush1.bf16.msra.mxu0 %v9508_v8  ;;  %7442 = vmatpush1.bf16.msra.mxu1 %v9557_v25 }
 0x917   :  { %7412 = vmatprep.subr.bf16.mxu0 %v9510_v9  ;;  %7444 = vmatprep.subr.bf16.mxu1 %v9582_v33 }
 0x918   :  { %3027 = vmatprep.mubr.f32.mxu0 %v12411_v2  ;;  %3098 = vmatprep.mubr.f32.mxu1 %v12411_v2 }
 0x91a   :  { %7414 = vmatpush1.bf16.msra.mxu0 %v9526_v14  ;;  %7446 = vmatpush1.bf16.msra.mxu1 %v9593_v37 }
 0x91b   :  { %7416 = vmatprep.subr.bf16.mxu0 %v9535_v17  ;;  %7448 = vmatprep.subr.bf16.mxu1 %v9617_v45 }
 0x91e   :  { %7418 = vmatpush1.bf16.msra.mxu0 %v9560_v26  ;;  %7450 = vmatpush1.bf16.msra.mxu1 %v9626_v48 }
 0x91f   :  { %7420 = vmatprep.subr.bf16.mxu0 %v9573_v30  ;;  %7452 = vmatprep.subr.bf16.mxu1 %v9638_v52 }
 0x922   :  { %7422 = vmatpush1.bf16.msra.mxu0 %v9609_v42  ;;  %7454 = vmatpush1.bf16.msra.mxu1 %v9668_v62 }
 0x923   :  { %7424 = vmatprep.subr.bf16.mxu0 %v9620_v46  ;;  %7456 = vmatprep.subr.bf16.mxu1 %v9674_v0 }
 0x926   :  { %7426 = vmatpush1.bf16.msra.mxu0 %v9647_v55  ;;  %7458 = vmatpush1.bf16.msra.mxu1 %v9704_v15 }
 0x927   :  { %7428 = vmatprep.subr.bf16.mxu0 %v9656_v58  ;;  %7460 = vmatprep.subr.bf16.mxu1 %v9710_v18 }
 0x92a   :  { %7430 = vmatpush1.bf16.msra.mxu0 %v9689_v7  ;;  %7462 = vmatpush1.bf16.msra.mxu1 %v9737_v31 }
 0x92b   :  { %7432 = vmatprep.subr.bf16.mxu0 %v9692_v10  ;;  %7464 = vmatprep.subr.bf16.mxu1 %v9743_v34 }
 0x92e   :  { %7434 = vmatpush1.bf16.msra.mxu0 %v9725_v24  ;;  %7466 = vmatpush1.bf16.msra.mxu1 %v9765_v43 }
 0x92f   :  { %7436 = vmatprep.subr.bf16.mxu0 %v9728_v27  ;;  %7468 = vmatprep.subr.bf16.mxu1 %v9779_v51 }
 0x932   :  { %7438 = vmatpush1.bf16.msra.mxu0 %v9761_v41  ;;  %7470 = vmatpush1.bf16.msra.mxu1 %v9800_v61 }
 0x933   :  { %7472 = vmatprep.subr.bf16.mxu0 %v9770_v47  ;;  %7536 = vmatprep.subr.bf16.mxu1 %v9815_v6 }
 0x935   :  { %3028 = vmatmul.mubr.f32.vlgmr.msra.gmra.mrb[32].mxu0 %v2791_v23  ;;  %3099 = vmatmul.mubr.f32.vlgmr.msra.gmra.mrb[32].mxu1 %v2791_v23  ;;  %v12830_v23 = vld [vmem:[#allocation22_spill] sm:$0xff] }
 0x936   :  { %7474 = vmatpush1.bf16.msra.mxu0 %v9797_v60  ;;  %7538 = vmatpush1.bf16.msra.mxu1 %v9838_v21 }
 0x937   :  { %7476 = vmatprep.subr.bf16.mxu0 %v9806_v1  ;;  %7540 = vmatprep.subr.bf16.mxu1 %v9853_v35 }
 0x93a   :  { %7478 = vmatpush1.bf16.msra.mxu0 %v9834_v20  ;;  %7542 = vmatpush1.bf16.msra.mxu1 %v9875_v50 }
 0x93b   :  { %7480 = vmatprep.subr.bf16.mxu0 %v9844_v28  ;;  %7544 = vmatprep.subr.bf16.mxu1 %v9890_v59 }
 0x93e   :  { %7482 = vmatpush1.bf16.msra.mxu0 %v9872_v49  ;;  %7546 = vmatpush1.bf16.msra.mxu1 %v9912_v16 }
 0x93f   :  { %7484 = vmatprep.subr.bf16.mxu0 %v12465_v56  ;;  %7548 = vmatprep.subr.bf16.mxu1 %v12813_v44 }
 0x942   :  { %7486 = vmatpush1.bf16.msra.mxu0 %v12814_v39  ;;  %7550 = vmatpush1.bf16.msra.mxu1 %v12815_v36 }
 0x943   :  { %7488 = vmatprep.subr.bf16.mxu0 %v12816_v54  ;;  %7552 = vmatprep.subr.bf16.mxu1 %v12817_v3  ;;  %v12868_v54 = vld [vmem:[#allocation58_spill] sm:$0xff] }
 0x946   :  { %7490 = vmatpush1.bf16.msra.mxu0 %v12818_v29  ;;  %7554 = vmatpush1.bf16.msra.mxu1 %v12819_v11  ;;  %v12866_v11 = vld [vmem:[#allocation56_spill] sm:$0xff] }
 0x947   :  { %7492 = vmatprep.subr.bf16.mxu0 %v12820_v13  ;;  %7556 = vmatprep.subr.bf16.mxu1 %v12821_v22  ;;  %v12831_v13 = vld [vmem:[#allocation23_spill] sm:$0xff]  ;;  %v12832_v22 = vld [vmem:[#allocation24_spill] sm:$0xff] }
 0x94a   :  { %7494 = vmatpush1.bf16.msra.mxu0 %v12822_v53  ;;  %7558 = vmatpush1.bf16.msra.mxu1 %v12823_v40  ;;  %v12833_v53 = vld [vmem:[#allocation25_spill] sm:$0xff]  ;;  %v12834_v40 = vld [vmem:[#allocation26_spill] sm:$0xff] }
 0x94b   :  { %7496 = vmatprep.subr.bf16.mxu0 %v12824_v32  ;;  %7560 = vmatprep.subr.bf16.mxu1 %v12825_v12  ;;  %v12835_v32 = vld [vmem:[#allocation27_spill] sm:$0xff]  ;;  %v12836_v12 = vld [vmem:[#allocation28_spill] sm:$0xff] }
 0x94e   :  { %7498 = vmatpush1.bf16.msra.mxu0 %v12826_v38  ;;  %7562 = vmatpush1.bf16.msra.mxu1 %v12827_v63  ;;  %v12837_v38 = vld [vmem:[#allocation29_spill] sm:$0xff]  ;;  %v12838_v63 = vld [vmem:[#allocation30_spill] sm:$0xff] }
 0x94f   :  { %7500 = vmatprep.subr.bf16.mxu0 %v12828_v5  ;;  %7564 = vmatprep.subr.bf16.mxu1 %v12829_v19  ;;  %v12839_v5 = vld [vmem:[#allocation31_spill] sm:$0xff]  ;;  %v12840_v19 = vld [vmem:[#allocation32_spill] sm:$0xff] }
 0x952   :  { %7502 = vmatpush1.bf16.msra.mxu0 %v12830_v23  ;;  %7566 = vmatpush1.bf16.msra.mxu1 %v12831_v13  ;;  %v12841_v23 = vld [vmem:[#allocation33_spill] sm:$0xff]  ;;  %v12842_v13 = vld [vmem:[#allocation34_spill] sm:$0xff] }
 0x953   :  { %7504 = vmatprep.subr.bf16.mxu0 %v12832_v22  ;;  %7568 = vmatprep.subr.bf16.mxu1 %v12833_v53  ;;  %v12843_v22 = vld [vmem:[#allocation35_spill] sm:$0xff]  ;;  %v12844_v53 = vld [vmem:[#allocation36_spill] sm:$0xff] }
 0x956   :  { %7506 = vmatpush1.bf16.msra.mxu0 %v12834_v40  ;;  %7570 = vmatpush1.bf16.msra.mxu1 %v12835_v32  ;;  %v12845_v40 = vld [vmem:[#allocation37_spill] sm:$0xff]  ;;  %v12846_v32 = vld [vmem:[#allocation38_spill] sm:$0xff] }
 0x957   :  { %7508 = vmatprep.subr.bf16.mxu0 %v12836_v12  ;;  %7572 = vmatprep.subr.bf16.mxu1 %v12837_v38  ;;  %v12847_v12 = vld [vmem:[#allocation39_spill] sm:$0xff]  ;;  %v12848_v38 = vld [vmem:[#allocation40_spill] sm:$0xff] }
 0x95a   :  { %7510 = vmatpush1.bf16.msra.mxu0 %v12838_v63  ;;  %7574 = vmatpush1.bf16.msra.mxu1 %v12839_v5  ;;  %v12849_v63 = vld [vmem:[#allocation41_spill] sm:$0xff]  ;;  %v12850_v5 = vld [vmem:[#allocation42_spill] sm:$0xff] }
 0x95b   :  { %7512 = vmatprep.subr.bf16.mxu0 %v12840_v19  ;;  %7576 = vmatprep.subr.bf16.mxu1 %v12841_v23  ;;  %v12851_v19 = vld [vmem:[#allocation43_spill] sm:$0xff]  ;;  %v12852_v23 = vld [vmem:[#allocation44_spill] sm:$0xff] }
 0x95e   :  { %7514 = vmatpush1.bf16.msra.mxu0 %v12842_v13  ;;  %7578 = vmatpush1.bf16.msra.mxu1 %v12843_v22  ;;  %v12853_v13 = vld [vmem:[#allocation45_spill] sm:$0xff]  ;;  %v12854_v22 = vld [vmem:[#allocation46_spill] sm:$0xff] }
 0x95f   :  { %7516 = vmatprep.subr.bf16.mxu0 %v12844_v53  ;;  %7580 = vmatprep.subr.bf16.mxu1 %v12845_v40  ;;  %v12855_v53 = vld [vmem:[#allocation47_spill] sm:$0xff]  ;;  %v12856_v40 = vld [vmem:[#allocation48_spill] sm:$0xff] }
 0x962   :  { %7518 = vmatpush1.bf16.msra.mxu0 %v12846_v32  ;;  %7582 = vmatpush1.bf16.msra.mxu1 %v12847_v12  ;;  %v12857_v32 = vld [vmem:[#allocation49_spill] sm:$0xff]  ;;  %v12858_v12 = vld [vmem:[#allocation50_spill] sm:$0xff] }
 0x963   :  { %7520 = vmatprep.subr.bf16.mxu0 %v12848_v38  ;;  %7584 = vmatprep.subr.bf16.mxu1 %v12849_v63  ;;  %v12859_v38 = vld [vmem:[#allocation51_spill] sm:$0xff]  ;;  %v12860_v63 = vld [vmem:[#allocation52_spill] sm:$0xff] }
 0x966   :  { %7522 = vmatpush1.bf16.msra.mxu0 %v12850_v5  ;;  %7586 = vmatpush1.bf16.msra.mxu1 %v12851_v19  ;;  %v12861_v5 = vld [vmem:[#allocation53_spill] sm:$0xff]  ;;  %v12862_v19 = vld [vmem:[#allocation54_spill] sm:$0xff] }
 0x967   :  { %7524 = vmatprep.subr.bf16.mxu0 %v12852_v23  ;;  %7588 = vmatprep.subr.bf16.mxu1 %v12853_v13  ;;  %v12863_v23 = vld [vmem:[#allocation55_spill] sm:$0xff]  ;;  %v12864_v13 = vld [vmem:[#allocation2_spill] sm:$0xff] }
 0x96a   :  { %7526 = vmatpush1.bf16.msra.mxu0 %v12854_v22  ;;  %7590 = vmatpush1.bf16.msra.mxu1 %v12855_v53  ;;  %v12865_v22 = vld [vmem:[#allocation3_spill] sm:$0xff] }
 0x96b   :  { %7528 = vmatprep.subr.bf16.mxu0 %v12856_v40  ;;  %7592 = vmatprep.subr.bf16.mxu1 %v12857_v32 }
 0x96e   :  { %7530 = vmatpush1.bf16.msra.mxu0 %v12858_v12  ;;  %7594 = vmatpush1.bf16.msra.mxu1 %v12859_v38 }
 0x96f   :  { %7532 = vmatprep.subr.bf16.mxu0 %v12860_v63  ;;  %7596 = vmatprep.subr.bf16.mxu1 %v12861_v5  ;;  %v12867_v5 = vld [vmem:[#allocation57_spill] sm:$0xff] }
 0x972   :  { %7534 = vmatpush1.bf16.msra.mxu0 %v12862_v19  ;;  %7598 = vmatpush1.bf16.msra.mxu1 %v12863_v23 }
 0x973   :  { %7600 = vmatprep.subr.bf16.mxu0 %v12864_v13  ;;  %7632 = vmatprep.subr.bf16.mxu1 %v12865_v22 }
 0x9e8   :  { %v2858_v53 = vpop.f32.mrb[30].mxu0  ;;  %v2929_v40 = vpop.f32.mrb[30].mxu1 }
 0x9e9   :  { %v2859_v32 = vadd.f32 %v2858_v53, %v12866_v11  ;;  %v2860_v29 = vpop.f32.mrb[31].mxu0  ;;  %v2931_v12 = vpop.f32.mrb[31].mxu1  ;;  %v2930_v19 = vadd.f32 %v2929_v40, %v12867_v5  ;;  %v5788_v40 = vld [vmem:[%s12224_s0 + $0x100] sm:$0xff] }
 0x9ea   :  { %v2861_v38 = vadd.f32 %v2860_v29, %v10476_v4  ;;  %v2932_v23 = vadd.f32 %v2931_v12, %v12868_v54  ;;  %v12869_v12 = vld [vmem:[#allocation59_spill] sm:$0xff] }
 0x9eb   :  { %v5785_v3 = vmul.f32 -1.442695, %v2859_v32  ;;  %v5787_v36 = vmul.f32 -1.442695, %v2930_v19 }
 0x9ec   :  { %v5786_v63 = vmul.f32 -1.442695, %v2861_v38 }
 0x9ed   :  { %9184 = vpow2.f32 %v5785_v3 }
 0x9ee   :  { %9186 = vpow2.f32 %v5786_v63 }
 0x9ef   :  { %9188 = vtanh.f32 %v2932_v23 }
 0x9f0   :  { %9190 = vpow2.f32 %v5787_v36 }
 0x9f7   :  { %v9185_v13 = vpop.eup %9184 }
 0x9f8   :  { %v2943_v39 = vadd.f32 1.0, %v9185_v13  ;;  %v9187_v22 = vpop.eup %9186  ;;  %v5789_v13 = vld [vmem:[%s12224_s0 + $0x108] sm:$0xff] }
 0x9f9   :  { %v2944_v53 = vadd.f32 1.0, %v9187_v22  ;;  %v9189_v11 = vpop.eup %9188 }
 0x9fa   :  { %9192 = vrcp.f32 %v2943_v39  ;;  %v9191_v44 = vpop.eup %9190 }
 0x9fb   :  { %9194 = vrcp.f32 %v2944_v53  ;;  %v2945_v3 = vadd.f32 1.0, %v9191_v44 }
 0x9fd   :  { %9196 = vrcp.f32 %v2945_v3 }
 0xa04   :  { %v9193_v29 = vpop.eup %9192 }
 0xa05   :  { %v2954_v32 = vmul.f32 %v9193_v29, %v9189_v11  ;;  %v9195_v38 = vpop.eup %9194 }
 0xa06   :  { %v2953_v63 = vmul.f32 %v9195_v38, %v12869_v12  ;;  %v5790_v38 = vld [vmem:[%s12224_s0 + $0x110] sm:$0xff] }
 0xa08   :  { %v3029_v36 = vpop.f32.mrb[32].mxu0  ;;  %v3100_v39 = vpop.f32.mrb[32].mxu1  ;;  %v11346_v22 = vadd.f32 %v2954_v32, %v2953_v63  ;;  %v5791_v32 = vld [vmem:[%s12224_s0 + $0x118] sm:$0xff] }
 0xa09   :  { %v3105_v19 = vadd.f32 %v5788_v40, %v3029_v36  ;;  %v3031_v23 = vpop.f32.mrb[33].mxu0  ;;  %v3102_v53 = vpop.f32.mrb[33].mxu1  ;;  %v3107_v12 = vadd.f32 %v5790_v38, %v3100_v39 }
 0xa0a   :  { %12870 = vst [vmem:[#allocation4_spill] sm:$0xff] %v11346_v22  ;;  %v3106_v11 = vadd.f32 %v5789_v13, %v3031_v23  ;;  %9198 = vtanh.f32 %v11346_v22  ;;  %v9197_v40 = vpop.eup %9196  ;;  %v3108_v63 = vadd.f32 %v5791_v32, %v3102_v53 }
 0xa0b   :  { %v5792_v44 = vmul.f32 -1.442695, %v3105_v19  ;;  %v5794_v3 = vmul.f32 -1.442695, %v3107_v12 }
 0xa0c   :  { %v5793_v29 = vmul.f32 -1.442695, %v3106_v11 }
 0xa0d   :  { %9200 = vpow2.f32 %v5792_v44 }
 0xa0e   :  { %9202 = vpow2.f32 %v5793_v29 }
 0xa0f   :  { %9204 = vtanh.f32 %v3108_v63 }
 0xa10   :  { %9206 = vpow2.f32 %v5794_v3  ;;  %v12876_v3 = vld [vmem:[#allocation8_spill] sm:$0xff] }
 0xa14   :  { %v9199_v36 = vpop.eup %9198 }
 0xa15   :  { %v2957_v13 = vmul.f32 %v9199_v36, %v9197_v40  ;;  %v12875_v36 = vld [vmem:[#allocation10_spill] sm:$0xff] }
 0xa17   :  { %v9201_v19 = vpop.eup %9200  ;;  %3197 = vmatprep.mubr.f32.mxu0 %v2957_v13  ;;  %3268 = vmatprep.mubr.f32.mxu1 %v2957_v13  ;;  %v12877_v13 = vld [vmem:[#allocation11_spill] sm:$0xff] }
 0xa18   :  { %v3118_v23 = vadd.f32 1.0, %v9201_v19  ;;  %v9203_v11 = vpop.eup %9202  ;;  %v12878_v19 = vld [vmem:[#allocation12_spill] sm:$0xff] }
 0xa19   :  { %v3119_v44 = vadd.f32 1.0, %v9203_v11  ;;  %v9205_v39 = vpop.eup %9204  ;;  %v12880_v11 = vld [vmem:[#allocation14_spill] sm:$0xff] }
 0xa1a   :  { %9208 = vrcp.f32 %v3118_v23  ;;  %v9207_v29 = vpop.eup %9206  ;;  %v12879_v23 = vld [vmem:[#allocation13_spill] sm:$0xff] }
 0xa1b   :  { %9210 = vrcp.f32 %v3119_v44  ;;  %v3120_v5 = vadd.f32 1.0, %v9207_v29  ;;  %v12881_v44 = vld [vmem:[#allocation15_spill] sm:$0xff]  ;;  %v12883_v29 = vld [vmem:[#allocation17_spill] sm:$0xff] }
 0xa1d   :  { %9212 = vrcp.f32 %v3120_v5  ;;  %v12873_v5 = vld [vmem:[#allocation9_spill] sm:$0xff] }
 0xa24   :  { %v9209_v38 = vpop.eup %9208 }
 0xa25   :  { %v3129_v22 = vmul.f32 %v9209_v38, %v9205_v39  ;;  %v9211_v54 = vpop.eup %9210  ;;  %v12882_v39 = vld [vmem:[#allocation16_spill] sm:$0xff]  ;;  %v12884_v38 = vld [vmem:[#allocation18_spill] sm:$0xff] }
 0xa26   :  { %v3128_v53 = vmul.f32 %v9211_v54, %v11234_v57  ;;  %v12871_v57 = vld [vmem:[#allocation7_spill] sm:$0xff]  ;;  %v12872_v54 = vld [vmem:[#allocation5_spill] sm:$0xff] }
 0xa27   :  { %v9213_v32 = vpop.eup %9212 }
 0xa28   :  { %v11356_v12 = vadd.f32 %v3129_v22, %v3128_v53  ;;  %v12874_v22 = vld [vmem:[#allocation6_spill] sm:$0xff]  ;;  %v12885_v53 = vld [vmem:[#allocation19_spill] sm:$0xff] }
 0xa2a   :  { %9214 = vtanh.f32 %v11356_v12 }
 0xa34   :  { %v9215_v40 = vpop.eup %9214 }
 0xa35   :  { %v3132_v63 = vmul.f32 %v9215_v40, %v9213_v32  ;;  %v12886_v32 = vld [vmem:[#allocation20_spill] sm:$0xff]  ;;  %v12887_v40 = vld [vmem:[#allocation21_spill] sm:$0xff] }
 0xa37   :  { %3198 = vmatmul.mubr.f32.vlgmr.msra.gmra.mrb[34].mxu0 %v3132_v63  ;;  %3269 = vmatmul.mubr.f32.vlgmr.msra.gmra.mrb[34].mxu1 %v3132_v63 }
 0xa38   :  { %7602 = vmatpush1.bf16.msra.mxu0 %v9508_v8  ;;  %7634 = vmatpush1.bf16.msra.mxu1 %v9557_v25 }
 0xa39   :  { %7604 = vmatprep.subr.bf16.mxu0 %v9510_v9  ;;  %7636 = vmatprep.subr.bf16.mxu1 %v9582_v33 }
 0xa3a   :  { %3368 = vmatprep.mubr.f32.mxu0 %v12411_v2  ;;  %3439 = vmatprep.mubr.f32.mxu1 %v12411_v2 }
 0xa3c   :  { %7606 = vmatpush1.bf16.msra.mxu0 %v9526_v14  ;;  %7638 = vmatpush1.bf16.msra.mxu1 %v9593_v37 }
 0xa3d   :  { %7608 = vmatprep.subr.bf16.mxu0 %v9535_v17  ;;  %7640 = vmatprep.subr.bf16.mxu1 %v9617_v45 }
 0xa40   :  { %7610 = vmatpush1.bf16.msra.mxu0 %v9560_v26  ;;  %7642 = vmatpush1.bf16.msra.mxu1 %v9626_v48 }
 0xa41   :  { %7612 = vmatprep.subr.bf16.mxu0 %v9573_v30  ;;  %7644 = vmatprep.subr.bf16.mxu1 %v9638_v52 }
 0xa44   :  { %7614 = vmatpush1.bf16.msra.mxu0 %v9609_v42  ;;  %7646 = vmatpush1.bf16.msra.mxu1 %v9668_v62 }
 0xa45   :  { %7616 = vmatprep.subr.bf16.mxu0 %v9620_v46  ;;  %7648 = vmatprep.subr.bf16.mxu1 %v9674_v0 }
 0xa48   :  { %7618 = vmatpush1.bf16.msra.mxu0 %v9647_v55  ;;  %7650 = vmatpush1.bf16.msra.mxu1 %v9704_v15 }
 0xa49   :  { %7620 = vmatprep.subr.bf16.mxu0 %v9656_v58  ;;  %7652 = vmatprep.subr.bf16.mxu1 %v9710_v18 }
 0xa4c   :  { %7622 = vmatpush1.bf16.msra.mxu0 %v9689_v7  ;;  %7654 = vmatpush1.bf16.msra.mxu1 %v9737_v31 }
 0xa4d   :  { %7624 = vmatprep.subr.bf16.mxu0 %v9692_v10  ;;  %7656 = vmatprep.subr.bf16.mxu1 %v9743_v34 }
 0xa50   :  { %7626 = vmatpush1.bf16.msra.mxu0 %v9725_v24  ;;  %7658 = vmatpush1.bf16.msra.mxu1 %v9765_v43 }
 0xa51   :  { %7628 = vmatprep.subr.bf16.mxu0 %v9728_v27  ;;  %7660 = vmatprep.subr.bf16.mxu1 %v9779_v51 }
 0xa54   :  { %7630 = vmatpush1.bf16.msra.mxu0 %v9761_v41  ;;  %7662 = vmatpush1.bf16.msra.mxu1 %v9800_v61 }
 0xa55   :  { %7664 = vmatprep.subr.bf16.mxu0 %v9770_v47  ;;  %7728 = vmatprep.subr.bf16.mxu1 %v9815_v6 }
 0xa57   :  { %3369 = vmatmul.mubr.f32.vlgmr.msra.gmra.mrb[36].mxu0 %v3132_v63  ;;  %3440 = vmatmul.mubr.f32.vlgmr.msra.gmra.mrb[36].mxu1 %v3132_v63  ;;  %v12888_v63 = vld [vmem:[#allocation22_spill] sm:$0xff] }
 0xa58   :  { %7666 = vmatpush1.bf16.msra.mxu0 %v9797_v60  ;;  %7730 = vmatpush1.bf16.msra.mxu1 %v9838_v21 }
 0xa59   :  { %7668 = vmatprep.subr.bf16.mxu0 %v9806_v1  ;;  %7732 = vmatprep.subr.bf16.mxu1 %v9853_v35 }
 0xa5c   :  { %7670 = vmatpush1.bf16.msra.mxu0 %v9834_v20  ;;  %7734 = vmatpush1.bf16.msra.mxu1 %v9875_v50 }
 0xa5d   :  { %7672 = vmatprep.subr.bf16.mxu0 %v9844_v28  ;;  %7736 = vmatprep.subr.bf16.mxu1 %v9890_v59 }
 0xa60   :  { %7674 = vmatpush1.bf16.msra.mxu0 %v9872_v49  ;;  %7738 = vmatpush1.bf16.msra.mxu1 %v9912_v16 }
 0xa61   :  { %7676 = vmatprep.subr.bf16.mxu0 %v12465_v56  ;;  %7740 = vmatprep.subr.bf16.mxu1 %v12871_v57 }
 0xa64   :  { %7678 = vmatpush1.bf16.msra.mxu0 %v12872_v54  ;;  %7742 = vmatpush1.bf16.msra.mxu1 %v12873_v5 }
 0xa65   :  { %7680 = vmatprep.subr.bf16.mxu0 %v12874_v22  ;;  %7744 = vmatprep.subr.bf16.mxu1 %v12875_v36  ;;  %v12926_v22 = vld [vmem:[#allocation58_spill] sm:$0xff] }
 0xa68   :  { %7682 = vmatpush1.bf16.msra.mxu0 %v12876_v3  ;;  %7746 = vmatpush1.bf16.msra.mxu1 %v12877_v13  ;;  %v12924_v13 = vld [vmem:[#allocation56_spill] sm:$0xff] }
 0xa69   :  { %7684 = vmatprep.subr.bf16.mxu0 %v12878_v19  ;;  %7748 = vmatprep.subr.bf16.mxu1 %v12879_v23  ;;  %v12889_v19 = vld [vmem:[#allocation23_spill] sm:$0xff]  ;;  %v12890_v23 = vld [vmem:[#allocation24_spill] sm:$0xff] }
 0xa6c   :  { %7686 = vmatpush1.bf16.msra.mxu0 %v12880_v11  ;;  %7750 = vmatpush1.bf16.msra.mxu1 %v12881_v44  ;;  %v12891_v11 = vld [vmem:[#allocation25_spill] sm:$0xff]  ;;  %v12892_v44 = vld [vmem:[#allocation26_spill] sm:$0xff] }
 0xa6d   :  { %7688 = vmatprep.subr.bf16.mxu0 %v12882_v39  ;;  %7752 = vmatprep.subr.bf16.mxu1 %v12883_v29  ;;  %v12893_v39 = vld [vmem:[#allocation27_spill] sm:$0xff]  ;;  %v12894_v29 = vld [vmem:[#allocation28_spill] sm:$0xff] }
 0xa70   :  { %7690 = vmatpush1.bf16.msra.mxu0 %v12884_v38  ;;  %7754 = vmatpush1.bf16.msra.mxu1 %v12885_v53  ;;  %v12895_v38 = vld [vmem:[#allocation29_spill] sm:$0xff]  ;;  %v12896_v53 = vld [vmem:[#allocation30_spill] sm:$0xff] }
 0xa71   :  { %7692 = vmatprep.subr.bf16.mxu0 %v12886_v32  ;;  %7756 = vmatprep.subr.bf16.mxu1 %v12887_v40  ;;  %v12897_v32 = vld [vmem:[#allocation31_spill] sm:$0xff]  ;;  %v12898_v40 = vld [vmem:[#allocation32_spill] sm:$0xff] }
 0xa74   :  { %7694 = vmatpush1.bf16.msra.mxu0 %v12888_v63  ;;  %7758 = vmatpush1.bf16.msra.mxu1 %v12889_v19  ;;  %v12899_v63 = vld [vmem:[#allocation33_spill] sm:$0xff]  ;;  %v12900_v19 = vld [vmem:[#allocation34_spill] sm:$0xff] }
 0xa75   :  { %7696 = vmatprep.subr.bf16.mxu0 %v12890_v23  ;;  %7760 = vmatprep.subr.bf16.mxu1 %v12891_v11  ;;  %v12901_v23 = vld [vmem:[#allocation35_spill] sm:$0xff]  ;;  %v12902_v11 = vld [vmem:[#allocation36_spill] sm:$0xff] }
 0xa78   :  { %7698 = vmatpush1.bf16.msra.mxu0 %v12892_v44  ;;  %7762 = vmatpush1.bf16.msra.mxu1 %v12893_v39  ;;  %v12903_v44 = vld [vmem:[#allocation37_spill] sm:$0xff]  ;;  %v12904_v39 = vld [vmem:[#allocation38_spill] sm:$0xff] }
 0xa79   :  { %7700 = vmatprep.subr.bf16.mxu0 %v12894_v29  ;;  %7764 = vmatprep.subr.bf16.mxu1 %v12895_v38  ;;  %v12905_v29 = vld [vmem:[#allocation39_spill] sm:$0xff]  ;;  %v12906_v38 = vld [vmem:[#allocation40_spill] sm:$0xff] }
 0xa7c   :  { %7702 = vmatpush1.bf16.msra.mxu0 %v12896_v53  ;;  %7766 = vmatpush1.bf16.msra.mxu1 %v12897_v32  ;;  %v12907_v53 = vld [vmem:[#allocation41_spill] sm:$0xff]  ;;  %v12908_v32 = vld [vmem:[#allocation42_spill] sm:$0xff] }
 0xa7d   :  { %7704 = vmatprep.subr.bf16.mxu0 %v12898_v40  ;;  %7768 = vmatprep.subr.bf16.mxu1 %v12899_v63  ;;  %v12909_v40 = vld [vmem:[#allocation43_spill] sm:$0xff]  ;;  %v12910_v63 = vld [vmem:[#allocation44_spill] sm:$0xff] }
 0xa80   :  { %7706 = vmatpush1.bf16.msra.mxu0 %v12900_v19  ;;  %7770 = vmatpush1.bf16.msra.mxu1 %v12901_v23  ;;  %v12911_v19 = vld [vmem:[#allocation45_spill] sm:$0xff]  ;;  %v12912_v23 = vld [vmem:[#allocation46_spill] sm:$0xff] }
 0xa81   :  { %7708 = vmatprep.subr.bf16.mxu0 %v12902_v11  ;;  %7772 = vmatprep.subr.bf16.mxu1 %v12903_v44  ;;  %v12913_v11 = vld [vmem:[#allocation47_spill] sm:$0xff]  ;;  %v12914_v44 = vld [vmem:[#allocation48_spill] sm:$0xff] }
 0xa84   :  { %7710 = vmatpush1.bf16.msra.mxu0 %v12904_v39  ;;  %7774 = vmatpush1.bf16.msra.mxu1 %v12905_v29  ;;  %v12915_v39 = vld [vmem:[#allocation49_spill] sm:$0xff]  ;;  %v12916_v29 = vld [vmem:[#allocation50_spill] sm:$0xff] }
 0xa85   :  { %7712 = vmatprep.subr.bf16.mxu0 %v12906_v38  ;;  %7776 = vmatprep.subr.bf16.mxu1 %v12907_v53  ;;  %v12917_v38 = vld [vmem:[#allocation51_spill] sm:$0xff]  ;;  %v12918_v53 = vld [vmem:[#allocation52_spill] sm:$0xff] }
 0xa88   :  { %7714 = vmatpush1.bf16.msra.mxu0 %v12908_v32  ;;  %7778 = vmatpush1.bf16.msra.mxu1 %v12909_v40  ;;  %v12919_v32 = vld [vmem:[#allocation53_spill] sm:$0xff]  ;;  %v12920_v40 = vld [vmem:[#allocation54_spill] sm:$0xff] }
 0xa89   :  { %7716 = vmatprep.subr.bf16.mxu0 %v12910_v63  ;;  %7780 = vmatprep.subr.bf16.mxu1 %v12911_v19  ;;  %v12921_v63 = vld [vmem:[#allocation55_spill] sm:$0xff]  ;;  %v12922_v19 = vld [vmem:[#allocation2_spill] sm:$0xff] }
 0xa8c   :  { %7718 = vmatpush1.bf16.msra.mxu0 %v12912_v23  ;;  %7782 = vmatpush1.bf16.msra.mxu1 %v12913_v11  ;;  %v12923_v23 = vld [vmem:[#allocation3_spill] sm:$0xff] }
 0xa8d   :  { %7720 = vmatprep.subr.bf16.mxu0 %v12914_v44  ;;  %7784 = vmatprep.subr.bf16.mxu1 %v12915_v39 }
 0xa90   :  { %7722 = vmatpush1.bf16.msra.mxu0 %v12916_v29  ;;  %7786 = vmatpush1.bf16.msra.mxu1 %v12917_v38 }
 0xa91   :  { %7724 = vmatprep.subr.bf16.mxu0 %v12918_v53  ;;  %7788 = vmatprep.subr.bf16.mxu1 %v12919_v32  ;;  %v12925_v32 = vld [vmem:[#allocation57_spill] sm:$0xff] }
 0xa94   :  { %7726 = vmatpush1.bf16.msra.mxu0 %v12920_v40  ;;  %7790 = vmatpush1.bf16.msra.mxu1 %v12921_v63 }
 0xa95   :  { %7792 = vmatprep.subr.bf16.mxu0 %v12922_v19  ;;  %7824 = vmatprep.subr.bf16.mxu1 %v12923_v23 }
 0xb0a   :  { %v3199_v11 = vpop.f32.mrb[34].mxu0  ;;  %v3270_v44 = vpop.f32.mrb[34].mxu1 }
 0xb0b   :  { %v3200_v39 = vadd.f32 %v3199_v11, %v12924_v13  ;;  %v3201_v3 = vpop.f32.mrb[35].mxu0  ;;  %v3272_v29 = vpop.f32.mrb[35].mxu1  ;;  %v3271_v40 = vadd.f32 %v3270_v44, %v12925_v32  ;;  %v5798_v44 = vld [vmem:[%s12224_s0 + $0x120] sm:$0xff] }
 0xb0c   :  { %v3202_v38 = vadd.f32 %v3201_v3, %v10476_v4  ;;  %v3273_v63 = vadd.f32 %v3272_v29, %v12926_v22  ;;  %v12927_v29 = vld [vmem:[#allocation4_spill] sm:$0xff] }
 0xb0d   :  { %v5795_v36 = vmul.f32 -1.442695, %v3200_v39  ;;  %v5797_v5 = vmul.f32 -1.442695, %v3271_v40 }
 0xb0e   :  { %v5796_v53 = vmul.f32 -1.442695, %v3202_v38 }
 0xb0f   :  { %9216 = vpow2.f32 %v5795_v36 }
 0xb10   :  { %9218 = vpow2.f32 %v5796_v53 }
 0xb11   :  { %9220 = vtanh.f32 %v3273_v63 }
 0xb12   :  { %9222 = vpow2.f32 %v5797_v5 }
 0xb19   :  { %v9217_v19 = vpop.eup %9216 }
 0xb1a   :  { %v3284_v54 = vadd.f32 1.0, %v9217_v19  ;;  %v9219_v23 = vpop.eup %9218  ;;  %v5799_v19 = vld [vmem:[%s12224_s0 + $0x128] sm:$0xff] }
 0xb1b   :  { %v3285_v11 = vadd.f32 1.0, %v9219_v23  ;;  %v9221_v13 = vpop.eup %9220 }
 0xb1c   :  { %9224 = vrcp.f32 %v3284_v54  ;;  %v9223_v57 = vpop.eup %9222 }
 0xb1d   :  { %9226 = vrcp.f32 %v3285_v11  ;;  %v3286_v36 = vadd.f32 1.0, %v9223_v57 }
 0xb1f   :  { %9228 = vrcp.f32 %v3286_v36 }
 0xb26   :  { %v9225_v3 = vpop.eup %9224 }
 0xb27   :  { %v3295_v39 = vmul.f32 %v9225_v3, %v9221_v13  ;;  %v9227_v38 = vpop.eup %9226 }
 0xb28   :  { %v3294_v53 = vmul.f32 %v9227_v38, %v12927_v29  ;;  %v5800_v38 = vld [vmem:[%s12224_s0 + $0x130] sm:$0xff] }
 0xb2a   :  { %v3370_v5 = vpop.f32.mrb[36].mxu0  ;;  %v3441_v54 = vpop.f32.mrb[36].mxu1  ;;  %v11468_v23 = vadd.f32 %v3295_v39, %v3294_v53  ;;  %v5801_v39 = vld [vmem:[%s12224_s0 + $0x138] sm:$0xff] }
 0xb2b   :  { %v3446_v40 = vadd.f32 %v5798_v44, %v3370_v5  ;;  %v3372_v63 = vpop.f32.mrb[37].mxu0  ;;  %v3443_v11 = vpop.f32.mrb[37].mxu1  ;;  %v3448_v29 = vadd.f32 %v5800_v38, %v3441_v54 }
 0xb2c   :  { %12928 = vst [vmem:[#allocation59_spill] sm:$0xff] %v11468_v23  ;;  %v3447_v13 = vadd.f32 %v5799_v19, %v3372_v63  ;;  %9230 = vtanh.f32 %v11468_v23  ;;  %v9229_v44 = vpop.eup %9228  ;;  %v3449_v53 = vadd.f32 %v5801_v39, %v3443_v11 }
 0xb2d   :  { %v5802_v57 = vmul.f32 -1.442695, %v3446_v40  ;;  %v5804_v36 = vmul.f32 -1.442695, %v3448_v29 }
 0xb2e   :  { %v5803_v3 = vmul.f32 -1.442695, %v3447_v13 }
 0xb2f   :  { %9232 = vpow2.f32 %v5802_v57 }
 0xb30   :  { %9234 = vpow2.f32 %v5803_v3 }
 0xb31   :  { %9236 = vtanh.f32 %v3449_v53 }
 0xb32   :  { %9238 = vpow2.f32 %v5804_v36  ;;  %v12934_v36 = vld [vmem:[#allocation8_spill] sm:$0xff] }
 0xb36   :  { %v9231_v5 = vpop.eup %9230 }
 0xb37   :  { %v3298_v19 = vmul.f32 %v9231_v5, %v9229_v44  ;;  %v12933_v5 = vld [vmem:[#allocation10_spill] sm:$0xff] }
 0xb39   :  { %v9233_v40 = vpop.eup %9232  ;;  %3538 = vmatprep.mubr.f32.mxu0 %v3298_v19  ;;  %3609 = vmatprep.mubr.f32.mxu1 %v3298_v19  ;;  %v12935_v19 = vld [vmem:[#allocation11_spill] sm:$0xff] }
 0xb3a   :  { %v3459_v63 = vadd.f32 1.0, %v9233_v40  ;;  %v9235_v13 = vpop.eup %9234  ;;  %v12936_v40 = vld [vmem:[#allocation12_spill] sm:$0xff] }
 0xb3b   :  { %v3460_v57 = vadd.f32 1.0, %v9235_v13  ;;  %v9237_v54 = vpop.eup %9236  ;;  %v12938_v13 = vld [vmem:[#allocation14_spill] sm:$0xff] }
 0xb3c   :  { %9240 = vrcp.f32 %v3459_v63  ;;  %v9239_v3 = vpop.eup %9238  ;;  %v12937_v63 = vld [vmem:[#allocation13_spill] sm:$0xff] }
 0xb3d   :  { %9242 = vrcp.f32 %v3460_v57  ;;  %v3461_v32 = vadd.f32 1.0, %v9239_v3  ;;  %v12939_v57 = vld [vmem:[#allocation15_spill] sm:$0xff]  ;;  %v12941_v3 = vld [vmem:[#allocation17_spill] sm:$0xff] }
 0xb3f   :  { %9244 = vrcp.f32 %v3461_v32  ;;  %v12931_v32 = vld [vmem:[#allocation9_spill] sm:$0xff] }
 0xb46   :  { %v9241_v38 = vpop.eup %9240 }
 0xb47   :  { %v3470_v23 = vmul.f32 %v9241_v38, %v9237_v54  ;;  %v9243_v22 = vpop.eup %9242  ;;  %v12940_v54 = vld [vmem:[#allocation16_spill] sm:$0xff]  ;;  %v12942_v38 = vld [vmem:[#allocation18_spill] sm:$0xff] }
 0xb48   :  { %v3469_v11 = vmul.f32 %v9243_v22, %v11356_v12  ;;  %v12929_v12 = vld [vmem:[#allocation7_spill] sm:$0xff]  ;;  %v12930_v22 = vld [vmem:[#allocation5_spill] sm:$0xff] }
 0xb49   :  { %v9245_v39 = vpop.eup %9244 }
 0xb4a   :  { %v11478_v29 = vadd.f32 %v3470_v23, %v3469_v11  ;;  %v12932_v23 = vld [vmem:[#allocation6_spill] sm:$0xff]  ;;  %v12943_v11 = vld [vmem:[#allocation19_spill] sm:$0xff] }
 0xb4c   :  { %9246 = vtanh.f32 %v11478_v29 }
 0xb56   :  { %v9247_v44 = vpop.eup %9246 }
 0xb57   :  { %v3473_v53 = vmul.f32 %v9247_v44, %v9245_v39  ;;  %v12944_v39 = vld [vmem:[#allocation20_spill] sm:$0xff]  ;;  %v12945_v44 = vld [vmem:[#allocation21_spill] sm:$0xff] }
 0xb59   :  { %3539 = vmatmul.mubr.f32.vlgmr.msra.gmra.mrb[38].mxu0 %v3473_v53  ;;  %3610 = vmatmul.mubr.f32.vlgmr.msra.gmra.mrb[38].mxu1 %v3473_v53 }
 0xb5a   :  { %7794 = vmatpush1.bf16.msra.mxu0 %v9508_v8  ;;  %7826 = vmatpush1.bf16.msra.mxu1 %v9557_v25 }
 0xb5b   :  { %7796 = vmatprep.subr.bf16.mxu0 %v9510_v9  ;;  %7828 = vmatprep.subr.bf16.mxu1 %v9582_v33 }
 0xb5c   :  { %3709 = vmatprep.mubr.f32.mxu0 %v12411_v2  ;;  %3780 = vmatprep.mubr.f32.mxu1 %v12411_v2 }
 0xb5e   :  { %7798 = vmatpush1.bf16.msra.mxu0 %v9526_v14  ;;  %7830 = vmatpush1.bf16.msra.mxu1 %v9593_v37 }
 0xb5f   :  { %7800 = vmatprep.subr.bf16.mxu0 %v9535_v17  ;;  %7832 = vmatprep.subr.bf16.mxu1 %v9617_v45 }
 0xb62   :  { %7802 = vmatpush1.bf16.msra.mxu0 %v9560_v26  ;;  %7834 = vmatpush1.bf16.msra.mxu1 %v9626_v48 }
 0xb63   :  { %7804 = vmatprep.subr.bf16.mxu0 %v9573_v30  ;;  %7836 = vmatprep.subr.bf16.mxu1 %v9638_v52 }
 0xb66   :  { %7806 = vmatpush1.bf16.msra.mxu0 %v9609_v42  ;;  %7838 = vmatpush1.bf16.msra.mxu1 %v9668_v62 }
 0xb67   :  { %7808 = vmatprep.subr.bf16.mxu0 %v9620_v46  ;;  %7840 = vmatprep.subr.bf16.mxu1 %v9674_v0 }
 0xb6a   :  { %7810 = vmatpush1.bf16.msra.mxu0 %v9647_v55  ;;  %7842 = vmatpush1.bf16.msra.mxu1 %v9704_v15 }
 0xb6b   :  { %7812 = vmatprep.subr.bf16.mxu0 %v9656_v58  ;;  %7844 = vmatprep.subr.bf16.mxu1 %v9710_v18 }
 0xb6e   :  { %7814 = vmatpush1.bf16.msra.mxu0 %v9689_v7  ;;  %7846 = vmatpush1.bf16.msra.mxu1 %v9737_v31 }
 0xb6f   :  { %7816 = vmatprep.subr.bf16.mxu0 %v9692_v10  ;;  %7848 = vmatprep.subr.bf16.mxu1 %v9743_v34 }
 0xb72   :  { %7818 = vmatpush1.bf16.msra.mxu0 %v9725_v24  ;;  %7850 = vmatpush1.bf16.msra.mxu1 %v9765_v43 }
 0xb73   :  { %7820 = vmatprep.subr.bf16.mxu0 %v9728_v27  ;;  %7852 = vmatprep.subr.bf16.mxu1 %v9779_v51 }
 0xb76   :  { %7822 = vmatpush1.bf16.msra.mxu0 %v9761_v41  ;;  %7854 = vmatpush1.bf16.msra.mxu1 %v9800_v61 }
 0xb77   :  { %7856 = vmatprep.subr.bf16.mxu0 %v9770_v47  ;;  %7920 = vmatprep.subr.bf16.mxu1 %v9815_v6 }
 0xb79   :  { %3710 = vmatmul.mubr.f32.vlgmr.msra.gmra.mrb[40].mxu0 %v3473_v53  ;;  %3781 = vmatmul.mubr.f32.vlgmr.msra.gmra.mrb[40].mxu1 %v3473_v53  ;;  %v12946_v53 = vld [vmem:[#allocation22_spill] sm:$0xff] }
 0xb7a   :  { %7858 = vmatpush1.bf16.msra.mxu0 %v9797_v60  ;;  %7922 = vmatpush1.bf16.msra.mxu1 %v9838_v21 }
 0xb7b   :  { %7860 = vmatprep.subr.bf16.mxu0 %v9806_v1  ;;  %7924 = vmatprep.subr.bf16.mxu1 %v9853_v35 }
 0xb7e   :  { %7862 = vmatpush1.bf16.msra.mxu0 %v9834_v20  ;;  %7926 = vmatpush1.bf16.msra.mxu1 %v9875_v50 }
 0xb7f   :  { %7864 = vmatprep.subr.bf16.mxu0 %v9844_v28  ;;  %7928 = vmatprep.subr.bf16.mxu1 %v9890_v59 }
 0xb82   :  { %7866 = vmatpush1.bf16.msra.mxu0 %v9872_v49  ;;  %7930 = vmatpush1.bf16.msra.mxu1 %v9912_v16 }
 0xb83   :  { %7868 = vmatprep.subr.bf16.mxu0 %v12465_v56  ;;  %7932 = vmatprep.subr.bf16.mxu1 %v12929_v12 }
 0xb86   :  { %7870 = vmatpush1.bf16.msra.mxu0 %v12930_v22  ;;  %7934 = vmatpush1.bf16.msra.mxu1 %v12931_v32 }
 0xb87   :  { %7872 = vmatprep.subr.bf16.mxu0 %v12932_v23  ;;  %7936 = vmatprep.subr.bf16.mxu1 %v12933_v5  ;;  %v12984_v23 = vld [vmem:[#allocation58_spill] sm:$0xff] }
 0xb8a   :  { %7874 = vmatpush1.bf16.msra.mxu0 %v12934_v36  ;;  %7938 = vmatpush1.bf16.msra.mxu1 %v12935_v19  ;;  %v12982_v19 = vld [vmem:[#allocation56_spill] sm:$0xff] }
 0xb8b   :  { %7876 = vmatprep.subr.bf16.mxu0 %v12936_v40  ;;  %7940 = vmatprep.subr.bf16.mxu1 %v12937_v63  ;;  %v12947_v40 = vld [vmem:[#allocation23_spill] sm:$0xff]  ;;  %v12948_v63 = vld [vmem:[#allocation24_spill] sm:$0xff] }
 0xb8e   :  { %7878 = vmatpush1.bf16.msra.mxu0 %v12938_v13  ;;  %7942 = vmatpush1.bf16.msra.mxu1 %v12939_v57  ;;  %v12949_v13 = vld [vmem:[#allocation25_spill] sm:$0xff]  ;;  %v12950_v57 = vld [vmem:[#allocation26_spill] sm:$0xff] }
 0xb8f   :  { %7880 = vmatprep.subr.bf16.mxu0 %v12940_v54  ;;  %7944 = vmatprep.subr.bf16.mxu1 %v12941_v3  ;;  %v12951_v54 = vld [vmem:[#allocation27_spill] sm:$0xff]  ;;  %v12952_v3 = vld [vmem:[#allocation28_spill] sm:$0xff] }
 0xb92   :  { %7882 = vmatpush1.bf16.msra.mxu0 %v12942_v38  ;;  %7946 = vmatpush1.bf16.msra.mxu1 %v12943_v11  ;;  %v12953_v38 = vld [vmem:[#allocation29_spill] sm:$0xff]  ;;  %v12954_v11 = vld [vmem:[#allocation30_spill] sm:$0xff] }
 0xb93   :  { %7884 = vmatprep.subr.bf16.mxu0 %v12944_v39  ;;  %7948 = vmatprep.subr.bf16.mxu1 %v12945_v44  ;;  %v12955_v39 = vld [vmem:[#allocation31_spill] sm:$0xff]  ;;  %v12956_v44 = vld [vmem:[#allocation32_spill] sm:$0xff] }
 0xb96   :  { %7886 = vmatpush1.bf16.msra.mxu0 %v12946_v53  ;;  %7950 = vmatpush1.bf16.msra.mxu1 %v12947_v40  ;;  %v12957_v53 = vld [vmem:[#allocation33_spill] sm:$0xff]  ;;  %v12958_v40 = vld [vmem:[#allocation34_spill] sm:$0xff] }
 0xb97   :  { %7888 = vmatprep.subr.bf16.mxu0 %v12948_v63  ;;  %7952 = vmatprep.subr.bf16.mxu1 %v12949_v13  ;;  %v12959_v63 = vld [vmem:[#allocation35_spill] sm:$0xff]  ;;  %v12960_v13 = vld [vmem:[#allocation36_spill] sm:$0xff] }
 0xb9a   :  { %7890 = vmatpush1.bf16.msra.mxu0 %v12950_v57  ;;  %7954 = vmatpush1.bf16.msra.mxu1 %v12951_v54  ;;  %v12961_v57 = vld [vmem:[#allocation37_spill] sm:$0xff]  ;;  %v12962_v54 = vld [vmem:[#allocation38_spill] sm:$0xff] }
 0xb9b   :  { %7892 = vmatprep.subr.bf16.mxu0 %v12952_v3  ;;  %7956 = vmatprep.subr.bf16.mxu1 %v12953_v38  ;;  %v12963_v3 = vld [vmem:[#allocation39_spill] sm:$0xff]  ;;  %v12964_v38 = vld [vmem:[#allocation40_spill] sm:$0xff] }
 0xb9e   :  { %7894 = vmatpush1.bf16.msra.mxu0 %v12954_v11  ;;  %7958 = vmatpush1.bf16.msra.mxu1 %v12955_v39  ;;  %v12965_v11 = vld [vmem:[#allocation41_spill] sm:$0xff]  ;;  %v12966_v39 = vld [vmem:[#allocation42_spill] sm:$0xff] }
 0xb9f   :  { %7896 = vmatprep.subr.bf16.mxu0 %v12956_v44  ;;  %7960 = vmatprep.subr.bf16.mxu1 %v12957_v53  ;;  %v12967_v44 = vld [vmem:[#allocation43_spill] sm:$0xff]  ;;  %v12968_v53 = vld [vmem:[#allocation44_spill] sm:$0xff] }
 0xba2   :  { %7898 = vmatpush1.bf16.msra.mxu0 %v12958_v40  ;;  %7962 = vmatpush1.bf16.msra.mxu1 %v12959_v63  ;;  %v12969_v40 = vld [vmem:[#allocation45_spill] sm:$0xff]  ;;  %v12970_v63 = vld [vmem:[#allocation46_spill] sm:$0xff] }
 0xba3   :  { %7900 = vmatprep.subr.bf16.mxu0 %v12960_v13  ;;  %7964 = vmatprep.subr.bf16.mxu1 %v12961_v57  ;;  %v12971_v13 = vld [vmem:[#allocation47_spill] sm:$0xff]  ;;  %v12972_v57 = vld [vmem:[#allocation48_spill] sm:$0xff] }
 0xba6   :  { %7902 = vmatpush1.bf16.msra.mxu0 %v12962_v54  ;;  %7966 = vmatpush1.bf16.msra.mxu1 %v12963_v3  ;;  %v12973_v54 = vld [vmem:[#allocation49_spill] sm:$0xff]  ;;  %v12974_v3 = vld [vmem:[#allocation50_spill] sm:$0xff] }
 0xba7   :  { %7904 = vmatprep.subr.bf16.mxu0 %v12964_v38  ;;  %7968 = vmatprep.subr.bf16.mxu1 %v12965_v11  ;;  %v12975_v38 = vld [vmem:[#allocation51_spill] sm:$0xff]  ;;  %v12976_v11 = vld [vmem:[#allocation52_spill] sm:$0xff] }
 0xbaa   :  { %7906 = vmatpush1.bf16.msra.mxu0 %v12966_v39  ;;  %7970 = vmatpush1.bf16.msra.mxu1 %v12967_v44  ;;  %v12977_v39 = vld [vmem:[#allocation53_spill] sm:$0xff]  ;;  %v12978_v44 = vld [vmem:[#allocation54_spill] sm:$0xff] }
 0xbab   :  { %7908 = vmatprep.subr.bf16.mxu0 %v12968_v53  ;;  %7972 = vmatprep.subr.bf16.mxu1 %v12969_v40  ;;  %v12979_v53 = vld [vmem:[#allocation55_spill] sm:$0xff]  ;;  %v12980_v40 = vld [vmem:[#allocation2_spill] sm:$0xff] }
 0xbae   :  { %7910 = vmatpush1.bf16.msra.mxu0 %v12970_v63  ;;  %7974 = vmatpush1.bf16.msra.mxu1 %v12971_v13  ;;  %v12981_v63 = vld [vmem:[#allocation3_spill] sm:$0xff] }
 0xbaf   :  { %7912 = vmatprep.subr.bf16.mxu0 %v12972_v57  ;;  %7976 = vmatprep.subr.bf16.mxu1 %v12973_v54 }
 0xbb2   :  { %7914 = vmatpush1.bf16.msra.mxu0 %v12974_v3  ;;  %7978 = vmatpush1.bf16.msra.mxu1 %v12975_v38 }
 0xbb3   :  { %7916 = vmatprep.subr.bf16.mxu0 %v12976_v11  ;;  %7980 = vmatprep.subr.bf16.mxu1 %v12977_v39  ;;  %v12983_v39 = vld [vmem:[#allocation57_spill] sm:$0xff] }
 0xbb6   :  { %7918 = vmatpush1.bf16.msra.mxu0 %v12978_v44  ;;  %7982 = vmatpush1.bf16.msra.mxu1 %v12979_v53 }
 0xbb7   :  { %7984 = vmatprep.subr.bf16.mxu0 %v12980_v40  ;;  %8016 = vmatprep.subr.bf16.mxu1 %v12981_v63 }
 0xc2c   :  { %v3540_v13 = vpop.f32.mrb[38].mxu0  ;;  %v3611_v57 = vpop.f32.mrb[38].mxu1 }
 0xc2d   :  { %v3541_v54 = vadd.f32 %v3540_v13, %v12982_v19  ;;  %v3542_v36 = vpop.f32.mrb[39].mxu0  ;;  %v3613_v3 = vpop.f32.mrb[39].mxu1  ;;  %v3612_v44 = vadd.f32 %v3611_v57, %v12983_v39  ;;  %v5808_v57 = vld [vmem:[%s12224_s0 + $0x140] sm:$0xff] }
 0xc2e   :  { %v3543_v38 = vadd.f32 %v3542_v36, %v10476_v4  ;;  %v3614_v53 = vadd.f32 %v3613_v3, %v12984_v23  ;;  %v12985_v3 = vld [vmem:[#allocation59_spill] sm:$0xff] }
 0xc2f   :  { %v5805_v5 = vmul.f32 -1.442695, %v3541_v54  ;;  %v5807_v32 = vmul.f32 -1.442695, %v3612_v44 }
 0xc30   :  { %v5806_v11 = vmul.f32 -1.442695, %v3543_v38 }
 0xc31   :  { %9248 = vpow2.f32 %v5805_v5 }
 0xc32   :  { %9250 = vpow2.f32 %v5806_v11 }
 0xc33   :  { %9252 = vtanh.f32 %v3614_v53 }
 0xc34   :  { %9254 = vpow2.f32 %v5807_v32 }
 0xc3b   :  { %v9249_v40 = vpop.eup %9248 }
 0xc3c   :  { %v3625_v22 = vadd.f32 1.0, %v9249_v40  ;;  %v9251_v63 = vpop.eup %9250  ;;  %v5809_v40 = vld [vmem:[%s12224_s0 + $0x148] sm:$0xff] }
 0xc3d   :  { %v3626_v13 = vadd.f32 1.0, %v9251_v63  ;;  %v9253_v19 = vpop.eup %9252 }
 0xc3e   :  { %9256 = vrcp.f32 %v3625_v22  ;;  %v9255_v12 = vpop.eup %9254 }
 0xc3f   :  { %9258 = vrcp.f32 %v3626_v13  ;;  %v3627_v5 = vadd.f32 1.0, %v9255_v12 }
 0xc41   :  { %9260 = vrcp.f32 %v3627_v5 }
 0xc48   :  { %v9257_v36 = vpop.eup %9256 }
 0xc49   :  { %v3636_v54 = vmul.f32 %v9257_v36, %v9253_v19  ;;  %v9259_v38 = vpop.eup %9258 }
 0xc4a   :  { %v3635_v11 = vmul.f32 %v9259_v38, %v12985_v3  ;;  %v5810_v38 = vld [vmem:[%s12224_s0 + $0x150] sm:$0xff] }
 0xc4c   :  { %v3711_v32 = vpop.f32.mrb[40].mxu0  ;;  %v3782_v22 = vpop.f32.mrb[40].mxu1  ;;  %v11590_v63 = vadd.f32 %v3636_v54, %v3635_v11  ;;  %v5811_v54 = vld [vmem:[%s12224_s0 + $0x158] sm:$0xff] }
 0xc4d   :  { %v3787_v44 = vadd.f32 %v5808_v57, %v3711_v32  ;;  %v3713_v53 = vpop.f32.mrb[41].mxu0  ;;  %v3784_v13 = vpop.f32.mrb[41].mxu1  ;;  %v3789_v3 = vadd.f32 %v5810_v38, %v3782_v22 }
 0xc4e   :  { %12986 = vst [vmem:[#allocation4_spill] sm:$0xff] %v11590_v63  ;;  %v3788_v19 = vadd.f32 %v5809_v40, %v3713_v53  ;;  %9262 = vtanh.f32 %v11590_v63  ;;  %v9261_v57 = vpop.eup %9260  ;;  %v3790_v11 = vadd.f32 %v5811_v54, %v3784_v13 }
 0xc4f   :  { %v5812_v12 = vmul.f32 -1.442695, %v3787_v44  ;;  %v5814_v5 = vmul.f32 -1.442695, %v3789_v3 }
 0xc50   :  { %v5813_v36 = vmul.f32 -1.442695, %v3788_v19 }
 0xc51   :  { %9264 = vpow2.f32 %v5812_v12 }
 0xc52   :  { %9266 = vpow2.f32 %v5813_v36 }
 0xc53   :  { %9268 = vtanh.f32 %v3790_v11 }
 0xc54   :  { %9270 = vpow2.f32 %v5814_v5  ;;  %v12992_v5 = vld [vmem:[#allocation8_spill] sm:$0xff] }
 0xc58   :  { %v9263_v32 = vpop.eup %9262 }
 0xc59   :  { %v3639_v40 = vmul.f32 %v9263_v32, %v9261_v57  ;;  %v12991_v32 = vld [vmem:[#allocation10_spill] sm:$0xff] }
 0xc5b   :  { %v9265_v44 = vpop.eup %9264  ;;  %3879 = vmatprep.mubr.f32.mxu0 %v3639_v40  ;;  %3950 = vmatprep.mubr.f32.mxu1 %v3639_v40  ;;  %v12993_v40 = vld [vmem:[#allocation11_spill] sm:$0xff] }
 0xc5c   :  { %v3800_v53 = vadd.f32 1.0, %v9265_v44  ;;  %v9267_v19 = vpop.eup %9266  ;;  %v12994_v44 = vld [vmem:[#allocation12_spill] sm:$0xff] }
 0xc5d   :  { %v3801_v12 = vadd.f32 1.0, %v9267_v19  ;;  %v9269_v22 = vpop.eup %9268  ;;  %v12996_v19 = vld [vmem:[#allocation14_spill] sm:$0xff] }
 0xc5e   :  { %9272 = vrcp.f32 %v3800_v53  ;;  %v9271_v36 = vpop.eup %9270  ;;  %v12995_v53 = vld [vmem:[#allocation13_spill] sm:$0xff] }
 0xc5f   :  { %9274 = vrcp.f32 %v3801_v12  ;;  %v3802_v39 = vadd.f32 1.0, %v9271_v36  ;;  %v12997_v12 = vld [vmem:[#allocation15_spill] sm:$0xff]  ;;  %v12999_v36 = vld [vmem:[#allocation17_spill] sm:$0xff] }
 0xc61   :  { %9276 = vrcp.f32 %v3802_v39  ;;  %v12989_v39 = vld [vmem:[#allocation9_spill] sm:$0xff] }
 0xc68   :  { %v9273_v38 = vpop.eup %9272 }
 0xc69   :  { %v3811_v63 = vmul.f32 %v9273_v38, %v9269_v22  ;;  %v9275_v23 = vpop.eup %9274  ;;  %v12998_v22 = vld [vmem:[#allocation16_spill] sm:$0xff]  ;;  %v13000_v38 = vld [vmem:[#allocation18_spill] sm:$0xff] }
 0xc6a   :  { %v3810_v13 = vmul.f32 %v9275_v23, %v11478_v29  ;;  %v12987_v29 = vld [vmem:[#allocation7_spill] sm:$0xff]  ;;  %v12988_v23 = vld [vmem:[#allocation5_spill] sm:$0xff] }
 0xc6b   :  { %v9277_v54 = vpop.eup %9276 }
 0xc6c   :  { %v11600_v3 = vadd.f32 %v3811_v63, %v3810_v13  ;;  %v12990_v63 = vld [vmem:[#allocation6_spill] sm:$0xff]  ;;  %v13001_v13 = vld [vmem:[#allocation19_spill] sm:$0xff] }
 0xc6e   :  { %9278 = vtanh.f32 %v11600_v3 }
 0xc78   :  { %v9279_v57 = vpop.eup %9278 }
 0xc79   :  { %v3814_v11 = vmul.f32 %v9279_v57, %v9277_v54  ;;  %v13002_v54 = vld [vmem:[#allocation20_spill] sm:$0xff]  ;;  %v13003_v57 = vld [vmem:[#allocation21_spill] sm:$0xff] }
 0xc7b   :  { %3880 = vmatmul.mubr.f32.vlgmr.msra.gmra.mrb[42].mxu0 %v3814_v11  ;;  %3951 = vmatmul.mubr.f32.vlgmr.msra.gmra.mrb[42].mxu1 %v3814_v11 }
 0xc7c   :  { %7986 = vmatpush1.bf16.msra.mxu0 %v9508_v8  ;;  %8018 = vmatpush1.bf16.msra.mxu1 %v9557_v25 }
 0xc7d   :  { %7988 = vmatprep.subr.bf16.mxu0 %v9510_v9  ;;  %8020 = vmatprep.subr.bf16.mxu1 %v9582_v33 }
 0xc7e   :  { %4050 = vmatprep.mubr.f32.mxu0 %v12411_v2  ;;  %4121 = vmatprep.mubr.f32.mxu1 %v12411_v2 }
 0xc80   :  { %7990 = vmatpush1.bf16.msra.mxu0 %v9526_v14  ;;  %8022 = vmatpush1.bf16.msra.mxu1 %v9593_v37 }
 0xc81   :  { %7992 = vmatprep.subr.bf16.mxu0 %v9535_v17  ;;  %8024 = vmatprep.subr.bf16.mxu1 %v9617_v45 }
 0xc84   :  { %7994 = vmatpush1.bf16.msra.mxu0 %v9560_v26  ;;  %8026 = vmatpush1.bf16.msra.mxu1 %v9626_v48 }
 0xc85   :  { %7996 = vmatprep.subr.bf16.mxu0 %v9573_v30  ;;  %8028 = vmatprep.subr.bf16.mxu1 %v9638_v52 }
 0xc88   :  { %7998 = vmatpush1.bf16.msra.mxu0 %v9609_v42  ;;  %8030 = vmatpush1.bf16.msra.mxu1 %v9668_v62 }
 0xc89   :  { %8000 = vmatprep.subr.bf16.mxu0 %v9620_v46  ;;  %8032 = vmatprep.subr.bf16.mxu1 %v9674_v0 }
 0xc8c   :  { %8002 = vmatpush1.bf16.msra.mxu0 %v9647_v55  ;;  %8034 = vmatpush1.bf16.msra.mxu1 %v9704_v15 }
 0xc8d   :  { %8004 = vmatprep.subr.bf16.mxu0 %v9656_v58  ;;  %8036 = vmatprep.subr.bf16.mxu1 %v9710_v18 }
 0xc90   :  { %8006 = vmatpush1.bf16.msra.mxu0 %v9689_v7  ;;  %8038 = vmatpush1.bf16.msra.mxu1 %v9737_v31 }
 0xc91   :  { %8008 = vmatprep.subr.bf16.mxu0 %v9692_v10  ;;  %8040 = vmatprep.subr.bf16.mxu1 %v9743_v34 }
 0xc94   :  { %8010 = vmatpush1.bf16.msra.mxu0 %v9725_v24  ;;  %8042 = vmatpush1.bf16.msra.mxu1 %v9765_v43 }
 0xc95   :  { %8012 = vmatprep.subr.bf16.mxu0 %v9728_v27  ;;  %8044 = vmatprep.subr.bf16.mxu1 %v9779_v51 }
 0xc98   :  { %8014 = vmatpush1.bf16.msra.mxu0 %v9761_v41  ;;  %8046 = vmatpush1.bf16.msra.mxu1 %v9800_v61 }
 0xc99   :  { %8048 = vmatprep.subr.bf16.mxu0 %v9770_v47  ;;  %8112 = vmatprep.subr.bf16.mxu1 %v9815_v6 }
 0xc9b   :  { %4051 = vmatmul.mubr.f32.vlgmr.msra.gmra.mrb[44].mxu0 %v3814_v11  ;;  %4122 = vmatmul.mubr.f32.vlgmr.msra.gmra.mrb[44].mxu1 %v3814_v11  ;;  %v13004_v11 = vld [vmem:[#allocation22_spill] sm:$0xff] }
 0xc9c   :  { %8050 = vmatpush1.bf16.msra.mxu0 %v9797_v60  ;;  %8114 = vmatpush1.bf16.msra.mxu1 %v9838_v21 }
 0xc9d   :  { %8052 = vmatprep.subr.bf16.mxu0 %v9806_v1  ;;  %8116 = vmatprep.subr.bf16.mxu1 %v9853_v35 }
 0xca0   :  { %8054 = vmatpush1.bf16.msra.mxu0 %v9834_v20  ;;  %8118 = vmatpush1.bf16.msra.mxu1 %v9875_v50 }
 0xca1   :  { %8056 = vmatprep.subr.bf16.mxu0 %v9844_v28  ;;  %8120 = vmatprep.subr.bf16.mxu1 %v9890_v59 }
 0xca4   :  { %8058 = vmatpush1.bf16.msra.mxu0 %v9872_v49  ;;  %8122 = vmatpush1.bf16.msra.mxu1 %v9912_v16 }
 0xca5   :  { %8060 = vmatprep.subr.bf16.mxu0 %v12465_v56  ;;  %8124 = vmatprep.subr.bf16.mxu1 %v12987_v29 }
 0xca8   :  { %8062 = vmatpush1.bf16.msra.mxu0 %v12988_v23  ;;  %8126 = vmatpush1.bf16.msra.mxu1 %v12989_v39 }
 0xca9   :  { %8064 = vmatprep.subr.bf16.mxu0 %v12990_v63  ;;  %8128 = vmatprep.subr.bf16.mxu1 %v12991_v32  ;;  %v13042_v63 = vld [vmem:[#allocation58_spill] sm:$0xff] }
 0xcac   :  { %8066 = vmatpush1.bf16.msra.mxu0 %v12992_v5  ;;  %8130 = vmatpush1.bf16.msra.mxu1 %v12993_v40  ;;  %v13040_v40 = vld [vmem:[#allocation56_spill] sm:$0xff] }
 0xcad   :  { %8068 = vmatprep.subr.bf16.mxu0 %v12994_v44  ;;  %8132 = vmatprep.subr.bf16.mxu1 %v12995_v53  ;;  %v13005_v44 = vld [vmem:[#allocation23_spill] sm:$0xff]  ;;  %v13006_v53 = vld [vmem:[#allocation24_spill] sm:$0xff] }
 0xcb0   :  { %8070 = vmatpush1.bf16.msra.mxu0 %v12996_v19  ;;  %8134 = vmatpush1.bf16.msra.mxu1 %v12997_v12  ;;  %v13007_v19 = vld [vmem:[#allocation25_spill] sm:$0xff]  ;;  %v13008_v12 = vld [vmem:[#allocation26_spill] sm:$0xff] }
 0xcb1   :  { %8072 = vmatprep.subr.bf16.mxu0 %v12998_v22  ;;  %8136 = vmatprep.subr.bf16.mxu1 %v12999_v36  ;;  %v13009_v22 = vld [vmem:[#allocation27_spill] sm:$0xff]  ;;  %v13010_v36 = vld [vmem:[#allocation28_spill] sm:$0xff] }
 0xcb4   :  { %8074 = vmatpush1.bf16.msra.mxu0 %v13000_v38  ;;  %8138 = vmatpush1.bf16.msra.mxu1 %v13001_v13  ;;  %v13011_v38 = vld [vmem:[#allocation29_spill] sm:$0xff]  ;;  %v13012_v13 = vld [vmem:[#allocation30_spill] sm:$0xff] }
 0xcb5   :  { %8076 = vmatprep.subr.bf16.mxu0 %v13002_v54  ;;  %8140 = vmatprep.subr.bf16.mxu1 %v13003_v57  ;;  %v13013_v54 = vld [vmem:[#allocation31_spill] sm:$0xff]  ;;  %v13014_v57 = vld [vmem:[#allocation32_spill] sm:$0xff] }
 0xcb8   :  { %8078 = vmatpush1.bf16.msra.mxu0 %v13004_v11  ;;  %8142 = vmatpush1.bf16.msra.mxu1 %v13005_v44  ;;  %v13015_v11 = vld [vmem:[#allocation33_spill] sm:$0xff]  ;;  %v13016_v44 = vld [vmem:[#allocation34_spill] sm:$0xff] }
 0xcb9   :  { %8080 = vmatprep.subr.bf16.mxu0 %v13006_v53  ;;  %8144 = vmatprep.subr.bf16.mxu1 %v13007_v19  ;;  %v13017_v53 = vld [vmem:[#allocation35_spill] sm:$0xff]  ;;  %v13018_v19 = vld [vmem:[#allocation36_spill] sm:$0xff] }
 0xcbc   :  { %8082 = vmatpush1.bf16.msra.mxu0 %v13008_v12  ;;  %8146 = vmatpush1.bf16.msra.mxu1 %v13009_v22  ;;  %v13019_v12 = vld [vmem:[#allocation37_spill] sm:$0xff]  ;;  %v13020_v22 = vld [vmem:[#allocation38_spill] sm:$0xff] }
 0xcbd   :  { %8084 = vmatprep.subr.bf16.mxu0 %v13010_v36  ;;  %8148 = vmatprep.subr.bf16.mxu1 %v13011_v38  ;;  %v13021_v36 = vld [vmem:[#allocation39_spill] sm:$0xff]  ;;  %v13022_v38 = vld [vmem:[#allocation40_spill] sm:$0xff] }
 0xcc0   :  { %8086 = vmatpush1.bf16.msra.mxu0 %v13012_v13  ;;  %8150 = vmatpush1.bf16.msra.mxu1 %v13013_v54  ;;  %v13023_v13 = vld [vmem:[#allocation41_spill] sm:$0xff]  ;;  %v13024_v54 = vld [vmem:[#allocation42_spill] sm:$0xff] }
 0xcc1   :  { %8088 = vmatprep.subr.bf16.mxu0 %v13014_v57  ;;  %8152 = vmatprep.subr.bf16.mxu1 %v13015_v11  ;;  %v13025_v57 = vld [vmem:[#allocation43_spill] sm:$0xff]  ;;  %v13026_v11 = vld [vmem:[#allocation44_spill] sm:$0xff] }
 0xcc4   :  { %8090 = vmatpush1.bf16.msra.mxu0 %v13016_v44  ;;  %8154 = vmatpush1.bf16.msra.mxu1 %v13017_v53  ;;  %v13027_v44 = vld [vmem:[#allocation45_spill] sm:$0xff]  ;;  %v13028_v53 = vld [vmem:[#allocation46_spill] sm:$0xff] }
 0xcc5   :  { %8092 = vmatprep.subr.bf16.mxu0 %v13018_v19  ;;  %8156 = vmatprep.subr.bf16.mxu1 %v13019_v12  ;;  %v13029_v19 = vld [vmem:[#allocation47_spill] sm:$0xff]  ;;  %v13030_v12 = vld [vmem:[#allocation48_spill] sm:$0xff] }
 0xcc8   :  { %8094 = vmatpush1.bf16.msra.mxu0 %v13020_v22  ;;  %8158 = vmatpush1.bf16.msra.mxu1 %v13021_v36  ;;  %v13031_v22 = vld [vmem:[#allocation49_spill] sm:$0xff]  ;;  %v13032_v36 = vld [vmem:[#allocation50_spill] sm:$0xff] }
 0xcc9   :  { %8096 = vmatprep.subr.bf16.mxu0 %v13022_v38  ;;  %8160 = vmatprep.subr.bf16.mxu1 %v13023_v13  ;;  %v13033_v38 = vld [vmem:[#allocation51_spill] sm:$0xff]  ;;  %v13034_v13 = vld [vmem:[#allocation52_spill] sm:$0xff] }
 0xccc   :  { %8098 = vmatpush1.bf16.msra.mxu0 %v13024_v54  ;;  %8162 = vmatpush1.bf16.msra.mxu1 %v13025_v57  ;;  %v13035_v54 = vld [vmem:[#allocation53_spill] sm:$0xff]  ;;  %v13036_v57 = vld [vmem:[#allocation54_spill] sm:$0xff] }
 0xccd   :  { %8100 = vmatprep.subr.bf16.mxu0 %v13026_v11  ;;  %8164 = vmatprep.subr.bf16.mxu1 %v13027_v44  ;;  %v13037_v11 = vld [vmem:[#allocation55_spill] sm:$0xff]  ;;  %v13038_v44 = vld [vmem:[#allocation2_spill] sm:$0xff] }
 0xcd0   :  { %8102 = vmatpush1.bf16.msra.mxu0 %v13028_v53  ;;  %8166 = vmatpush1.bf16.msra.mxu1 %v13029_v19  ;;  %v13039_v53 = vld [vmem:[#allocation3_spill] sm:$0xff] }
 0xcd1   :  { %8104 = vmatprep.subr.bf16.mxu0 %v13030_v12  ;;  %8168 = vmatprep.subr.bf16.mxu1 %v13031_v22 }
 0xcd4   :  { %8106 = vmatpush1.bf16.msra.mxu0 %v13032_v36  ;;  %8170 = vmatpush1.bf16.msra.mxu1 %v13033_v38 }
 0xcd5   :  { %8108 = vmatprep.subr.bf16.mxu0 %v13034_v13  ;;  %8172 = vmatprep.subr.bf16.mxu1 %v13035_v54  ;;  %v13041_v54 = vld [vmem:[#allocation57_spill] sm:$0xff] }
 0xcd8   :  { %8110 = vmatpush1.bf16.msra.mxu0 %v13036_v57  ;;  %8174 = vmatpush1.bf16.msra.mxu1 %v13037_v11 }
 0xcd9   :  { %8176 = vmatprep.subr.bf16.mxu0 %v13038_v44  ;;  %8208 = vmatprep.subr.bf16.mxu1 %v13039_v53 }
 0xd4e   :  { %v3881_v19 = vpop.f32.mrb[42].mxu0  ;;  %v3952_v12 = vpop.f32.mrb[42].mxu1 }
 0xd4f   :  { %v3882_v22 = vadd.f32 %v3881_v19, %v13040_v40  ;;  %v3883_v5 = vpop.f32.mrb[43].mxu0  ;;  %v3954_v36 = vpop.f32.mrb[43].mxu1  ;;  %v3953_v57 = vadd.f32 %v3952_v12, %v13041_v54  ;;  %v5818_v12 = vld [vmem:[%s12224_s0 + $0x160] sm:$0xff] }
 0xd50   :  { %v3884_v38 = vadd.f32 %v3883_v5, %v10476_v4  ;;  %v3955_v11 = vadd.f32 %v3954_v36, %v13042_v63  ;;  %v13043_v36 = vld [vmem:[#allocation4_spill] sm:$0xff] }
 0xd51   :  { %v5815_v32 = vmul.f32 -1.442695, %v3882_v22  ;;  %v5817_v39 = vmul.f32 -1.442695, %v3953_v57 }
 0xd52   :  { %v5816_v13 = vmul.f32 -1.442695, %v3884_v38 }
 0xd53   :  { %9280 = vpow2.f32 %v5815_v32 }
 0xd54   :  { %9282 = vpow2.f32 %v5816_v13 }
 0xd55   :  { %9284 = vtanh.f32 %v3955_v11 }
 0xd56   :  { %9286 = vpow2.f32 %v5817_v39 }
 0xd5d   :  { %v9281_v44 = vpop.eup %9280 }
 0xd5e   :  { %v3966_v23 = vadd.f32 1.0, %v9281_v44  ;;  %v9283_v53 = vpop.eup %9282  ;;  %v5819_v44 = vld [vmem:[%s12224_s0 + $0x168] sm:$0xff] }
 0xd5f   :  { %v3967_v19 = vadd.f32 1.0, %v9283_v53  ;;  %v9285_v40 = vpop.eup %9284 }
 0xd60   :  { %9288 = vrcp.f32 %v3966_v23  ;;  %v9287_v29 = vpop.eup %9286 }
 0xd61   :  { %9290 = vrcp.f32 %v3967_v19  ;;  %v3968_v32 = vadd.f32 1.0, %v9287_v29 }
 0xd63   :  { %9292 = vrcp.f32 %v3968_v32 }
 0xd6a   :  { %v9289_v5 = vpop.eup %9288 }
 0xd6b   :  { %v3977_v22 = vmul.f32 %v9289_v5, %v9285_v40  ;;  %v9291_v38 = vpop.eup %9290 }
 0xd6c   :  { %v3976_v13 = vmul.f32 %v9291_v38, %v13043_v36  ;;  %v5820_v38 = vld [vmem:[%s12224_s0 + $0x170] sm:$0xff] }
 0xd6e   :  { %v4052_v39 = vpop.f32.mrb[44].mxu0  ;;  %v4123_v23 = vpop.f32.mrb[44].mxu1  ;;  %v11712_v53 = vadd.f32 %v3977_v22, %v3976_v13  ;;  %v5821_v22 = vld [vmem:[%s12224_s0 + $0x178] sm:$0xff] }
 0xd6f   :  { %v4128_v57 = vadd.f32 %v5818_v12, %v4052_v39  ;;  %v4054_v11 = vpop.f32.mrb[45].mxu0  ;;  %v4125_v19 = vpop.f32.mrb[45].mxu1  ;;  %v4130_v36 = vadd.f32 %v5820_v38, %v4123_v23 }
 0xd70   :  { %13044 = vst [vmem:[#allocation59_spill] sm:$0xff] %v11712_v53  ;;  %v4129_v40 = vadd.f32 %v5819_v44, %v4054_v11  ;;  %9294 = vtanh.f32 %v11712_v53  ;;  %v9293_v12 = vpop.eup %9292  ;;  %v4131_v13 = vadd.f32 %v5821_v22, %v4125_v19 }
 0xd71   :  { %v5822_v29 = vmul.f32 -1.442695, %v4128_v57  ;;  %v5824_v32 = vmul.f32 -1.442695, %v4130_v36 }
 0xd72   :  { %v5823_v5 = vmul.f32 -1.442695, %v4129_v40 }
 0xd73   :  { %9296 = vpow2.f32 %v5822_v29 }
 0xd74   :  { %9298 = vpow2.f32 %v5823_v5 }
 0xd75   :  { %9300 = vtanh.f32 %v4131_v13 }
 0xd76   :  { %9302 = vpow2.f32 %v5824_v32  ;;  %v13050_v32 = vld [vmem:[#allocation8_spill] sm:$0xff] }
 0xd7a   :  { %v9295_v39 = vpop.eup %9294 }
 0xd7b   :  { %v3980_v44 = vmul.f32 %v9295_v39, %v9293_v12  ;;  %v13049_v39 = vld [vmem:[#allocation10_spill] sm:$0xff] }
 0xd7d   :  { %v9297_v57 = vpop.eup %9296  ;;  %4220 = vmatprep.mubr.f32.mxu0 %v3980_v44  ;;  %4291 = vmatprep.mubr.f32.mxu1 %v3980_v44  ;;  %v13051_v44 = vld [vmem:[#allocation11_spill] sm:$0xff] }
 0xd7e   :  { %v4141_v11 = vadd.f32 1.0, %v9297_v57  ;;  %v9299_v40 = vpop.eup %9298  ;;  %v13052_v57 = vld [vmem:[#allocation12_spill] sm:$0xff] }
 0xd7f   :  { %v4142_v29 = vadd.f32 1.0, %v9299_v40  ;;  %v9301_v23 = vpop.eup %9300  ;;  %v13054_v40 = vld [vmem:[#allocation14_spill] sm:$0xff] }
 0xd80   :  { %9304 = vrcp.f32 %v4141_v11  ;;  %v9303_v5 = vpop.eup %9302  ;;  %v13053_v11 = vld [vmem:[#allocation13_spill] sm:$0xff] }
 0xd81   :  { %9306 = vrcp.f32 %v4142_v29  ;;  %v4143_v54 = vadd.f32 1.0, %v9303_v5  ;;  %v13055_v29 = vld [vmem:[#allocation15_spill] sm:$0xff]  ;;  %v13057_v5 = vld [vmem:[#allocation17_spill] sm:$0xff] }
 0xd83   :  { %9308 = vrcp.f32 %v4143_v54  ;;  %v13047_v54 = vld [vmem:[#allocation9_spill] sm:$0xff] }
 0xd8a   :  { %v9305_v38 = vpop.eup %9304 }
 0xd8b   :  { %v4152_v53 = vmul.f32 %v9305_v38, %v9301_v23  ;;  %v9307_v63 = vpop.eup %9306  ;;  %v13056_v23 = vld [vmem:[#allocation16_spill] sm:$0xff]  ;;  %v13058_v38 = vld [vmem:[#allocation18_spill] sm:$0xff] }
 0xd8c   :  { %v4151_v19 = vmul.f32 %v9307_v63, %v11600_v3  ;;  %v13045_v3 = vld [vmem:[#allocation7_spill] sm:$0xff]  ;;  %v13046_v63 = vld [vmem:[#allocation5_spill] sm:$0xff] }
 0xd8d   :  { %v9309_v22 = vpop.eup %9308 }
 0xd8e   :  { %v11722_v36 = vadd.f32 %v4152_v53, %v4151_v19  ;;  %v13048_v53 = vld [vmem:[#allocation6_spill] sm:$0xff]  ;;  %v13059_v19 = vld [vmem:[#allocation19_spill] sm:$0xff] }
 0xd90   :  { %9310 = vtanh.f32 %v11722_v36 }
 0xd9a   :  { %v9311_v12 = vpop.eup %9310 }
 0xd9b   :  { %v4155_v13 = vmul.f32 %v9311_v12, %v9309_v22  ;;  %v13060_v22 = vld [vmem:[#allocation20_spill] sm:$0xff]  ;;  %v13061_v12 = vld [vmem:[#allocation21_spill] sm:$0xff] }
 0xd9d   :  { %4221 = vmatmul.mubr.f32.vlgmr.msra.gmra.mrb[46].mxu0 %v4155_v13  ;;  %4292 = vmatmul.mubr.f32.vlgmr.msra.gmra.mrb[46].mxu1 %v4155_v13 }
 0xd9e   :  { %8178 = vmatpush1.bf16.msra.mxu0 %v9508_v8  ;;  %8210 = vmatpush1.bf16.msra.mxu1 %v9557_v25 }
 0xd9f   :  { %8180 = vmatprep.subr.bf16.mxu0 %v9510_v9  ;;  %8212 = vmatprep.subr.bf16.mxu1 %v9582_v33 }
 0xda0   :  { %4391 = vmatprep.mubr.f32.mxu0 %v12411_v2  ;;  %4462 = vmatprep.mubr.f32.mxu1 %v12411_v2 }
 0xda2   :  { %8182 = vmatpush1.bf16.msra.mxu0 %v9526_v14  ;;  %8214 = vmatpush1.bf16.msra.mxu1 %v9593_v37 }
 0xda3   :  { %8184 = vmatprep.subr.bf16.mxu0 %v9535_v17  ;;  %8216 = vmatprep.subr.bf16.mxu1 %v9617_v45 }
 0xda6   :  { %8186 = vmatpush1.bf16.msra.mxu0 %v9560_v26  ;;  %8218 = vmatpush1.bf16.msra.mxu1 %v9626_v48 }
 0xda7   :  { %8188 = vmatprep.subr.bf16.mxu0 %v9573_v30  ;;  %8220 = vmatprep.subr.bf16.mxu1 %v9638_v52 }
 0xdaa   :  { %8190 = vmatpush1.bf16.msra.mxu0 %v9609_v42  ;;  %8222 = vmatpush1.bf16.msra.mxu1 %v9668_v62 }
 0xdab   :  { %8192 = vmatprep.subr.bf16.mxu0 %v9620_v46  ;;  %8224 = vmatprep.subr.bf16.mxu1 %v9674_v0 }
 0xdae   :  { %8194 = vmatpush1.bf16.msra.mxu0 %v9647_v55  ;;  %8226 = vmatpush1.bf16.msra.mxu1 %v9704_v15 }
 0xdaf   :  { %8196 = vmatprep.subr.bf16.mxu0 %v9656_v58  ;;  %8228 = vmatprep.subr.bf16.mxu1 %v9710_v18 }
 0xdb2   :  { %8198 = vmatpush1.bf16.msra.mxu0 %v9689_v7  ;;  %8230 = vmatpush1.bf16.msra.mxu1 %v9737_v31 }
 0xdb3   :  { %8200 = vmatprep.subr.bf16.mxu0 %v9692_v10  ;;  %8232 = vmatprep.subr.bf16.mxu1 %v9743_v34 }
 0xdb6   :  { %8202 = vmatpush1.bf16.msra.mxu0 %v9725_v24  ;;  %8234 = vmatpush1.bf16.msra.mxu1 %v9765_v43 }
 0xdb7   :  { %8204 = vmatprep.subr.bf16.mxu0 %v9728_v27  ;;  %8236 = vmatprep.subr.bf16.mxu1 %v9779_v51 }
 0xdba   :  { %8206 = vmatpush1.bf16.msra.mxu0 %v9761_v41  ;;  %8238 = vmatpush1.bf16.msra.mxu1 %v9800_v61 }
 0xdbb   :  { %8240 = vmatprep.subr.bf16.mxu0 %v9770_v47  ;;  %8304 = vmatprep.subr.bf16.mxu1 %v9815_v6 }
 0xdbd   :  { %4392 = vmatmul.mubr.f32.vlgmr.msra.gmra.mrb[48].mxu0 %v4155_v13  ;;  %4463 = vmatmul.mubr.f32.vlgmr.msra.gmra.mrb[48].mxu1 %v4155_v13  ;;  %v13062_v13 = vld [vmem:[#allocation22_spill] sm:$0xff] }
 0xdbe   :  { %8242 = vmatpush1.bf16.msra.mxu0 %v9797_v60  ;;  %8306 = vmatpush1.bf16.msra.mxu1 %v9838_v21 }
 0xdbf   :  { %8244 = vmatprep.subr.bf16.mxu0 %v9806_v1  ;;  %8308 = vmatprep.subr.bf16.mxu1 %v9853_v35 }
 0xdc2   :  { %8246 = vmatpush1.bf16.msra.mxu0 %v9834_v20  ;;  %8310 = vmatpush1.bf16.msra.mxu1 %v9875_v50 }
 0xdc3   :  { %8248 = vmatprep.subr.bf16.mxu0 %v9844_v28  ;;  %8312 = vmatprep.subr.bf16.mxu1 %v9890_v59 }
 0xdc6   :  { %8250 = vmatpush1.bf16.msra.mxu0 %v9872_v49  ;;  %8314 = vmatpush1.bf16.msra.mxu1 %v9912_v16 }
 0xdc7   :  { %8252 = vmatprep.subr.bf16.mxu0 %v12465_v56  ;;  %8316 = vmatprep.subr.bf16.mxu1 %v13045_v3 }
 0xdca   :  { %8254 = vmatpush1.bf16.msra.mxu0 %v13046_v63  ;;  %8318 = vmatpush1.bf16.msra.mxu1 %v13047_v54 }
 0xdcb   :  { %8256 = vmatprep.subr.bf16.mxu0 %v13048_v53  ;;  %8320 = vmatprep.subr.bf16.mxu1 %v13049_v39  ;;  %v13100_v53 = vld [vmem:[#allocation58_spill] sm:$0xff] }
 0xdce   :  { %8258 = vmatpush1.bf16.msra.mxu0 %v13050_v32  ;;  %8322 = vmatpush1.bf16.msra.mxu1 %v13051_v44  ;;  %v13098_v44 = vld [vmem:[#allocation56_spill] sm:$0xff] }
 0xdcf   :  { %8260 = vmatprep.subr.bf16.mxu0 %v13052_v57  ;;  %8324 = vmatprep.subr.bf16.mxu1 %v13053_v11  ;;  %v13063_v57 = vld [vmem:[#allocation23_spill] sm:$0xff]  ;;  %v13064_v11 = vld [vmem:[#allocation24_spill] sm:$0xff] }
 0xdd2   :  { %8262 = vmatpush1.bf16.msra.mxu0 %v13054_v40  ;;  %8326 = vmatpush1.bf16.msra.mxu1 %v13055_v29  ;;  %v13065_v40 = vld [vmem:[#allocation25_spill] sm:$0xff]  ;;  %v13066_v29 = vld [vmem:[#allocation26_spill] sm:$0xff] }
 0xdd3   :  { %8264 = vmatprep.subr.bf16.mxu0 %v13056_v23  ;;  %8328 = vmatprep.subr.bf16.mxu1 %v13057_v5  ;;  %v13067_v23 = vld [vmem:[#allocation27_spill] sm:$0xff]  ;;  %v13068_v5 = vld [vmem:[#allocation28_spill] sm:$0xff] }
 0xdd6   :  { %8266 = vmatpush1.bf16.msra.mxu0 %v13058_v38  ;;  %8330 = vmatpush1.bf16.msra.mxu1 %v13059_v19  ;;  %v13069_v38 = vld [vmem:[#allocation29_spill] sm:$0xff]  ;;  %v13070_v19 = vld [vmem:[#allocation30_spill] sm:$0xff] }
 0xdd7   :  { %8268 = vmatprep.subr.bf16.mxu0 %v13060_v22  ;;  %8332 = vmatprep.subr.bf16.mxu1 %v13061_v12  ;;  %v13071_v22 = vld [vmem:[#allocation31_spill] sm:$0xff]  ;;  %v13072_v12 = vld [vmem:[#allocation32_spill] sm:$0xff] }
 0xdda   :  { %8270 = vmatpush1.bf16.msra.mxu0 %v13062_v13  ;;  %8334 = vmatpush1.bf16.msra.mxu1 %v13063_v57  ;;  %v13073_v13 = vld [vmem:[#allocation33_spill] sm:$0xff]  ;;  %v13074_v57 = vld [vmem:[#allocation34_spill] sm:$0xff] }
 0xddb   :  { %8272 = vmatprep.subr.bf16.mxu0 %v13064_v11  ;;  %8336 = vmatprep.subr.bf16.mxu1 %v13065_v40  ;;  %v13075_v11 = vld [vmem:[#allocation35_spill] sm:$0xff]  ;;  %v13076_v40 = vld [vmem:[#allocation36_spill] sm:$0xff] }
 0xdde   :  { %8274 = vmatpush1.bf16.msra.mxu0 %v13066_v29  ;;  %8338 = vmatpush1.bf16.msra.mxu1 %v13067_v23  ;;  %v13077_v29 = vld [vmem:[#allocation37_spill] sm:$0xff]  ;;  %v13078_v23 = vld [vmem:[#allocation38_spill] sm:$0xff] }
 0xddf   :  { %8276 = vmatprep.subr.bf16.mxu0 %v13068_v5  ;;  %8340 = vmatprep.subr.bf16.mxu1 %v13069_v38  ;;  %v13079_v5 = vld [vmem:[#allocation39_spill] sm:$0xff]  ;;  %v13080_v38 = vld [vmem:[#allocation40_spill] sm:$0xff] }
 0xde2   :  { %8278 = vmatpush1.bf16.msra.mxu0 %v13070_v19  ;;  %8342 = vmatpush1.bf16.msra.mxu1 %v13071_v22  ;;  %v13081_v19 = vld [vmem:[#allocation41_spill] sm:$0xff]  ;;  %v13082_v22 = vld [vmem:[#allocation42_spill] sm:$0xff] }
 0xde3   :  { %8280 = vmatprep.subr.bf16.mxu0 %v13072_v12  ;;  %8344 = vmatprep.subr.bf16.mxu1 %v13073_v13  ;;  %v13083_v12 = vld [vmem:[#allocation43_spill] sm:$0xff]  ;;  %v13084_v13 = vld [vmem:[#allocation44_spill] sm:$0xff] }
 0xde6   :  { %8282 = vmatpush1.bf16.msra.mxu0 %v13074_v57  ;;  %8346 = vmatpush1.bf16.msra.mxu1 %v13075_v11  ;;  %v13085_v57 = vld [vmem:[#allocation45_spill] sm:$0xff]  ;;  %v13086_v11 = vld [vmem:[#allocation46_spill] sm:$0xff] }
 0xde7   :  { %8284 = vmatprep.subr.bf16.mxu0 %v13076_v40  ;;  %8348 = vmatprep.subr.bf16.mxu1 %v13077_v29  ;;  %v13087_v40 = vld [vmem:[#allocation47_spill] sm:$0xff]  ;;  %v13088_v29 = vld [vmem:[#allocation48_spill] sm:$0xff] }
 0xdea   :  { %8286 = vmatpush1.bf16.msra.mxu0 %v13078_v23  ;;  %8350 = vmatpush1.bf16.msra.mxu1 %v13079_v5  ;;  %v13089_v23 = vld [vmem:[#allocation49_spill] sm:$0xff]  ;;  %v13090_v5 = vld [vmem:[#allocation50_spill] sm:$0xff] }
 0xdeb   :  { %8288 = vmatprep.subr.bf16.mxu0 %v13080_v38  ;;  %8352 = vmatprep.subr.bf16.mxu1 %v13081_v19  ;;  %v13091_v38 = vld [vmem:[#allocation51_spill] sm:$0xff]  ;;  %v13092_v19 = vld [vmem:[#allocation52_spill] sm:$0xff] }
 0xdee   :  { %8290 = vmatpush1.bf16.msra.mxu0 %v13082_v22  ;;  %8354 = vmatpush1.bf16.msra.mxu1 %v13083_v12  ;;  %v13093_v22 = vld [vmem:[#allocation53_spill] sm:$0xff]  ;;  %v13094_v12 = vld [vmem:[#allocation54_spill] sm:$0xff] }
 0xdef   :  { %8292 = vmatprep.subr.bf16.mxu0 %v13084_v13  ;;  %8356 = vmatprep.subr.bf16.mxu1 %v13085_v57  ;;  %v13095_v13 = vld [vmem:[#allocation55_spill] sm:$0xff]  ;;  %v13096_v57 = vld [vmem:[#allocation2_spill] sm:$0xff] }
 0xdf2   :  { %8294 = vmatpush1.bf16.msra.mxu0 %v13086_v11  ;;  %8358 = vmatpush1.bf16.msra.mxu1 %v13087_v40  ;;  %v13097_v11 = vld [vmem:[#allocation3_spill] sm:$0xff] }
 0xdf3   :  { %8296 = vmatprep.subr.bf16.mxu0 %v13088_v29  ;;  %8360 = vmatprep.subr.bf16.mxu1 %v13089_v23 }
 0xdf6   :  { %8298 = vmatpush1.bf16.msra.mxu0 %v13090_v5  ;;  %8362 = vmatpush1.bf16.msra.mxu1 %v13091_v38 }
 0xdf7   :  { %8300 = vmatprep.subr.bf16.mxu0 %v13092_v19  ;;  %8364 = vmatprep.subr.bf16.mxu1 %v13093_v22  ;;  %v13099_v22 = vld [vmem:[#allocation57_spill] sm:$0xff] }
 0xdfa   :  { %8302 = vmatpush1.bf16.msra.mxu0 %v13094_v12  ;;  %8366 = vmatpush1.bf16.msra.mxu1 %v13095_v13 }
 0xdfb   :  { %8368 = vmatprep.subr.bf16.mxu0 %v13096_v57  ;;  %8400 = vmatprep.subr.bf16.mxu1 %v13097_v11 }
 0xe70   :  { %v4222_v40 = vpop.f32.mrb[46].mxu0  ;;  %v4293_v29 = vpop.f32.mrb[46].mxu1 }
 0xe71   :  { %v4223_v23 = vadd.f32 %v4222_v40, %v13098_v44  ;;  %v4224_v32 = vpop.f32.mrb[47].mxu0  ;;  %v4295_v5 = vpop.f32.mrb[47].mxu1  ;;  %v4294_v12 = vadd.f32 %v4293_v29, %v13099_v22  ;;  %v5828_v29 = vld [vmem:[%s12224_s0 + $0x180] sm:$0xff] }
 0xe72   :  { %v4225_v38 = vadd.f32 %v4224_v32, %v10476_v4  ;;  %v4296_v13 = vadd.f32 %v4295_v5, %v13100_v53  ;;  %v13101_v5 = vld [vmem:[#allocation59_spill] sm:$0xff] }
 0xe73   :  { %v5825_v39 = vmul.f32 -1.442695, %v4223_v23  ;;  %v5827_v54 = vmul.f32 -1.442695, %v4294_v12 }
 0xe74   :  { %v5826_v19 = vmul.f32 -1.442695, %v4225_v38 }
 0xe75   :  { %9312 = vpow2.f32 %v5825_v39 }
 0xe76   :  { %9314 = vpow2.f32 %v5826_v19 }
 0xe77   :  { %9316 = vtanh.f32 %v4296_v13 }
 0xe78   :  { %9318 = vpow2.f32 %v5827_v54 }
 0xe7f   :  { %v9313_v57 = vpop.eup %9312 }
 0xe80   :  { %v4307_v63 = vadd.f32 1.0, %v9313_v57  ;;  %v9315_v11 = vpop.eup %9314  ;;  %v5829_v57 = vld [vmem:[%s12224_s0 + $0x188] sm:$0xff] }
 0xe81   :  { %v4308_v40 = vadd.f32 1.0, %v9315_v11  ;;  %v9317_v44 = vpop.eup %9316 }
 0xe82   :  { %9320 = vrcp.f32 %v4307_v63  ;;  %v9319_v3 = vpop.eup %9318 }
 0xe83   :  { %9322 = vrcp.f32 %v4308_v40  ;;  %v4309_v39 = vadd.f32 1.0, %v9319_v3 }
 0xe85   :  { %9324 = vrcp.f32 %v4309_v39 }
 0xe8c   :  { %v9321_v32 = vpop.eup %9320 }
 0xe8d   :  { %v4318_v23 = vmul.f32 %v9321_v32, %v9317_v44  ;;  %v9323_v38 = vpop.eup %9322 }
 0xe8e   :  { %v4317_v19 = vmul.f32 %v9323_v38, %v13101_v5  ;;  %v5830_v38 = vld [vmem:[%s12224_s0 + $0x190] sm:$0xff] }
 0xe90   :  { %v4393_v54 = vpop.f32.mrb[48].mxu0  ;;  %v4464_v63 = vpop.f32.mrb[48].mxu1  ;;  %v11834_v11 = vadd.f32 %v4318_v23, %v4317_v19  ;;  %v5831_v23 = vld [vmem:[%s12224_s0 + $0x198] sm:$0xff] }
 0xe91   :  { %v4469_v12 = vadd.f32 %v5828_v29, %v4393_v54  ;;  %v4395_v13 = vpop.f32.mrb[49].mxu0  ;;  %v4466_v40 = vpop.f32.mrb[49].mxu1  ;;  %v4471_v5 = vadd.f32 %v5830_v38, %v4464_v63 }
 0xe92   :  { %13102 = vst [vmem:[#allocation4_spill] sm:$0xff] %v11834_v11  ;;  %v4470_v44 = vadd.f32 %v5829_v57, %v4395_v13  ;;  %9326 = vtanh.f32 %v11834_v11  ;;  %v9325_v29 = vpop.eup %9324  ;;  %v4472_v19 = vadd.f32 %v5831_v23, %v4466_v40 }
 0xe93   :  { %v5832_v3 = vmul.f32 -1.442695, %v4469_v12  ;;  %v5834_v39 = vmul.f32 -1.442695, %v4471_v5 }
 0xe94   :  { %v5833_v32 = vmul.f32 -1.442695, %v4470_v44 }
 0xe95   :  { %9328 = vpow2.f32 %v5832_v3 }
 0xe96   :  { %9330 = vpow2.f32 %v5833_v32 }
 0xe97   :  { %9332 = vtanh.f32 %v4472_v19 }
 0xe98   :  { %9334 = vpow2.f32 %v5834_v39  ;;  %v13108_v39 = vld [vmem:[#allocation8_spill] sm:$0xff] }
 0xe9c   :  { %v9327_v54 = vpop.eup %9326 }
 0xe9d   :  { %v4321_v57 = vmul.f32 %v9327_v54, %v9325_v29  ;;  %v13107_v54 = vld [vmem:[#allocation10_spill] sm:$0xff] }
 0xe9f   :  { %v9329_v12 = vpop.eup %9328  ;;  %4561 = vmatprep.mubr.f32.mxu0 %v4321_v57  ;;  %4632 = vmatprep.mubr.f32.mxu1 %v4321_v57  ;;  %v13109_v57 = vld [vmem:[#allocation11_spill] sm:$0xff] }
 0xea0   :  { %v4482_v13 = vadd.f32 1.0, %v9329_v12  ;;  %v9331_v44 = vpop.eup %9330  ;;  %v13110_v12 = vld [vmem:[#allocation12_spill] sm:$0xff] }
 0xea1   :  { %v4483_v3 = vadd.f32 1.0, %v9331_v44  ;;  %v9333_v63 = vpop.eup %9332  ;;  %v13112_v44 = vld [vmem:[#allocation14_spill] sm:$0xff] }
 0xea2   :  { %9336 = vrcp.f32 %v4482_v13  ;;  %v9335_v32 = vpop.eup %9334  ;;  %v13111_v13 = vld [vmem:[#allocation13_spill] sm:$0xff] }
 0xea3   :  { %9338 = vrcp.f32 %v4483_v3  ;;  %v4484_v22 = vadd.f32 1.0, %v9335_v32  ;;  %v13113_v3 = vld [vmem:[#allocation15_spill] sm:$0xff]  ;;  %v13115_v32 = vld [vmem:[#allocation17_spill] sm:$0xff] }
 0xea5   :  { %9340 = vrcp.f32 %v4484_v22  ;;  %v13105_v22 = vld [vmem:[#allocation9_spill] sm:$0xff] }
 0xeac   :  { %v9337_v38 = vpop.eup %9336 }
 0xead   :  { %v4493_v11 = vmul.f32 %v9337_v38, %v9333_v63  ;;  %v9339_v53 = vpop.eup %9338  ;;  %v13114_v63 = vld [vmem:[#allocation16_spill] sm:$0xff]  ;;  %v13116_v38 = vld [vmem:[#allocation18_spill] sm:$0xff] }
 0xeae   :  { %v4492_v40 = vmul.f32 %v9339_v53, %v11722_v36  ;;  %v13103_v36 = vld [vmem:[#allocation7_spill] sm:$0xff]  ;;  %v13104_v53 = vld [vmem:[#allocation5_spill] sm:$0xff] }
 0xeaf   :  { %v9341_v23 = vpop.eup %9340 }
 0xeb0   :  { %v11844_v5 = vadd.f32 %v4493_v11, %v4492_v40  ;;  %v13106_v11 = vld [vmem:[#allocation6_spill] sm:$0xff]  ;;  %v13117_v40 = vld [vmem:[#allocation19_spill] sm:$0xff] }
 0xeb2   :  { %9342 = vtanh.f32 %v11844_v5 }
 0xebc   :  { %v9343_v29 = vpop.eup %9342 }
 0xebd   :  { %v4496_v19 = vmul.f32 %v9343_v29, %v9341_v23  ;;  %v13118_v23 = vld [vmem:[#allocation20_spill] sm:$0xff]  ;;  %v13119_v29 = vld [vmem:[#allocation21_spill] sm:$0xff] }
 0xebf   :  { %4562 = vmatmul.mubr.f32.vlgmr.msra.gmra.mrb[50].mxu0 %v4496_v19  ;;  %4633 = vmatmul.mubr.f32.vlgmr.msra.gmra.mrb[50].mxu1 %v4496_v19 }
 0xec0   :  { %8370 = vmatpush1.bf16.msra.mxu0 %v9508_v8  ;;  %8402 = vmatpush1.bf16.msra.mxu1 %v9557_v25 }
 0xec1   :  { %8372 = vmatprep.subr.bf16.mxu0 %v9510_v9  ;;  %8404 = vmatprep.subr.bf16.mxu1 %v9582_v33 }
 0xec2   :  { %4732 = vmatprep.mubr.f32.mxu0 %v12411_v2  ;;  %4803 = vmatprep.mubr.f32.mxu1 %v12411_v2 }
 0xec4   :  { %8374 = vmatpush1.bf16.msra.mxu0 %v9526_v14  ;;  %8406 = vmatpush1.bf16.msra.mxu1 %v9593_v37 }
 0xec5   :  { %8376 = vmatprep.subr.bf16.mxu0 %v9535_v17  ;;  %8408 = vmatprep.subr.bf16.mxu1 %v9617_v45 }
 0xec8   :  { %8378 = vmatpush1.bf16.msra.mxu0 %v9560_v26  ;;  %8410 = vmatpush1.bf16.msra.mxu1 %v9626_v48 }
 0xec9   :  { %8380 = vmatprep.subr.bf16.mxu0 %v9573_v30  ;;  %8412 = vmatprep.subr.bf16.mxu1 %v9638_v52 }
 0xecc   :  { %8382 = vmatpush1.bf16.msra.mxu0 %v9609_v42  ;;  %8414 = vmatpush1.bf16.msra.mxu1 %v9668_v62 }
 0xecd   :  { %8384 = vmatprep.subr.bf16.mxu0 %v9620_v46  ;;  %8416 = vmatprep.subr.bf16.mxu1 %v9674_v0 }
 0xed0   :  { %8386 = vmatpush1.bf16.msra.mxu0 %v9647_v55  ;;  %8418 = vmatpush1.bf16.msra.mxu1 %v9704_v15 }
 0xed1   :  { %8388 = vmatprep.subr.bf16.mxu0 %v9656_v58  ;;  %8420 = vmatprep.subr.bf16.mxu1 %v9710_v18 }
 0xed4   :  { %8390 = vmatpush1.bf16.msra.mxu0 %v9689_v7  ;;  %8422 = vmatpush1.bf16.msra.mxu1 %v9737_v31 }
 0xed5   :  { %8392 = vmatprep.subr.bf16.mxu0 %v9692_v10  ;;  %8424 = vmatprep.subr.bf16.mxu1 %v9743_v34 }
 0xed8   :  { %8394 = vmatpush1.bf16.msra.mxu0 %v9725_v24  ;;  %8426 = vmatpush1.bf16.msra.mxu1 %v9765_v43 }
 0xed9   :  { %8396 = vmatprep.subr.bf16.mxu0 %v9728_v27  ;;  %8428 = vmatprep.subr.bf16.mxu1 %v9779_v51 }
 0xedc   :  { %8398 = vmatpush1.bf16.msra.mxu0 %v9761_v41  ;;  %8430 = vmatpush1.bf16.msra.mxu1 %v9800_v61 }
 0xedd   :  { %8432 = vmatprep.subr.bf16.mxu0 %v9770_v47  ;;  %8496 = vmatprep.subr.bf16.mxu1 %v9815_v6 }
 0xedf   :  { %4733 = vmatmul.mubr.f32.vlgmr.msra.gmra.mrb[52].mxu0 %v4496_v19  ;;  %4804 = vmatmul.mubr.f32.vlgmr.msra.gmra.mrb[52].mxu1 %v4496_v19  ;;  %v13120_v19 = vld [vmem:[#allocation22_spill] sm:$0xff] }
 0xee0   :  { %8434 = vmatpush1.bf16.msra.mxu0 %v9797_v60  ;;  %8498 = vmatpush1.bf16.msra.mxu1 %v9838_v21 }
 0xee1   :  { %8436 = vmatprep.subr.bf16.mxu0 %v9806_v1  ;;  %8500 = vmatprep.subr.bf16.mxu1 %v9853_v35 }
 0xee4   :  { %8438 = vmatpush1.bf16.msra.mxu0 %v9834_v20  ;;  %8502 = vmatpush1.bf16.msra.mxu1 %v9875_v50 }
 0xee5   :  { %8440 = vmatprep.subr.bf16.mxu0 %v9844_v28  ;;  %8504 = vmatprep.subr.bf16.mxu1 %v9890_v59 }
 0xee8   :  { %8442 = vmatpush1.bf16.msra.mxu0 %v9872_v49  ;;  %8506 = vmatpush1.bf16.msra.mxu1 %v9912_v16 }
 0xee9   :  { %8444 = vmatprep.subr.bf16.mxu0 %v12465_v56  ;;  %8508 = vmatprep.subr.bf16.mxu1 %v13103_v36 }
 0xeec   :  { %8446 = vmatpush1.bf16.msra.mxu0 %v13104_v53  ;;  %8510 = vmatpush1.bf16.msra.mxu1 %v13105_v22 }
 0xeed   :  { %8448 = vmatprep.subr.bf16.mxu0 %v13106_v11  ;;  %8512 = vmatprep.subr.bf16.mxu1 %v13107_v54  ;;  %v13158_v11 = vld [vmem:[#allocation58_spill] sm:$0xff] }
 0xef0   :  { %8450 = vmatpush1.bf16.msra.mxu0 %v13108_v39  ;;  %8514 = vmatpush1.bf16.msra.mxu1 %v13109_v57  ;;  %v13156_v57 = vld [vmem:[#allocation56_spill] sm:$0xff] }
 0xef1   :  { %8452 = vmatprep.subr.bf16.mxu0 %v13110_v12  ;;  %8516 = vmatprep.subr.bf16.mxu1 %v13111_v13  ;;  %v13121_v12 = vld [vmem:[#allocation23_spill] sm:$0xff]  ;;  %v13122_v13 = vld [vmem:[#allocation24_spill] sm:$0xff] }
 0xef4   :  { %8454 = vmatpush1.bf16.msra.mxu0 %v13112_v44  ;;  %8518 = vmatpush1.bf16.msra.mxu1 %v13113_v3  ;;  %v13123_v44 = vld [vmem:[#allocation25_spill] sm:$0xff]  ;;  %v13124_v3 = vld [vmem:[#allocation26_spill] sm:$0xff] }
 0xef5   :  { %8456 = vmatprep.subr.bf16.mxu0 %v13114_v63  ;;  %8520 = vmatprep.subr.bf16.mxu1 %v13115_v32  ;;  %v13125_v63 = vld [vmem:[#allocation27_spill] sm:$0xff]  ;;  %v13126_v32 = vld [vmem:[#allocation28_spill] sm:$0xff] }
 0xef8   :  { %8458 = vmatpush1.bf16.msra.mxu0 %v13116_v38  ;;  %8522 = vmatpush1.bf16.msra.mxu1 %v13117_v40  ;;  %v13127_v38 = vld [vmem:[#allocation29_spill] sm:$0xff]  ;;  %v13128_v40 = vld [vmem:[#allocation30_spill] sm:$0xff] }
 0xef9   :  { %8460 = vmatprep.subr.bf16.mxu0 %v13118_v23  ;;  %8524 = vmatprep.subr.bf16.mxu1 %v13119_v29  ;;  %v13129_v23 = vld [vmem:[#allocation31_spill] sm:$0xff]  ;;  %v13130_v29 = vld [vmem:[#allocation32_spill] sm:$0xff] }
 0xefc   :  { %8462 = vmatpush1.bf16.msra.mxu0 %v13120_v19  ;;  %8526 = vmatpush1.bf16.msra.mxu1 %v13121_v12  ;;  %v13131_v19 = vld [vmem:[#allocation33_spill] sm:$0xff]  ;;  %v13132_v12 = vld [vmem:[#allocation34_spill] sm:$0xff] }
 0xefd   :  { %8464 = vmatprep.subr.bf16.mxu0 %v13122_v13  ;;  %8528 = vmatprep.subr.bf16.mxu1 %v13123_v44  ;;  %v13133_v13 = vld [vmem:[#allocation35_spill] sm:$0xff]  ;;  %v13134_v44 = vld [vmem:[#allocation36_spill] sm:$0xff] }
 0xf00   :  { %8466 = vmatpush1.bf16.msra.mxu0 %v13124_v3  ;;  %8530 = vmatpush1.bf16.msra.mxu1 %v13125_v63  ;;  %v13135_v3 = vld [vmem:[#allocation37_spill] sm:$0xff]  ;;  %v13136_v63 = vld [vmem:[#allocation38_spill] sm:$0xff] }
 0xf01   :  { %8468 = vmatprep.subr.bf16.mxu0 %v13126_v32  ;;  %8532 = vmatprep.subr.bf16.mxu1 %v13127_v38  ;;  %v13137_v32 = vld [vmem:[#allocation39_spill] sm:$0xff]  ;;  %v13138_v38 = vld [vmem:[#allocation40_spill] sm:$0xff] }
 0xf04   :  { %8470 = vmatpush1.bf16.msra.mxu0 %v13128_v40  ;;  %8534 = vmatpush1.bf16.msra.mxu1 %v13129_v23  ;;  %v13139_v40 = vld [vmem:[#allocation41_spill] sm:$0xff]  ;;  %v13140_v23 = vld [vmem:[#allocation42_spill] sm:$0xff] }
 0xf05   :  { %8472 = vmatprep.subr.bf16.mxu0 %v13130_v29  ;;  %8536 = vmatprep.subr.bf16.mxu1 %v13131_v19  ;;  %v13141_v29 = vld [vmem:[#allocation43_spill] sm:$0xff]  ;;  %v13142_v19 = vld [vmem:[#allocation44_spill] sm:$0xff] }
 0xf08   :  { %8474 = vmatpush1.bf16.msra.mxu0 %v13132_v12  ;;  %8538 = vmatpush1.bf16.msra.mxu1 %v13133_v13  ;;  %v13143_v12 = vld [vmem:[#allocation45_spill] sm:$0xff]  ;;  %v13144_v13 = vld [vmem:[#allocation46_spill] sm:$0xff] }
 0xf09   :  { %8476 = vmatprep.subr.bf16.mxu0 %v13134_v44  ;;  %8540 = vmatprep.subr.bf16.mxu1 %v13135_v3  ;;  %v13145_v44 = vld [vmem:[#allocation47_spill] sm:$0xff]  ;;  %v13146_v3 = vld [vmem:[#allocation48_spill] sm:$0xff] }
 0xf0c   :  { %8478 = vmatpush1.bf16.msra.mxu0 %v13136_v63  ;;  %8542 = vmatpush1.bf16.msra.mxu1 %v13137_v32  ;;  %v13147_v63 = vld [vmem:[#allocation49_spill] sm:$0xff]  ;;  %v13148_v32 = vld [vmem:[#allocation50_spill] sm:$0xff] }
 0xf0d   :  { %8480 = vmatprep.subr.bf16.mxu0 %v13138_v38  ;;  %8544 = vmatprep.subr.bf16.mxu1 %v13139_v40  ;;  %v13149_v38 = vld [vmem:[#allocation51_spill] sm:$0xff]  ;;  %v13150_v40 = vld [vmem:[#allocation52_spill] sm:$0xff] }
 0xf10   :  { %8482 = vmatpush1.bf16.msra.mxu0 %v13140_v23  ;;  %8546 = vmatpush1.bf16.msra.mxu1 %v13141_v29  ;;  %v13151_v23 = vld [vmem:[#allocation53_spill] sm:$0xff]  ;;  %v13152_v29 = vld [vmem:[#allocation54_spill] sm:$0xff] }
 0xf11   :  { %8484 = vmatprep.subr.bf16.mxu0 %v13142_v19  ;;  %8548 = vmatprep.subr.bf16.mxu1 %v13143_v12  ;;  %v13153_v19 = vld [vmem:[#allocation55_spill] sm:$0xff]  ;;  %v13154_v12 = vld [vmem:[#allocation2_spill] sm:$0xff] }
 0xf14   :  { %8486 = vmatpush1.bf16.msra.mxu0 %v13144_v13  ;;  %8550 = vmatpush1.bf16.msra.mxu1 %v13145_v44  ;;  %v13155_v13 = vld [vmem:[#allocation3_spill] sm:$0xff] }
 0xf15   :  { %8488 = vmatprep.subr.bf16.mxu0 %v13146_v3  ;;  %8552 = vmatprep.subr.bf16.mxu1 %v13147_v63 }
 0xf18   :  { %8490 = vmatpush1.bf16.msra.mxu0 %v13148_v32  ;;  %8554 = vmatpush1.bf16.msra.mxu1 %v13149_v38 }
 0xf19   :  { %8492 = vmatprep.subr.bf16.mxu0 %v13150_v40  ;;  %8556 = vmatprep.subr.bf16.mxu1 %v13151_v23  ;;  %v13157_v23 = vld [vmem:[#allocation57_spill] sm:$0xff] }
 0xf1c   :  { %8494 = vmatpush1.bf16.msra.mxu0 %v13152_v29  ;;  %8558 = vmatpush1.bf16.msra.mxu1 %v13153_v19 }
 0xf1d   :  { %8560 = vmatprep.subr.bf16.mxu0 %v13154_v12  ;;  %8592 = vmatprep.subr.bf16.mxu1 %v13155_v13 }
 0xf92   :  { %v4563_v44 = vpop.f32.mrb[50].mxu0  ;;  %v4634_v3 = vpop.f32.mrb[50].mxu1 }
 0xf93   :  { %v4564_v63 = vadd.f32 %v4563_v44, %v13156_v57  ;;  %v4565_v39 = vpop.f32.mrb[51].mxu0  ;;  %v4636_v32 = vpop.f32.mrb[51].mxu1  ;;  %v4635_v29 = vadd.f32 %v4634_v3, %v13157_v23  ;;  %v5838_v3 = vld [vmem:[%s12224_s0 + $0x1a0] sm:$0xff] }
 0xf94   :  { %v4566_v38 = vadd.f32 %v4565_v39, %v10476_v4  ;;  %v4637_v19 = vadd.f32 %v4636_v32, %v13158_v11  ;;  %v13159_v32 = vld [vmem:[#allocation4_spill] sm:$0xff] }
 0xf95   :  { %v5835_v54 = vmul.f32 -1.442695, %v4564_v63  ;;  %v5837_v22 = vmul.f32 -1.442695, %v4635_v29 }
 0xf96   :  { %v5836_v40 = vmul.f32 -1.442695, %v4566_v38 }
 0xf97   :  { %9344 = vpow2.f32 %v5835_v54 }
 0xf98   :  { %9346 = vpow2.f32 %v5836_v40 }
 0xf99   :  { %9348 = vtanh.f32 %v4637_v19 }
 0xf9a   :  { %9350 = vpow2.f32 %v5837_v22 }
 0xfa1   :  { %v9345_v12 = vpop.eup %9344 }
 0xfa2   :  { %v4648_v53 = vadd.f32 1.0, %v9345_v12  ;;  %v9347_v13 = vpop.eup %9346  ;;  %v5839_v12 = vld [vmem:[%s12224_s0 + $0x1a8] sm:$0xff] }
 0xfa3   :  { %v4649_v44 = vadd.f32 1.0, %v9347_v13  ;;  %v9349_v57 = vpop.eup %9348 }
 0xfa4   :  { %9352 = vrcp.f32 %v4648_v53  ;;  %v9351_v36 = vpop.eup %9350 }
 0xfa5   :  { %9354 = vrcp.f32 %v4649_v44  ;;  %v4650_v54 = vadd.f32 1.0, %v9351_v36 }
 0xfa7   :  { %9356 = vrcp.f32 %v4650_v54 }
 0xfae   :  { %v9353_v39 = vpop.eup %9352 }
 0xfaf   :  { %v4659_v63 = vmul.f32 %v9353_v39, %v9349_v57  ;;  %v9355_v38 = vpop.eup %9354 }
 0xfb0   :  { %v4658_v40 = vmul.f32 %v9355_v38, %v13159_v32  ;;  %v5840_v38 = vld [vmem:[%s12224_s0 + $0x1b0] sm:$0xff] }
 0xfb2   :  { %v4734_v22 = vpop.f32.mrb[52].mxu0  ;;  %v4805_v53 = vpop.f32.mrb[52].mxu1  ;;  %v11956_v13 = vadd.f32 %v4659_v63, %v4658_v40  ;;  %v5841_v63 = vld [vmem:[%s12224_s0 + $0x1b8] sm:$0xff] }
 0xfb3   :  { %v4810_v29 = vadd.f32 %v5838_v3, %v4734_v22  ;;  %v4736_v19 = vpop.f32.mrb[53].mxu0  ;;  %v4807_v44 = vpop.f32.mrb[53].mxu1  ;;  %v4812_v32 = vadd.f32 %v5840_v38, %v4805_v53 }
 0xfb4   :  { %13160 = vst [vmem:[#allocation59_spill] sm:$0xff] %v11956_v13  ;;  %v4811_v57 = vadd.f32 %v5839_v12, %v4736_v19  ;;  %9358 = vtanh.f32 %v11956_v13  ;;  %v9357_v3 = vpop.eup %9356  ;;  %v4813_v40 = vadd.f32 %v5841_v63, %v4807_v44 }
 0xfb5   :  { %v5842_v36 = vmul.f32 -1.442695, %v4810_v29  ;;  %v5844_v54 = vmul.f32 -1.442695, %v4812_v32 }
 0xfb6   :  { %v5843_v39 = vmul.f32 -1.442695, %v4811_v57 }
 0xfb7   :  { %9360 = vpow2.f32 %v5842_v36 }
 0xfb8   :  { %9362 = vpow2.f32 %v5843_v39 }
 0xfb9   :  { %9364 = vtanh.f32 %v4813_v40 }
 0xfba   :  { %9366 = vpow2.f32 %v5844_v54  ;;  %v13166_v54 = vld [vmem:[#allocation8_spill] sm:$0xff] }
 0xfbe   :  { %v9359_v22 = vpop.eup %9358 }
 0xfbf   :  { %v4662_v12 = vmul.f32 %v9359_v22, %v9357_v3  ;;  %v13165_v22 = vld [vmem:[#allocation10_spill] sm:$0xff] }
 0xfc1   :  { %v9361_v29 = vpop.eup %9360  ;;  %4902 = vmatprep.mubr.f32.mxu0 %v4662_v12  ;;  %4973 = vmatprep.mubr.f32.mxu1 %v4662_v12  ;;  %v13167_v12 = vld [vmem:[#allocation11_spill] sm:$0xff] }
 0xfc2   :  { %v4823_v19 = vadd.f32 1.0, %v9361_v29  ;;  %v9363_v57 = vpop.eup %9362  ;;  %v13168_v29 = vld [vmem:[#allocation12_spill] sm:$0xff] }
 0xfc3   :  { %v4824_v36 = vadd.f32 1.0, %v9363_v57  ;;  %v9365_v53 = vpop.eup %9364  ;;  %v13170_v57 = vld [vmem:[#allocation14_spill] sm:$0xff] }
 0xfc4   :  { %9368 = vrcp.f32 %v4823_v19  ;;  %v9367_v39 = vpop.eup %9366  ;;  %v13169_v19 = vld [vmem:[#allocation13_spill] sm:$0xff] }
 0xfc5   :  { %9370 = vrcp.f32 %v4824_v36  ;;  %v4825_v23 = vadd.f32 1.0, %v9367_v39  ;;  %v13171_v36 = vld [vmem:[#allocation15_spill] sm:$0xff]  ;;  %v13173_v39 = vld [vmem:[#allocation17_spill] sm:$0xff] }
 0xfc7   :  { %9372 = vrcp.f32 %v4825_v23  ;;  %v13163_v23 = vld [vmem:[#allocation9_spill] sm:$0xff] }
 0xfce   :  { %v9369_v38 = vpop.eup %9368 }
 0xfcf   :  { %v4834_v13 = vmul.f32 %v9369_v38, %v9365_v53  ;;  %v9371_v11 = vpop.eup %9370  ;;  %v13172_v53 = vld [vmem:[#allocation16_spill] sm:$0xff]  ;;  %v13174_v38 = vld [vmem:[#allocation18_spill] sm:$0xff] }
 0xfd0   :  { %v4833_v44 = vmul.f32 %v9371_v11, %v11844_v5  ;;  %v13161_v5 = vld [vmem:[#allocation7_spill] sm:$0xff]  ;;  %v13162_v11 = vld [vmem:[#allocation5_spill] sm:$0xff] }
 0xfd1   :  { %v9373_v63 = vpop.eup %9372 }
 0xfd2   :  { %v11966_v32 = vadd.f32 %v4834_v13, %v4833_v44  ;;  %v13164_v13 = vld [vmem:[#allocation6_spill] sm:$0xff]  ;;  %v13175_v44 = vld [vmem:[#allocation19_spill] sm:$0xff] }
 0xfd4   :  { %9374 = vtanh.f32 %v11966_v32 }
 0xfde   :  { %v9375_v3 = vpop.eup %9374 }
 0xfdf   :  { %v4837_v40 = vmul.f32 %v9375_v3, %v9373_v63  ;;  %v13176_v63 = vld [vmem:[#allocation20_spill] sm:$0xff]  ;;  %v13177_v3 = vld [vmem:[#allocation21_spill] sm:$0xff] }
 0xfe1   :  { %4903 = vmatmul.mubr.f32.vlgmr.msra.gmra.mrb[54].mxu0 %v4837_v40  ;;  %4974 = vmatmul.mubr.f32.vlgmr.msra.gmra.mrb[54].mxu1 %v4837_v40 }
 0xfe2   :  { %8562 = vmatpush1.bf16.msra.mxu0 %v9508_v8  ;;  %8594 = vmatpush1.bf16.msra.mxu1 %v9557_v25 }
 0xfe3   :  { %8564 = vmatprep.subr.bf16.mxu0 %v9510_v9  ;;  %8596 = vmatprep.subr.bf16.mxu1 %v9582_v33 }
 0xfe4   :  { %5073 = vmatprep.mubr.f32.mxu0 %v12411_v2  ;;  %5144 = vmatprep.mubr.f32.mxu1 %v12411_v2 }
 0xfe6   :  { %8566 = vmatpush1.bf16.msra.mxu0 %v9526_v14  ;;  %8598 = vmatpush1.bf16.msra.mxu1 %v9593_v37 }
 0xfe7   :  { %8568 = vmatprep.subr.bf16.mxu0 %v9535_v17  ;;  %8600 = vmatprep.subr.bf16.mxu1 %v9617_v45 }
 0xfea   :  { %8570 = vmatpush1.bf16.msra.mxu0 %v9560_v26  ;;  %8602 = vmatpush1.bf16.msra.mxu1 %v9626_v48 }
 0xfeb   :  { %8572 = vmatprep.subr.bf16.mxu0 %v9573_v30  ;;  %8604 = vmatprep.subr.bf16.mxu1 %v9638_v52 }
 0xfee   :  { %8574 = vmatpush1.bf16.msra.mxu0 %v9609_v42  ;;  %8606 = vmatpush1.bf16.msra.mxu1 %v9668_v62 }
 0xfef   :  { %8576 = vmatprep.subr.bf16.mxu0 %v9620_v46  ;;  %8608 = vmatprep.subr.bf16.mxu1 %v9674_v0 }
 0xff2   :  { %8578 = vmatpush1.bf16.msra.mxu0 %v9647_v55  ;;  %8610 = vmatpush1.bf16.msra.mxu1 %v9704_v15 }
 0xff3   :  { %8580 = vmatprep.subr.bf16.mxu0 %v9656_v58  ;;  %8612 = vmatprep.subr.bf16.mxu1 %v9710_v18 }
 0xff6   :  { %8582 = vmatpush1.bf16.msra.mxu0 %v9689_v7  ;;  %8614 = vmatpush1.bf16.msra.mxu1 %v9737_v31 }
 0xff7   :  { %8584 = vmatprep.subr.bf16.mxu0 %v9692_v10  ;;  %8616 = vmatprep.subr.bf16.mxu1 %v9743_v34 }
 0xffa   :  { %8586 = vmatpush1.bf16.msra.mxu0 %v9725_v24  ;;  %8618 = vmatpush1.bf16.msra.mxu1 %v9765_v43 }
 0xffb   :  { %8588 = vmatprep.subr.bf16.mxu0 %v9728_v27  ;;  %8620 = vmatprep.subr.bf16.mxu1 %v9779_v51 }
 0xffe   :  { %8590 = vmatpush1.bf16.msra.mxu0 %v9761_v41  ;;  %8622 = vmatpush1.bf16.msra.mxu1 %v9800_v61 }
 0xfff   :  { %8624 = vmatprep.subr.bf16.mxu0 %v9770_v47  ;;  %8688 = vmatprep.subr.bf16.mxu1 %v9815_v6 }
0x1001   :  { %5074 = vmatmul.mubr.f32.vlgmr.msra.gmra.mrb[56].mxu0 %v4837_v40  ;;  %5145 = vmatmul.mubr.f32.vlgmr.msra.gmra.mrb[56].mxu1 %v4837_v40  ;;  %v13178_v40 = vld [vmem:[#allocation22_spill] sm:$0xff] }
0x1002   :  { %8626 = vmatpush1.bf16.msra.mxu0 %v9797_v60  ;;  %8690 = vmatpush1.bf16.msra.mxu1 %v9838_v21 }
0x1003   :  { %8628 = vmatprep.subr.bf16.mxu0 %v9806_v1  ;;  %8692 = vmatprep.subr.bf16.mxu1 %v9853_v35 }
0x1006   :  { %8630 = vmatpush1.bf16.msra.mxu0 %v9834_v20  ;;  %8694 = vmatpush1.bf16.msra.mxu1 %v9875_v50 }
0x1007   :  { %8632 = vmatprep.subr.bf16.mxu0 %v9844_v28  ;;  %8696 = vmatprep.subr.bf16.mxu1 %v9890_v59 }
0x100a   :  { %8634 = vmatpush1.bf16.msra.mxu0 %v9872_v49  ;;  %8698 = vmatpush1.bf16.msra.mxu1 %v9912_v16 }
0x100b   :  { %8636 = vmatprep.subr.bf16.mxu0 %v12465_v56  ;;  %8700 = vmatprep.subr.bf16.mxu1 %v13161_v5 }
0x100e   :  { %8638 = vmatpush1.bf16.msra.mxu0 %v13162_v11  ;;  %8702 = vmatpush1.bf16.msra.mxu1 %v13163_v23 }
0x100f   :  { %8640 = vmatprep.subr.bf16.mxu0 %v13164_v13  ;;  %8704 = vmatprep.subr.bf16.mxu1 %v13165_v22  ;;  %v13216_v13 = vld [vmem:[#allocation58_spill] sm:$0xff] }
0x1012   :  { %8642 = vmatpush1.bf16.msra.mxu0 %v13166_v54  ;;  %8706 = vmatpush1.bf16.msra.mxu1 %v13167_v12  ;;  %v13214_v12 = vld [vmem:[#allocation56_spill] sm:$0xff] }
0x1013   :  { %8644 = vmatprep.subr.bf16.mxu0 %v13168_v29  ;;  %8708 = vmatprep.subr.bf16.mxu1 %v13169_v19  ;;  %v13179_v29 = vld [vmem:[#allocation23_spill] sm:$0xff]  ;;  %v13180_v19 = vld [vmem:[#allocation24_spill] sm:$0xff] }
0x1016   :  { %8646 = vmatpush1.bf16.msra.mxu0 %v13170_v57  ;;  %8710 = vmatpush1.bf16.msra.mxu1 %v13171_v36  ;;  %v13181_v57 = vld [vmem:[#allocation25_spill] sm:$0xff]  ;;  %v13182_v36 = vld [vmem:[#allocation26_spill] sm:$0xff] }
0x1017   :  { %8648 = vmatprep.subr.bf16.mxu0 %v13172_v53  ;;  %8712 = vmatprep.subr.bf16.mxu1 %v13173_v39  ;;  %v13183_v53 = vld [vmem:[#allocation27_spill] sm:$0xff]  ;;  %v13184_v39 = vld [vmem:[#allocation28_spill] sm:$0xff] }
0x101a   :  { %8650 = vmatpush1.bf16.msra.mxu0 %v13174_v38  ;;  %8714 = vmatpush1.bf16.msra.mxu1 %v13175_v44  ;;  %v13185_v38 = vld [vmem:[#allocation29_spill] sm:$0xff]  ;;  %v13186_v44 = vld [vmem:[#allocation30_spill] sm:$0xff] }
0x101b   :  { %8652 = vmatprep.subr.bf16.mxu0 %v13176_v63  ;;  %8716 = vmatprep.subr.bf16.mxu1 %v13177_v3  ;;  %v13187_v63 = vld [vmem:[#allocation31_spill] sm:$0xff]  ;;  %v13188_v3 = vld [vmem:[#allocation32_spill] sm:$0xff] }
0x101e   :  { %8654 = vmatpush1.bf16.msra.mxu0 %v13178_v40  ;;  %8718 = vmatpush1.bf16.msra.mxu1 %v13179_v29  ;;  %v13189_v40 = vld [vmem:[#allocation33_spill] sm:$0xff]  ;;  %v13190_v29 = vld [vmem:[#allocation34_spill] sm:$0xff] }
0x101f   :  { %8656 = vmatprep.subr.bf16.mxu0 %v13180_v19  ;;  %8720 = vmatprep.subr.bf16.mxu1 %v13181_v57  ;;  %v13191_v19 = vld [vmem:[#allocation35_spill] sm:$0xff]  ;;  %v13192_v57 = vld [vmem:[#allocation36_spill] sm:$0xff] }
0x1022   :  { %8658 = vmatpush1.bf16.msra.mxu0 %v13182_v36  ;;  %8722 = vmatpush1.bf16.msra.mxu1 %v13183_v53  ;;  %v13193_v36 = vld [vmem:[#allocation37_spill] sm:$0xff]  ;;  %v13194_v53 = vld [vmem:[#allocation38_spill] sm:$0xff] }
0x1023   :  { %8660 = vmatprep.subr.bf16.mxu0 %v13184_v39  ;;  %8724 = vmatprep.subr.bf16.mxu1 %v13185_v38  ;;  %v13195_v39 = vld [vmem:[#allocation39_spill] sm:$0xff]  ;;  %v13196_v38 = vld [vmem:[#allocation40_spill] sm:$0xff] }
0x1026   :  { %8662 = vmatpush1.bf16.msra.mxu0 %v13186_v44  ;;  %8726 = vmatpush1.bf16.msra.mxu1 %v13187_v63  ;;  %v13197_v44 = vld [vmem:[#allocation41_spill] sm:$0xff]  ;;  %v13198_v63 = vld [vmem:[#allocation42_spill] sm:$0xff] }
0x1027   :  { %8664 = vmatprep.subr.bf16.mxu0 %v13188_v3  ;;  %8728 = vmatprep.subr.bf16.mxu1 %v13189_v40  ;;  %v13199_v3 = vld [vmem:[#allocation43_spill] sm:$0xff]  ;;  %v13200_v40 = vld [vmem:[#allocation44_spill] sm:$0xff] }
0x102a   :  { %8666 = vmatpush1.bf16.msra.mxu0 %v13190_v29  ;;  %8730 = vmatpush1.bf16.msra.mxu1 %v13191_v19  ;;  %v13201_v29 = vld [vmem:[#allocation45_spill] sm:$0xff]  ;;  %v13202_v19 = vld [vmem:[#allocation46_spill] sm:$0xff] }
0x102b   :  { %8668 = vmatprep.subr.bf16.mxu0 %v13192_v57  ;;  %8732 = vmatprep.subr.bf16.mxu1 %v13193_v36  ;;  %v13203_v57 = vld [vmem:[#allocation47_spill] sm:$0xff]  ;;  %v13204_v36 = vld [vmem:[#allocation48_spill] sm:$0xff] }
0x102e   :  { %8670 = vmatpush1.bf16.msra.mxu0 %v13194_v53  ;;  %8734 = vmatpush1.bf16.msra.mxu1 %v13195_v39  ;;  %v13205_v53 = vld [vmem:[#allocation49_spill] sm:$0xff]  ;;  %v13206_v39 = vld [vmem:[#allocation50_spill] sm:$0xff] }
0x102f   :  { %8672 = vmatprep.subr.bf16.mxu0 %v13196_v38  ;;  %8736 = vmatprep.subr.bf16.mxu1 %v13197_v44  ;;  %v13207_v38 = vld [vmem:[#allocation51_spill] sm:$0xff]  ;;  %v13208_v44 = vld [vmem:[#allocation52_spill] sm:$0xff] }
0x1032   :  { %8674 = vmatpush1.bf16.msra.mxu0 %v13198_v63  ;;  %8738 = vmatpush1.bf16.msra.mxu1 %v13199_v3  ;;  %v13209_v63 = vld [vmem:[#allocation53_spill] sm:$0xff]  ;;  %v13210_v3 = vld [vmem:[#allocation54_spill] sm:$0xff] }
0x1033   :  { %8676 = vmatprep.subr.bf16.mxu0 %v13200_v40  ;;  %8740 = vmatprep.subr.bf16.mxu1 %v13201_v29  ;;  %v13211_v40 = vld [vmem:[#allocation55_spill] sm:$0xff]  ;;  %v13212_v29 = vld [vmem:[#allocation2_spill] sm:$0xff] }
0x1036   :  { %8678 = vmatpush1.bf16.msra.mxu0 %v13202_v19  ;;  %8742 = vmatpush1.bf16.msra.mxu1 %v13203_v57  ;;  %v13213_v19 = vld [vmem:[#allocation3_spill] sm:$0xff] }
0x1037   :  { %8680 = vmatprep.subr.bf16.mxu0 %v13204_v36  ;;  %8744 = vmatprep.subr.bf16.mxu1 %v13205_v53 }
0x103a   :  { %8682 = vmatpush1.bf16.msra.mxu0 %v13206_v39  ;;  %8746 = vmatpush1.bf16.msra.mxu1 %v13207_v38 }
0x103b   :  { %8684 = vmatprep.subr.bf16.mxu0 %v13208_v44  ;;  %8748 = vmatprep.subr.bf16.mxu1 %v13209_v63  ;;  %v13215_v63 = vld [vmem:[#allocation57_spill] sm:$0xff] }
0x103e   :  { %8686 = vmatpush1.bf16.msra.mxu0 %v13210_v3  ;;  %8750 = vmatpush1.bf16.msra.mxu1 %v13211_v40 }
0x103f   :  { %8752 = vmatprep.subr.bf16.mxu0 %v13212_v29  ;;  %8784 = vmatprep.subr.bf16.mxu1 %v13213_v19 }
0x10b4   :  { %v4904_v57 = vpop.f32.mrb[54].mxu0  ;;  %v4975_v36 = vpop.f32.mrb[54].mxu1 }
0x10b5   :  { %v4905_v53 = vadd.f32 %v4904_v57, %v13214_v12  ;;  %v4906_v54 = vpop.f32.mrb[55].mxu0  ;;  %v4977_v39 = vpop.f32.mrb[55].mxu1  ;;  %v4976_v3 = vadd.f32 %v4975_v36, %v13215_v63  ;;  %v5848_v36 = vld [vmem:[%s12224_s0 + $0x1c0] sm:$0xff] }
0x10b6   :  { %v4907_v38 = vadd.f32 %v4906_v54, %v10476_v4  ;;  %v4978_v40 = vadd.f32 %v4977_v39, %v13216_v13  ;;  %v13217_v39 = vld [vmem:[#allocation59_spill] sm:$0xff] }
0x10b7   :  { %v5845_v22 = vmul.f32 -1.442695, %v4905_v53  ;;  %v5847_v23 = vmul.f32 -1.442695, %v4976_v3  ;;  %v5849_v3 = vld [vmem:[%s12224_s0 + $0x1c8] sm:$0xff] }
0x10b8   :  { %v5846_v44 = vmul.f32 -1.442695, %v4907_v38 }
0x10b9   :  { %9376 = vpow2.f32 %v5845_v22 }
0x10ba   :  { %9378 = vpow2.f32 %v5846_v44 }
0x10bb   :  { %9380 = vtanh.f32 %v4978_v40 }
0x10bc   :  { %9382 = vpow2.f32 %v5847_v23 }
0x10c3   :  { %v9377_v29 = vpop.eup %9376 }
0x10c4   :  { %v4989_v11 = vadd.f32 1.0, %v9377_v29  ;;  %v9379_v19 = vpop.eup %9378 }
0x10c5   :  { %v4990_v57 = vadd.f32 1.0, %v9379_v19  ;;  %v9381_v12 = vpop.eup %9380 }
0x10c6   :  { %9384 = vrcp.f32 %v4989_v11  ;;  %v9383_v5 = vpop.eup %9382 }
0x10c7   :  { %9386 = vrcp.f32 %v4990_v57  ;;  %v4991_v22 = vadd.f32 1.0, %v9383_v5 }
0x10c9   :  { %9388 = vrcp.f32 %v4991_v22 }
0x10d0   :  { %v9385_v54 = vpop.eup %9384 }
0x10d1   :  { %v5000_v53 = vmul.f32 %v9385_v54, %v9381_v12  ;;  %v9387_v38 = vpop.eup %9386 }
0x10d2   :  { %v4999_v44 = vmul.f32 %v9387_v38, %v13217_v39  ;;  %v5850_v38 = vld [vmem:[%s12224_s0 + $0x1d0] sm:$0xff] }
0x10d4   :  { %v5075_v23 = vpop.f32.mrb[56].mxu0  ;;  %v5146_v11 = vpop.f32.mrb[56].mxu1  ;;  %v12078_v40 = vadd.f32 %v5000_v53, %v4999_v44  ;;  %v5851_v53 = vld [vmem:[%s12224_s0 + $0x1d8] sm:$0xff] }
0x10d5   :  { %v5151_v29 = vadd.f32 %v5848_v36, %v5075_v23  ;;  %v5077_v19 = vpop.f32.mrb[57].mxu0  ;;  %v5148_v57 = vpop.f32.mrb[57].mxu1  ;;  %v5153_v39 = vadd.f32 %v5850_v38, %v5146_v11 }
0x10d6   :  { %13218 = vst [vmem:[#allocation4_spill] sm:$0xff] %v12078_v40  ;;  %v5152_v12 = vadd.f32 %v5849_v3, %v5077_v19  ;;  %9390 = vtanh.f32 %v12078_v40  ;;  %v9389_v36 = vpop.eup %9388  ;;  %v5154_v44 = vadd.f32 %v5851_v53, %v5148_v57 }
0x10d7   :  { %v5852_v5 = vmul.f32 -1.442695, %v5151_v29  ;;  %v5854_v22 = vmul.f32 -1.442695, %v5153_v39 }
0x10d8   :  { %v5853_v54 = vmul.f32 -1.442695, %v5152_v12 }
0x10d9   :  { %9392 = vpow2.f32 %v5852_v5 }
0x10da   :  { %9394 = vpow2.f32 %v5853_v54 }
0x10db   :  { %9396 = vtanh.f32 %v5154_v44 }
0x10dc   :  { %9398 = vpow2.f32 %v5854_v22  ;;  %v13268_v22 = vld [vmem:[#allocation54_spill] sm:$0xff] }
0x10e0   :  { %v9391_v23 = vpop.eup %9390 }
0x10e1   :  { %v5003_v3 = vmul.f32 %v9391_v23, %v9389_v36  ;;  %v13267_v23 = vld [vmem:[#allocation53_spill] sm:$0xff] }
0x10e3   :  { %v9393_v29 = vpop.eup %9392  ;;  %5243 = vmatprep.mubr.f32.mxu0 %v5003_v3  ;;  %5314 = vmatprep.mubr.f32.mxu1 %v5003_v3  ;;  %v13269_v3 = vld [vmem:[#allocation55_spill] sm:$0xff] }
0x10e4   :  { %v5164_v19 = vadd.f32 1.0, %v9393_v29  ;;  %v9395_v12 = vpop.eup %9394 }
0x10e5   :  { %v5165_v5 = vadd.f32 1.0, %v9395_v12  ;;  %v9397_v11 = vpop.eup %9396  ;;  %v13270_v12 = vld [vmem:[#allocation56_spill] sm:$0xff] }
0x10e6   :  { %9400 = vrcp.f32 %v5164_v19  ;;  %v9399_v54 = vpop.eup %9398 }
0x10e7   :  { %9402 = vrcp.f32 %v5165_v5  ;;  %v5166_v63 = vadd.f32 1.0, %v9399_v54 }
0x10e9   :  { %9404 = vrcp.f32 %v5166_v63  ;;  %v13265_v63 = vld [vmem:[#allocation51_spill] sm:$0xff] }
0x10f0   :  { %v9401_v38 = vpop.eup %9400 }
0x10f1   :  { %v5175_v40 = vmul.f32 %v9401_v38, %v9397_v11  ;;  %v9403_v13 = vpop.eup %9402 }
0x10f2   :  { %v5174_v57 = vmul.f32 %v9403_v13, %v11966_v32  ;;  %v13263_v32 = vld [vmem:[#allocation49_spill] sm:$0xff]  ;;  %v13264_v13 = vld [vmem:[#allocation50_spill] sm:$0xff] }
0x10f3   :  { %v9405_v53 = vpop.eup %9404 }
0x10f4   :  { %v12088_v39 = vadd.f32 %v5175_v40, %v5174_v57  ;;  %v13266_v40 = vld [vmem:[#allocation52_spill] sm:$0xff] }
0x10f6   :  { %9406 = vtanh.f32 %v12088_v39 }
0x1100   :  { %v9407_v36 = vpop.eup %9406 }
0x1101   :  { %v5178_v44 = vmul.f32 %v9407_v36, %v9405_v53  ;;  %v13271_v36 = vld [vmem:[#allocation57_spill] sm:$0xff] }
0x1103   :  { %5244 = vmatmul.mubr.f32.vlgmr.msra.gmra.mrb[58].mxu0 %v5178_v44  ;;  %5315 = vmatmul.mubr.f32.vlgmr.msra.gmra.mrb[58].mxu1 %v5178_v44 }
0x1104   :  { %8754 = vmatpush1.bf16.msra.mxu0 %v9508_v8  ;;  %8786 = vmatpush1.bf16.msra.mxu1 %v9557_v25  ;;  %v13219_v8 = vld [vmem:[#allocation7_spill] sm:$0xff]  ;;  %v13223_v25 = vld [vmem:[#allocation10_spill] sm:$0xff] }
0x1105   :  { %8756 = vmatprep.subr.bf16.mxu0 %v9510_v9  ;;  %8788 = vmatprep.subr.bf16.mxu1 %v9582_v33  ;;  %v13220_v9 = vld [vmem:[#allocation5_spill] sm:$0xff]  ;;  %v13226_v33 = vld [vmem:[#allocation12_spill] sm:$0xff] }
0x1106   :  { %5414 = vmatprep.mubr.f32.mxu0 %v12411_v2  ;;  %5485 = vmatprep.mubr.f32.mxu1 %v12411_v2  ;;  %v13261_v2 = vld [vmem:[#allocation47_spill] sm:$0xff] }
0x1108   :  { %8758 = vmatpush1.bf16.msra.mxu0 %v9526_v14  ;;  %8790 = vmatpush1.bf16.msra.mxu1 %v9593_v37  ;;  %v13221_v14 = vld [vmem:[#allocation9_spill] sm:$0xff] }
0x1109   :  { %8760 = vmatprep.subr.bf16.mxu0 %v9535_v17  ;;  %8792 = vmatprep.subr.bf16.mxu1 %v9617_v45  ;;  %v13222_v17 = vld [vmem:[#allocation6_spill] sm:$0xff]  ;;  %v13227_v37 = vld [vmem:[#allocation13_spill] sm:$0xff]  ;;  %v13229_v45 = vld [vmem:[#allocation15_spill] sm:$0xff] }
0x110c   :  { %8762 = vmatpush1.bf16.msra.mxu0 %v9560_v26  ;;  %8794 = vmatpush1.bf16.msra.mxu1 %v9626_v48  ;;  %v13224_v26 = vld [vmem:[#allocation8_spill] sm:$0xff]  ;;  %v13231_v48 = vld [vmem:[#allocation17_spill] sm:$0xff] }
0x110d   :  { %8764 = vmatprep.subr.bf16.mxu0 %v9573_v30  ;;  %8796 = vmatprep.subr.bf16.mxu1 %v9638_v52  ;;  %v13225_v30 = vld [vmem:[#allocation11_spill] sm:$0xff]  ;;  %v13232_v52 = vld [vmem:[#allocation18_spill] sm:$0xff] }
0x1110   :  { %8766 = vmatpush1.bf16.msra.mxu0 %v9609_v42  ;;  %8798 = vmatpush1.bf16.msra.mxu1 %v9668_v62  ;;  %v13228_v42 = vld [vmem:[#allocation14_spill] sm:$0xff]  ;;  %v13235_v62 = vld [vmem:[#allocation21_spill] sm:$0xff] }
0x1111   :  { %8768 = vmatprep.subr.bf16.mxu0 %v9620_v46  ;;  %8800 = vmatprep.subr.bf16.mxu1 %v9674_v0  ;;  %v13230_v46 = vld [vmem:[#allocation16_spill] sm:$0xff]  ;;  %v13236_v0 = vld [vmem:[#allocation22_spill] sm:$0xff] }
0x1114   :  { %8770 = vmatpush1.bf16.msra.mxu0 %v9647_v55  ;;  %8802 = vmatpush1.bf16.msra.mxu1 %v9704_v15  ;;  %v13233_v55 = vld [vmem:[#allocation19_spill] sm:$0xff]  ;;  %v13239_v15 = vld [vmem:[#allocation25_spill] sm:$0xff] }
0x1115   :  { %8772 = vmatprep.subr.bf16.mxu0 %v9656_v58  ;;  %8804 = vmatprep.subr.bf16.mxu1 %v9710_v18  ;;  %v13234_v58 = vld [vmem:[#allocation20_spill] sm:$0xff]  ;;  %v13240_v18 = vld [vmem:[#allocation26_spill] sm:$0xff] }
0x1118   :  { %8774 = vmatpush1.bf16.msra.mxu0 %v9689_v7  ;;  %8806 = vmatpush1.bf16.msra.mxu1 %v9737_v31  ;;  %v13237_v7 = vld [vmem:[#allocation23_spill] sm:$0xff]  ;;  %v13243_v31 = vld [vmem:[#allocation29_spill] sm:$0xff] }
0x1119   :  { %8776 = vmatprep.subr.bf16.mxu0 %v9692_v10  ;;  %8808 = vmatprep.subr.bf16.mxu1 %v9743_v34  ;;  %v13238_v10 = vld [vmem:[#allocation24_spill] sm:$0xff]  ;;  %v13244_v34 = vld [vmem:[#allocation30_spill] sm:$0xff] }
0x111c   :  { %8778 = vmatpush1.bf16.msra.mxu0 %v9725_v24  ;;  %8810 = vmatpush1.bf16.msra.mxu1 %v9765_v43  ;;  %v13241_v24 = vld [vmem:[#allocation27_spill] sm:$0xff]  ;;  %v13246_v43 = vld [vmem:[#allocation32_spill] sm:$0xff] }
0x111d   :  { %8780 = vmatprep.subr.bf16.mxu0 %v9728_v27  ;;  %8812 = vmatprep.subr.bf16.mxu1 %v9779_v51  ;;  %v13242_v27 = vld [vmem:[#allocation28_spill] sm:$0xff]  ;;  %v13248_v51 = vld [vmem:[#allocation34_spill] sm:$0xff] }
0x1120   :  { %8782 = vmatpush1.bf16.msra.mxu0 %v9761_v41  ;;  %8814 = vmatpush1.bf16.msra.mxu1 %v9800_v61  ;;  %v13245_v41 = vld [vmem:[#allocation31_spill] sm:$0xff]  ;;  %v13250_v61 = vld [vmem:[#allocation36_spill] sm:$0xff] }
0x1121   :  { %8816 = vmatprep.subr.bf16.mxu0 %v9770_v47  ;;  %8880 = vmatprep.subr.bf16.mxu1 %v9815_v6  ;;  %v13247_v47 = vld [vmem:[#allocation33_spill] sm:$0xff]  ;;  %v13252_v6 = vld [vmem:[#allocation38_spill] sm:$0xff] }
0x1123   :  { %5415 = vmatmul.mubr.f32.vlgmr.msra.gmra.mrb[60].mxu0 %v5178_v44  ;;  %5486 = vmatmul.mubr.f32.vlgmr.msra.gmra.mrb[60].mxu1 %v5178_v44 }
0x1124   :  { %8818 = vmatpush1.bf16.msra.mxu0 %v9797_v60  ;;  %8882 = vmatpush1.bf16.msra.mxu1 %v9838_v21  ;;  %v13249_v60 = vld [vmem:[#allocation35_spill] sm:$0xff]  ;;  %v13254_v21 = vld [vmem:[#allocation40_spill] sm:$0xff] }
0x1125   :  { %8820 = vmatprep.subr.bf16.mxu0 %v9806_v1  ;;  %8884 = vmatprep.subr.bf16.mxu1 %v9853_v35  ;;  %v13251_v1 = vld [vmem:[#allocation37_spill] sm:$0xff]  ;;  %v13256_v35 = vld [vmem:[#allocation42_spill] sm:$0xff] }
0x1128   :  { %8822 = vmatpush1.bf16.msra.mxu0 %v9834_v20  ;;  %8886 = vmatpush1.bf16.msra.mxu1 %v9875_v50  ;;  %v13253_v20 = vld [vmem:[#allocation39_spill] sm:$0xff]  ;;  %v13258_v50 = vld [vmem:[#allocation44_spill] sm:$0xff] }
0x1129   :  { %8824 = vmatprep.subr.bf16.mxu0 %v9844_v28  ;;  %8888 = vmatprep.subr.bf16.mxu1 %v9890_v59  ;;  %v13255_v28 = vld [vmem:[#allocation41_spill] sm:$0xff] }
0x112a   :  { %v13259_v59 = vld [vmem:[#allocation45_spill] sm:$0xff] }
0x112c   :  { %8826 = vmatpush1.bf16.msra.mxu0 %v9872_v49  ;;  %8890 = vmatpush1.bf16.msra.mxu1 %v9912_v16  ;;  %v13257_v49 = vld [vmem:[#allocation43_spill] sm:$0xff]  ;;  %v13260_v16 = vld [vmem:[#allocation46_spill] sm:$0xff] }
0x112d   :  { %8828 = vmatprep.subr.bf16.mxu0 %v12465_v56  ;;  %8892 = vmatprep.subr.bf16.mxu1 %v13219_v8  ;;  %v13262_v56 = vld [vmem:[#allocation48_spill] sm:$0xff]  ;;  %v13272_v8 = vld [vmem:[#allocation58_spill] sm:$0xff] }
0x1130   :  { %8830 = vmatpush1.bf16.msra.mxu0 %v13220_v9  ;;  %8894 = vmatpush1.bf16.msra.mxu1 %v13221_v14 }
0x1131   :  { %8832 = vmatprep.subr.bf16.mxu0 %v13222_v17  ;;  %8896 = vmatprep.subr.bf16.mxu1 %v13223_v25 }
0x1134   :  { %8834 = vmatpush1.bf16.msra.mxu0 %v13224_v26  ;;  %8898 = vmatpush1.bf16.msra.mxu1 %v13225_v30 }
0x1135   :  { %8836 = vmatprep.subr.bf16.mxu0 %v13226_v33  ;;  %8900 = vmatprep.subr.bf16.mxu1 %v13227_v37 }
0x1138   :  { %8838 = vmatpush1.bf16.msra.mxu0 %v13228_v42  ;;  %8902 = vmatpush1.bf16.msra.mxu1 %v13229_v45 }
0x1139   :  { %8840 = vmatprep.subr.bf16.mxu0 %v13230_v46  ;;  %8904 = vmatprep.subr.bf16.mxu1 %v13231_v48 }
0x113c   :  { %8842 = vmatpush1.bf16.msra.mxu0 %v13232_v52  ;;  %8906 = vmatpush1.bf16.msra.mxu1 %v13233_v55  ;;  %v5858_v52 = vld [vmem:[%s12224_s0 + $0x1e0] sm:$0xff]  ;;  %v13273_v55 = vld [vmem:[#allocation4_spill] sm:$0xff] }
0x113d   :  { %8844 = vmatprep.subr.bf16.mxu0 %v13234_v58  ;;  %8908 = vmatprep.subr.bf16.mxu1 %v13235_v62  ;;  %v5859_v62 = vld [vmem:[%s12224_s0 + $0x1e8] sm:$0xff] }
0x1140   :  { %8846 = vmatpush1.bf16.msra.mxu0 %v13236_v0  ;;  %8910 = vmatpush1.bf16.msra.mxu1 %v13237_v7 }
0x1141   :  { %8848 = vmatprep.subr.bf16.mxu0 %v13238_v10  ;;  %8912 = vmatprep.subr.bf16.mxu1 %v13239_v15 }
0x1144   :  { %8850 = vmatpush1.bf16.msra.mxu0 %v13240_v18  ;;  %8914 = vmatpush1.bf16.msra.mxu1 %v13241_v24 }
0x1145   :  { %8852 = vmatprep.subr.bf16.mxu0 %v13242_v27  ;;  %8916 = vmatprep.subr.bf16.mxu1 %v13243_v31 }
0x1148   :  { %8854 = vmatpush1.bf16.msra.mxu0 %v13244_v34  ;;  %8918 = vmatpush1.bf16.msra.mxu1 %v13245_v41  ;;  %v5860_v41 = vld [vmem:[%s12224_s0 + $0x1f0] sm:$0xff] }
0x1149   :  { %8856 = vmatprep.subr.bf16.mxu0 %v13246_v43  ;;  %8920 = vmatprep.subr.bf16.mxu1 %v13247_v47  ;;  %v5861_v47 = vld [vmem:[%s12224_s0 + $0x1f8] sm:$0xff] }
0x114c   :  { %8858 = vmatpush1.bf16.msra.mxu0 %v13248_v51  ;;  %8922 = vmatpush1.bf16.msra.mxu1 %v13249_v60 }
0x114d   :  { %8860 = vmatprep.subr.bf16.mxu0 %v13250_v61  ;;  %8924 = vmatprep.subr.bf16.mxu1 %v13251_v1 }
0x1150   :  { %8862 = vmatpush1.bf16.msra.mxu0 %v13252_v6  ;;  %8926 = vmatpush1.bf16.msra.mxu1 %v13253_v20 }
0x1151   :  { %8864 = vmatprep.subr.bf16.mxu0 %v13254_v21  ;;  %8928 = vmatprep.subr.bf16.mxu1 %v13255_v28 }
0x1154   :  { %8866 = vmatpush1.bf16.msra.mxu0 %v13256_v35  ;;  %8930 = vmatpush1.bf16.msra.mxu1 %v13257_v49 }
0x1155   :  { %8868 = vmatprep.subr.bf16.mxu0 %v13258_v50  ;;  %8932 = vmatprep.subr.bf16.mxu1 %v13259_v59 }
0x1158   :  { %8870 = vmatpush1.bf16.msra.mxu0 %v13260_v16  ;;  %8934 = vmatpush1.bf16.msra.mxu1 %v13261_v2 }
0x1159   :  { %8872 = vmatprep.subr.bf16.mxu0 %v13262_v56  ;;  %8936 = vmatprep.subr.bf16.mxu1 %v13263_v32 }
0x115c   :  { %8874 = vmatpush1.bf16.msra.mxu0 %v13264_v13  ;;  %8938 = vmatpush1.bf16.msra.mxu1 %v13265_v63 }
0x115d   :  { %8876 = vmatprep.subr.bf16.mxu0 %v13266_v40  ;;  %8940 = vmatprep.subr.bf16.mxu1 %v13267_v23 }
0x1160   :  { %8878 = vmatpush1.bf16.msra.mxu0 %v13268_v22  ;;  %8942 = vmatpush1.bf16.msra.mxu1 %v13269_v3 }
0x11d6   :  { %v5245_v29 = vpop.f32.mrb[58].mxu0  ;;  %v5316_v19 = vpop.f32.mrb[58].mxu1 }
0x11d7   :  { %v5246_v5 = vadd.f32 %v5245_v29, %v13270_v12  ;;  %v5247_v11 = vpop.f32.mrb[59].mxu0  ;;  %v5318_v54 = vpop.f32.mrb[59].mxu1  ;;  %v5317_v44 = vadd.f32 %v5316_v19, %v13271_v36 }
0x11d8   :  { %v5248_v38 = vadd.f32 %v5247_v11, %v10476_v4  ;;  %v5319_v9 = vadd.f32 %v5318_v54, %v13272_v8 }
0x11d9   :  { %v5855_v57 = vmul.f32 -1.442695, %v5246_v5  ;;  %v5857_v14 = vmul.f32 -1.442695, %v5317_v44 }
0x11da   :  { %v5856_v53 = vmul.f32 -1.442695, %v5248_v38 }
0x11db   :  { %9408 = vpow2.f32 %v5855_v57 }
0x11dc   :  { %9410 = vpow2.f32 %v5856_v53 }
0x11dd   :  { %9412 = vtanh.f32 %v5319_v9 }
0x11de   :  { %9414 = vpow2.f32 %v5857_v14 }
0x11e5   :  { %v9409_v17 = vpop.eup %9408 }
0x11e6   :  { %v5330_v25 = vadd.f32 1.0, %v9409_v17  ;;  %v9411_v26 = vpop.eup %9410 }
0x11e7   :  { %v5331_v30 = vadd.f32 1.0, %v9411_v26  ;;  %v9413_v33 = vpop.eup %9412 }
0x11e8   :  { %9416 = vrcp.f32 %v5330_v25  ;;  %v9415_v37 = vpop.eup %9414 }
0x11e9   :  { %9418 = vrcp.f32 %v5331_v30  ;;  %v5332_v48 = vadd.f32 1.0, %v9415_v37 }
0x11eb   :  { %9420 = vrcp.f32 %v5332_v48 }
0x11f2   :  { %v9417_v42 = vpop.eup %9416 }
0x11f3   :  { %v5341_v45 = vmul.f32 %v9417_v42, %v9413_v33  ;;  %v9419_v46 = vpop.eup %9418 }
0x11f4   :  { %v5340_v58 = vmul.f32 %v9419_v46, %v13273_v55 }
0x11f5   :  { %v9421_v51 = vpop.eup %9420 }
0x11f6   :  { %v5416_v0 = vpop.f32.mrb[60].mxu0  ;;  %v5487_v7 = vpop.f32.mrb[60].mxu1  ;;  %v12198_v10 = vadd.f32 %v5341_v45, %v5340_v58  ;;  %v5868_v45 = vld [vmem:[%s12225_s3 + $0x1] ss:$0 sm:$0xff] }
0x11f7   :  { %v5492_v15 = vadd.f32 %v5858_v52, %v5416_v0  ;;  %v5418_v18 = vpop.f32.mrb[61].mxu0  ;;  %v5489_v24 = vpop.f32.mrb[61].mxu1  ;;  %v5494_v43 = vadd.f32 %v5860_v41, %v5487_v7  ;;  %v5869_v52 = vld [vmem:[%s12225_s3 + $0x3] ss:$0 sm:$0xff] }
0x11f8   :  { %v5493_v27 = vadd.f32 %v5859_v62, %v5418_v18  ;;  %9422 = vtanh.f32 %v12198_v10  ;;  %v5495_v60 = vadd.f32 %v5861_v47, %v5489_v24 }
0x11f9   :  { %v5862_v31 = vmul.f32 -1.442695, %v5492_v15  ;;  %v5864_v1 = vmul.f32 -1.442695, %v5494_v43 }
0x11fa   :  { %v5863_v34 = vmul.f32 -1.442695, %v5493_v27 }
0x11fb   :  { %9424 = vpow2.f32 %v5862_v31 }
0x11fc   :  { %9426 = vpow2.f32 %v5863_v34 }
0x11fd   :  { %9428 = vtanh.f32 %v5495_v60 }
0x11fe   :  { %9430 = vpow2.f32 %v5864_v1 }
0x1202   :  { %v9423_v61 = vpop.eup %9422 }
0x1203   :  { %v5344_v6 = vmul.f32 %v9423_v61, %v9421_v51 }
0x1205   :  { %v9425_v20 = vpop.eup %9424  ;;  %5584 = vmatprep.mubr.f32.mxu0 %v5344_v6  ;;  %5655 = vmatprep.mubr.f32.mxu1 %v5344_v6 }
0x1206   :  { %v5505_v21 = vadd.f32 1.0, %v9425_v20  ;;  %v9427_v28 = vpop.eup %9426 }
0x1207   :  { %v5506_v35 = vadd.f32 1.0, %v9427_v28  ;;  %v9429_v49 = vpop.eup %9428 }
0x1208   :  { %9432 = vrcp.f32 %v5505_v21  ;;  %v9431_v50 = vpop.eup %9430 }
0x1209   :  { %9434 = vrcp.f32 %v5506_v35  ;;  %v5507_v56 = vadd.f32 1.0, %v9431_v50 }
0x120b   :  { %9436 = vrcp.f32 %v5507_v56 }
0x1212   :  { %v9433_v59 = vpop.eup %9432 }
0x1213   :  { %v5516_v16 = vmul.f32 %v9433_v59, %v9429_v49  ;;  %v9435_v2 = vpop.eup %9434 }
0x1214   :  { %v5515_v32 = vmul.f32 %v9435_v2, %v12088_v39 }
0x1215   :  { %v9437_v63 = vpop.eup %9436 }
0x1216   :  { %v5517_v13 = vadd.f32 %v5516_v16, %v5515_v32 }
0x1218   :  { %9438 = vtanh.f32 %v5517_v13 }
0x1222   :  { %v9439_v40 = vpop.eup %9438 }
0x1223   :  { %v5519_v23 = vmul.f32 %v9439_v40, %v9437_v63 }
0x1225   :  { %5585 = vmatmul.mubr.f32.vlgmr.msra.gmra.mrb[62].mxu0 %v5519_v23  ;;  %5656 = vmatmul.mubr.f32.vlgmr.msra.gmra.mrb[62].mxu1 %v5519_v23 }
0x12f8   :  { %v5586_v22 = vpop.f32.mrb[62].mxu0  ;;  %v5657_v3 = vpop.f32.mrb[62].mxu1 }
0x12f9   :  { %v5587_v29 = vadd.f32 %v5586_v22, %v13270_v12  ;;  %v5588_v19 = vpop.f32.mrb[63].mxu0  ;;  %v5659_v5 = vpop.f32.mrb[63].mxu1  ;;  %v5658_v39 = vadd.f32 %v5657_v3, %v13271_v36 }
0x12fa   :  { %v5589_v11 = vadd.f32 %v5588_v19, %v10476_v4  ;;  %v5660_v57 = vadd.f32 %v5659_v5, %v13272_v8 }
0x12fb   :  { %v5865_v54 = vmul.f32 -1.442695, %v5587_v29  ;;  %v5867_v53 = vmul.f32 -1.442695, %v5658_v39 }
0x12fc   :  { %v5866_v38 = vmul.f32 -1.442695, %v5589_v11 }
0x12fd   :  { %9440 = vpow2.f32 %v5865_v54 }
0x12fe   :  { %9442 = vpow2.f32 %v5866_v38 }
0x12ff   :  { %9444 = vtanh.f32 %v5660_v57 }
0x1300   :  { %9446 = vpow2.f32 %v5867_v53 }
0x1307   :  { %v9441_v44 = vpop.eup %9440 }
0x1308   :  { %v5671_v9 = vadd.f32 1.0, %v9441_v44  ;;  %v9443_v14 = vpop.eup %9442 }
0x1309   :  { %v5672_v12 = vadd.f32 1.0, %v9443_v14  ;;  %v9445_v17 = vpop.eup %9444 }
0x130a   :  { %9448 = vrcp.f32 %v5671_v9  ;;  %v9447_v25 = vpop.eup %9446 }
0x130b   :  { %9450 = vrcp.f32 %v5672_v12  ;;  %v5673_v33 = vadd.f32 1.0, %v9447_v25 }
0x130d   :  { %9452 = vrcp.f32 %v5673_v33 }
0x1314   :  { %v9449_v4 = vpop.eup %9448 }
0x1315   :  { %v5682_v26 = vmul.f32 %v9449_v4, %v9445_v17  ;;  %v9451_v30 = vpop.eup %9450 }
0x1316   :  { %v5681_v37 = vmul.f32 %v9451_v30, %v12198_v10 }
0x1317   :  { %v9453_v8 = vpop.eup %9452 }
0x1318   :  { %v5683_v36 = vadd.f32 %v5682_v26, %v5681_v37 }
0x131a   :  { %9454 = vtanh.f32 %v5683_v36 }
0x1324   :  { %v9455_v42 = vpop.eup %9454 }
0x1325   :  { %v5685_v46 = vmul.f32 %v9455_v42, %v9453_v8 }
0x1327   :  { %v5692_v48 = vmul.f32 %v5868_v45, %v5685_v46 }
0x1329   :  { %5693 = vadd.xlane.f32.xlu0 %v5692_v48 }
0x13b6   :  { %v5694_v55 = vpop.xlane.xlu0 %5693 }
0x13b7   :  { %v5699_v58 = vadd.f32 %v5869_v52, %v5694_v55 }
0x13b9   :  { %v5870_v62 = vmul.f32 -1.442695, %v5699_v58 }
0x13bb   :  { %9456 = vpow2.f32 %v5870_v62 }
0x13c5   :  { %v9457_v0 = vpop.eup %9456 }
0x13c6   :  { %v5703_v7 = vadd.f32 1.0, %v9457_v0 }
0x13c8   :  { %9458 = vrcp.f32 %v5703_v7 }
0x13d2   :  { %v9459_v10 = vpop.eup %9458 }
0x13d3   :  { %5707 = vst.msk [vmem:[%s12226_s4] sm:$0xff] %vm5706_vm0, %v9459_v10 }

</bundles_post_ra>
